<compile_context>
chip_gen: v7x
topology: tpu7x:2x2x1
jax: 0.10.0
libtpu: 0.0.40
codegen_flags: <defaults>
</compile_context>

<pallas_src>
import functools
import math

import jax
import jax.numpy as jnp
from jax.experimental import pallas as pl
from jax.experimental.pallas import tpu as pltpu

BN_EPS = 1e-5
LANE = 128


def _round_up(n, m):
    return ((n + m - 1) // m) * m


@functools.lru_cache(maxsize=1)
def _vmem_limit_bytes():
    # Generation-aware scoped-VMEM budget: ~3/4 of physical capacity, capped at 96 MiB
    # (-> ~48 MiB on v7x's 64 MiB VMEM, 96 MiB on v5e/v6e's 128 MiB).
    try:
        cap = int(pltpu.get_tpu_info().vmem_capacity_bytes)
    except Exception:
        return 32 * 1024 * 1024
    return min(cap * 3 // 4, 96 * 1024 * 1024)


# ----------------------------------------------------------------------------
# Pallas kernel 1: fused spatial GEMM
#   o = [relu]( x @ w + shift )   (BN scale pre-folded into w; conv bias folded into shift)
# ----------------------------------------------------------------------------
def _mm_shift_kernel(x_ref, w_ref, t_ref, o_ref, *, relu):
    acc = jnp.dot(x_ref[...], w_ref[...], preferred_element_type=jnp.float32)
    acc = acc + t_ref[...]
    if relu:
        acc = jnp.maximum(acc, 0.0)
    o_ref[...] = acc.astype(o_ref.dtype)


def _pick_tm(M):
    if M >= 2048:
        return 512
    if M >= 512:
        return 256
    return 128


def _pick_tn(K, Np):
    # Keep the resident (K, tn) bf16 weight block modest so it double-buffers comfortably
    # even within v7x's 64 MiB VMEM; for small channel counts this is just Np (one tile).
    for tn in (Np, 512, 256, 128):
        if tn <= Np and Np % tn == 0 and 2 * K * tn <= (4 << 20):
            return tn
    return 128


def matmul_shift(x2d, w, shift, relu):
    """(M, K)bf16 @ (K, Np)bf16 + shift -> (M, Np)bf16; Np is a multiple of 128."""
    M, K = x2d.shape
    Np = w.shape[1]
    tm = _pick_tm(M)
    tn = _pick_tn(K, Np)
    Mp = _round_up(M, tm)
    if Mp != M:
        x2d = jnp.pad(x2d, ((0, Mp - M), (0, 0)))
    cost = pl.CostEstimate(flops=2 * Mp * K * Np, transcendentals=0,
                           bytes_accessed=2 * (Mp * K + K * Np + Mp * Np))
    out = pl.pallas_call(
        functools.partial(_mm_shift_kernel, relu=relu),
        out_shape=jax.ShapeDtypeStruct((Mp, Np), jnp.bfloat16),
        grid=(Mp // tm, Np // tn),
        in_specs=[
            pl.BlockSpec((tm, K), lambda i, j: (i, 0)),
            pl.BlockSpec((K, tn), lambda i, j: (0, j)),
            pl.BlockSpec((1, tn), lambda i, j: (0, j)),
        ],
        out_specs=pl.BlockSpec((tm, tn), lambda i, j: (i, j)),
        compiler_params=pltpu.CompilerParams(
            dimension_semantics=("parallel", "parallel"),
            vmem_limit_bytes=_vmem_limit_bytes()),
        cost_estimate=cost,
    )(x2d.astype(jnp.bfloat16), w.astype(jnp.bfloat16),
      shift.reshape(1, Np).astype(jnp.float32))
    return out[:M] if Mp != M else out


# ----------------------------------------------------------------------------
# Pallas kernel 2: temporal (Kt x 1 x 1) conv.
#   One grid step per sample; fully-resident (kt, C, Np) weight; static tap loop with one
#   (To*HW, C) matmul per tap; epilogue fuses conv bias + following BN
#   (+ optional residual add + ReLU).
# ----------------------------------------------------------------------------
def _temporal_kernel(*refs, kt, st, HW, To, L, relu, has_res):
    if has_res:
        y_ref, w_ref, t_ref, r_ref, o_ref = refs
    else:
        y_ref, w_ref, t_ref, o_ref = refs
        r_ref = None

    acc = None
    for dt in range(kt):                 # static taps: weight stays resident in VMEM
        row0 = ((dt % st) * L + dt // st) * HW        # contiguous slab per tap
        lhs = y_ref[0, pl.ds(row0, To * HW), :]       # (To*HW, C), M >= 256 typical
        part = jnp.dot(lhs, w_ref[dt], preferred_element_type=jnp.float32)
        acc = part if acc is None else acc + part     # no zero-fill of an accumulator

    z = acc + t_ref[...]
    if has_res:
        z = z + r_ref[0].astype(jnp.float32)
    if relu:
        z = jnp.maximum(z, 0.0)
    o_ref[0] = z.astype(o_ref.dtype)


def temporal_conv(y, wt, shift, st, pt, relu, residual=None):
    """y: (N, T, HW, C) bf16; wt: (kt, C, Np) bf16; shift: (Np,) f32.
    residual (optional): (N, To*HW, Np) bf16, added pre-ReLU in the epilogue.
    Returns ((N, To*HW, Np) bf16, To)."""
    N, T, HW, C = y.shape
    kt, _, Np = wt.shape
    Tp = T + 2 * pt
    To = (Tp - kt) // st + 1
    if pt > 0:
        # TODO(synk): this small HBM pad of the spatial-conv output could be removed by
        # masking boundary taps in-kernel (review item 8).
        y = jnp.pad(y, ((0, 0), (pt, pt), (0, 0), (0, 0)))

    if st > 1 and kt == 1:
        # Pointwise temporal conv with stride: just pre-select the output frames.
        y = y[:, ::st][:, :To]
        st, Tp = 1, To

    L = (kt - 1) // st + To              # frames per stride phase (== Tp when st == 1)
    if st == 1:
        y = y.reshape(N, Tp * HW, C)
    else:
        # De-interleave frames by stride phase so every tap reads one contiguous slab.
        need = st * L
        if need > Tp:
            y = jnp.pad(y, ((0, 0), (0, need - Tp), (0, 0), (0, 0)))
        y = y[:, :need].reshape(N, L, st, HW, C)
        y = jnp.transpose(y, (0, 2, 1, 3, 4)).reshape(N, st * L * HW, C)
    rows_in = y.shape[1]

    in_specs = [
        pl.BlockSpec((1, rows_in, C), lambda n: (n, 0, 0)),   # whole sample, DMA'd once
        pl.BlockSpec((kt, C, Np), lambda n: (0, 0, 0)),       # fully-resident weight
        pl.BlockSpec((1, Np), lambda n: (0, 0)),
    ]
    args = [y, wt, shift.reshape(1, Np).astype(jnp.float32)]
    if residual is not None:
        in_specs.append(pl.BlockSpec((1, To * HW, Np), lambda n: (n, 0, 0)))
        args.append(residual)

    res_bytes = (N * To * HW * Np) if residual is not None else 0
    cost = pl.CostEstimate(
        flops=2 * N * kt * To * HW * C * Np, transcendentals=0,
        bytes_accessed=2 * (N * rows_in * C + kt * C * Np + N * To * HW * Np + res_bytes))

    out = pl.pallas_call(
        functools.partial(_temporal_kernel, kt=kt, st=st, HW=HW, To=To, L=L,
                          relu=relu, has_res=residual is not None),
        out_shape=jax.ShapeDtypeStruct((N, To * HW, Np), jnp.bfloat16),
        grid=(N,),                                   # >= 2 parallel steps for v7x megacore
        in_specs=in_specs,
        out_specs=pl.BlockSpec((1, To * HW, Np), lambda n: (n, 0, 0)),
        compiler_params=pltpu.CompilerParams(
            dimension_semantics=("parallel",),
            vmem_limit_bytes=_vmem_limit_bytes()),
        cost_estimate=cost,
    )(*args)
    return out, To


# ----------------------------------------------------------------------------
# im2col glue for the spatial conv (plain JAX, bf16)
# ----------------------------------------------------------------------------
def spatial_conv_patches(x, kh, kw, sh, sw, ph, pw):
    """x: (N, T, H, W, C) bf16 -> (N*T*Ho*Wo, kh*kw*C) bf16."""
    N, T, H, W, C = x.shape
    Ho = (H + 2 * ph - kh) // sh + 1
    Wo = (W + 2 * pw - kw) // sw + 1
    if kh == 1 and kw == 1 and ph == 0 and pw == 0:
        xs = x[:, :, :(Ho - 1) * sh + 1:sh, :(Wo - 1) * sw + 1:sw, :]
        return xs.reshape(N * T * Ho * Wo, C), (N, T, Ho, Wo)
    xp = jnp.pad(x, ((0, 0), (0, 0), (ph, ph), (pw, pw), (0, 0)))
    cols = []
    for dy in range(kh):
        for dx in range(kw):
            cols.append(xp[:, :, dy:dy + sh * Ho:sh, dx:dx + sw * Wo:sw, :])
    p = jnp.stack(cols, axis=4)  # (N, T, Ho, Wo, kh*kw, C)
    return p.reshape(N * T * Ho * Wo, kh * kw * C), (N, T, Ho, Wo)
# TODO(synk): the 3x3 spatial conv still materializes bf16 im2col patches in HBM (kh*kw read
# inflation); an in-kernel kh*kw tap reduction (review item 3) needs element-offset
# BlockSpecs and is left for a follow-up.


# ----------------------------------------------------------------------------
# Parameters (deterministic synthetic init; PyTorch-default BN statistics)
# ----------------------------------------------------------------------------
def _winit(key, shape, scale=0.05):
    return scale * jax.random.normal(key, shape, dtype=jnp.float32)


def _bn_init(ch):
    return dict(gamma=jnp.ones((ch,), jnp.float32),
                beta=jnp.zeros((ch,), jnp.float32),
                mean=jnp.zeros((ch,), jnp.float32),
                var=jnp.ones((ch,), jnp.float32))


def _bn_scale_shift(bn):
    # Inference-mode BatchNorm folded into (scale, shift).
    s = bn['gamma'] / jnp.sqrt(bn['var'] + BN_EPS)
    t = bn['beta'] - bn['mean'] * s
    return s, t
# TODO(synk): BatchNorm3d is applied with running statistics (inference mode), not
# training-mode batch statistics.


def init_st_conv(key, in_ch, out_ch, ksize):
    kt, kh, kw = ksize
    intermed = int(math.floor(kt * kh * kw * in_ch * out_ch /
                              (kh * kw * in_ch + kt * out_ch)))
    k1, k2, k3, k4 = jax.random.split(key, 4)
    return dict(
        kernel=(kt, kh, kw),
        ws=_winit(k1, (kh, kw, in_ch, intermed)),   # spatial conv weight
        bs=_winit(k2, (intermed,), 0.01),           # spatial conv bias
        bn=_bn_init(intermed),                      # BN between spatial & temporal conv
        wt=_winit(k3, (kt, intermed, out_ch)),      # temporal conv weight
        bt=_winit(k4, (out_ch,), 0.01),             # temporal conv bias
    )


def init_resblock(key, in_ch, out_ch, k, downsample):
    keys = jax.random.split(key, 3)
    p = dict(
        downsample=downsample,
        conv1=init_st_conv(keys[0], in_ch, out_ch, (k, k, k)),
        bn1=_bn_init(out_ch),
        conv2=init_st_conv(keys[1], out_ch, out_ch, (k, k, k)),
        bn2=_bn_init(out_ch),
    )
    if downsample:
        p['dconv'] = init_st_conv(keys[2], in_ch, out_ch, (1, 1, 1))
        p['dbn'] = _bn_init(out_ch)
    return p


def init_reslayer(key, in_ch, out_ch, k, layer_size, downsample=False):
    keys = jax.random.split(key, max(layer_size, 1))
    blocks = [init_resblock(keys[0], in_ch, out_ch, k, downsample)]
    for i in range(1, layer_size):
        blocks.append(init_resblock(keys[i], out_ch, out_ch, k, False))
    return dict(blocks=blocks, k=k, out_channels=out_ch)


# ----------------------------------------------------------------------------
# Forward passes
# ----------------------------------------------------------------------------
def st_conv_forward(p, x, stride, padding, post_scale, post_shift, post_relu,
                    residual=None):
    """SpatioTemporalConv: temporal_conv(relu(bn(spatial_conv(x)))).
    The following BN (bn1/bn2/downsamplebn) is folded into the temporal epilogue via
    (post_scale, post_shift); post_relu/residual fuse the res-block add+ReLU too."""
    kt, kh, kw = p['kernel']
    st_, sh, sw = stride
    pt, ph, pw = padding
    c_act = x.shape[-1]                      # activation channels (may be lane-padded)

    # --- spatial 1 x kh x kw conv; internal BN folded into weights; ReLU fused ---
    ws, bs = p['ws'], p['bs']
    c_in, intermed = ws.shape[2], ws.shape[3]
    s_bn, t_bn = _bn_scale_shift(p['bn'])
    wsf = ws * s_bn
    shift_s = bs * s_bn + t_bn
    i_p = _round_up(intermed, LANE)
    wsf = jnp.pad(wsf, ((0, 0), (0, 0), (0, c_act - c_in), (0, i_p - intermed)))
    shift_s = jnp.pad(shift_s, (0, i_p - intermed))
    wsf2 = wsf.reshape(kh * kw * c_act, i_p)

    patches, (N, T, Ho, Wo) = spatial_conv_patches(x, kh, kw, sh, sw, ph, pw)
    y = matmul_shift(patches, wsf2, shift_s, relu=True)
    y = y.reshape(N, T, Ho * Wo, i_p)

    # --- temporal kt x 1 x 1 conv; external BN (+ residual + ReLU) in the epilogue ---
    wt, bt = p['wt'], p['bt']
    out_ch = wt.shape[-1]
    if post_scale is None:
        post_scale = jnp.ones((out_ch,), jnp.float32)
        post_shift = jnp.zeros((out_ch,), jnp.float32)
    o_p = _round_up(out_ch, LANE)
    wtf = jnp.pad(wt * post_scale,
                  ((0, 0), (0, i_p - intermed), (0, o_p - out_ch))).astype(jnp.bfloat16)
    shift_t = jnp.pad(bt * post_scale + post_shift, (0, o_p - out_ch))

    res2 = None
    if residual is not None:
        Nr, Tr, Hr, Wr, Cr = residual.shape
        res2 = residual.reshape(Nr, Tr * Hr * Wr, Cr).astype(jnp.bfloat16)

    z, To = temporal_conv(y, wtf, shift_t, st_, pt, relu=post_relu, residual=res2)
    return z.reshape(N, To, Ho, Wo, o_p)
# TODO(synk): fusing the spatial GEMM and temporal tap-reduction of one SpatioTemporalConv
# into a single kernel (review item 10) would remove one HBM round trip of the intermediate.


def resblock_forward(p, x, k):
    pad = k // 2
    out_ch = p['conv2']['wt'].shape[-1]
    o_p = _round_up(out_ch, LANE)

    if p['downsample']:
        sd, td = _bn_scale_shift(p['dbn'])
        shortcut = st_conv_forward(p['dconv'], x, (2, 2, 2), (0, 0, 0), sd, td, False)
        stride = (2, 2, 2)
    else:
        shortcut = x
        if shortcut.shape[-1] < o_p:   # identity path: lane-pad to match conv2 output
            shortcut = jnp.pad(shortcut,
                               ((0, 0),) * 4 + ((0, o_p - shortcut.shape[-1]),))
        stride = (1, 1, 1)

    s1, t1 = _bn_scale_shift(p['bn1'])
    h = st_conv_forward(p['conv1'], x, stride, (pad, pad, pad), s1, t1, True)
    s2, t2 = _bn_scale_shift(p['bn2'])
    # conv2's temporal epilogue fuses bn2, the residual add and the final ReLU.
    return st_conv_forward(p['conv2'], h, (1, 1, 1), (pad, pad, pad), s2, t2, True,
                           residual=shortcut)


def reslayer_forward(params, x):
    """x: (N, C, T, H, W) float32 -> (N, out_channels, T', H', W') float32."""
    x = jnp.transpose(jnp.asarray(x, jnp.float32), (0, 2, 3, 4, 1)).astype(jnp.bfloat16)
    for bp in params['blocks']:
        x = resblock_forward(bp, x, params['k'])
    x = x[..., :params['out_channels']].astype(jnp.float32)
    return jnp.transpose(x, (0, 4, 1, 2, 3))


if __name__ == "__main__":
    key = jax.random.PRNGKey(0)
    pkey, xkey = jax.random.split(key)

    in_ch, out_ch, k, layer_size = 32, 128, 3, 2
    params = init_reslayer(pkey, in_ch, out_ch, k, layer_size, downsample=True)

    # (N, C, T, H, W) as in the PyTorch module; downsample halves T, H, W.
    x = jax.random.normal(xkey, (2, in_ch, 8, 16, 16), dtype=jnp.float32)

    fwd = jax.jit(lambda inp: reslayer_forward(params, inp))
    out = jax.block_until_ready(fwd(x))
    assert out.shape == (2, out_ch, 4, 8, 8), out.shape
    assert bool(jnp.all(jnp.isfinite(out)))
    print("KERNEL_OK")
</pallas_src>

<mosaic_0001>
module attributes {stable_mosaic.version = 11 : i64} {
  func.func @_mm_shift_kernel(%arg0: i32, %arg1: i32, %arg2: memref<256x288xbf16, #tpu.memory_space<vmem>>, %arg3: memref<288x256xbf16, #tpu.memory_space<vmem>>, %arg4: memref<1x256xf32, #tpu.memory_space<vmem>>, %arg5: memref<256x256xbf16, #tpu.memory_space<vmem>>) attributes {dimension_semantics = [#tpu.dimension_semantics<parallel>, #tpu.dimension_semantics<parallel>], iteration_bounds = array<i64: 4, 1>, scalar_prefetch = 0 : i64, scratch_operands = 0 : i64, tpu.core_type = #tpu.core_type<tc>, window_params = [{transform_indices = @transform_0, window_bounds = array<i64: 256, 288>}, {transform_indices = @transform_1, window_bounds = array<i64: 288, 256>}, {transform_indices = @transform_2, window_bounds = array<i64: 1, 256>}, {transform_indices = @transform_3, window_bounds = array<i64: 256, 256>}]} {
    %c0 = arith.constant 0 : index
    %c0_0 = arith.constant 0 : index
    %0 = vector.load %arg2[%c0, %c0_0] : memref<256x288xbf16, #tpu.memory_space<vmem>>, vector<256x288xbf16>
    %c0_1 = arith.constant 0 : index
    %c0_2 = arith.constant 0 : index
    %1 = vector.load %arg3[%c0_1, %c0_2] : memref<288x256xbf16, #tpu.memory_space<vmem>>, vector<288x256xbf16>
    %cst = arith.constant dense<0.000000e+00> : vector<256x256xf32>
    %2 = tpu.matmul %0, %1, %cst {dimension_numbers = #tpu.dot_dimension_numbers<[1], [0], [0], [1], [0, 0, 1, 1], [], []>} : vector<256x288xbf16>, vector<288x256xbf16>, vector<256x256xf32> -> vector<256x256xf32>
    %c0_3 = arith.constant 0 : index
    %c0_4 = arith.constant 0 : index
    %3 = vector.load %arg4[%c0_3, %c0_4] : memref<1x256xf32, #tpu.memory_space<vmem>>, vector<1x256xf32>
    %4 = vector.broadcast %3 : vector<1x256xf32> to vector<256x256xf32>
    %5 = arith.addf %2, %4 : vector<256x256xf32>
    %cst_5 = arith.constant 0.000000e+00 : f32
    %6 = vector.broadcast %cst_5 : f32 to vector<256x256xf32>
    %7 = arith.maximumf %5, %6 : vector<256x256xf32>
    %8 = arith.truncf %7 : vector<256x256xf32> to vector<256x256xbf16>
    %c0_6 = arith.constant 0 : index
    %c0_7 = arith.constant 0 : index
    %9 = vector.load %arg5[%c0_6, %c0_7] : memref<256x256xbf16, #tpu.memory_space<vmem>>, vector<256x256xbf16>
    tpu.vector_store %arg5[%c0_6, %c0_7], %8 {strides = array<i32>} : memref<256x256xbf16, #tpu.memory_space<vmem>>, vector<256x256xbf16>,
    return
  }
  func.func @transform_0(%arg0: i32, %arg1: i32) -> (i32, i32) {
    %c0_i32 = arith.constant 0 : i32
    %c0_i32_0 = arith.constant 0 : i32
    return %arg0, %c0_i32 : i32, i32
  }
  func.func @transform_1(%arg0: i32, %arg1: i32) -> (i32, i32) {
    %c0_i32 = arith.constant 0 : i32
    %c0_i32_0 = arith.constant 0 : i32
    return %c0_i32, %arg1 : i32, i32
  }
  func.func @transform_2(%arg0: i32, %arg1: i32) -> (i32, i32) {
    %c0_i32 = arith.constant 0 : i32
    %c0_i32_0 = arith.constant 0 : i32
    return %c0_i32, %arg1 : i32, i32
  }
  func.func @transform_3(%arg0: i32, %arg1: i32) -> (i32, i32) {
    %c0_i32 = arith.constant 0 : i32
    return %arg0, %arg1 : i32, i32
  }
}

module attributes {stable_mosaic.version = 11 : i64} {
  func.func @_temporal_kernel(%arg0: i32, %arg1: memref<1x640x256xbf16, #tpu.memory_space<vmem>>, %arg2: memref<3x256x128xbf16, #tpu.memory_space<vmem>>, %arg3: memref<1x128xf32, #tpu.memory_space<vmem>>, %arg4: memref<1x256x128xbf16, #tpu.memory_space<vmem>>) attributes {dimension_semantics = [#tpu.dimension_semantics<parallel>], iteration_bounds = array<i64: 2>, scalar_prefetch = 0 : i64, scratch_operands = 0 : i64, tpu.core_type = #tpu.core_type<tc>, window_params = [{transform_indices = @transform_0, window_bounds = array<i64: 1, 640, 256>}, {pipeline_mode = #tpu.pipeline_mode<synchronous>, transform_indices = @transform_1, window_bounds = array<i64: 3, 256, 128>}, {pipeline_mode = #tpu.pipeline_mode<synchronous>, transform_indices = @transform_2, window_bounds = array<i64: 1, 128>}, {transform_indices = @transform_3, window_bounds = array<i64: 1, 256, 128>}]} {
    %c0 = arith.constant 0 : index
    %c0_0 = arith.constant 0 : index
    %c0_1 = arith.constant 0 : index
    %0 = vector.load %arg1[%c0, %c0_0, %c0_1] : memref<1x640x256xbf16, #tpu.memory_space<vmem>>, vector<1x256x256xbf16>
    %1 = vector.shape_cast %0 : vector<1x256x256xbf16> to vector<256x256xbf16>
    %c0_2 = arith.constant 0 : index
    %c0_3 = arith.constant 0 : index
    %c0_4 = arith.constant 0 : index
    %2 = vector.load %arg2[%c0_2, %c0_3, %c0_4] : memref<3x256x128xbf16, #tpu.memory_space<vmem>>, vector<1x256x128xbf16>
    %3 = vector.shape_cast %2 : vector<1x256x128xbf16> to vector<256x128xbf16>
    %cst = arith.constant dense<0.000000e+00> : vector<256x128xf32>
    %4 = tpu.matmul %1, %3, %cst {dimension_numbers = #tpu.dot_dimension_numbers<[1], [0], [0], [1], [0, 0, 1, 1], [], []>} : vector<256x256xbf16>, vector<256x128xbf16>, vector<256x128xf32> -> vector<256x128xf32>
    %c0_5 = arith.constant 0 : index
    %c320 = arith.constant 320 : index
    %c0_6 = arith.constant 0 : index
    %5 = vector.load %arg1[%c0_5, %c320, %c0_6] : memref<1x640x256xbf16, #tpu.memory_space<vmem>>, vector<1x256x256xbf16>
    %6 = vector.shape_cast %5 : vector<1x256x256xbf16> to vector<256x256xbf16>
    %c1 = arith.constant 1 : index
    %c0_7 = arith.constant 0 : index
    %c0_8 = arith.constant 0 : index
    %7 = vector.load %arg2[%c1, %c0_7, %c0_8] : memref<3x256x128xbf16, #tpu.memory_space<vmem>>, vector<1x256x128xbf16>
    %8 = vector.shape_cast %7 : vector<1x256x128xbf16> to vector<256x128xbf16>
    %cst_9 = arith.constant dense<0.000000e+00> : vector<256x128xf32>
    %9 = tpu.matmul %6, %8, %cst_9 {dimension_numbers = #tpu.dot_dimension_numbers<[1], [0], [0], [1], [0, 0, 1, 1], [], []>} : vector<256x256xbf16>, vector<256x128xbf16>, vector<256x128xf32> -> vector<256x128xf32>
    %10 = arith.addf %4, %9 : vector<256x128xf32>
    %c0_10 = arith.constant 0 : index
    %c64 = arith.constant 64 : index
    %c0_11 = arith.constant 0 : index
    %11 = vector.load %arg1[%c0_10, %c64, %c0_11] : memref<1x640x256xbf16, #tpu.memory_space<vmem>>, vector<1x256x256xbf16>
    %12 = vector.shape_cast %11 : vector<1x256x256xbf16> to vector<256x256xbf16>
    %c2 = arith.constant 2 : index
    %c0_12 = arith.constant 0 : index
    %c0_13 = arith.constant 0 : index
    %13 = vector.load %arg2[%c2, %c0_12, %c0_13] : memref<3x256x128xbf16, #tpu.memory_space<vmem>>, vector<1x256x128xbf16>
    %14 = vector.shape_cast %13 : vector<1x256x128xbf16> to vector<256x128xbf16>
    %cst_14 = arith.constant dense<0.000000e+00> : vector<256x128xf32>
    %15 = tpu.matmul %12, %14, %cst_14 {dimension_numbers = #tpu.dot_dimension_numbers<[1], [0], [0], [1], [0, 0, 1, 1], [], []>} : vector<256x256xbf16>, vector<256x128xbf16>, vector<256x128xf32> -> vector<256x128xf32>
    %16 = arith.addf %10, %15 : vector<256x128xf32>
    %c0_15 = arith.constant 0 : index
    %c0_16 = arith.constant 0 : index
    %17 = vector.load %arg3[%c0_15, %c0_16] : memref<1x128xf32, #tpu.memory_space<vmem>>, vector<1x128xf32>
    %18 = vector.broadcast %17 : vector<1x128xf32> to vector<256x128xf32>
    %19 = arith.addf %16, %18 : vector<256x128xf32>
    %cst_17 = arith.constant 0.000000e+00 : f32
    %20 = vector.broadcast %cst_17 : f32 to vector<256x128xf32>
    %21 = arith.maximumf %19, %20 : vector<256x128xf32>
    %22 = arith.truncf %21 : vector<256x128xf32> to vector<256x128xbf16>
    %c0_18 = arith.constant 0 : index
    %c0_19 = arith.constant 0 : index
    %c0_20 = arith.constant 0 : index
    %23 = vector.load %arg4[%c0_18, %c0_19, %c0_20] : memref<1x256x128xbf16, #tpu.memory_space<vmem>>, vector<1x256x128xbf16>
    %24 = vector.shape_cast %23 : vector<1x256x128xbf16> to vector<256x128xbf16>
    %25 = vector.shape_cast %22 : vector<256x128xbf16> to vector<1x256x128xbf16>
    tpu.vector_store %arg4[%c0_18, %c0_19, %c0_20], %25 {strides = array<i32>} : memref<1x256x128xbf16, #tpu.memory_space<vmem>>, vector<1x256x128xbf16>,
    return
  }
  func.func @transform_0(%arg0: i32) -> (i32, i32, i32) {
    %c0_i32 = arith.constant 0 : i32
    %c0_i32_0 = arith.constant 0 : i32
    %c0_i32_1 = arith.constant 0 : i32
    return %arg0, %c0_i32, %c0_i32_0 : i32, i32, i32
  }
  func.func @transform_1(%arg0: i32) -> (i32, i32, i32) {
    %c0_i32 = arith.constant 0 : i32
    %c0_i32_0 = arith.constant 0 : i32
    %c0_i32_1 = arith.constant 0 : i32
    %c0_i32_2 = arith.constant 0 : i32
    return %c0_i32, %c0_i32_0, %c0_i32_1 : i32, i32, i32
  }
  func.func @transform_2(%arg0: i32) -> (i32, i32) {
    %c0_i32 = arith.constant 0 : i32
    %c0_i32_0 = arith.constant 0 : i32
    %c0_i32_1 = arith.constant 0 : i32
    return %c0_i32, %c0_i32_0 : i32, i32
  }
  func.func @transform_3(%arg0: i32) -> (i32, i32, i32) {
    %c0_i32 = arith.constant 0 : i32
    %c0_i32_0 = arith.constant 0 : i32
    %c0_i32_1 = arith.constant 0 : i32
    return %arg0, %c0_i32, %c0_i32_0 : i32, i32, i32
  }
}

module attributes {stable_mosaic.version = 11 : i64} {
  func.func @_mm_shift_kernel(%arg0: i32, %arg1: i32, %arg2: memref<256x1152xbf16, #tpu.memory_space<vmem>>, %arg3: memref<1152x384xbf16, #tpu.memory_space<vmem>>, %arg4: memref<1x384xf32, #tpu.memory_space<vmem>>, %arg5: memref<256x384xbf16, #tpu.memory_space<vmem>>) attributes {dimension_semantics = [#tpu.dimension_semantics<parallel>, #tpu.dimension_semantics<parallel>], iteration_bounds = array<i64: 2, 1>, scalar_prefetch = 0 : i64, scratch_operands = 0 : i64, tpu.core_type = #tpu.core_type<tc>, window_params = [{transform_indices = @transform_0, window_bounds = array<i64: 256, 1152>}, {transform_indices = @transform_1, window_bounds = array<i64: 1152, 384>}, {transform_indices = @transform_2, window_bounds = array<i64: 1, 384>}, {transform_indices = @transform_3, window_bounds = array<i64: 256, 384>}]} {
    %c0 = arith.constant 0 : index
    %c0_0 = arith.constant 0 : index
    %0 = vector.load %arg2[%c0, %c0_0] : memref<256x1152xbf16, #tpu.memory_space<vmem>>, vector<256x1152xbf16>
    %c0_1 = arith.constant 0 : index
    %c0_2 = arith.constant 0 : index
    %1 = vector.load %arg3[%c0_1, %c0_2] : memref<1152x384xbf16, #tpu.memory_space<vmem>>, vector<1152x384xbf16>
    %cst = arith.constant dense<0.000000e+00> : vector<256x384xf32>
    %2 = tpu.matmul %0, %1, %cst {dimension_numbers = #tpu.dot_dimension_numbers<[1], [0], [0], [1], [0, 0, 1, 1], [], []>} : vector<256x1152xbf16>, vector<1152x384xbf16>, vector<256x384xf32> -> vector<256x384xf32>
    %c0_3 = arith.constant 0 : index
    %c0_4 = arith.constant 0 : index
    %3 = vector.load %arg4[%c0_3, %c0_4] : memref<1x384xf32, #tpu.memory_space<vmem>>, vector<1x384xf32>
    %4 = vector.broadcast %3 : vector<1x384xf32> to vector<256x384xf32>
    %5 = arith.addf %2, %4 : vector<256x384xf32>
    %cst_5 = arith.constant 0.000000e+00 : f32
    %6 = vector.broadcast %cst_5 : f32 to vector<256x384xf32>
    %7 = arith.maximumf %5, %6 : vector<256x384xf32>
    %8 = arith.truncf %7 : vector<256x384xf32> to vector<256x384xbf16>
    %c0_6 = arith.constant 0 : index
    %c0_7 = arith.constant 0 : index
    %9 = vector.load %arg5[%c0_6, %c0_7] : memref<256x384xbf16, #tpu.memory_space<vmem>>, vector<256x384xbf16>
    tpu.vector_store %arg5[%c0_6, %c0_7], %8 {strides = array<i32>} : memref<256x384xbf16, #tpu.memory_space<vmem>>, vector<256x384xbf16>,
    return
  }
  func.func @transform_0(%arg0: i32, %arg1: i32) -> (i32, i32) {
    %c0_i32 = arith.constant 0 : i32
    %c0_i32_0 = arith.constant 0 : i32
    return %arg0, %c0_i32 : i32, i32
  }
  func.func @transform_1(%arg0: i32, %arg1: i32) -> (i32, i32) {
    %c0_i32 = arith.constant 0 : i32
    %c0_i32_0 = arith.constant 0 : i32
    return %c0_i32, %arg1 : i32, i32
  }
  func.func @transform_2(%arg0: i32, %arg1: i32) -> (i32, i32) {
    %c0_i32 = arith.constant 0 : i32
    %c0_i32_0 = arith.constant 0 : i32
    return %c0_i32, %arg1 : i32, i32
  }
  func.func @transform_3(%arg0: i32, %arg1: i32) -> (i32, i32) {
    %c0_i32 = arith.constant 0 : i32
    return %arg0, %arg1 : i32, i32
  }
}

module attributes {stable_mosaic.version = 11 : i64} {
  func.func @_mm_shift_kernel(%arg0: i32, %arg1: i32, %arg2: memref<256x32xbf16, #tpu.memory_space<vmem>>, %arg3: memref<32x128xbf16, #tpu.memory_space<vmem>>, %arg4: memref<1x128xf32, #tpu.memory_space<vmem>>, %arg5: memref<256x128xbf16, #tpu.memory_space<vmem>>) attributes {dimension_semantics = [#tpu.dimension_semantics<parallel>, #tpu.dimension_semantics<parallel>], iteration_bounds = array<i64: 4, 1>, scalar_prefetch = 0 : i64, scratch_operands = 0 : i64, tpu.core_type = #tpu.core_type<tc>, window_params = [{transform_indices = @transform_0, window_bounds = array<i64: 256, 32>}, {transform_indices = @transform_1, window_bounds = array<i64: 32, 128>}, {transform_indices = @transform_2, window_bounds = array<i64: 1, 128>}, {transform_indices = @transform_3, window_bounds = array<i64: 256, 128>}]} {
    %c0 = arith.constant 0 : index
    %c0_0 = arith.constant 0 : index
    %0 = vector.load %arg2[%c0, %c0_0] : memref<256x32xbf16, #tpu.memory_space<vmem>>, vector<256x32xbf16>
    %c0_1 = arith.constant 0 : index
    %c0_2 = arith.constant 0 : index
    %1 = vector.load %arg3[%c0_1, %c0_2] : memref<32x128xbf16, #tpu.memory_space<vmem>>, vector<32x128xbf16>
    %cst = arith.constant dense<0.000000e+00> : vector<256x128xf32>
    %2 = tpu.matmul %0, %1, %cst {dimension_numbers = #tpu.dot_dimension_numbers<[1], [0], [0], [1], [0, 0, 1, 1], [], []>} : vector<256x32xbf16>, vector<32x128xbf16>, vector<256x128xf32> -> vector<256x128xf32>
    %c0_3 = arith.constant 0 : index
    %c0_4 = arith.constant 0 : index
    %3 = vector.load %arg4[%c0_3, %c0_4] : memref<1x128xf32, #tpu.memory_space<vmem>>, vector<1x128xf32>
    %4 = vector.broadcast %3 : vector<1x128xf32> to vector<256x128xf32>
    %5 = arith.addf %2, %4 : vector<256x128xf32>
    %cst_5 = arith.constant 0.000000e+00 : f32
    %6 = vector.broadcast %cst_5 : f32 to vector<256x128xf32>
    %7 = arith.maximumf %5, %6 : vector<256x128xf32>
    %8 = arith.truncf %7 : vector<256x128xf32> to vector<256x128xbf16>
    %c0_6 = arith.constant 0 : index
    %c0_7 = arith.constant 0 : index
    %9 = vector.load %arg5[%c0_6, %c0_7] : memref<256x128xbf16, #tpu.memory_space<vmem>>, vector<256x128xbf16>
    tpu.vector_store %arg5[%c0_6, %c0_7], %8 {strides = array<i32>} : memref<256x128xbf16, #tpu.memory_space<vmem>>, vector<256x128xbf16>,
    return
  }
  func.func @transform_0(%arg0: i32, %arg1: i32) -> (i32, i32) {
    %c0_i32 = arith.constant 0 : i32
    %c0_i32_0 = arith.constant 0 : i32
    return %arg0, %c0_i32 : i32, i32
  }
  func.func @transform_1(%arg0: i32, %arg1: i32) -> (i32, i32) {
    %c0_i32 = arith.constant 0 : i32
    %c0_i32_0 = arith.constant 0 : i32
    return %c0_i32, %arg1 : i32, i32
  }
  func.func @transform_2(%arg0: i32, %arg1: i32) -> (i32, i32) {
    %c0_i32 = arith.constant 0 : i32
    %c0_i32_0 = arith.constant 0 : i32
    return %c0_i32, %arg1 : i32, i32
  }
  func.func @transform_3(%arg0: i32, %arg1: i32) -> (i32, i32) {
    %c0_i32 = arith.constant 0 : i32
    return %arg0, %arg1 : i32, i32
  }
}

module attributes {stable_mosaic.version = 11 : i64} {
  func.func @_temporal_kernel(%arg0: i32, %arg1: memref<1x256x128xbf16, #tpu.memory_space<vmem>>, %arg2: memref<1x128x128xbf16, #tpu.memory_space<vmem>>, %arg3: memref<1x128xf32, #tpu.memory_space<vmem>>, %arg4: memref<1x256x128xbf16, #tpu.memory_space<vmem>>) attributes {dimension_semantics = [#tpu.dimension_semantics<parallel>], iteration_bounds = array<i64: 2>, scalar_prefetch = 0 : i64, scratch_operands = 0 : i64, tpu.core_type = #tpu.core_type<tc>, window_params = [{transform_indices = @transform_0, window_bounds = array<i64: 1, 256, 128>}, {pipeline_mode = #tpu.pipeline_mode<synchronous>, transform_indices = @transform_1, window_bounds = array<i64: 1, 128, 128>}, {pipeline_mode = #tpu.pipeline_mode<synchronous>, transform_indices = @transform_2, window_bounds = array<i64: 1, 128>}, {transform_indices = @transform_3, window_bounds = array<i64: 1, 256, 128>}]} {
    %c0 = arith.constant 0 : index
    %c0_0 = arith.constant 0 : index
    %c0_1 = arith.constant 0 : index
    %0 = vector.load %arg1[%c0, %c0_0, %c0_1] : memref<1x256x128xbf16, #tpu.memory_space<vmem>>, vector<1x256x128xbf16>
    %1 = vector.shape_cast %0 : vector<1x256x128xbf16> to vector<256x128xbf16>
    %c0_2 = arith.constant 0 : index
    %c0_3 = arith.constant 0 : index
    %c0_4 = arith.constant 0 : index
    %2 = vector.load %arg2[%c0_2, %c0_3, %c0_4] : memref<1x128x128xbf16, #tpu.memory_space<vmem>>, vector<1x128x128xbf16>
    %3 = vector.shape_cast %2 : vector<1x128x128xbf16> to vector<128x128xbf16>
    %cst = arith.constant dense<0.000000e+00> : vector<256x128xf32>
    %4 = tpu.matmul %1, %3, %cst {dimension_numbers = #tpu.dot_dimension_numbers<[1], [0], [0], [1], [0, 0, 1, 1], [], []>} : vector<256x128xbf16>, vector<128x128xbf16>, vector<256x128xf32> -> vector<256x128xf32>
    %c0_5 = arith.constant 0 : index
    %c0_6 = arith.constant 0 : index
    %5 = vector.load %arg3[%c0_5, %c0_6] : memref<1x128xf32, #tpu.memory_space<vmem>>, vector<1x128xf32>
    %6 = vector.broadcast %5 : vector<1x128xf32> to vector<256x128xf32>
    %7 = arith.addf %4, %6 : vector<256x128xf32>
    %8 = arith.truncf %7 : vector<256x128xf32> to vector<256x128xbf16>
    %c0_7 = arith.constant 0 : index
    %c0_8 = arith.constant 0 : index
    %c0_9 = arith.constant 0 : index
    %9 = vector.load %arg4[%c0_7, %c0_8, %c0_9] : memref<1x256x128xbf16, #tpu.memory_space<vmem>>, vector<1x256x128xbf16>
    %10 = vector.shape_cast %9 : vector<1x256x128xbf16> to vector<256x128xbf16>
    %11 = vector.shape_cast %8 : vector<256x128xbf16> to vector<1x256x128xbf16>
    tpu.vector_store %arg4[%c0_7, %c0_8, %c0_9], %11 {strides = array<i32>} : memref<1x256x128xbf16, #tpu.memory_space<vmem>>, vector<1x256x128xbf16>,
    return
  }
  func.func @transform_0(%arg0: i32) -> (i32, i32, i32) {
    %c0_i32 = arith.constant 0 : i32
    %c0_i32_0 = arith.constant 0 : i32
    %c0_i32_1 = arith.constant 0 : i32
    return %arg0, %c0_i32, %c0_i32_0 : i32, i32, i32
  }
  func.func @transform_1(%arg0: i32) -> (i32, i32, i32) {
    %c0_i32 = arith.constant 0 : i32
    %c0_i32_0 = arith.constant 0 : i32
    %c0_i32_1 = arith.constant 0 : i32
    %c0_i32_2 = arith.constant 0 : i32
    return %c0_i32, %c0_i32_0, %c0_i32_1 : i32, i32, i32
  }
  func.func @transform_2(%arg0: i32) -> (i32, i32) {
    %c0_i32 = arith.constant 0 : i32
    %c0_i32_0 = arith.constant 0 : i32
    %c0_i32_1 = arith.constant 0 : i32
    return %c0_i32, %c0_i32_0 : i32, i32
  }
  func.func @transform_3(%arg0: i32) -> (i32, i32, i32) {
    %c0_i32 = arith.constant 0 : i32
    %c0_i32_0 = arith.constant 0 : i32
    %c0_i32_1 = arith.constant 0 : i32
    return %arg0, %c0_i32, %c0_i32_0 : i32, i32, i32
  }
}

module attributes {stable_mosaic.version = 11 : i64} {
  func.func @_temporal_kernel(%arg0: i32, %arg1: memref<1x384x384xbf16, #tpu.memory_space<vmem>>, %arg2: memref<3x384x128xbf16, #tpu.memory_space<vmem>>, %arg3: memref<1x128xf32, #tpu.memory_space<vmem>>, %arg4: memref<1x256x128xbf16, #tpu.memory_space<vmem>>) attributes {dimension_semantics = [#tpu.dimension_semantics<parallel>], iteration_bounds = array<i64: 2>, scalar_prefetch = 0 : i64, scratch_operands = 0 : i64, tpu.core_type = #tpu.core_type<tc>, window_params = [{transform_indices = @transform_0, window_bounds = array<i64: 1, 384, 384>}, {pipeline_mode = #tpu.pipeline_mode<synchronous>, transform_indices = @transform_1, window_bounds = array<i64: 3, 384, 128>}, {pipeline_mode = #tpu.pipeline_mode<synchronous>, transform_indices = @transform_2, window_bounds = array<i64: 1, 128>}, {transform_indices = @transform_3, window_bounds = array<i64: 1, 256, 128>}]} {
    %c0 = arith.constant 0 : index
    %c0_0 = arith.constant 0 : index
    %c0_1 = arith.constant 0 : index
    %0 = vector.load %arg1[%c0, %c0_0, %c0_1] : memref<1x384x384xbf16, #tpu.memory_space<vmem>>, vector<1x256x384xbf16>
    %1 = vector.shape_cast %0 : vector<1x256x384xbf16> to vector<256x384xbf16>
    %c0_2 = arith.constant 0 : index
    %c0_3 = arith.constant 0 : index
    %c0_4 = arith.constant 0 : index
    %2 = vector.load %arg2[%c0_2, %c0_3, %c0_4] : memref<3x384x128xbf16, #tpu.memory_space<vmem>>, vector<1x384x128xbf16>
    %3 = vector.shape_cast %2 : vector<1x384x128xbf16> to vector<384x128xbf16>
    %cst = arith.constant dense<0.000000e+00> : vector<256x128xf32>
    %4 = tpu.matmul %1, %3, %cst {dimension_numbers = #tpu.dot_dimension_numbers<[1], [0], [0], [1], [0, 0, 1, 1], [], []>} : vector<256x384xbf16>, vector<384x128xbf16>, vector<256x128xf32> -> vector<256x128xf32>
    %c0_5 = arith.constant 0 : index
    %c64 = arith.constant 64 : index
    %c0_6 = arith.constant 0 : index
    %5 = vector.load %arg1[%c0_5, %c64, %c0_6] : memref<1x384x384xbf16, #tpu.memory_space<vmem>>, vector<1x256x384xbf16>
    %6 = vector.shape_cast %5 : vector<1x256x384xbf16> to vector<256x384xbf16>
    %c1 = arith.constant 1 : index
    %c0_7 = arith.constant 0 : index
    %c0_8 = arith.constant 0 : index
    %7 = vector.load %arg2[%c1, %c0_7, %c0_8] : memref<3x384x128xbf16, #tpu.memory_space<vmem>>, vector<1x384x128xbf16>
    %8 = vector.shape_cast %7 : vector<1x384x128xbf16> to vector<384x128xbf16>
    %cst_9 = arith.constant dense<0.000000e+00> : vector<256x128xf32>
    %9 = tpu.matmul %6, %8, %cst_9 {dimension_numbers = #tpu.dot_dimension_numbers<[1], [0], [0], [1], [0, 0, 1, 1], [], []>} : vector<256x384xbf16>, vector<384x128xbf16>, vector<256x128xf32> -> vector<256x128xf32>
    %10 = arith.addf %4, %9 : vector<256x128xf32>
    %c0_10 = arith.constant 0 : index
    %c128 = arith.constant 128 : index
    %c0_11 = arith.constant 0 : index
    %11 = vector.load %arg1[%c0_10, %c128, %c0_11] : memref<1x384x384xbf16, #tpu.memory_space<vmem>>, vector<1x256x384xbf16>
    %12 = vector.shape_cast %11 : vector<1x256x384xbf16> to vector<256x384xbf16>
    %c2 = arith.constant 2 : index
    %c0_12 = arith.constant 0 : index
    %c0_13 = arith.constant 0 : index
    %13 = vector.load %arg2[%c2, %c0_12, %c0_13] : memref<3x384x128xbf16, #tpu.memory_space<vmem>>, vector<1x384x128xbf16>
    %14 = vector.shape_cast %13 : vector<1x384x128xbf16> to vector<384x128xbf16>
    %cst_14 = arith.constant dense<0.000000e+00> : vector<256x128xf32>
    %15 = tpu.matmul %12, %14, %cst_14 {dimension_numbers = #tpu.dot_dimension_numbers<[1], [0], [0], [1], [0, 0, 1, 1], [], []>} : vector<256x384xbf16>, vector<384x128xbf16>, vector<256x128xf32> -> vector<256x128xf32>
    %16 = arith.addf %10, %15 : vector<256x128xf32>
    %c0_15 = arith.constant 0 : index
    %c0_16 = arith.constant 0 : index
    %17 = vector.load %arg3[%c0_15, %c0_16] : memref<1x128xf32, #tpu.memory_space<vmem>>, vector<1x128xf32>
    %18 = vector.broadcast %17 : vector<1x128xf32> to vector<256x128xf32>
    %19 = arith.addf %16, %18 : vector<256x128xf32>
    %cst_17 = arith.constant 0.000000e+00 : f32
    %20 = vector.broadcast %cst_17 : f32 to vector<256x128xf32>
    %21 = arith.maximumf %19, %20 : vector<256x128xf32>
    %22 = arith.truncf %21 : vector<256x128xf32> to vector<256x128xbf16>
    %c0_18 = arith.constant 0 : index
    %c0_19 = arith.constant 0 : index
    %c0_20 = arith.constant 0 : index
    %23 = vector.load %arg4[%c0_18, %c0_19, %c0_20] : memref<1x256x128xbf16, #tpu.memory_space<vmem>>, vector<1x256x128xbf16>
    %24 = vector.shape_cast %23 : vector<1x256x128xbf16> to vector<256x128xbf16>
    %25 = vector.shape_cast %22 : vector<256x128xbf16> to vector<1x256x128xbf16>
    tpu.vector_store %arg4[%c0_18, %c0_19, %c0_20], %25 {strides = array<i32>} : memref<1x256x128xbf16, #tpu.memory_space<vmem>>, vector<1x256x128xbf16>,
    return
  }
  func.func @transform_0(%arg0: i32) -> (i32, i32, i32) {
    %c0_i32 = arith.constant 0 : i32
    %c0_i32_0 = arith.constant 0 : i32
    %c0_i32_1 = arith.constant 0 : i32
    return %arg0, %c0_i32, %c0_i32_0 : i32, i32, i32
  }
  func.func @transform_1(%arg0: i32) -> (i32, i32, i32) {
    %c0_i32 = arith.constant 0 : i32
    %c0_i32_0 = arith.constant 0 : i32
    %c0_i32_1 = arith.constant 0 : i32
    %c0_i32_2 = arith.constant 0 : i32
    return %c0_i32, %c0_i32_0, %c0_i32_1 : i32, i32, i32
  }
  func.func @transform_2(%arg0: i32) -> (i32, i32) {
    %c0_i32 = arith.constant 0 : i32
    %c0_i32_0 = arith.constant 0 : i32
    %c0_i32_1 = arith.constant 0 : i32
    return %c0_i32, %c0_i32_0 : i32, i32
  }
  func.func @transform_3(%arg0: i32) -> (i32, i32, i32) {
    %c0_i32 = arith.constant 0 : i32
    %c0_i32_0 = arith.constant 0 : i32
    %c0_i32_1 = arith.constant 0 : i32
    return %arg0, %c0_i32, %c0_i32_0 : i32, i32, i32
  }
}

module attributes {stable_mosaic.version = 11 : i64} {
  func.func @_temporal_kernel(%arg0: i32, %arg1: memref<1x384x384xbf16, #tpu.memory_space<vmem>>, %arg2: memref<3x384x128xbf16, #tpu.memory_space<vmem>>, %arg3: memref<1x128xf32, #tpu.memory_space<vmem>>, %arg4: memref<1x256x128xbf16, #tpu.memory_space<vmem>>, %arg5: memref<1x256x128xbf16, #tpu.memory_space<vmem>>) attributes {dimension_semantics = [#tpu.dimension_semantics<parallel>], iteration_bounds = array<i64: 2>, scalar_prefetch = 0 : i64, scratch_operands = 0 : i64, tpu.core_type = #tpu.core_type<tc>, window_params = [{transform_indices = @transform_0, window_bounds = array<i64: 1, 384, 384>}, {pipeline_mode = #tpu.pipeline_mode<synchronous>, transform_indices = @transform_1, window_bounds = array<i64: 3, 384, 128>}, {pipeline_mode = #tpu.pipeline_mode<synchronous>, transform_indices = @transform_2, window_bounds = array<i64: 1, 128>}, {transform_indices = @transform_3, window_bounds = array<i64: 1, 256, 128>}, {transform_indices = @transform_4, window_bounds = array<i64: 1, 256, 128>}]} {
    %c0 = arith.constant 0 : index
    %c0_0 = arith.constant 0 : index
    %c0_1 = arith.constant 0 : index
    %0 = vector.load %arg1[%c0, %c0_0, %c0_1] : memref<1x384x384xbf16, #tpu.memory_space<vmem>>, vector<1x256x384xbf16>
    %1 = vector.shape_cast %0 : vector<1x256x384xbf16> to vector<256x384xbf16>
    %c0_2 = arith.constant 0 : index
    %c0_3 = arith.constant 0 : index
    %c0_4 = arith.constant 0 : index
    %2 = vector.load %arg2[%c0_2, %c0_3, %c0_4] : memref<3x384x128xbf16, #tpu.memory_space<vmem>>, vector<1x384x128xbf16>
    %3 = vector.shape_cast %2 : vector<1x384x128xbf16> to vector<384x128xbf16>
    %cst = arith.constant dense<0.000000e+00> : vector<256x128xf32>
    %4 = tpu.matmul %1, %3, %cst {dimension_numbers = #tpu.dot_dimension_numbers<[1], [0], [0], [1], [0, 0, 1, 1], [], []>} : vector<256x384xbf16>, vector<384x128xbf16>, vector<256x128xf32> -> vector<256x128xf32>
    %c0_5 = arith.constant 0 : index
    %c64 = arith.constant 64 : index
    %c0_6 = arith.constant 0 : index
    %5 = vector.load %arg1[%c0_5, %c64, %c0_6] : memref<1x384x384xbf16, #tpu.memory_space<vmem>>, vector<1x256x384xbf16>
    %6 = vector.shape_cast %5 : vector<1x256x384xbf16> to vector<256x384xbf16>
    %c1 = arith.constant 1 : index
    %c0_7 = arith.constant 0 : index
    %c0_8 = arith.constant 0 : index
    %7 = vector.load %arg2[%c1, %c0_7, %c0_8] : memref<3x384x128xbf16, #tpu.memory_space<vmem>>, vector<1x384x128xbf16>
    %8 = vector.shape_cast %7 : vector<1x384x128xbf16> to vector<384x128xbf16>
    %cst_9 = arith.constant dense<0.000000e+00> : vector<256x128xf32>
    %9 = tpu.matmul %6, %8, %cst_9 {dimension_numbers = #tpu.dot_dimension_numbers<[1], [0], [0], [1], [0, 0, 1, 1], [], []>} : vector<256x384xbf16>, vector<384x128xbf16>, vector<256x128xf32> -> vector<256x128xf32>
    %10 = arith.addf %4, %9 : vector<256x128xf32>
    %c0_10 = arith.constant 0 : index
    %c128 = arith.constant 128 : index
    %c0_11 = arith.constant 0 : index
    %11 = vector.load %arg1[%c0_10, %c128, %c0_11] : memref<1x384x384xbf16, #tpu.memory_space<vmem>>, vector<1x256x384xbf16>
    %12 = vector.shape_cast %11 : vector<1x256x384xbf16> to vector<256x384xbf16>
    %c2 = arith.constant 2 : index
    %c0_12 = arith.constant 0 : index
    %c0_13 = arith.constant 0 : index
    %13 = vector.load %arg2[%c2, %c0_12, %c0_13] : memref<3x384x128xbf16, #tpu.memory_space<vmem>>, vector<1x384x128xbf16>
    %14 = vector.shape_cast %13 : vector<1x384x128xbf16> to vector<384x128xbf16>
    %cst_14 = arith.constant dense<0.000000e+00> : vector<256x128xf32>
    %15 = tpu.matmul %12, %14, %cst_14 {dimension_numbers = #tpu.dot_dimension_numbers<[1], [0], [0], [1], [0, 0, 1, 1], [], []>} : vector<256x384xbf16>, vector<384x128xbf16>, vector<256x128xf32> -> vector<256x128xf32>
    %16 = arith.addf %10, %15 : vector<256x128xf32>
    %c0_15 = arith.constant 0 : index
    %c0_16 = arith.constant 0 : index
    %17 = vector.load %arg3[%c0_15, %c0_16] : memref<1x128xf32, #tpu.memory_space<vmem>>, vector<1x128xf32>
    %18 = vector.broadcast %17 : vector<1x128xf32> to vector<256x128xf32>
    %19 = arith.addf %16, %18 : vector<256x128xf32>
    %c0_17 = arith.constant 0 : index
    %c0_18 = arith.constant 0 : index
    %c0_19 = arith.constant 0 : index
    %20 = vector.load %arg4[%c0_17, %c0_18, %c0_19] : memref<1x256x128xbf16, #tpu.memory_space<vmem>>, vector<1x256x128xbf16>
    %21 = vector.shape_cast %20 : vector<1x256x128xbf16> to vector<256x128xbf16>
    %22 = arith.extf %21 : vector<256x128xbf16> to vector<256x128xf32>
    %23 = arith.addf %19, %22 : vector<256x128xf32>
    %cst_20 = arith.constant 0.000000e+00 : f32
    %24 = vector.broadcast %cst_20 : f32 to vector<256x128xf32>
    %25 = arith.maximumf %23, %24 : vector<256x128xf32>
    %26 = arith.truncf %25 : vector<256x128xf32> to vector<256x128xbf16>
    %c0_21 = arith.constant 0 : index
    %c0_22 = arith.constant 0 : index
    %c0_23 = arith.constant 0 : index
    %27 = vector.load %arg5[%c0_21, %c0_22, %c0_23] : memref<1x256x128xbf16, #tpu.memory_space<vmem>>, vector<1x256x128xbf16>
    %28 = vector.shape_cast %27 : vector<1x256x128xbf16> to vector<256x128xbf16>
    %29 = vector.shape_cast %26 : vector<256x128xbf16> to vector<1x256x128xbf16>
    tpu.vector_store %arg5[%c0_21, %c0_22, %c0_23], %29 {strides = array<i32>} : memref<1x256x128xbf16, #tpu.memory_space<vmem>>, vector<1x256x128xbf16>,
    return
  }
  func.func @transform_0(%arg0: i32) -> (i32, i32, i32) {
    %c0_i32 = arith.constant 0 : i32
    %c0_i32_0 = arith.constant 0 : i32
    %c0_i32_1 = arith.constant 0 : i32
    return %arg0, %c0_i32, %c0_i32_0 : i32, i32, i32
  }
  func.func @transform_1(%arg0: i32) -> (i32, i32, i32) {
    %c0_i32 = arith.constant 0 : i32
    %c0_i32_0 = arith.constant 0 : i32
    %c0_i32_1 = arith.constant 0 : i32
    %c0_i32_2 = arith.constant 0 : i32
    return %c0_i32, %c0_i32_0, %c0_i32_1 : i32, i32, i32
  }
  func.func @transform_2(%arg0: i32) -> (i32, i32) {
    %c0_i32 = arith.constant 0 : i32
    %c0_i32_0 = arith.constant 0 : i32
    %c0_i32_1 = arith.constant 0 : i32
    return %c0_i32, %c0_i32_0 : i32, i32
  }
  func.func @transform_3(%arg0: i32) -> (i32, i32, i32) {
    %c0_i32 = arith.constant 0 : i32
    %c0_i32_0 = arith.constant 0 : i32
    %c0_i32_1 = arith.constant 0 : i32
    return %arg0, %c0_i32, %c0_i32_0 : i32, i32, i32
  }
  func.func @transform_4(%arg0: i32) -> (i32, i32, i32) {
    %c0_i32 = arith.constant 0 : i32
    %c0_i32_0 = arith.constant 0 : i32
    %c0_i32_1 = arith.constant 0 : i32
    return %arg0, %c0_i32, %c0_i32_0 : i32, i32, i32
  }
}

</mosaic_0001>

<bundles_post_ra>
// kernel: _lambda_.12
= control target key start
LH: loop header
LB: loop body
LE: loop exit
PB: predicated region body
PF: predicated region fallthrough
CT: control target
= control target key end

     0   :  { %s2106_s12 = smov 0   ;;  %s2108_s13 = smov 0   ;;  %s2609_s0 = inlined_call_operand.vmem [shape: bf16[1024,288], index: 0, kind: input, shape index: {}]   ;;  %s2610_s1 = inlined_call_operand.vmem [shape: bf16[288,256], index: 1, kind: input, shape index: {}]   ;;  %s2611_s2 = inlined_call_operand.vmem [shape: f32[1,256], index: 2, kind: input, shape index: {}]   ;;  %s2612_s3 = inlined_call_operand.vmem [shape: bf16[1024,256], index: 3, kind: output, shape index: {}]  }
   0x1   :  { %s2110_s14 = smov 0  }
   0x2 LB: > { %s25_s15 = sadd.s32 1, %s2079_s13  ;;  %p1616_p0 = scmp.ge.s32.totalorder %s2083_s14, 1  ;;  %s2083_s14 = sphi %s2110_s14, %s13_s14   ;;  %s2079_s13 = sphi %s2108_s13, %s2614_s13   ;;  %s2075_s12 = sphi %s2106_s12, %s2613_s12  }
   0x3   : > { %p27_p1 = scmp.ge.s32.totalorder %s25_s15, 4  ;;  %p174_p2 = scmp.lt.s32.totalorder %s2083_s14, 5 }
   0x5   : > { %s2616_s15 = smov (%p27_p1, %s25_s15), 0  ;;  %p175_p3 = pnand %p1616_p0, %p174_p2 }
   0x6   : > { %v1943_v0 = vld [vmem:[%s2610_s1 + $0x4] ss:$8 sps:$4 sm:$0xff] (!%p175_p3)   ;;  %v1945_v1 = vld [vmem:[%s2610_s1] ss:$8 sps:$4 sm:$0xff] (!%p175_p3)   ;;  %v2085_v2 = vmov (!%p175_p3), 0   ;;  %s1617_s28 = sshll.u32 (!%p175_p3), %s2075_s12, 5 }
   0x7   : > { %178 = sbr.rel (%p175_p3) target bundleno = 415 (0x19f), region = 32  ;;  %1050 = vmatprep.mubr.bf16.mxu0 (!%p175_p3), %v2085_v2  ;;  %825 = vmatprep.subr.bf16.mxu1 (!%p175_p3), %v1943_v0  ;;  %v1946_v3 = vld [vmem:[%s2610_s1 + $0x14] ss:$8 sps:$4 sm:$0xff] (!%p175_p3)   ;;  %v1948_v4 = vld [vmem:[%s2610_s1 + $0x10] ss:$8 sps:$4 sm:$0xff] (!%p175_p3)   ;;  %p214_p4 = scmp.lt.s32.totalorder (!%p175_p3), %s1617_s28, 127 }
   0x8   : > { %826 = vmatpush1.bf16.msra.mxu1 (!%p175_p3), %v1945_v1  ;;  %v1949_v5 = vld [vmem:[%s2610_s1 + $0x24] ss:$8 sps:$4 sm:$0xff] (!%p175_p3)   ;;  %v1951_v6 = vld [vmem:[%s2610_s1 + $0x20] ss:$8 sps:$4 sm:$0xff] (!%p175_p3)   ;;  %v1952_v7 = vld [vmem:[%s2610_s1 + $0x34] ss:$8 sps:$4 sm:$0xff] (!%p175_p3)  }
   0x9   : > { %827 = vmatprep.subr.bf16.mxu1 (!%p175_p3), %v1946_v3  ;;  %v1954_v8 = vld [vmem:[%s2610_s1 + $0x30] ss:$8 sps:$4 sm:$0xff] (!%p175_p3)   ;;  %v1955_v9 = vld [vmem:[%s2610_s1 + $0x44] ss:$8 sps:$4 sm:$0xff] (!%p175_p3)   ;;  %v1957_v10 = vld [vmem:[%s2610_s1 + $0x40] ss:$8 sps:$4 sm:$0xff] (!%p175_p3)  }
   0xa   : > { %v1958_v11 = vld [vmem:[%s2610_s1 + $0x54] ss:$8 sps:$4 sm:$0xff] (!%p175_p3)   ;;  %v1960_v12 = vld [vmem:[%s2610_s1 + $0x50] ss:$8 sps:$4 sm:$0xff] (!%p175_p3)   ;;  %v1985_v13 = vld [vmem:[%s2610_s1 + $0x104] ss:$8 sps:$4 sm:$0xff] (!%p175_p3)  }
   0xb   : > { %v1961_v14 = vld [vmem:[%s2610_s1 + $0x64] ss:$8 sps:$4 sm:$0xff] (!%p175_p3)   ;;  %v1989_v15 = vld [vmem:[%s2610_s1 + $0x100] ss:$8 sps:$4 sm:$0xff] (!%p175_p3)   ;;  %1018 = vmatprep.subr.bf16.mxu0 (!%p175_p3), %v1985_v13  ;;  %v1991_v16 = vld [vmem:[%s2610_s1 + $0x114] ss:$8 sps:$4 sm:$0xff] (!%p175_p3)  }
   0xc   : > { %828 = vmatpush1.bf16.msra.mxu1 (!%p175_p3), %v1948_v4  ;;  %1019 = vmatpush1.bf16.msra.mxu0 (!%p175_p3), %v1989_v15  ;;  %v1963_v17 = vld [vmem:[%s2610_s1 + $0x60] ss:$8 sps:$4 sm:$0xff] (!%p175_p3)   ;;  %v1995_v18 = vld [vmem:[%s2610_s1 + $0x110] ss:$8 sps:$4 sm:$0xff] (!%p175_p3)   ;;  %v1964_v19 = vld [vmem:[%s2610_s1 + $0x74] ss:$8 sps:$4 sm:$0xff] (!%p175_p3)  }
   0xd   : > { %829 = vmatprep.subr.bf16.mxu1 (!%p175_p3), %v1949_v5  ;;  %1020 = vmatprep.subr.bf16.mxu0 (!%p175_p3), %v1991_v16  ;;  %vm776_vm0 = vcmask (!%p175_p3), 261120   ;;  %v1966_v22 = vld [vmem:[%s2610_s1 + $0x70] ss:$8 sps:$4 sm:$0xff] (!%p175_p3)   ;;  %v1967_v23 = vld [vmem:[%s2610_s1 + $0x84] ss:$8 sps:$4 sm:$0xff] (!%p175_p3)  }
   0xe   : > { %s2618_s28 = smov (!%p214_p4, %s1617_s28), 127  ;;  %v1969_v24 = vld [vmem:[%s2610_s1 + $0x80] ss:$8 sps:$4 sm:$0xff]   ;;  %v1970_v25 = vld [vmem:[%s2610_s1 + $0x94] ss:$8 sps:$4 sm:$0xff]  }
   0xf   : > { %s1917_s17 = smul.u32 12, %s2618_s28  ;;  %v1972_v27 = vld [vmem:[%s2610_s1 + $0x90] ss:$8 sps:$4 sm:$0xff]   ;;  %v1973_v28 = vld [vmem:[%s2610_s1 + $0xa4] ss:$8 sps:$4 sm:$0xff]   ;;  %s1756_s25 = sshll.u32 %s2618_s28, 3 }
  0x10   : > { %830 = vmatpush1.bf16.msra.mxu1 %v1951_v6  ;;  %1021 = vmatpush1.bf16.msra.mxu0 %v1995_v18  ;;  %v1975_v29 = vld [vmem:[%s2610_s1 + $0xa0] ss:$8 sps:$4 sm:$0xff]   ;;  %v1976_v30 = vld [vmem:[%s2610_s1 + $0xb4] ss:$8 sps:$4 sm:$0xff]   ;;  %v1978_v32 = vld [vmem:[%s2610_s1 + $0xb0] ss:$8 sps:$4 sm:$0xff]   ;;  %s2370_s30 = scalar_lea.vmem %s2612_s3, %s1756_s25 }
  0x11   : > { %831 = vmatprep.subr.bf16.mxu1 %v1952_v7  ;;  %s2182_s29 = scalar_lea.vmem %s2609_s0, %s1917_s17  ;;  %v1979_v33 = vld [vmem:[%s2610_s1 + $0xc4] ss:$8 sps:$4 sm:$0xff]   ;;  %v1981_v34 = vld [vmem:[%s2610_s1 + $0xc0] ss:$8 sps:$4 sm:$0xff]   ;;  %v1982_v35 = vld [vmem:[%s2610_s1 + $0xd4] ss:$8 sps:$4 sm:$0xff]  }
  0x12   : > { %v1999_v20 = vld [vmem:[%s2182_s29 + $0x4] ss:$12 sps:$4 sm:$0xff]   ;;  %v2000_v21 = vld [vmem:[%s2182_s29 + $0x8] ss:$12 sps:$4 sm:$0xff]   ;;  %v2003_v26 = vld [vmem:[%s2182_s29 + $0x20] ss:$12 sps:$4 sm:$0xff]  }
  0x13   : > { %857 = vmatprep.mubr.bf16.mxu1 %v1999_v20  ;;  %1706 = vmatmul.mubr.msk.bf16.vlgmr.msra.gmra.mrb[0].mxu0 %vm776_vm0, %v2000_v21  ;;  %v2007_v31 = vld [vmem:[%s2182_s29 + $0x38] ss:$12 sps:$4 sm:$0xff]   ;;  %v2011_v36 = vld [vmem:[%s2182_s29 + $0x50] ss:$12 sps:$4 sm:$0xff]   ;;  %v1990_v39 = vld [vmem:[%s2610_s1 + $0xe0] ss:$8 sps:$4 sm:$0xff]  }
  0x14   : > { %832 = vmatpush1.bf16.msra.mxu1 %v1954_v8  ;;  %1060 = vmatprep.mubr.bf16.mxu0 %v2085_v2  ;;  %v1984_v37 = vld [vmem:[%s2610_s1 + $0xd0] ss:$8 sps:$4 sm:$0xff]   ;;  %v1987_v38 = vld [vmem:[%s2610_s1 + $0xe4] ss:$8 sps:$4 sm:$0xff]   ;;  %v1993_v40 = vld [vmem:[%s2610_s1 + $0xf4] ss:$8 sps:$4 sm:$0xff]  }
  0x15   : > { %833 = vmatprep.subr.bf16.mxu1 %v1955_v9  ;;  %v2015_v41 = vld [vmem:[%s2182_s29 + $0x68] ss:$12 sps:$4 sm:$0xff]   ;;  %v1996_v42 = vld [vmem:[%s2610_s1 + $0xf0] ss:$8 sps:$4 sm:$0xff]   ;;  %v1997_v43 = vld [vmem:[%s2182_s29] ss:$12 sps:$4 sm:$0xff]  }
  0x16   : > { %v2001_v44 = vld [vmem:[%s2182_s29 + $0x1c] ss:$12 sps:$4 sm:$0xff]   ;;  %v2019_v45 = vld [vmem:[%s2182_s29 + $0x80] ss:$12 sps:$4 sm:$0xff]   ;;  %v2004_v46 = vld [vmem:[%s2182_s29 + $0x18] ss:$12 sps:$4 sm:$0xff]  }
  0x17   : > { %v2005_v47 = vld [vmem:[%s2182_s29 + $0x34] ss:$12 sps:$4 sm:$0xff]   ;;  %v2023_v48 = vld [vmem:[%s2182_s29 + $0x98] ss:$12 sps:$4 sm:$0xff]   ;;  %v2008_v49 = vld [vmem:[%s2182_s29 + $0x30] ss:$12 sps:$4 sm:$0xff]  }
  0x18   : > { %834 = vmatpush1.bf16.msra.mxu1 %v1957_v10  ;;  %v2009_v50 = vld [vmem:[%s2182_s29 + $0x4c] ss:$12 sps:$4 sm:$0xff]   ;;  %v2027_v51 = vld [vmem:[%s2182_s29 + $0xb0] ss:$12 sps:$4 sm:$0xff]   ;;  %v2012_v52 = vld [vmem:[%s2182_s29 + $0x48] ss:$12 sps:$4 sm:$0xff]  }
  0x19   : > { %835 = vmatprep.subr.bf16.mxu1 %v1958_v11  ;;  %v2013_v53 = vld [vmem:[%s2182_s29 + $0x64] ss:$12 sps:$4 sm:$0xff]   ;;  %v2031_v54 = vld [vmem:[%s2182_s29 + $0xc8] ss:$12 sps:$4 sm:$0xff]   ;;  %v2016_v55 = vld [vmem:[%s2182_s29 + $0x60] ss:$12 sps:$4 sm:$0xff]  }
  0x1a   : > { %v2017_v56 = vld [vmem:[%s2182_s29 + $0x7c] ss:$12 sps:$4 sm:$0xff]   ;;  %v2035_v57 = vld [vmem:[%s2182_s29 + $0xe0] ss:$12 sps:$4 sm:$0xff]   ;;  %v2020_v58 = vld [vmem:[%s2182_s29 + $0x78] ss:$12 sps:$4 sm:$0xff]  }
  0x1b   : > { %1707 = vmatmul.mubr.msk.bf16.gmra.mrb[4].mxu0 %vm776_vm0, %v2003_v26  ;;  %v2021_v59 = vld [vmem:[%s2182_s29 + $0x94] ss:$12 sps:$4 sm:$0xff]   ;;  %v2039_v60 = vld [vmem:[%s2182_s29 + $0xf8] ss:$12 sps:$4 sm:$0xff]   ;;  %v2024_v61 = vld [vmem:[%s2182_s29 + $0x90] ss:$12 sps:$4 sm:$0xff]  }
  0x1c   : > { %836 = vmatpush1.bf16.msra.mxu1 %v1960_v12  ;;  %1070 = vmatprep.mubr.bf16.mxu0 %v2085_v2  ;;  %v2025_v62 = vld [vmem:[%s2182_s29 + $0xac] ss:$12 sps:$4 sm:$0xff]   ;;  %v2043_v63 = vld [vmem:[%s2182_s29 + $0x110] ss:$12 sps:$4 sm:$0xff]   ;;  %v2028_v0 = vld [vmem:[%s2182_s29 + $0xa8] ss:$12 sps:$4 sm:$0xff]  }
  0x1d   : > { %837 = vmatprep.subr.bf16.mxu1 %v1961_v14  ;;  %v2029_v1 = vld [vmem:[%s2182_s29 + $0xc4] ss:$12 sps:$4 sm:$0xff]   ;;  %v2047_v3 = vld [vmem:[%s2182_s29 + $0x128] ss:$12 sps:$4 sm:$0xff]   ;;  %v2032_v4 = vld [vmem:[%s2182_s29 + $0xc0] ss:$12 sps:$4 sm:$0xff]  }
  0x1e   : > { %v2033_v5 = vld [vmem:[%s2182_s29 + $0xdc] ss:$12 sps:$4 sm:$0xff]   ;;  %v2051_v6 = vld [vmem:[%s2182_s29 + $0x140] ss:$12 sps:$4 sm:$0xff]   ;;  %v2036_v7 = vld [vmem:[%s2182_s29 + $0xd8] ss:$12 sps:$4 sm:$0xff]  }
  0x1f   : > { %v2037_v8 = vld [vmem:[%s2182_s29 + $0xf4] ss:$12 sps:$4 sm:$0xff]   ;;  %v2055_v9 = vld [vmem:[%s2182_s29 + $0x158] ss:$12 sps:$4 sm:$0xff]   ;;  %v2040_v10 = vld [vmem:[%s2182_s29 + $0xf0] ss:$12 sps:$4 sm:$0xff]  }
  0x20   : > { %838 = vmatpush1.bf16.msra.mxu1 %v1963_v17  ;;  %v2041_v11 = vld [vmem:[%s2182_s29 + $0x10c] ss:$12 sps:$4 sm:$0xff]   ;;  %v2059_v12 = vld [vmem:[%s2182_s29 + $0x170] ss:$12 sps:$4 sm:$0xff]   ;;  %v2044_v13 = vld [vmem:[%s2182_s29 + $0x108] ss:$12 sps:$4 sm:$0xff]  }
  0x21   : > { %839 = vmatprep.subr.bf16.mxu1 %v1964_v19  ;;  %v2045_v14 = vld [vmem:[%s2182_s29 + $0x124] ss:$12 sps:$4 sm:$0xff]   ;;  %v2048_v15 = vld [vmem:[%s2182_s29 + $0x120] ss:$12 sps:$4 sm:$0xff]   ;;  %v2049_v16 = vld [vmem:[%s2182_s29 + $0x13c] ss:$12 sps:$4 sm:$0xff]  }
  0x22   : > { %v2052_v17 = vld [vmem:[%s2182_s29 + $0x138] ss:$12 sps:$4 sm:$0xff]   ;;  %v2053_v18 = vld [vmem:[%s2182_s29 + $0x154] ss:$12 sps:$4 sm:$0xff]  }
  0x23   : > { %1708 = vmatmul.mubr.msk.bf16.gmra.mrb[8].mxu0 %vm776_vm0, %v2007_v31  ;;  %v2057_v19 = vld [vmem:[%s2182_s29 + $0x16c] ss:$12 sps:$4 sm:$0xff]   ;;  %v2060_v20 = vld [vmem:[%s2182_s29 + $0x168] ss:$12 sps:$4 sm:$0xff]  }
  0x24   : > { %840 = vmatpush1.bf16.msra.mxu1 %v1966_v22  ;;  %1080 = vmatprep.mubr.bf16.mxu0 %v2085_v2 }
  0x25   : > { %841 = vmatprep.subr.bf16.mxu1 %v1967_v23 }
  0x28   : > { %842 = vmatpush1.bf16.msra.mxu1 %v1969_v24 }
  0x29   : > { %843 = vmatprep.subr.bf16.mxu1 %v1970_v25 }
  0x2b   : > { %1709 = vmatmul.mubr.msk.bf16.gmra.mrb[12].mxu0 %vm776_vm0, %v2011_v36 }
  0x2c   : > { %844 = vmatpush1.bf16.msra.mxu1 %v1972_v27  ;;  %1090 = vmatprep.mubr.bf16.mxu0 %v2085_v2 }
  0x2d   : > { %845 = vmatprep.subr.bf16.mxu1 %v1973_v28 }
  0x30   : > { %846 = vmatpush1.bf16.msra.mxu1 %v1975_v29 }
  0x31   : > { %847 = vmatprep.subr.bf16.mxu1 %v1976_v30 }
  0x33   : > { %1710 = vmatmul.mubr.msk.bf16.gmra.mrb[16].mxu0 %vm776_vm0, %v2015_v41 }
  0x34   : > { %848 = vmatpush1.bf16.msra.mxu1 %v1978_v32  ;;  %1100 = vmatprep.mubr.bf16.mxu0 %v2085_v2 }
  0x35   : > { %849 = vmatprep.subr.bf16.mxu1 %v1979_v33  ;;  %v346_v33 = vlaneseq }
  0x37   : > { %v347_v36 = vshrl.u32 %v346_v33, 7 }
  0x38   : > { %850 = vmatpush1.bf16.msra.mxu1 %v1981_v34 }
  0x39   : > { %851 = vmatprep.subr.bf16.mxu1 %v1982_v35  ;;  %v352_v41 = vsub.s32 1, %v347_v36 }
  0x3b   : > { %1711 = vmatmul.mubr.msk.bf16.gmra.mrb[20].mxu0 %vm776_vm0, %v2019_v45 }
  0x3c   : > { %852 = vmatpush1.bf16.msra.mxu1 %v1984_v37  ;;  %1110 = vmatprep.mubr.bf16.mxu0 %v2085_v2 }
  0x3d   : > { %853 = vmatprep.subr.bf16.mxu1 %v1987_v38 }
  0x40   : > { %854 = vmatpush1.bf16.msra.mxu1 %v1990_v39  ;;  %v348_v39 = vsub.s32 0, %v347_v36 }
  0x41   : > { %855 = vmatprep.subr.bf16.mxu1 %v1993_v40  ;;  %v344_v40 = vld [vmem:[%s2611_s2] sm:$0x3] }
  0x43   : > { %1712 = vmatmul.mubr.msk.bf16.gmra.mrb[24].mxu0 %vm776_vm0, %v2023_v48 }
  0x44   : > { %856 = vmatpush1.bf16.msra.mxu1 %v1996_v42  ;;  %1120 = vmatprep.mubr.bf16.mxu0 %v2085_v2 }
  0x47   : > { %858 = vmatmul.mubr.bf16.vlgmr.msra.gmra.mrb[0].mxu1 %v1997_v43 }
  0x48   : > { %867 = vmatprep.mubr.bf16.mxu1 %v2001_v44  ;;  %v2346_v44 = vrot.slane %v344_v40, %v348_v39 }
  0x4b   : > { %1713 = vmatmul.mubr.msk.bf16.gmra.mrb[28].mxu0 %vm776_vm0, %v2027_v51 }
  0x4c   : > { %1130 = vmatprep.mubr.bf16.mxu0 %v2085_v2 }
  0x4f   : > { %868 = vmatmul.mubr.bf16.gmra.mrb[4].mxu1 %v2004_v46  ;;  %v2350_v46 = vrot.slane %v344_v40, %v352_v41 }
  0x50   : > { %877 = vmatprep.mubr.bf16.mxu1 %v2005_v47 }
  0x53   : > { %1714 = vmatmul.mubr.msk.bf16.gmra.mrb[32].mxu0 %vm776_vm0, %v2031_v54 }
  0x54   : > { %1140 = vmatprep.mubr.bf16.mxu0 %v2085_v2 }
  0x57   : > { %878 = vmatmul.mubr.bf16.gmra.mrb[8].mxu1 %v2008_v49 }
  0x58   : > { %887 = vmatprep.mubr.bf16.mxu1 %v2009_v50 }
  0x5b   : > { %1715 = vmatmul.mubr.msk.bf16.gmra.mrb[36].mxu0 %vm776_vm0, %v2035_v57 }
  0x5c   : > { %1150 = vmatprep.mubr.bf16.mxu0 %v2085_v2 }
  0x5f   : > { %888 = vmatmul.mubr.bf16.gmra.mrb[12].mxu1 %v2012_v52 }
  0x60   : > { %897 = vmatprep.mubr.bf16.mxu1 %v2013_v53 }
  0x63   : > { %1716 = vmatmul.mubr.msk.bf16.gmra.mrb[40].mxu0 %vm776_vm0, %v2039_v60 }
  0x64   : > { %1160 = vmatprep.mubr.bf16.mxu0 %v2085_v2 }
  0x67   : > { %898 = vmatmul.mubr.bf16.gmra.mrb[16].mxu1 %v2016_v55 }
  0x68   : > { %907 = vmatprep.mubr.bf16.mxu1 %v2017_v56 }
  0x6b   : > { %1717 = vmatmul.mubr.msk.bf16.gmra.mrb[44].mxu0 %vm776_vm0, %v2043_v63 }
  0x6c   : > { %1170 = vmatprep.mubr.bf16.mxu0 %v2085_v2 }
  0x6f   : > { %908 = vmatmul.mubr.bf16.gmra.mrb[20].mxu1 %v2020_v58 }
  0x70   : > { %917 = vmatprep.mubr.bf16.mxu1 %v2021_v59 }
  0x73   : > { %1718 = vmatmul.mubr.msk.bf16.gmra.mrb[48].mxu0 %vm776_vm0, %v2047_v3 }
  0x74   : > { %1180 = vmatprep.mubr.bf16.mxu0 %v2085_v2 }
  0x77   : > { %918 = vmatmul.mubr.bf16.gmra.mrb[24].mxu1 %v2024_v61 }
  0x78   : > { %927 = vmatprep.mubr.bf16.mxu1 %v2025_v62 }
  0x7b   : > { %1719 = vmatmul.mubr.msk.bf16.gmra.mrb[52].mxu0 %vm776_vm0, %v2051_v6 }
  0x7c   : > { %1190 = vmatprep.mubr.bf16.mxu0 %v2085_v2 }
  0x7f   : > { %928 = vmatmul.mubr.bf16.gmra.mrb[28].mxu1 %v2028_v0 }
  0x80   : > { %937 = vmatprep.mubr.bf16.mxu1 %v2029_v1 }
  0x83   : > { %1720 = vmatmul.mubr.msk.bf16.gmra.mrb[56].mxu0 %vm776_vm0, %v2055_v9 }
  0x84   : > { %1200 = vmatprep.mubr.bf16.mxu0 %v2085_v2  ;;  %v2056_v2 = vld [vmem:[%s2182_s29 + $0x150] ss:$12 sps:$4 sm:$0xff]  }
  0x87   : > { %938 = vmatmul.mubr.bf16.gmra.mrb[32].mxu1 %v2032_v4 }
  0x88   : > { %947 = vmatprep.mubr.bf16.mxu1 %v2033_v5 }
  0x8b   : > { %1721 = vmatmul.mubr.msk.bf16.gmra.mrb[60].mxu0 %vm776_vm0, %v2059_v12 }
  0x8f   : > { %948 = vmatmul.mubr.bf16.gmra.mrb[36].mxu1 %v2036_v7 }
  0x90   : > { %957 = vmatprep.mubr.bf16.mxu1 %v2037_v8 }
  0x97   : > { %958 = vmatmul.mubr.bf16.gmra.mrb[40].mxu1 %v2040_v10 }
  0x98   : > { %967 = vmatprep.mubr.bf16.mxu1 %v2041_v11 }
  0x9f   : > { %968 = vmatmul.mubr.bf16.gmra.mrb[44].mxu1 %v2044_v13 }
  0xa0   : > { %977 = vmatprep.mubr.bf16.mxu1 %v2045_v14 }
  0xa7   : > { %978 = vmatmul.mubr.bf16.gmra.mrb[48].mxu1 %v2048_v15 }
  0xa8   : > { %987 = vmatprep.mubr.bf16.mxu1 %v2049_v16 }
  0xaf   : > { %988 = vmatmul.mubr.bf16.gmra.mrb[52].mxu1 %v2052_v17 }
  0xb0   : > { %997 = vmatprep.mubr.bf16.mxu1 %v2053_v18 }
  0xb7   : > { %998 = vmatmul.mubr.bf16.gmra.mrb[56].mxu1 %v2056_v2 }
  0xb8   : > { %1007 = vmatprep.mubr.bf16.mxu1 %v2057_v19 }
  0xbf   : > { %1008 = vmatmul.mubr.bf16.gmra.mrb[60].mxu1 %v2060_v20 }
  0xe6   : > { %v1052_v21 = vpop.f32.mrb[0].mxu0 }
  0xe7   : > { %v1054_v22 = vpop.f32.mrb[1].mxu0 }
  0xe8   : > { %v1056_v23 = vpop.f32.mrb[2].mxu0 }
  0xe9   : > { %v1058_v24 = vpop.f32.mrb[3].mxu0 }
  0xee   : > { %v1062_v25 = vpop.f32.mrb[4].mxu0 }
  0xef   : > { %v1064_v26 = vpop.f32.mrb[5].mxu0 }
  0xf0   : > { %v1066_v27 = vpop.f32.mrb[6].mxu0 }
  0xf1   : > { %v1068_v28 = vpop.f32.mrb[7].mxu0 }
  0xf6   : > { %v2323_v29 = vpop.f32.mrb[8].mxu0 }
  0xf7   : > { %v2325_v30 = vpop.f32.mrb[9].mxu0 }
  0xf8   : > { %v2327_v31 = vpop.f32.mrb[10].mxu0 }
  0xf9   : > { %v2329_v32 = vpop.f32.mrb[11].mxu0 }
  0xfe   : > { %v2331_v34 = vpop.f32.mrb[12].mxu0 }
  0xff   : > { %v2333_v35 = vpop.f32.mrb[13].mxu0 }
 0x100   : > { %v2335_v37 = vpop.f32.mrb[14].mxu0 }
 0x101   : > { %v2337_v38 = vpop.f32.mrb[15].mxu0 }
 0x106   : > { %v2342_v42 = vpop.f32.mrb[16].mxu0 }
 0x107   : > { %v2344_v43 = vpop.f32.mrb[17].mxu0 }
 0x108   : > { %v2348_v45 = vpop.f32.mrb[18].mxu0 }
 0x109   : > { %v2352_v47 = vpop.f32.mrb[19].mxu0 }
 0x10e   : > { %v2357_v56 = vpop.f32.mrb[20].mxu0 }
 0x10f   : > { %v2361_v59 = vpop.f32.mrb[21].mxu0 }
 0x110   : > { %v2363_v62 = vpop.f32.mrb[22].mxu0 }
 0x111   : > { %v2365_v1 = vpop.f32.mrb[23].mxu0 }
 0x116   : > { %v2376_v15 = vpop.f32.mrb[24].mxu0 }
 0x117   : > { %v2380_v18 = vpop.f32.mrb[25].mxu0 }
 0x118   : > { %v2382_v20 = vpop.f32.mrb[26].mxu0 }
 0x11a   : > { %v859_v48 = vpop.f32.mrb[0].mxu1 }
 0x11b   : > { %v860_v49 = vadd.f32 %v859_v48, %v2346_v44  ;;  %v861_v50 = vpop.f32.mrb[1].mxu1 }
 0x11c   : > { %v862_v51 = vadd.f32 %v861_v50, %v2350_v46  ;;  %v863_v52 = vpop.f32.mrb[2].mxu1 }
 0x11d   : > { %v1053_v53 = vadd.f32 %v1052_v21, %v860_v49  ;;  %v864_v54 = vadd.f32 %v863_v52, %v2346_v44  ;;  %v865_v55 = vpop.f32.mrb[3].mxu1 }
 0x11e   : > { %v1055_v57 = vadd.f32 %v1054_v22, %v862_v51  ;;  %v866_v58 = vadd.f32 %v865_v55, %v2350_v46 }
 0x11f   : > { %v1211_v60 = vmax.f32 %v1053_v53, 0.0  ;;  %v1057_v61 = vadd.f32 %v1056_v23, %v864_v54  ;;  %v2384_v23 = vpop.f32.mrb[27].mxu0 }
 0x120   : > { %v1212_v63 = vmax.f32 %v1055_v57, 0.0  ;;  %v1059_v0 = vadd.f32 %v1058_v24, %v866_v58  ;;  %v2391_v50 = vpop.f32.mrb[28].mxu0 }
 0x121   : > { %v1213_v3 = vmax.f32 %v1057_v61, 0.0  ;;  %v2396_v53 = vpop.f32.mrb[29].mxu0 }
 0x122   : > { %v1757_v4 = vpack.c.bf16 %v1212_v63, %v1211_v60  ;;  %v1214_v5 = vmax.f32 %v1059_v0, 0.0  ;;  %v869_v6 = vpop.f32.mrb[4].mxu1  ;;  %v2399_v57 = vpop.f32.mrb[30].mxu0 }
 0x123   : > { %v870_v7 = vadd.f32 %v869_v6, %v2346_v44  ;;  %v871_v8 = vpop.f32.mrb[5].mxu1  ;;  %v2402_v60 = vpop.f32.mrb[31].mxu0 }
 0x124   : > { %1467 = vst [vmem:[%s2370_s30] sm:$0xff] %v1757_v4  ;;  %v1758_v9 = vpack.c.bf16 %v1214_v5, %v1213_v3  ;;  %v872_v10 = vadd.f32 %v871_v8, %v2350_v46  ;;  %v873_v11 = vpop.f32.mrb[6].mxu1 }
 0x125   : > { %v1063_v12 = vadd.f32 %v1062_v25, %v870_v7  ;;  %v874_v13 = vadd.f32 %v873_v11, %v2346_v44  ;;  %v875_v14 = vpop.f32.mrb[7].mxu1 }
 0x126   : > { %1468 = vst [vmem:[%s2370_s30 + $0x8] sm:$0xff] %v1758_v9  ;;  %v1065_v16 = vadd.f32 %v1064_v26, %v872_v10  ;;  %v876_v17 = vadd.f32 %v875_v14, %v2350_v46  ;;  %v2409_v9 = vpop.f32.mrb[32].mxu0 }
 0x127   : > { %v1215_v2 = vmax.f32 %v1063_v12, 0.0  ;;  %v1067_v19 = vadd.f32 %v1066_v27, %v874_v13  ;;  %v2414_v12 = vpop.f32.mrb[33].mxu0 }
 0x128   : > { %v1216_v21 = vmax.f32 %v1065_v16, 0.0  ;;  %v1069_v22 = vadd.f32 %v1068_v28, %v876_v17  ;;  %v2417_v16 = vpop.f32.mrb[34].mxu0 }
 0x129   : > { %v1217_v24 = vmax.f32 %v1067_v19, 0.0 }
 0x12a   : > { %v1759_v25 = vpack.c.bf16 %v1216_v21, %v1215_v2  ;;  %v1218_v33 = vmax.f32 %v1069_v22, 0.0  ;;  %v879_v36 = vpop.f32.mrb[8].mxu1  ;;  %v2420_v2 = vpop.f32.mrb[35].mxu0 }
 0x12b   : > { %v880_v39 = vadd.f32 %v879_v36, %v2346_v44  ;;  %v881_v26 = vpop.f32.mrb[9].mxu1 }
 0x12c   : > { %1469 = vst [vmem:[%s2370_s30 + $0x10] sm:$0xff] %v1759_v25  ;;  %v1760_v40 = vpack.c.bf16 %v1218_v33, %v1217_v24  ;;  %v882_v41 = vadd.f32 %v881_v26, %v2350_v46  ;;  %v883_v48 = vpop.f32.mrb[10].mxu1 }
 0x12d   : > { %v1073_v27 = vadd.f32 %v2323_v29, %v880_v39  ;;  %v884_v49 = vadd.f32 %v883_v48, %v2346_v44  ;;  %v885_v28 = vpop.f32.mrb[11].mxu1 }
 0x12e   : > { %1470 = vst [vmem:[%s2370_s30 + $0x18] sm:$0xff] %v1760_v40  ;;  %v1075_v51 = vadd.f32 %v2325_v30, %v882_v41  ;;  %v886_v52 = vadd.f32 %v885_v28, %v2350_v46  ;;  %v2427_v40 = vpop.f32.mrb[36].mxu0 }
 0x12f   : > { %v1219_v54 = vmax.f32 %v1073_v27, 0.0  ;;  %v1077_v55 = vadd.f32 %v2327_v31, %v884_v49  ;;  %v2432_v27 = vpop.f32.mrb[37].mxu0 }
 0x130   : > { %v1220_v58 = vmax.f32 %v1075_v51, 0.0  ;;  %v1079_v29 = vadd.f32 %v2329_v32, %v886_v52  ;;  %v2435_v51 = vpop.f32.mrb[38].mxu0 }
 0x131   : > { %v1221_v61 = vmax.f32 %v1077_v55, 0.0 }
 0x132   : > { %v1761_v63 = vpack.c.bf16 %v1220_v58, %v1219_v54  ;;  %v1222_v0 = vmax.f32 %v1079_v29, 0.0  ;;  %v889_v3 = vpop.f32.mrb[12].mxu1  ;;  %v2438_v54 = vpop.f32.mrb[39].mxu0 }
 0x133   : > { %v890_v30 = vadd.f32 %v889_v3, %v2346_v44  ;;  %v891_v4 = vpop.f32.mrb[13].mxu1 }
 0x134   : > { %1471 = vst [vmem:[%s2370_s30 + $0x20] sm:$0xff] %v1761_v63  ;;  %v1762_v5 = vpack.c.bf16 %v1222_v0, %v1221_v61  ;;  %v892_v6 = vadd.f32 %v891_v4, %v2350_v46  ;;  %v893_v31 = vpop.f32.mrb[14].mxu1 }
 0x135   : > { %v1083_v7 = vadd.f32 %v2331_v34, %v890_v30  ;;  %v894_v8 = vadd.f32 %v893_v31, %v2346_v44  ;;  %v895_v32 = vpop.f32.mrb[15].mxu1 }
 0x136   : > { %1472 = vst [vmem:[%s2370_s30 + $0x28] sm:$0xff] %v1762_v5  ;;  %v1085_v10 = vadd.f32 %v2333_v35, %v892_v6  ;;  %v896_v11 = vadd.f32 %v895_v32, %v2350_v46  ;;  %v2445_v5 = vpop.f32.mrb[40].mxu0 }
 0x137   : > { %v1223_v13 = vmax.f32 %v1083_v7, 0.0  ;;  %v1087_v14 = vadd.f32 %v2335_v37, %v894_v8  ;;  %v2450_v7 = vpop.f32.mrb[41].mxu0 }
 0x138   : > { %v1224_v17 = vmax.f32 %v1085_v10, 0.0  ;;  %v1089_v34 = vadd.f32 %v2337_v38, %v896_v11  ;;  %v2453_v10 = vpop.f32.mrb[42].mxu0 }
 0x139   : > { %v1225_v19 = vmax.f32 %v1087_v14, 0.0 }
 0x13a   : > { %v1763_v21 = vpack.c.bf16 %v1224_v17, %v1223_v13  ;;  %v1226_v22 = vmax.f32 %v1089_v34, 0.0  ;;  %v899_v24 = vpop.f32.mrb[16].mxu1  ;;  %v2456_v13 = vpop.f32.mrb[43].mxu0 }
 0x13b   : > { %v900_v35 = vadd.f32 %v899_v24, %v2346_v44  ;;  %v901_v25 = vpop.f32.mrb[17].mxu1 }
 0x13c   : > { %1473 = vst [vmem:[%s2370_s30 + $0x30] sm:$0xff] %v1763_v21  ;;  %v1764_v33 = vpack.c.bf16 %v1226_v22, %v1225_v19  ;;  %v902_v36 = vadd.f32 %v901_v25, %v2350_v46  ;;  %v903_v37 = vpop.f32.mrb[18].mxu1 }
 0x13d   : > { %v1093_v39 = vadd.f32 %v2342_v42, %v900_v35  ;;  %v904_v26 = vadd.f32 %v903_v37, %v2346_v44  ;;  %v905_v38 = vpop.f32.mrb[19].mxu1 }
 0x13e   : > { %1474 = vst [vmem:[%s2370_s30 + $0x38] sm:$0xff] %v1764_v33  ;;  %v1095_v41 = vadd.f32 %v2344_v43, %v902_v36  ;;  %v906_v48 = vadd.f32 %v905_v38, %v2350_v46  ;;  %v2463_v33 = vpop.f32.mrb[44].mxu0 }
 0x13f   : > { %v1227_v49 = vmax.f32 %v1093_v39, 0.0  ;;  %v1097_v28 = vadd.f32 %v2348_v45, %v904_v26  ;;  %v2468_v39 = vpop.f32.mrb[45].mxu0 }
 0x140   : > { %v1228_v52 = vmax.f32 %v1095_v41, 0.0  ;;  %v1099_v42 = vadd.f32 %v2352_v47, %v906_v48  ;;  %v2471_v41 = vpop.f32.mrb[46].mxu0 }
 0x141   : > { %v1229_v55 = vmax.f32 %v1097_v28, 0.0 }
 0x142   : > { %v1765_v58 = vpack.c.bf16 %v1228_v52, %v1227_v49  ;;  %v1230_v29 = vmax.f32 %v1099_v42, 0.0  ;;  %v909_v61 = vpop.f32.mrb[20].mxu1  ;;  %v2474_v49 = vpop.f32.mrb[47].mxu0 }
 0x143   : > { %v910_v43 = vadd.f32 %v909_v61, %v2346_v44  ;;  %v911_v63 = vpop.f32.mrb[21].mxu1 }
 0x144   : > { %1475 = vst [vmem:[%s2370_s30 + $0x40] sm:$0xff] %v1765_v58  ;;  %v1766_v0 = vpack.c.bf16 %v1230_v29, %v1229_v55  ;;  %v912_v3 = vadd.f32 %v911_v63, %v2350_v46  ;;  %v913_v45 = vpop.f32.mrb[22].mxu1 }
 0x145   : > { %v1103_v30 = vadd.f32 %v2357_v56, %v910_v43  ;;  %v914_v4 = vadd.f32 %v913_v45, %v2346_v44  ;;  %v915_v47 = vpop.f32.mrb[23].mxu1 }
 0x146   : > { %1476 = vst [vmem:[%s2370_s30 + $0x48] sm:$0xff] %v1766_v0  ;;  %v1105_v6 = vadd.f32 %v2361_v59, %v912_v3  ;;  %v916_v31 = vadd.f32 %v915_v47, %v2350_v46  ;;  %v2481_v0 = vpop.f32.mrb[48].mxu0 }
 0x147   : > { %v1231_v8 = vmax.f32 %v1103_v30, 0.0  ;;  %v1107_v32 = vadd.f32 %v2363_v62, %v914_v4  ;;  %v2486_v30 = vpop.f32.mrb[49].mxu0 }
 0x148   : > { %v1232_v11 = vmax.f32 %v1105_v6, 0.0  ;;  %v1109_v56 = vadd.f32 %v2365_v1, %v916_v31  ;;  %v2489_v6 = vpop.f32.mrb[50].mxu0 }
 0x149   : > { %v1233_v14 = vmax.f32 %v1107_v32, 0.0 }
 0x14a   : > { %v1767_v17 = vpack.c.bf16 %v1232_v11, %v1231_v8  ;;  %v1234_v34 = vmax.f32 %v1109_v56, 0.0  ;;  %v919_v19 = vpop.f32.mrb[24].mxu1  ;;  %v2492_v8 = vpop.f32.mrb[51].mxu0 }
 0x14b   : > { %v920_v59 = vadd.f32 %v919_v19, %v2346_v44  ;;  %v921_v21 = vpop.f32.mrb[25].mxu1 }
 0x14c   : > { %1477 = vst [vmem:[%s2370_s30 + $0x50] sm:$0xff] %v1767_v17  ;;  %v1768_v22 = vpack.c.bf16 %v1234_v34, %v1233_v14  ;;  %v922_v24 = vadd.f32 %v921_v21, %v2350_v46  ;;  %v923_v62 = vpop.f32.mrb[26].mxu1 }
 0x14d   : > { %v1113_v35 = vadd.f32 %v2376_v15, %v920_v59  ;;  %v924_v25 = vadd.f32 %v923_v62, %v2346_v44  ;;  %v925_v1 = vpop.f32.mrb[27].mxu1 }
 0x14e   : > { %1478 = vst [vmem:[%s2370_s30 + $0x58] sm:$0xff] %v1768_v22  ;;  %v1115_v36 = vadd.f32 %v2380_v18, %v922_v24  ;;  %v926_v37 = vadd.f32 %v925_v1, %v2350_v46  ;;  %v2499_v22 = vpop.f32.mrb[52].mxu0 }
 0x14f   : > { %v1235_v26 = vmax.f32 %v1113_v35, 0.0  ;;  %v1117_v38 = vadd.f32 %v2382_v20, %v924_v25  ;;  %v2504_v35 = vpop.f32.mrb[53].mxu0 }
 0x150   : > { %v1236_v48 = vmax.f32 %v1115_v36, 0.0  ;;  %v1119_v15 = vadd.f32 %v2384_v23, %v926_v37  ;;  %v2507_v36 = vpop.f32.mrb[54].mxu0 }
 0x151   : > { %v1237_v28 = vmax.f32 %v1117_v38, 0.0 }
 0x152   : > { %v1769_v52 = vpack.c.bf16 %v1236_v48, %v1235_v26  ;;  %v1238_v42 = vmax.f32 %v1119_v15, 0.0  ;;  %v929_v55 = vpop.f32.mrb[28].mxu1  ;;  %v2510_v26 = vpop.f32.mrb[55].mxu0 }
 0x153   : > { %v930_v18 = vadd.f32 %v929_v55, %v2346_v44  ;;  %v931_v58 = vpop.f32.mrb[29].mxu1 }
 0x154   : > { %1479 = vst [vmem:[%s2370_s30 + $0x60] sm:$0xff] %v1769_v52  ;;  %v1770_v29 = vpack.c.bf16 %v1238_v42, %v1237_v28  ;;  %v932_v61 = vadd.f32 %v931_v58, %v2350_v46  ;;  %v933_v20 = vpop.f32.mrb[30].mxu1 }
 0x155   : > { %v1123_v43 = vadd.f32 %v2391_v50, %v930_v18  ;;  %v934_v63 = vadd.f32 %v933_v20, %v2346_v44  ;;  %v935_v23 = vpop.f32.mrb[31].mxu1 }
 0x156   : > { %1480 = vst [vmem:[%s2370_s30 + $0x68] sm:$0xff] %v1770_v29  ;;  %v1125_v3 = vadd.f32 %v2396_v53, %v932_v61  ;;  %v936_v45 = vadd.f32 %v935_v23, %v2350_v46  ;;  %v2517_v29 = vpop.f32.mrb[56].mxu0 }
 0x157   : > { %v1239_v4 = vmax.f32 %v1123_v43, 0.0  ;;  %v1127_v47 = vadd.f32 %v2399_v57, %v934_v63  ;;  %v2522_v43 = vpop.f32.mrb[57].mxu0 }
 0x158   : > { %v1240_v31 = vmax.f32 %v1125_v3, 0.0  ;;  %v1129_v50 = vadd.f32 %v2402_v60, %v936_v45  ;;  %v2525_v3 = vpop.f32.mrb[58].mxu0 }
 0x159   : > { %v1241_v32 = vmax.f32 %v1127_v47, 0.0 }
 0x15a   : > { %v1771_v11 = vpack.c.bf16 %v1240_v31, %v1239_v4  ;;  %v1242_v56 = vmax.f32 %v1129_v50, 0.0  ;;  %v939_v14 = vpop.f32.mrb[32].mxu1  ;;  %v2528_v4 = vpop.f32.mrb[59].mxu0 }
 0x15b   : > { %v940_v53 = vadd.f32 %v939_v14, %v2346_v44  ;;  %v941_v17 = vpop.f32.mrb[33].mxu1 }
 0x15c   : > { %1481 = vst [vmem:[%s2370_s30 + $0x70] sm:$0xff] %v1771_v11  ;;  %v1772_v34 = vpack.c.bf16 %v1242_v56, %v1241_v32  ;;  %v942_v19 = vadd.f32 %v941_v17, %v2350_v46  ;;  %v943_v57 = vpop.f32.mrb[34].mxu1 }
 0x15d   : > { %v1133_v59 = vadd.f32 %v2409_v9, %v940_v53  ;;  %v944_v21 = vadd.f32 %v943_v57, %v2346_v44  ;;  %v945_v60 = vpop.f32.mrb[35].mxu1 }
 0x15e   : > { %1482 = vst [vmem:[%s2370_s30 + $0x78] sm:$0xff] %v1772_v34  ;;  %v1135_v24 = vadd.f32 %v2414_v12, %v942_v19  ;;  %v946_v62 = vadd.f32 %v945_v60, %v2350_v46  ;;  %v2535_v34 = vpop.f32.mrb[60].mxu0 }
 0x15f   : > { %v1243_v25 = vmax.f32 %v1133_v59, 0.0  ;;  %v1137_v1 = vadd.f32 %v2417_v16, %v944_v21  ;;  %v2540_v59 = vpop.f32.mrb[61].mxu0 }
 0x160   : > { %v1244_v37 = vmax.f32 %v1135_v24, 0.0  ;;  %v1139_v9 = vadd.f32 %v2420_v2, %v946_v62  ;;  %v2543_v24 = vpop.f32.mrb[62].mxu0 }
 0x161   : > { %v1245_v38 = vmax.f32 %v1137_v1, 0.0 }
 0x162   : > { %v1773_v48 = vpack.c.bf16 %v1244_v37, %v1243_v25  ;;  %v1246_v15 = vmax.f32 %v1139_v9, 0.0  ;;  %v949_v28 = vpop.f32.mrb[36].mxu1  ;;  %v2546_v25 = vpop.f32.mrb[63].mxu0 }
 0x163   : > { %v950_v12 = vadd.f32 %v949_v28, %v2346_v44  ;;  %v951_v52 = vpop.f32.mrb[37].mxu1 }
 0x164   : > { %1483 = vst [vmem:[%s2370_s30 + $0x80] sm:$0xff] %v1773_v48  ;;  %v1774_v42 = vpack.c.bf16 %v1246_v15, %v1245_v38  ;;  %v952_v55 = vadd.f32 %v951_v52, %v2350_v46  ;;  %v953_v16 = vpop.f32.mrb[38].mxu1 }
 0x165   : > { %v1143_v18 = vadd.f32 %v2427_v40, %v950_v12  ;;  %v954_v58 = vadd.f32 %v953_v16, %v2346_v44  ;;  %v955_v2 = vpop.f32.mrb[39].mxu1 }
 0x166   : > { %1484 = vst [vmem:[%s2370_s30 + $0x88] sm:$0xff] %v1774_v42  ;;  %v1145_v61 = vadd.f32 %v2432_v27, %v952_v55  ;;  %v956_v20 = vadd.f32 %v955_v2, %v2350_v46 }
 0x167   : > { %v1247_v63 = vmax.f32 %v1143_v18, 0.0  ;;  %v1147_v23 = vadd.f32 %v2435_v51, %v954_v58 }
 0x168   : > { %v1248_v45 = vmax.f32 %v1145_v61, 0.0  ;;  %v1149_v40 = vadd.f32 %v2438_v54, %v956_v20 }
 0x169   : > { %v1249_v47 = vmax.f32 %v1147_v23, 0.0 }
 0x16a   : > { %v1775_v31 = vpack.c.bf16 %v1248_v45, %v1247_v63  ;;  %v1250_v50 = vmax.f32 %v1149_v40, 0.0  ;;  %v959_v32 = vpop.f32.mrb[40].mxu1 }
 0x16b   : > { %v960_v27 = vadd.f32 %v959_v32, %v2346_v44  ;;  %v961_v11 = vpop.f32.mrb[41].mxu1 }
 0x16c   : > { %1485 = vst [vmem:[%s2370_s30 + $0x90] sm:$0xff] %v1775_v31  ;;  %v1776_v56 = vpack.c.bf16 %v1250_v50, %v1249_v47  ;;  %v962_v14 = vadd.f32 %v961_v11, %v2350_v46  ;;  %v963_v51 = vpop.f32.mrb[42].mxu1 }
 0x16d   : > { %v1153_v53 = vadd.f32 %v2445_v5, %v960_v27  ;;  %v964_v17 = vadd.f32 %v963_v51, %v2346_v44  ;;  %v965_v54 = vpop.f32.mrb[43].mxu1 }
 0x16e   : > { %1486 = vst [vmem:[%s2370_s30 + $0x98] sm:$0xff] %v1776_v56  ;;  %v1155_v19 = vadd.f32 %v2450_v7, %v962_v14  ;;  %v966_v57 = vadd.f32 %v965_v54, %v2350_v46 }
 0x16f   : > { %v1251_v21 = vmax.f32 %v1153_v53, 0.0  ;;  %v1157_v60 = vadd.f32 %v2453_v10, %v964_v17 }
 0x170   : > { %v1252_v62 = vmax.f32 %v1155_v19, 0.0  ;;  %v1159_v5 = vadd.f32 %v2456_v13, %v966_v57 }
 0x171   : > { %v1253_v1 = vmax.f32 %v1157_v60, 0.0 }
 0x172   : > { %v1777_v37 = vpack.c.bf16 %v1252_v62, %v1251_v21  ;;  %v1254_v9 = vmax.f32 %v1159_v5, 0.0  ;;  %v969_v38 = vpop.f32.mrb[44].mxu1 }
 0x173   : > { %v970_v7 = vadd.f32 %v969_v38, %v2346_v44  ;;  %v971_v48 = vpop.f32.mrb[45].mxu1 }
 0x174   : > { %1487 = vst [vmem:[%s2370_s30 + $0xa0] sm:$0xff] %v1777_v37  ;;  %v1778_v15 = vpack.c.bf16 %v1254_v9, %v1253_v1  ;;  %v972_v28 = vadd.f32 %v971_v48, %v2350_v46  ;;  %v973_v10 = vpop.f32.mrb[46].mxu1 }
 0x175   : > { %v1163_v12 = vadd.f32 %v2463_v33, %v970_v7  ;;  %v974_v52 = vadd.f32 %v973_v10, %v2346_v44  ;;  %v975_v13 = vpop.f32.mrb[47].mxu1 }
 0x176   : > { %1488 = vst [vmem:[%s2370_s30 + $0xa8] sm:$0xff] %v1778_v15  ;;  %v1165_v42 = vadd.f32 %v2468_v39, %v972_v28  ;;  %v976_v55 = vadd.f32 %v975_v13, %v2350_v46 }
 0x177   : > { %v1255_v16 = vmax.f32 %v1163_v12, 0.0  ;;  %v1167_v18 = vadd.f32 %v2471_v41, %v974_v52 }
 0x178   : > { %v1256_v58 = vmax.f32 %v1165_v42, 0.0  ;;  %v1169_v2 = vadd.f32 %v2474_v49, %v976_v55 }
 0x179   : > { %v1257_v61 = vmax.f32 %v1167_v18, 0.0 }
 0x17a   : > { %v1779_v20 = vpack.c.bf16 %v1256_v58, %v1255_v16  ;;  %v1258_v63 = vmax.f32 %v1169_v2, 0.0  ;;  %v979_v33 = vpop.f32.mrb[48].mxu1 }
 0x17b   : > { %v980_v23 = vadd.f32 %v979_v33, %v2346_v44  ;;  %v981_v45 = vpop.f32.mrb[49].mxu1 }
 0x17c   : > { %1489 = vst [vmem:[%s2370_s30 + $0xb0] sm:$0xff] %v1779_v20  ;;  %v1780_v40 = vpack.c.bf16 %v1258_v63, %v1257_v61  ;;  %v982_v39 = vadd.f32 %v981_v45, %v2350_v46  ;;  %v983_v47 = vpop.f32.mrb[50].mxu1 }
 0x17d   : > { %v1173_v31 = vadd.f32 %v2481_v0, %v980_v23  ;;  %v984_v41 = vadd.f32 %v983_v47, %v2346_v44  ;;  %v985_v50 = vpop.f32.mrb[51].mxu1 }
 0x17e   : > { %1490 = vst [vmem:[%s2370_s30 + $0xb8] sm:$0xff] %v1780_v40  ;;  %v1175_v49 = vadd.f32 %v2486_v30, %v982_v39  ;;  %v986_v32 = vadd.f32 %v985_v50, %v2350_v46 }
 0x17f   : > { %v1259_v27 = vmax.f32 %v1173_v31, 0.0  ;;  %v1177_v11 = vadd.f32 %v2489_v6, %v984_v41 }
 0x180   : > { %v1260_v56 = vmax.f32 %v1175_v49, 0.0  ;;  %v1179_v14 = vadd.f32 %v2492_v8, %v986_v32 }
 0x181   : > { %v1261_v51 = vmax.f32 %v1177_v11, 0.0 }
 0x182   : > { %v1781_v53 = vpack.c.bf16 %v1260_v56, %v1259_v27  ;;  %v1262_v17 = vmax.f32 %v1179_v14, 0.0  ;;  %v989_v0 = vpop.f32.mrb[52].mxu1 }
 0x183   : > { %v990_v54 = vadd.f32 %v989_v0, %v2346_v44  ;;  %v991_v19 = vpop.f32.mrb[53].mxu1 }
 0x184   : > { %1491 = vst [vmem:[%s2370_s30 + $0xc0] sm:$0xff] %v1781_v53  ;;  %v1782_v57 = vpack.c.bf16 %v1262_v17, %v1261_v51  ;;  %v992_v30 = vadd.f32 %v991_v19, %v2350_v46  ;;  %v993_v21 = vpop.f32.mrb[54].mxu1 }
 0x185   : > { %v1183_v60 = vadd.f32 %v2499_v22, %v990_v54  ;;  %v994_v6 = vadd.f32 %v993_v21, %v2346_v44  ;;  %v995_v62 = vpop.f32.mrb[55].mxu1 }
 0x186   : > { %1492 = vst [vmem:[%s2370_s30 + $0xc8] sm:$0xff] %v1782_v57  ;;  %v1185_v8 = vadd.f32 %v2504_v35, %v992_v30  ;;  %v996_v5 = vadd.f32 %v995_v62, %v2350_v46 }
 0x187   : > { %v1263_v1 = vmax.f32 %v1183_v60, 0.0  ;;  %v1187_v37 = vadd.f32 %v2507_v36, %v994_v6 }
 0x188   : > { %v1264_v9 = vmax.f32 %v1185_v8, 0.0  ;;  %v1189_v38 = vadd.f32 %v2510_v26, %v996_v5 }
 0x189   : > { %v1265_v7 = vmax.f32 %v1187_v37, 0.0 }
 0x18a   : > { %v1783_v48 = vpack.c.bf16 %v1264_v9, %v1263_v1  ;;  %v1266_v15 = vmax.f32 %v1189_v38, 0.0  ;;  %v999_v22 = vpop.f32.mrb[56].mxu1 }
 0x18b   : > { %v1000_v28 = vadd.f32 %v999_v22, %v2346_v44  ;;  %v1001_v10 = vpop.f32.mrb[57].mxu1 }
 0x18c   : > { %1493 = vst [vmem:[%s2370_s30 + $0xd0] sm:$0xff] %v1783_v48  ;;  %v1784_v12 = vpack.c.bf16 %v1266_v15, %v1265_v7  ;;  %v1002_v35 = vadd.f32 %v1001_v10, %v2350_v46  ;;  %v1003_v52 = vpop.f32.mrb[58].mxu1 }
 0x18d   : > { %v1193_v13 = vadd.f32 %v2517_v29, %v1000_v28  ;;  %v1004_v36 = vadd.f32 %v1003_v52, %v2346_v44  ;;  %v1005_v42 = vpop.f32.mrb[59].mxu1 }
 0x18e   : > { %1494 = vst [vmem:[%s2370_s30 + $0xd8] sm:$0xff] %v1784_v12  ;;  %v1195_v26 = vadd.f32 %v2522_v43, %v1002_v35  ;;  %v1006_v55 = vadd.f32 %v1005_v42, %v2350_v46 }
 0x18f   : > { %v1267_v16 = vmax.f32 %v1193_v13, 0.0  ;;  %v1197_v18 = vadd.f32 %v2525_v3, %v1004_v36 }
 0x190   : > { %v1268_v58 = vmax.f32 %v1195_v26, 0.0  ;;  %v1199_v2 = vadd.f32 %v2528_v4, %v1006_v55 }
 0x191   : > { %v1269_v61 = vmax.f32 %v1197_v18, 0.0 }
 0x192   : > { %v1785_v20 = vpack.c.bf16 %v1268_v58, %v1267_v16  ;;  %v1270_v63 = vmax.f32 %v1199_v2, 0.0  ;;  %v1009_v29 = vpop.f32.mrb[60].mxu1 }
 0x193   : > { %v1010_v33 = vadd.f32 %v1009_v29, %v2346_v44  ;;  %v1011_v23 = vpop.f32.mrb[61].mxu1 }
 0x194   : > { %1495 = vst [vmem:[%s2370_s30 + $0xe0] sm:$0xff] %v1785_v20  ;;  %v1786_v45 = vpack.c.bf16 %v1270_v63, %v1269_v61  ;;  %v1012_v43 = vadd.f32 %v1011_v23, %v2350_v46  ;;  %v1013_v40 = vpop.f32.mrb[62].mxu1 }
 0x195   : > { %v1203_v3 = vadd.f32 %v2535_v34, %v1010_v33  ;;  %v1014_v39 = vadd.f32 %v1013_v40, %v2346_v44  ;;  %v1015_v47 = vpop.f32.mrb[63].mxu1 }
 0x196   : > { %1496 = vst [vmem:[%s2370_s30 + $0xe8] sm:$0xff] %v1786_v45  ;;  %v1205_v4 = vadd.f32 %v2540_v59, %v1012_v43  ;;  %v1016_v31 = vadd.f32 %v1015_v47, %v2350_v46 }
 0x197   : > { %v1271_v41 = vmax.f32 %v1203_v3, 0.0  ;;  %v1207_v50 = vadd.f32 %v2543_v24, %v1014_v39 }
 0x198   : > { %v1272_v49 = vmax.f32 %v1205_v4, 0.0  ;;  %v1209_v32 = vadd.f32 %v2546_v25, %v1016_v31 }
 0x199   : > { %v1273_v27 = vmax.f32 %v1207_v50, 0.0 }
 0x19a   : > { %v1787_v11 = vpack.c.bf16 %v1272_v49, %v1271_v41  ;;  %v1274_v56 = vmax.f32 %v1209_v32, 0.0 }
 0x19c   : > { %1497 = vst [vmem:[%s2370_s30 + $0xf0] sm:$0xff] %v1787_v11  ;;  %v1788_v14 = vpack.c.bf16 %v1274_v56, %v1273_v27 }
 0x19e   : > { %1498 = vst [vmem:[%s2370_s30 + $0xf8] sm:$0xff] %v1788_v14 }
 0x19f PF: > { %s13_s14 = sadd.s32 1, %s2083_s14   ;;  %s2613_s12 = smov %s2079_s13 }
 0x1a0   : > { %p10_p5 = scmp.ge.s32.totalorder %s13_s14, 6   ;;  %s2614_s13 = smov %s2616_s15 }
 0x1a2   :  { %12 = sbr.rel (!%p10_p5) target bundleno = 2 (0x2), region = 68 }

// kernel: _lambda_.13
= control target key start
LH: loop header
LB: loop body
LE: loop exit
PB: predicated region body
PF: predicated region fallthrough
CT: control target
= control target key end

     0   :  { %s2859_s12 = smov 0   ;;  %s3249_s0 = inlined_call_operand.vmem [shape: bf16[2,640,256], index: 0, kind: input, shape index: {}]   ;;  %s3250_s1 = inlined_call_operand.vmem [shape: bf16[3,256,128], index: 1, kind: input, shape index: {}]   ;;  %s3251_s2 = inlined_call_operand.vmem [shape: f32[1,128], index: 2, kind: input, shape index: {}]   ;;  %s3252_s3 = inlined_call_operand.vmem [shape: bf16[2,256,128], index: 3, kind: output, shape index: {}]  }
   0x1 LB: > { %s1935_s13 = sadd.s32 4294967295, %s2837_s12   ;;  %p1939_p0 = scmp.ge.s32.totalorder %s2837_s12, 1  ;;  %s2837_s12 = sphi %s2859_s12, %s13_s12  }
   0x2   : > { %p137_p1 = scmp.lt.s32.totalorder %s2837_s12, 3 }
   0x4   : > { %p138_p2 = pnand %p1939_p0, %p137_p1 }
   0x5   : > { %v2675_v0 = vld [vmem:[%s3250_s1 + $0xc0] sm:$0xff] (!%p138_p2)   ;;  %v2677_v2 = vld [vmem:[%s3250_s1 + $0xc8] sm:$0xff] (!%p138_p2)   ;;  %p161_p3 = scmp.lt.s32.totalorder (!%p138_p2), %s1935_s13, 1  ;;  %v2679_v4 = vld [vmem:[%s3250_s1 + $0xd0] sm:$0xff] (!%p138_p2)  }
   0x6   : > { %141 = sbr.rel (%p138_p2) target bundleno = 450 (0x1c2), region = 32  ;;  %v2676_v1 = vld [vmem:[%s3250_s1 + $0x80] sm:$0xff] (!%p138_p2)   ;;  %2314 = vmatprep.subr.bf16.mxu0 (!%p138_p2), %v2675_v0  ;;  %2650 = vmatprep.subr.bf16.mxu1 (!%p138_p2), %v2675_v0  ;;  %v2678_v3 = vld [vmem:[%s3250_s1 + $0x88] sm:$0xff] (!%p138_p2)   ;;  %v2680_v5 = vld [vmem:[%s3250_s1 + $0x90] sm:$0xff] (!%p138_p2)  }
   0x7   : > { %2315 = vmatpush3.bf16.msra.mxu0 (!%p138_p2), %v2676_v1  ;;  %2658 = vmatpush3.bf16.msra.mxu1 (!%p138_p2), %v2676_v1  ;;  %v2681_v6 = vld [vmem:[%s3250_s1 + $0xd8] sm:$0xff] (!%p138_p2)   ;;  %v2683_v8 = vld [vmem:[%s3250_s1 + $0xe0] sm:$0xff] (!%p138_p2)   ;;  %v2685_v10 = vld [vmem:[%s3250_s1 + $0xe8] sm:$0xff] (!%p138_p2)  }
   0x8   : > { %2316 = vmatprep.subr.bf16.mxu0 (!%p138_p2), %v2677_v2  ;;  %2651 = vmatprep.subr.bf16.mxu1 (!%p138_p2), %v2677_v2  ;;  %v2682_v7 = vld [vmem:[%s3250_s1 + $0x98] sm:$0xff] (!%p138_p2)   ;;  %v2684_v9 = vld [vmem:[%s3250_s1 + $0xa0] sm:$0xff] (!%p138_p2)   ;;  %v2686_v13 = vld [vmem:[%s3250_s1 + $0xa8] sm:$0xff] (!%p138_p2)  }
   0x9   : > { %v2687_v14 = vld [vmem:[%s3250_s1 + $0xf0] sm:$0xff] (!%p138_p2)   ;;  %v2689_v16 = vld [vmem:[%s3250_s1 + $0xf8] sm:$0xff] (!%p138_p2)   ;;  %v2697_v18 = vld [vmem:[%s3250_s1 + $0x40] sm:$0xff] (!%p138_p2)  }
   0xa   : > { %v2688_v15 = vld [vmem:[%s3250_s1 + $0xb0] sm:$0xff] (!%p138_p2)   ;;  %v2690_v17 = vld [vmem:[%s3250_s1 + $0xb8] sm:$0xff] (!%p138_p2)   ;;  %v2699_v20 = vld [vmem:[%s3250_s1 + $0x140] sm:$0xff] (!%p138_p2)  }
   0xb   : > { %2317 = vmatpush3.bf16.msra.mxu0 (!%p138_p2), %v2678_v3  ;;  %2659 = vmatpush3.bf16.msra.mxu1 (!%p138_p2), %v2678_v3  ;;  %v2698_v22 = vld [vmem:[%s3250_s1] sm:$0xff] (!%p138_p2)   ;;  %v2707_v26 = vld [vmem:[%s3250_s1 + $0x48] sm:$0xff] (!%p138_p2)   ;;  %v2717_v30 = vld [vmem:[%s3250_s1 + $0x50] sm:$0xff] (!%p138_p2)  }
   0xc   : > { %2318 = vmatprep.subr.bf16.mxu0 (!%p138_p2), %v2679_v4  ;;  %2652 = vmatprep.subr.bf16.mxu1 (!%p138_p2), %v2679_v4  ;;  %v2700_v23 = vld [vmem:[%s3250_s1 + $0x100] sm:$0xff] (!%p138_p2)   ;;  %v2708_v27 = vld [vmem:[%s3250_s1 + $0x8] sm:$0xff] (!%p138_p2)   ;;  %v2719_v33 = vld [vmem:[%s3250_s1 + $0x150] sm:$0xff] (!%p138_p2)  }
   0xd   : > { %s3254_s13 = smov (!%p161_p3, %s1935_s13), 1  ;;  %v2709_v28 = vld [vmem:[%s3250_s1 + $0x148] sm:$0xff]   ;;  %v2718_v36 = vld [vmem:[%s3250_s1 + $0x10] sm:$0xff]   ;;  %v2727_v38 = vld [vmem:[%s3250_s1 + $0x58] sm:$0xff]  }
   0xe   : > { %s2666_s28 = smul.u32 640, %s3254_s13  ;;  %v2710_v29 = vld [vmem:[%s3250_s1 + $0x108] sm:$0xff]   ;;  %v2720_v37 = vld [vmem:[%s3250_s1 + $0x110] sm:$0xff]   ;;  %v2729_v39 = vld [vmem:[%s3250_s1 + $0x158] sm:$0xff]   ;;  %s2186_s18 = sshll.u32 %s3254_s13, 7 }
   0xf   : > { %2319 = vmatpush3.bf16.msra.mxu0 %v2680_v5  ;;  %2660 = vmatpush3.bf16.msra.mxu1 %v2680_v5  ;;  %v2728_v42 = vld [vmem:[%s3250_s1 + $0x18] sm:$0xff]   ;;  %v2737_v46 = vld [vmem:[%s3250_s1 + $0x60] sm:$0xff]   ;;  %v2747_v52 = vld [vmem:[%s3250_s1 + $0x68] sm:$0xff]   ;;  %s3169_s21 = scalar_lea.vmem %s3252_s3, %s2186_s18 }
  0x10   : > { %2320 = vmatprep.subr.bf16.mxu0 %v2681_v6  ;;  %2653 = vmatprep.subr.bf16.mxu1 %v2681_v6  ;;  %s2900_s8 = scalar_lea.vmem %s3249_s0, %s2666_s28  ;;  %v2730_v43 = vld [vmem:[%s3250_s1 + $0x118] sm:$0xff]   ;;  %v2738_v47 = vld [vmem:[%s3250_s1 + $0x20] sm:$0xff]   ;;  %v2748_v55 = vld [vmem:[%s3250_s1 + $0x28] sm:$0xff]  }
  0x11   : > { %v2693_v11 = vld [vmem:[%s2900_s8 + $0x144] ss:$8 sps:$4 sm:$0xff]   ;;  %v2691_v19 = vld [vmem:[%s2900_s8 + $0x140] ss:$8 sps:$4 sm:$0xff]   ;;  %v2701_v24 = vld [vmem:[%s2900_s8 + $0x154] ss:$8 sps:$4 sm:$0xff]  }
  0x12   : > { %v2696_v12 = vld [vmem:[%s2900_s8 + $0x1c4] ss:$8 sps:$4 sm:$0xff]   ;;  %589 = vmatprep.mubr.bf16.mxu0 %v2693_v11  ;;  %v2694_v21 = vld [vmem:[%s2900_s8 + $0x1c0] ss:$8 sps:$4 sm:$0xff]   ;;  %v2703_v25 = vld [vmem:[%s2900_s8 + $0x1d4] ss:$8 sps:$4 sm:$0xff]  }
  0x13   : > { %2321 = vmatpush3.bf16.msra.mxu0 %v2682_v7  ;;  %2661 = vmatpush3.bf16.msra.mxu1 %v2682_v7  ;;  %v2705_v31 = vld [vmem:[%s2900_s8 + $0x150] ss:$8 sps:$4 sm:$0xff]   ;;  %v2711_v34 = vld [vmem:[%s2900_s8 + $0x164] ss:$8 sps:$4 sm:$0xff]   ;;  %v2715_v40 = vld [vmem:[%s2900_s8 + $0x160] ss:$8 sps:$4 sm:$0xff]  }
  0x14   : > { %2322 = vmatprep.subr.bf16.mxu0 %v2683_v8  ;;  %2654 = vmatprep.subr.bf16.mxu1 %v2683_v8  ;;  %v2706_v32 = vld [vmem:[%s2900_s8 + $0x1d0] ss:$8 sps:$4 sm:$0xff]   ;;  %v2713_v35 = vld [vmem:[%s2900_s8 + $0x1e4] ss:$8 sps:$4 sm:$0xff]   ;;  %v2716_v41 = vld [vmem:[%s2900_s8 + $0x1e0] ss:$8 sps:$4 sm:$0xff]  }
  0x15   : > { %653 = vmatprep.mubr.bf16.mxu1 %v2696_v12  ;;  %v2721_v44 = vld [vmem:[%s2900_s8 + $0x174] ss:$8 sps:$4 sm:$0xff]   ;;  %v2739_v48 = vld [vmem:[%s3250_s1 + $0x160] sm:$0xff]   ;;  %v2725_v50 = vld [vmem:[%s2900_s8 + $0x170] ss:$8 sps:$4 sm:$0xff]  }
  0x16   : > { %v2723_v45 = vld [vmem:[%s2900_s8 + $0x1f4] ss:$8 sps:$4 sm:$0xff]   ;;  %v2740_v49 = vld [vmem:[%s3250_s1 + $0x120] sm:$0xff]   ;;  %v2726_v51 = vld [vmem:[%s2900_s8 + $0x1f0] ss:$8 sps:$4 sm:$0xff]  }
  0x17   : > { %2323 = vmatpush3.bf16.msra.mxu0 %v2684_v9  ;;  %2662 = vmatpush3.bf16.msra.mxu1 %v2684_v9  ;;  %v2731_v53 = vld [vmem:[%s2900_s8 + $0x184] ss:$8 sps:$4 sm:$0xff]   ;;  %v2757_v58 = vld [vmem:[%s3250_s1 + $0x70] sm:$0xff]   ;;  %v2735_v59 = vld [vmem:[%s2900_s8 + $0x180] ss:$8 sps:$4 sm:$0xff]  }
  0x18   : > { %2324 = vmatprep.subr.bf16.mxu0 %v2685_v10  ;;  %2655 = vmatprep.subr.bf16.mxu1 %v2685_v10  ;;  %v2733_v54 = vld [vmem:[%s2900_s8 + $0x204] ss:$8 sps:$4 sm:$0xff]   ;;  %v2736_v60 = vld [vmem:[%s2900_s8 + $0x200] ss:$8 sps:$4 sm:$0xff]   ;;  %v2758_v61 = vld [vmem:[%s3250_s1 + $0x30] sm:$0xff]  }
  0x19   : > { %v2749_v56 = vld [vmem:[%s3250_s1 + $0x168] sm:$0xff]   ;;  %v2741_v62 = vld [vmem:[%s2900_s8 + $0x194] ss:$8 sps:$4 sm:$0xff]   ;;  %v2745_v6 = vld [vmem:[%s2900_s8 + $0x190] ss:$8 sps:$4 sm:$0xff]  }
  0x1a   : > { %v2750_v57 = vld [vmem:[%s3250_s1 + $0x128] sm:$0xff]   ;;  %v2759_v63 = vld [vmem:[%s3250_s1 + $0x170] sm:$0xff]   ;;  %v2767_v2 = vld [vmem:[%s3250_s1 + $0x78] sm:$0xff]  }
  0x1b   : > { %2325 = vmatpush3.bf16.msra.mxu0 %v2686_v13  ;;  %2663 = vmatpush3.bf16.msra.mxu1 %v2686_v13  ;;  %v2760_v0 = vld [vmem:[%s3250_s1 + $0x130] sm:$0xff]   ;;  %v2768_v3 = vld [vmem:[%s3250_s1 + $0x38] sm:$0xff]   ;;  %v2751_v8 = vld [vmem:[%s2900_s8 + $0x1a4] ss:$8 sps:$4 sm:$0xff]  }
  0x1c   : > { %2326 = vmatprep.subr.bf16.mxu0 %v2687_v14  ;;  %2656 = vmatprep.subr.bf16.mxu1 %v2687_v14  ;;  %v2743_v1 = vld [vmem:[%s2900_s8 + $0x214] ss:$8 sps:$4 sm:$0xff]   ;;  %v2746_v7 = vld [vmem:[%s2900_s8 + $0x210] ss:$8 sps:$4 sm:$0xff]   ;;  %v2753_v9 = vld [vmem:[%s2900_s8 + $0x224] ss:$8 sps:$4 sm:$0xff]  }
  0x1d   : > { %v2769_v4 = vld [vmem:[%s3250_s1 + $0x178] sm:$0xff]   ;;  %v2755_v10 = vld [vmem:[%s2900_s8 + $0x1a0] ss:$8 sps:$4 sm:$0xff]  }
  0x1e   : > { %v2770_v5 = vld [vmem:[%s3250_s1 + $0x138] sm:$0xff]   ;;  %v2756_v11 = vld [vmem:[%s2900_s8 + $0x220] ss:$8 sps:$4 sm:$0xff]  }
  0x1f   : > { %2327 = vmatpush3.bf16.msra.mxu0 %v2688_v15  ;;  %2664 = vmatpush3.bf16.msra.mxu1 %v2688_v15  ;;  %v2761_v12 = vld [vmem:[%s2900_s8 + $0x1b4] ss:$8 sps:$4 sm:$0xff]   ;;  %v2765_v14 = vld [vmem:[%s2900_s8 + $0x1b0] ss:$8 sps:$4 sm:$0xff]  }
  0x20   : > { %2328 = vmatprep.subr.bf16.mxu0 %v2689_v16  ;;  %2657 = vmatprep.subr.bf16.mxu1 %v2689_v16  ;;  %v2763_v13 = vld [vmem:[%s2900_s8 + $0x234] ss:$8 sps:$4 sm:$0xff]   ;;  %v2766_v15 = vld [vmem:[%s2900_s8 + $0x230] ss:$8 sps:$4 sm:$0xff]   ;;  %v2773_v16 = vld [vmem:[%s2900_s8 + $0x4] ss:$8 sps:$4 sm:$0xff]  }
  0x23   : > { %2329 = vmatpush3.bf16.msra.mxu0 %v2690_v17  ;;  %2665 = vmatpush3.bf16.msra.mxu1 %v2690_v17  ;;  %v2776_v17 = vld [vmem:[%s2900_s8 + $0x44] ss:$8 sps:$4 sm:$0xff]  }
  0x24   : > { %2426 = vmatprep.subr.bf16.mxu1 %v2697_v18  ;;  %2538 = vmatprep.subr.bf16.mxu0 %v2699_v20  ;;  %v2771_v18 = vld [vmem:[%s2900_s8] ss:$8 sps:$4 sm:$0xff]   ;;  %v2777_v20 = vld [vmem:[%s2900_s8 + $0x14] ss:$8 sps:$4 sm:$0xff]  }
  0x26   : > { %590 = vmatmul.mubr.bf16.vlgmr.msra.gmra.mrb[0].mxu0 %v2691_v19  ;;  %654 = vmatmul.mubr.bf16.vlgmr.msra.gmra.mrb[0].mxu1 %v2694_v21  ;;  %v2774_v19 = vld [vmem:[%s2900_s8 + $0x40] ss:$8 sps:$4 sm:$0xff]   ;;  %v2779_v21 = vld [vmem:[%s2900_s8 + $0x54] ss:$8 sps:$4 sm:$0xff]  }
  0x27   : > { %2427 = vmatpush3.bf16.msra.mxu1 %v2698_v22  ;;  %2539 = vmatpush3.bf16.msra.mxu0 %v2700_v23  ;;  %v2781_v22 = vld [vmem:[%s2900_s8 + $0x10] ss:$8 sps:$4 sm:$0xff]  }
  0x28   : > { %597 = vmatprep.mubr.bf16.mxu0 %v2701_v24  ;;  %661 = vmatprep.mubr.bf16.mxu1 %v2703_v25  ;;  %v2782_v23 = vld [vmem:[%s2900_s8 + $0x50] ss:$8 sps:$4 sm:$0xff]   ;;  %v2783_v24 = vld [vmem:[%s2900_s8 + $0x24] ss:$8 sps:$4 sm:$0xff]  }
  0x29   : > { %2428 = vmatprep.subr.bf16.mxu1 %v2707_v26  ;;  %2540 = vmatprep.subr.bf16.mxu0 %v2709_v28  ;;  %v2785_v25 = vld [vmem:[%s2900_s8 + $0x64] ss:$8 sps:$4 sm:$0xff]   ;;  %v2787_v26 = vld [vmem:[%s2900_s8 + $0x20] ss:$8 sps:$4 sm:$0xff]   ;;  %v2789_v28 = vld [vmem:[%s2900_s8 + $0x34] ss:$8 sps:$4 sm:$0xff]  }
  0x2b   : > { %2429 = vmatpush3.bf16.msra.mxu1 %v2708_v27  ;;  %2541 = vmatpush3.bf16.msra.mxu0 %v2710_v29  ;;  %v2788_v27 = vld [vmem:[%s2900_s8 + $0x60] ss:$8 sps:$4 sm:$0xff]   ;;  %v2791_v29 = vld [vmem:[%s2900_s8 + $0x74] ss:$8 sps:$4 sm:$0xff]  }
  0x2c   : > { %2430 = vmatprep.subr.bf16.mxu1 %v2717_v30  ;;  %2542 = vmatprep.subr.bf16.mxu0 %v2719_v33  ;;  %v2793_v30 = vld [vmem:[%s2900_s8 + $0x30] ss:$8 sps:$4 sm:$0xff]   ;;  %v2797_v33 = vld [vmem:[%s2900_s8 + $0x80] ss:$8 sps:$4 sm:$0xff]  }
  0x2e   : > { %598 = vmatmul.mubr.bf16.gmra.mrb[4].mxu0 %v2705_v31  ;;  %662 = vmatmul.mubr.bf16.gmra.mrb[4].mxu1 %v2706_v32  ;;  %v2794_v31 = vld [vmem:[%s2900_s8 + $0x70] ss:$8 sps:$4 sm:$0xff]   ;;  %v2795_v32 = vld [vmem:[%s2900_s8 + $0x84] ss:$8 sps:$4 sm:$0xff]  }
  0x2f   : > { %605 = vmatprep.mubr.bf16.mxu0 %v2711_v34  ;;  %669 = vmatprep.mubr.bf16.mxu1 %v2713_v35  ;;  %v2798_v34 = vld [vmem:[%s2900_s8 + $0x94] ss:$8 sps:$4 sm:$0xff]   ;;  %v2800_v35 = vld [vmem:[%s2900_s8 + $0x90] ss:$8 sps:$4 sm:$0xff]  }
  0x30   : > { %2431 = vmatpush3.bf16.msra.mxu1 %v2718_v36  ;;  %2543 = vmatpush3.bf16.msra.mxu0 %v2720_v37  ;;  %v2801_v36 = vld [vmem:[%s2900_s8 + $0xa4] ss:$8 sps:$4 sm:$0xff]   ;;  %v2803_v37 = vld [vmem:[%s2900_s8 + $0xa0] ss:$8 sps:$4 sm:$0xff]  }
  0x31   : > { %2432 = vmatprep.subr.bf16.mxu1 %v2727_v38  ;;  %2544 = vmatprep.subr.bf16.mxu0 %v2729_v39  ;;  %v2804_v38 = vld [vmem:[%s2900_s8 + $0xb4] ss:$8 sps:$4 sm:$0xff]   ;;  %v2806_v39 = vld [vmem:[%s2900_s8 + $0xb0] ss:$8 sps:$4 sm:$0xff]  }
  0x34   : > { %2433 = vmatpush3.bf16.msra.mxu1 %v2728_v42  ;;  %2545 = vmatpush3.bf16.msra.mxu0 %v2730_v43  ;;  %v2810_v42 = vld [vmem:[%s2900_s8 + $0xd4] ss:$8 sps:$4 sm:$0xff]   ;;  %v2812_v43 = vld [vmem:[%s2900_s8 + $0xd0] ss:$8 sps:$4 sm:$0xff]  }
  0x35   : > { %2434 = vmatprep.subr.bf16.mxu1 %v2737_v46  ;;  %2546 = vmatprep.subr.bf16.mxu0 %v2739_v48  ;;  %v2816_v46 = vld [vmem:[%s2900_s8 + $0xf4] ss:$8 sps:$4 sm:$0xff]   ;;  %v2819_v48 = vld [vmem:[%s2900_s8 + $0x104] ss:$8 sps:$4 sm:$0xff]  }
  0x36   : > { %606 = vmatmul.mubr.bf16.gmra.mrb[8].mxu0 %v2715_v40  ;;  %670 = vmatmul.mubr.bf16.gmra.mrb[8].mxu1 %v2716_v41  ;;  %v2807_v40 = vld [vmem:[%s2900_s8 + $0xc4] ss:$8 sps:$4 sm:$0xff]   ;;  %v2809_v41 = vld [vmem:[%s2900_s8 + $0xc0] ss:$8 sps:$4 sm:$0xff]  }
  0x37   : > { %613 = vmatprep.mubr.bf16.mxu0 %v2721_v44  ;;  %677 = vmatprep.mubr.bf16.mxu1 %v2723_v45  ;;  %v2813_v44 = vld [vmem:[%s2900_s8 + $0xe4] ss:$8 sps:$4 sm:$0xff]   ;;  %v2815_v45 = vld [vmem:[%s2900_s8 + $0xe0] ss:$8 sps:$4 sm:$0xff]  }
  0x38   : > { %2435 = vmatpush3.bf16.msra.mxu1 %v2738_v47  ;;  %2547 = vmatpush3.bf16.msra.mxu0 %v2740_v49  ;;  %v2818_v47 = vld [vmem:[%s2900_s8 + $0xf0] ss:$8 sps:$4 sm:$0xff]   ;;  %v2821_v49 = vld [vmem:[%s2900_s8 + $0x100] ss:$8 sps:$4 sm:$0xff]  }
  0x39   : > { %2436 = vmatprep.subr.bf16.mxu1 %v2747_v52  ;;  %2548 = vmatprep.subr.bf16.mxu0 %v2749_v56  ;;  %v2825_v52 = vld [vmem:[%s2900_s8 + $0x124] ss:$8 sps:$4 sm:$0xff]  }
  0x3c   : > { %2437 = vmatpush3.bf16.msra.mxu1 %v2748_v55  ;;  %2549 = vmatpush3.bf16.msra.mxu0 %v2750_v57  ;;  %v2830_v55 = vld [vmem:[%s2900_s8 + $0x130] ss:$8 sps:$4 sm:$0xff]  }
  0x3d   : > { %2438 = vmatprep.subr.bf16.mxu1 %v2757_v58  ;;  %2550 = vmatprep.subr.bf16.mxu0 %v2759_v63 }
  0x3e   : > { %614 = vmatmul.mubr.bf16.gmra.mrb[12].mxu0 %v2725_v50  ;;  %678 = vmatmul.mubr.bf16.gmra.mrb[12].mxu1 %v2726_v51  ;;  %v2822_v50 = vld [vmem:[%s2900_s8 + $0x114] ss:$8 sps:$4 sm:$0xff]   ;;  %v2824_v51 = vld [vmem:[%s2900_s8 + $0x110] ss:$8 sps:$4 sm:$0xff]  }
  0x3f   : > { %621 = vmatprep.mubr.bf16.mxu0 %v2731_v53  ;;  %685 = vmatprep.mubr.bf16.mxu1 %v2733_v54  ;;  %v2827_v53 = vld [vmem:[%s2900_s8 + $0x120] ss:$8 sps:$4 sm:$0xff]   ;;  %v2828_v54 = vld [vmem:[%s2900_s8 + $0x134] ss:$8 sps:$4 sm:$0xff]  }
  0x40   : > { %2439 = vmatpush3.bf16.msra.mxu1 %v2758_v61  ;;  %2551 = vmatpush3.bf16.msra.mxu0 %v2760_v0 }
  0x41   : > { %2440 = vmatprep.subr.bf16.mxu1 %v2767_v2  ;;  %2552 = vmatprep.subr.bf16.mxu0 %v2769_v4 }
  0x44   : > { %2441 = vmatpush3.bf16.msra.mxu1 %v2768_v3  ;;  %2553 = vmatpush3.bf16.msra.mxu0 %v2770_v5 }
  0x46   : > { %622 = vmatmul.mubr.bf16.gmra.mrb[16].mxu0 %v2735_v59  ;;  %686 = vmatmul.mubr.bf16.gmra.mrb[16].mxu1 %v2736_v60 }
  0x47   : > { %629 = vmatprep.mubr.bf16.mxu0 %v2741_v62  ;;  %693 = vmatprep.mubr.bf16.mxu1 %v2743_v1 }
  0x4e   : > { %630 = vmatmul.mubr.bf16.gmra.mrb[20].mxu0 %v2745_v6  ;;  %694 = vmatmul.mubr.bf16.gmra.mrb[20].mxu1 %v2746_v7 }
  0x4f   : > { %637 = vmatprep.mubr.bf16.mxu0 %v2751_v8  ;;  %701 = vmatprep.mubr.bf16.mxu1 %v2753_v9 }
  0x56   : > { %638 = vmatmul.mubr.bf16.gmra.mrb[24].mxu0 %v2755_v10  ;;  %702 = vmatmul.mubr.bf16.gmra.mrb[24].mxu1 %v2756_v11 }
  0x57   : > { %645 = vmatprep.mubr.bf16.mxu0 %v2761_v12  ;;  %709 = vmatprep.mubr.bf16.mxu1 %v2763_v13 }
  0x5e   : > { %646 = vmatmul.mubr.bf16.gmra.mrb[28].mxu0 %v2765_v14  ;;  %710 = vmatmul.mubr.bf16.gmra.mrb[28].mxu1 %v2766_v15 }
  0x5f   : > { %1006 = vmatprep.mubr.bf16.mxu1 %v2773_v16  ;;  %1488 = vmatprep.mubr.bf16.mxu0 %v2776_v17 }
  0x66   : > { %1007 = vmatmul.mubr.bf16.vlgmr.msra.gmra.mrb[32].mxu1 %v2771_v18  ;;  %1489 = vmatmul.mubr.bf16.vlgmr.msra.gmra.mrb[32].mxu0 %v2774_v19 }
  0x67   : > { %1014 = vmatprep.mubr.bf16.mxu1 %v2777_v20  ;;  %1496 = vmatprep.mubr.bf16.mxu0 %v2779_v21 }
  0x6e   : > { %1015 = vmatmul.mubr.bf16.gmra.mrb[36].mxu1 %v2781_v22  ;;  %1497 = vmatmul.mubr.bf16.gmra.mrb[36].mxu0 %v2782_v23 }
  0x6f   : > { %1022 = vmatprep.mubr.bf16.mxu1 %v2783_v24  ;;  %1504 = vmatprep.mubr.bf16.mxu0 %v2785_v25 }
  0x76   : > { %1023 = vmatmul.mubr.bf16.gmra.mrb[40].mxu1 %v2787_v26  ;;  %1505 = vmatmul.mubr.bf16.gmra.mrb[40].mxu0 %v2788_v27 }
  0x77   : > { %1030 = vmatprep.mubr.bf16.mxu1 %v2789_v28  ;;  %1512 = vmatprep.mubr.bf16.mxu0 %v2791_v29 }
  0x7e   : > { %1031 = vmatmul.mubr.bf16.gmra.mrb[44].mxu1 %v2793_v30  ;;  %1513 = vmatmul.mubr.bf16.gmra.mrb[44].mxu0 %v2794_v31 }
  0x7f   : > { %1038 = vmatprep.mubr.bf16.mxu1 %v2776_v17  ;;  %1520 = vmatprep.mubr.bf16.mxu0 %v2795_v32 }
  0x86   : > { %1039 = vmatmul.mubr.bf16.gmra.mrb[48].mxu1 %v2774_v19  ;;  %1521 = vmatmul.mubr.bf16.gmra.mrb[48].mxu0 %v2797_v33 }
  0x87   : > { %1046 = vmatprep.mubr.bf16.mxu1 %v2779_v21  ;;  %1528 = vmatprep.mubr.bf16.mxu0 %v2798_v34 }
  0x8e   : > { %1047 = vmatmul.mubr.bf16.gmra.mrb[52].mxu1 %v2782_v23  ;;  %1529 = vmatmul.mubr.bf16.gmra.mrb[52].mxu0 %v2800_v35 }
  0x8f   : > { %1054 = vmatprep.mubr.bf16.mxu1 %v2785_v25  ;;  %1536 = vmatprep.mubr.bf16.mxu0 %v2801_v36 }
  0x96   : > { %1055 = vmatmul.mubr.bf16.gmra.mrb[56].mxu1 %v2788_v27  ;;  %1537 = vmatmul.mubr.bf16.gmra.mrb[56].mxu0 %v2803_v37 }
  0x97   : > { %1062 = vmatprep.mubr.bf16.mxu1 %v2791_v29  ;;  %1544 = vmatprep.mubr.bf16.mxu0 %v2804_v38 }
  0x9e   : > { %1063 = vmatmul.mubr.bf16.gmra.mrb[60].mxu1 %v2794_v31  ;;  %1545 = vmatmul.mubr.bf16.gmra.mrb[60].mxu0 %v2806_v39 }
  0x9f   : > { %1070 = vmatprep.mubr.bf16.mxu1 %v2795_v32  ;;  %1552 = vmatprep.mubr.bf16.mxu0 %v2807_v40 }
  0xa6   : > { %1071 = vmatmul.mubr.bf16.gmra.mrb[64].mxu1 %v2797_v33  ;;  %1553 = vmatmul.mubr.bf16.gmra.mrb[64].mxu0 %v2809_v41 }
  0xa7   : > { %1078 = vmatprep.mubr.bf16.mxu1 %v2798_v34  ;;  %1560 = vmatprep.mubr.bf16.mxu0 %v2810_v42 }
  0xae   : > { %1079 = vmatmul.mubr.bf16.gmra.mrb[68].mxu1 %v2800_v35  ;;  %1561 = vmatmul.mubr.bf16.gmra.mrb[68].mxu0 %v2812_v43 }
  0xaf   : > { %1086 = vmatprep.mubr.bf16.mxu1 %v2801_v36  ;;  %1568 = vmatprep.mubr.bf16.mxu0 %v2813_v44 }
  0xb6   : > { %1087 = vmatmul.mubr.bf16.gmra.mrb[72].mxu1 %v2803_v37  ;;  %1569 = vmatmul.mubr.bf16.gmra.mrb[72].mxu0 %v2815_v45 }
  0xb7   : > { %1094 = vmatprep.mubr.bf16.mxu1 %v2804_v38  ;;  %1576 = vmatprep.mubr.bf16.mxu0 %v2816_v46 }
  0xbe   : > { %1095 = vmatmul.mubr.bf16.gmra.mrb[76].mxu1 %v2806_v39  ;;  %1577 = vmatmul.mubr.bf16.gmra.mrb[76].mxu0 %v2818_v47 }
  0xbf   : > { %1102 = vmatprep.mubr.bf16.mxu1 %v2807_v40  ;;  %1584 = vmatprep.mubr.bf16.mxu0 %v2819_v48 }
  0xc6   : > { %1103 = vmatmul.mubr.bf16.gmra.mrb[80].mxu1 %v2809_v41  ;;  %1585 = vmatmul.mubr.bf16.gmra.mrb[80].mxu0 %v2821_v49 }
  0xc7   : > { %1110 = vmatprep.mubr.bf16.mxu1 %v2810_v42  ;;  %1592 = vmatprep.mubr.bf16.mxu0 %v2822_v50 }
  0xce   : > { %1111 = vmatmul.mubr.bf16.gmra.mrb[84].mxu1 %v2812_v43  ;;  %1593 = vmatmul.mubr.bf16.gmra.mrb[84].mxu0 %v2824_v51 }
  0xcf   : > { %1118 = vmatprep.mubr.bf16.mxu1 %v2813_v44  ;;  %1600 = vmatprep.mubr.bf16.mxu0 %v2825_v52 }
  0xd6   : > { %1119 = vmatmul.mubr.bf16.gmra.mrb[88].mxu1 %v2815_v45  ;;  %1601 = vmatmul.mubr.bf16.gmra.mrb[88].mxu0 %v2827_v53 }
  0xd7   : > { %1126 = vmatprep.mubr.bf16.mxu1 %v2816_v46  ;;  %1608 = vmatprep.mubr.bf16.mxu0 %v2828_v54 }
  0xde   : > { %1127 = vmatmul.mubr.bf16.gmra.mrb[92].mxu1 %v2818_v47  ;;  %1609 = vmatmul.mubr.bf16.gmra.mrb[92].mxu0 %v2830_v55 }
  0xf9   : > { %v2330_v56 = vpop.f32.mrb[0].mxu0  ;;  %v2378_v57 = vpop.f32.mrb[0].mxu1 }
  0xfa   : > { %v2331_v58 = vpop.f32.mrb[1].mxu0  ;;  %v2379_v59 = vpop.f32.mrb[1].mxu1 }
  0xfb   : > { %v3091_v60 = vadd.f32 %v2331_v58, %v2330_v56  ;;  %v3093_v61 = vadd.f32 %v2379_v59, %v2378_v57  ;;  %v2333_v62 = vpop.f32.mrb[2].mxu0  ;;  %v2381_v63 = vpop.f32.mrb[2].mxu1 }
  0xfc   : > { %v2334_v0 = vpop.f32.mrb[3].mxu0  ;;  %v2382_v1 = vpop.f32.mrb[3].mxu1 }
  0xfd   : > { %v3095_v2 = vadd.f32 %v2334_v0, %v2333_v62  ;;  %v3097_v3 = vadd.f32 %v2382_v1, %v2381_v63 }
 0x101   : > { %v2336_v4 = vpop.f32.mrb[4].mxu0  ;;  %v2384_v5 = vpop.f32.mrb[4].mxu1 }
 0x102   : > { %v2337_v6 = vpop.f32.mrb[5].mxu0  ;;  %v2385_v7 = vpop.f32.mrb[5].mxu1 }
 0x103   : > { %v3099_v8 = vadd.f32 %v2337_v6, %v2336_v4  ;;  %v3101_v9 = vadd.f32 %v2385_v7, %v2384_v5  ;;  %v2339_v10 = vpop.f32.mrb[6].mxu0  ;;  %v2387_v11 = vpop.f32.mrb[6].mxu1 }
 0x104   : > { %v2340_v12 = vpop.f32.mrb[7].mxu0  ;;  %v2388_v13 = vpop.f32.mrb[7].mxu1 }
 0x105   : > { %v3103_v14 = vadd.f32 %v2340_v12, %v2339_v10  ;;  %v3105_v15 = vadd.f32 %v2388_v13, %v2387_v11 }
 0x109   : > { %v2342_v16 = vpop.f32.mrb[8].mxu0  ;;  %v2390_v17 = vpop.f32.mrb[8].mxu1 }
 0x10a   : > { %v2343_v18 = vpop.f32.mrb[9].mxu0  ;;  %v2391_v19 = vpop.f32.mrb[9].mxu1 }
 0x10b   : > { %v3107_v20 = vadd.f32 %v2343_v18, %v2342_v16  ;;  %v3109_v21 = vadd.f32 %v2391_v19, %v2390_v17  ;;  %v2345_v22 = vpop.f32.mrb[10].mxu0  ;;  %v2393_v23 = vpop.f32.mrb[10].mxu1 }
 0x10c   : > { %v2346_v24 = vpop.f32.mrb[11].mxu0  ;;  %v2394_v25 = vpop.f32.mrb[11].mxu1 }
 0x10d   : > { %v3111_v26 = vadd.f32 %v2346_v24, %v2345_v22  ;;  %v3113_v27 = vadd.f32 %v2394_v25, %v2393_v23 }
 0x111   : > { %v2348_v28 = vpop.f32.mrb[12].mxu0  ;;  %v2396_v29 = vpop.f32.mrb[12].mxu1 }
 0x112   : > { %v2349_v30 = vpop.f32.mrb[13].mxu0  ;;  %v2397_v31 = vpop.f32.mrb[13].mxu1 }
 0x113   : > { %v3115_v32 = vadd.f32 %v2349_v30, %v2348_v28  ;;  %v3117_v33 = vadd.f32 %v2397_v31, %v2396_v29  ;;  %v2351_v34 = vpop.f32.mrb[14].mxu0  ;;  %v2399_v35 = vpop.f32.mrb[14].mxu1 }
 0x114   : > { %v2352_v36 = vpop.f32.mrb[15].mxu0  ;;  %v2400_v37 = vpop.f32.mrb[15].mxu1 }
 0x115   : > { %v3119_v38 = vadd.f32 %v2352_v36, %v2351_v34  ;;  %v3121_v39 = vadd.f32 %v2400_v37, %v2399_v35 }
 0x119   : > { %v2354_v40 = vpop.f32.mrb[16].mxu0  ;;  %v2402_v41 = vpop.f32.mrb[16].mxu1 }
 0x11a   : > { %v2355_v42 = vpop.f32.mrb[17].mxu0  ;;  %v2403_v43 = vpop.f32.mrb[17].mxu1 }
 0x11b   : > { %v3123_v44 = vadd.f32 %v2355_v42, %v2354_v40  ;;  %v3125_v45 = vadd.f32 %v2403_v43, %v2402_v41  ;;  %v2357_v46 = vpop.f32.mrb[18].mxu0  ;;  %v2405_v47 = vpop.f32.mrb[18].mxu1 }
 0x11c   : > { %v2358_v48 = vpop.f32.mrb[19].mxu0  ;;  %v2406_v49 = vpop.f32.mrb[19].mxu1 }
 0x11d   : > { %v3127_v50 = vadd.f32 %v2358_v48, %v2357_v46  ;;  %v3129_v51 = vadd.f32 %v2406_v49, %v2405_v47 }
 0x121   : > { %v2360_v52 = vpop.f32.mrb[20].mxu0  ;;  %v2408_v53 = vpop.f32.mrb[20].mxu1 }
 0x122   : > { %v2361_v54 = vpop.f32.mrb[21].mxu0  ;;  %v2409_v55 = vpop.f32.mrb[21].mxu1 }
 0x123   : > { %v3131_v56 = vadd.f32 %v2361_v54, %v2360_v52  ;;  %v3133_v57 = vadd.f32 %v2409_v55, %v2408_v53  ;;  %v2363_v58 = vpop.f32.mrb[22].mxu0  ;;  %v2411_v59 = vpop.f32.mrb[22].mxu1 }
 0x124   : > { %v2364_v62 = vpop.f32.mrb[23].mxu0  ;;  %v2412_v63 = vpop.f32.mrb[23].mxu1 }
 0x125   : > { %v3135_v0 = vadd.f32 %v2364_v62, %v2363_v58  ;;  %v3137_v1 = vadd.f32 %v2412_v63, %v2411_v59  ;;  %v3159_v59 = vld [vmem:[%s3251_s2] ss:$0 sm:$0xff] }
 0x129   : > { %v2366_v4 = vpop.f32.mrb[24].mxu0  ;;  %v2414_v5 = vpop.f32.mrb[24].mxu1 }
 0x12a   : > { %v2367_v6 = vpop.f32.mrb[25].mxu0  ;;  %v2415_v7 = vpop.f32.mrb[25].mxu1 }
 0x12b   : > { %v3139_v10 = vadd.f32 %v2367_v6, %v2366_v4  ;;  %v3141_v11 = vadd.f32 %v2415_v7, %v2414_v5  ;;  %v2369_v12 = vpop.f32.mrb[26].mxu0  ;;  %v2417_v13 = vpop.f32.mrb[26].mxu1 }
 0x12c   : > { %v2370_v16 = vpop.f32.mrb[27].mxu0  ;;  %v2418_v17 = vpop.f32.mrb[27].mxu1 }
 0x12d   : > { %v3143_v18 = vadd.f32 %v2370_v16, %v2369_v12  ;;  %v3145_v19 = vadd.f32 %v2418_v17, %v2417_v13 }
 0x131   : > { %v2372_v22 = vpop.f32.mrb[28].mxu0  ;;  %v2420_v23 = vpop.f32.mrb[28].mxu1 }
 0x132   : > { %v2373_v24 = vpop.f32.mrb[29].mxu0  ;;  %v2421_v25 = vpop.f32.mrb[29].mxu1 }
 0x133   : > { %v3147_v28 = vadd.f32 %v2373_v24, %v2372_v22  ;;  %v3149_v29 = vadd.f32 %v2421_v25, %v2420_v23  ;;  %v2375_v30 = vpop.f32.mrb[30].mxu0  ;;  %v2423_v31 = vpop.f32.mrb[30].mxu1 }
 0x134   : > { %v2376_v34 = vpop.f32.mrb[31].mxu0  ;;  %v2424_v35 = vpop.f32.mrb[31].mxu1 }
 0x135   : > { %v3151_v36 = vadd.f32 %v2376_v34, %v2375_v30  ;;  %v3153_v37 = vadd.f32 %v2424_v35, %v2423_v31 }
 0x139   : > { %v2442_v40 = vpop.f32.mrb[32].mxu1  ;;  %v2554_v41 = vpop.f32.mrb[32].mxu0 }
 0x13a   : > { %v2443_v42 = vpop.f32.mrb[33].mxu1  ;;  %v2555_v43 = vpop.f32.mrb[33].mxu0 }
 0x13b   : > { %v2444_v46 = vadd.f32 %v2443_v42, %v2442_v40  ;;  %v2556_v47 = vadd.f32 %v2555_v43, %v2554_v41  ;;  %v2445_v48 = vpop.f32.mrb[34].mxu1  ;;  %v2557_v49 = vpop.f32.mrb[34].mxu0 }
 0x13c   : > { %v2446_v52 = vpop.f32.mrb[35].mxu1  ;;  %v2558_v53 = vpop.f32.mrb[35].mxu0 }
 0x13d   : > { %v1009_v54 = vadd.f32 %v2444_v46, %v3091_v60  ;;  %v2447_v55 = vadd.f32 %v2446_v52, %v2445_v48  ;;  %v2559_v58 = vadd.f32 %v2558_v53, %v2557_v49 }
 0x13f   : > { %v1617_v62 = vadd.f32 %v2556_v47, %v1009_v54  ;;  %v1012_v63 = vadd.f32 %v2447_v55, %v3095_v2 }
 0x141   : > { %v1656_v4 = vadd.f32 %v3159_v59, %v1617_v62  ;;  %v1618_v5 = vadd.f32 %v2559_v58, %v1012_v63  ;;  %v2448_v6 = vpop.f32.mrb[36].mxu1  ;;  %v2560_v7 = vpop.f32.mrb[36].mxu0 }
 0x142   : > { %v2449_v12 = vpop.f32.mrb[37].mxu1  ;;  %v2561_v13 = vpop.f32.mrb[37].mxu0 }
 0x143   : > { %v1657_v60 = vadd.f32 %v3159_v59, %v1618_v5  ;;  %v2450_v16 = vadd.f32 %v2449_v12, %v2448_v6  ;;  %v2562_v17 = vadd.f32 %v2561_v13, %v2560_v7  ;;  %v2451_v22 = vpop.f32.mrb[38].mxu1  ;;  %v2563_v23 = vpop.f32.mrb[38].mxu0  ;;  %v1688_v24 = vmax.f32 %v1656_v4, 0.0 }
 0x144   : > { %v2452_v25 = vpop.f32.mrb[39].mxu1  ;;  %v2564_v30 = vpop.f32.mrb[39].mxu0 }
 0x145   : > { %v1689_v31 = vmax.f32 %v1657_v60, 0.0  ;;  %v1017_v2 = vadd.f32 %v2450_v16, %v3099_v8  ;;  %v2453_v34 = vadd.f32 %v2452_v25, %v2451_v22  ;;  %v2565_v35 = vadd.f32 %v2564_v30, %v2563_v23 }
 0x147   : > { %v2222_v40 = vpack.c.bf16 %v1689_v31, %v1688_v24  ;;  %v1619_v41 = vadd.f32 %v2562_v17, %v1017_v2  ;;  %v1020_v42 = vadd.f32 %v2453_v34, %v3103_v14 }
 0x149   : > { %2223 = vst [vmem:[%s3169_s21] sm:$0xff] %v2222_v40   ;;  %v1658_v43 = vadd.f32 %v3159_v59, %v1619_v41  ;;  %v1620_v46 = vadd.f32 %v2565_v35, %v1020_v42  ;;  %v2454_v47 = vpop.f32.mrb[40].mxu1  ;;  %v2566_v48 = vpop.f32.mrb[40].mxu0 }
 0x14a   : > { %v2455_v49 = vpop.f32.mrb[41].mxu1  ;;  %v2567_v8 = vpop.f32.mrb[41].mxu0 }
 0x14b   : > { %v1659_v52 = vadd.f32 %v3159_v59, %v1620_v46  ;;  %v2456_v53 = vadd.f32 %v2455_v49, %v2454_v47  ;;  %v2568_v54 = vadd.f32 %v2567_v8, %v2566_v48  ;;  %v2457_v55 = vpop.f32.mrb[42].mxu1  ;;  %v2569_v58 = vpop.f32.mrb[42].mxu0  ;;  %v1690_v62 = vmax.f32 %v1658_v43, 0.0 }
 0x14c   : > { %v2458_v63 = vpop.f32.mrb[43].mxu1  ;;  %v2570_v4 = vpop.f32.mrb[43].mxu0 }
 0x14d   : > { %v1691_v5 = vmax.f32 %v1659_v52, 0.0  ;;  %v1025_v14 = vadd.f32 %v2456_v53, %v3107_v20  ;;  %v2459_v6 = vadd.f32 %v2458_v63, %v2457_v55  ;;  %v2571_v7 = vadd.f32 %v2570_v4, %v2569_v58 }
 0x14f   : > { %v2227_v12 = vpack.c.bf16 %v1691_v5, %v1690_v62  ;;  %v1621_v13 = vadd.f32 %v2568_v54, %v1025_v14  ;;  %v1028_v60 = vadd.f32 %v2459_v6, %v3111_v26 }
 0x151   : > { %2299 = vst [vmem:[%s3169_s21 + $0x8] sm:$0xff] %v2227_v12   ;;  %v1660_v16 = vadd.f32 %v3159_v59, %v1621_v13  ;;  %v1622_v17 = vadd.f32 %v2571_v7, %v1028_v60  ;;  %v2460_v22 = vpop.f32.mrb[44].mxu1  ;;  %v2572_v23 = vpop.f32.mrb[44].mxu0 }
 0x152   : > { %v2461_v24 = vpop.f32.mrb[45].mxu1  ;;  %v2573_v25 = vpop.f32.mrb[45].mxu0 }
 0x153   : > { %v1661_v30 = vadd.f32 %v3159_v59, %v1622_v17  ;;  %v2462_v31 = vadd.f32 %v2461_v24, %v2460_v22  ;;  %v2574_v2 = vadd.f32 %v2573_v25, %v2572_v23  ;;  %v2463_v20 = vpop.f32.mrb[46].mxu1  ;;  %v2575_v34 = vpop.f32.mrb[46].mxu0  ;;  %v1692_v35 = vmax.f32 %v1660_v16, 0.0 }
 0x154   : > { %v2464_v40 = vpop.f32.mrb[47].mxu1  ;;  %v2576_v41 = vpop.f32.mrb[47].mxu0 }
 0x155   : > { %v1693_v42 = vmax.f32 %v1661_v30, 0.0  ;;  %v1033_v26 = vadd.f32 %v2462_v31, %v3115_v32  ;;  %v2465_v43 = vadd.f32 %v2464_v40, %v2463_v20  ;;  %v2577_v46 = vadd.f32 %v2576_v41, %v2575_v34 }
 0x157   : > { %v2232_v47 = vpack.c.bf16 %v1693_v42, %v1692_v35  ;;  %v1623_v48 = vadd.f32 %v2574_v2, %v1033_v26  ;;  %v1036_v49 = vadd.f32 %v2465_v43, %v3119_v38 }
 0x159   : > { %2300 = vst [vmem:[%s3169_s21 + $0x10] sm:$0xff] %v2232_v47   ;;  %v1662_v8 = vadd.f32 %v3159_v59, %v1623_v48  ;;  %v1624_v52 = vadd.f32 %v2577_v46, %v1036_v49  ;;  %v2466_v53 = vpop.f32.mrb[48].mxu1  ;;  %v2578_v54 = vpop.f32.mrb[48].mxu0 }
 0x15a   : > { %v2467_v55 = vpop.f32.mrb[49].mxu1  ;;  %v2579_v58 = vpop.f32.mrb[49].mxu0 }
 0x15b   : > { %v1663_v62 = vadd.f32 %v3159_v59, %v1624_v52  ;;  %v2468_v63 = vadd.f32 %v2467_v55, %v2466_v53  ;;  %v2580_v4 = vadd.f32 %v2579_v58, %v2578_v54  ;;  %v2469_v32 = vpop.f32.mrb[50].mxu1  ;;  %v2581_v5 = vpop.f32.mrb[50].mxu0  ;;  %v1694_v14 = vmax.f32 %v1662_v8, 0.0 }
 0x15c   : > { %v2470_v6 = vpop.f32.mrb[51].mxu1  ;;  %v2582_v7 = vpop.f32.mrb[51].mxu0 }
 0x15d   : > { %v1695_v12 = vmax.f32 %v1663_v62, 0.0  ;;  %v1041_v38 = vadd.f32 %v2468_v63, %v3123_v44  ;;  %v2471_v13 = vadd.f32 %v2470_v6, %v2469_v32  ;;  %v2583_v60 = vadd.f32 %v2582_v7, %v2581_v5 }
 0x15f   : > { %v2237_v16 = vpack.c.bf16 %v1695_v12, %v1694_v14  ;;  %v1625_v17 = vadd.f32 %v2580_v4, %v1041_v38  ;;  %v1044_v22 = vadd.f32 %v2471_v13, %v3127_v50 }
 0x161   : > { %2301 = vst [vmem:[%s3169_s21 + $0x18] sm:$0xff] %v2237_v16   ;;  %v1664_v23 = vadd.f32 %v3159_v59, %v1625_v17  ;;  %v1626_v24 = vadd.f32 %v2583_v60, %v1044_v22  ;;  %v2472_v25 = vpop.f32.mrb[52].mxu1  ;;  %v2584_v30 = vpop.f32.mrb[52].mxu0 }
 0x162   : > { %v2473_v31 = vpop.f32.mrb[53].mxu1  ;;  %v2585_v2 = vpop.f32.mrb[53].mxu0 }
 0x163   : > { %v1665_v20 = vadd.f32 %v3159_v59, %v1626_v24  ;;  %v2474_v34 = vadd.f32 %v2473_v31, %v2472_v25  ;;  %v2586_v35 = vadd.f32 %v2585_v2, %v2584_v30  ;;  %v2475_v44 = vpop.f32.mrb[54].mxu1  ;;  %v2587_v40 = vpop.f32.mrb[54].mxu0  ;;  %v1696_v41 = vmax.f32 %v1664_v23, 0.0 }
 0x164   : > { %v2476_v42 = vpop.f32.mrb[55].mxu1  ;;  %v2588_v26 = vpop.f32.mrb[55].mxu0 }
 0x165   : > { %v1697_v43 = vmax.f32 %v1665_v20, 0.0  ;;  %v1049_v50 = vadd.f32 %v2474_v34, %v3131_v56  ;;  %v2477_v46 = vadd.f32 %v2476_v42, %v2475_v44  ;;  %v2589_v47 = vadd.f32 %v2588_v26, %v2587_v40 }
 0x167   : > { %v2242_v48 = vpack.c.bf16 %v1697_v43, %v1696_v41  ;;  %v1627_v49 = vadd.f32 %v2586_v35, %v1049_v50  ;;  %v1052_v8 = vadd.f32 %v2477_v46, %v3135_v0 }
 0x169   : > { %2302 = vst [vmem:[%s3169_s21 + $0x20] sm:$0xff] %v2242_v48   ;;  %v1666_v52 = vadd.f32 %v3159_v59, %v1627_v49  ;;  %v1628_v53 = vadd.f32 %v2589_v47, %v1052_v8  ;;  %v2478_v54 = vpop.f32.mrb[56].mxu1  ;;  %v2590_v55 = vpop.f32.mrb[56].mxu0 }
 0x16a   : > { %v2479_v58 = vpop.f32.mrb[57].mxu1  ;;  %v2591_v62 = vpop.f32.mrb[57].mxu0 }
 0x16b   : > { %v1667_v63 = vadd.f32 %v3159_v59, %v1628_v53  ;;  %v2480_v4 = vadd.f32 %v2479_v58, %v2478_v54  ;;  %v2592_v32 = vadd.f32 %v2591_v62, %v2590_v55  ;;  %v2481_v56 = vpop.f32.mrb[58].mxu1  ;;  %v2593_v5 = vpop.f32.mrb[58].mxu0  ;;  %v1698_v14 = vmax.f32 %v1666_v52, 0.0 }
 0x16c   : > { %v2482_v6 = vpop.f32.mrb[59].mxu1  ;;  %v2594_v7 = vpop.f32.mrb[59].mxu0 }
 0x16d   : > { %v1699_v12 = vmax.f32 %v1667_v63, 0.0  ;;  %v1057_v0 = vadd.f32 %v2480_v4, %v3139_v10  ;;  %v2483_v38 = vadd.f32 %v2482_v6, %v2481_v56  ;;  %v2595_v13 = vadd.f32 %v2594_v7, %v2593_v5 }
 0x16f   : > { %v2247_v60 = vpack.c.bf16 %v1699_v12, %v1698_v14  ;;  %v1629_v16 = vadd.f32 %v2592_v32, %v1057_v0  ;;  %v1060_v17 = vadd.f32 %v2483_v38, %v3143_v18 }
 0x171   : > { %2303 = vst [vmem:[%s3169_s21 + $0x28] sm:$0xff] %v2247_v60   ;;  %v1668_v22 = vadd.f32 %v3159_v59, %v1629_v16  ;;  %v1630_v23 = vadd.f32 %v2595_v13, %v1060_v17  ;;  %v2484_v24 = vpop.f32.mrb[60].mxu1  ;;  %v2596_v25 = vpop.f32.mrb[60].mxu0 }
 0x172   : > { %v2485_v30 = vpop.f32.mrb[61].mxu1  ;;  %v2597_v31 = vpop.f32.mrb[61].mxu0 }
 0x173   : > { %v1669_v2 = vadd.f32 %v3159_v59, %v1630_v23  ;;  %v2486_v20 = vadd.f32 %v2485_v30, %v2484_v24  ;;  %v2598_v34 = vadd.f32 %v2597_v31, %v2596_v25  ;;  %v2487_v10 = vpop.f32.mrb[62].mxu1  ;;  %v2599_v35 = vpop.f32.mrb[62].mxu0  ;;  %v1700_v44 = vmax.f32 %v1668_v22, 0.0 }
 0x174   : > { %v2488_v40 = vpop.f32.mrb[63].mxu1  ;;  %v2600_v41 = vpop.f32.mrb[63].mxu0 }
 0x175   : > { %v1701_v42 = vmax.f32 %v1669_v2, 0.0  ;;  %v1065_v18 = vadd.f32 %v2486_v20, %v3147_v28  ;;  %v2489_v26 = vadd.f32 %v2488_v40, %v2487_v10  ;;  %v2601_v43 = vadd.f32 %v2600_v41, %v2599_v35 }
 0x177   : > { %v2252_v50 = vpack.c.bf16 %v1701_v42, %v1700_v44  ;;  %v1631_v46 = vadd.f32 %v2598_v34, %v1065_v18  ;;  %v1068_v47 = vadd.f32 %v2489_v26, %v3151_v36 }
 0x179   : > { %2304 = vst [vmem:[%s3169_s21 + $0x30] sm:$0xff] %v2252_v50   ;;  %v1670_v48 = vadd.f32 %v3159_v59, %v1631_v46  ;;  %v1632_v49 = vadd.f32 %v2601_v43, %v1068_v47  ;;  %v2490_v8 = vpop.f32.mrb[64].mxu1  ;;  %v2602_v52 = vpop.f32.mrb[64].mxu0 }
 0x17a   : > { %v2491_v53 = vpop.f32.mrb[65].mxu1  ;;  %v2603_v54 = vpop.f32.mrb[65].mxu0 }
 0x17b   : > { %v1671_v55 = vadd.f32 %v3159_v59, %v1632_v49  ;;  %v2492_v58 = vadd.f32 %v2491_v53, %v2490_v8  ;;  %v2604_v62 = vadd.f32 %v2603_v54, %v2602_v52  ;;  %v2493_v28 = vpop.f32.mrb[66].mxu1  ;;  %v2605_v63 = vpop.f32.mrb[66].mxu0  ;;  %v1702_v4 = vmax.f32 %v1670_v48, 0.0 }
 0x17c   : > { %v2494_v32 = vpop.f32.mrb[67].mxu1  ;;  %v2606_v56 = vpop.f32.mrb[67].mxu0 }
 0x17d   : > { %v1703_v5 = vmax.f32 %v1671_v55, 0.0  ;;  %v1073_v36 = vadd.f32 %v2492_v58, %v3093_v61  ;;  %v2495_v14 = vadd.f32 %v2494_v32, %v2493_v28  ;;  %v2607_v6 = vadd.f32 %v2606_v56, %v2605_v63 }
 0x17f   : > { %v2257_v7 = vpack.c.bf16 %v1703_v5, %v1702_v4  ;;  %v1633_v12 = vadd.f32 %v2604_v62, %v1073_v36  ;;  %v1076_v0 = vadd.f32 %v2495_v14, %v3097_v3 }
 0x181   : > { %2305 = vst [vmem:[%s3169_s21 + $0x38] sm:$0xff] %v2257_v7   ;;  %v1672_v38 = vadd.f32 %v3159_v59, %v1633_v12  ;;  %v1634_v13 = vadd.f32 %v2607_v6, %v1076_v0  ;;  %v2496_v60 = vpop.f32.mrb[68].mxu1  ;;  %v2608_v16 = vpop.f32.mrb[68].mxu0 }
 0x182   : > { %v2497_v17 = vpop.f32.mrb[69].mxu1  ;;  %v2609_v22 = vpop.f32.mrb[69].mxu0 }
 0x183   : > { %v1673_v23 = vadd.f32 %v3159_v59, %v1634_v13  ;;  %v2498_v24 = vadd.f32 %v2497_v17, %v2496_v60  ;;  %v2610_v25 = vadd.f32 %v2609_v22, %v2608_v16  ;;  %v2499_v61 = vpop.f32.mrb[70].mxu1  ;;  %v2611_v30 = vpop.f32.mrb[70].mxu0  ;;  %v1704_v31 = vmax.f32 %v1672_v38, 0.0 }
 0x184   : > { %v2500_v2 = vpop.f32.mrb[71].mxu1  ;;  %v2612_v20 = vpop.f32.mrb[71].mxu0 }
 0x185   : > { %v1705_v34 = vmax.f32 %v1673_v23, 0.0  ;;  %v1081_v3 = vadd.f32 %v2498_v24, %v3101_v9  ;;  %v2501_v10 = vadd.f32 %v2500_v2, %v2499_v61  ;;  %v2613_v35 = vadd.f32 %v2612_v20, %v2611_v30 }
 0x187   : > { %v2262_v44 = vpack.c.bf16 %v1705_v34, %v1704_v31  ;;  %v1635_v40 = vadd.f32 %v2610_v25, %v1081_v3  ;;  %v1084_v41 = vadd.f32 %v2501_v10, %v3105_v15 }
 0x189   : > { %2306 = vst [vmem:[%s3169_s21 + $0x40] sm:$0xff] %v2262_v44   ;;  %v1674_v42 = vadd.f32 %v3159_v59, %v1635_v40  ;;  %v1636_v18 = vadd.f32 %v2613_v35, %v1084_v41  ;;  %v2502_v26 = vpop.f32.mrb[72].mxu1  ;;  %v2614_v43 = vpop.f32.mrb[72].mxu0 }
 0x18a   : > { %v2503_v50 = vpop.f32.mrb[73].mxu1  ;;  %v2615_v46 = vpop.f32.mrb[73].mxu0 }
 0x18b   : > { %v1675_v47 = vadd.f32 %v3159_v59, %v1636_v18  ;;  %v2504_v48 = vadd.f32 %v2503_v50, %v2502_v26  ;;  %v2616_v49 = vadd.f32 %v2615_v46, %v2614_v43  ;;  %v2505_v9 = vpop.f32.mrb[74].mxu1  ;;  %v2617_v8 = vpop.f32.mrb[74].mxu0  ;;  %v1706_v52 = vmax.f32 %v1674_v42, 0.0 }
 0x18c   : > { %v2506_v53 = vpop.f32.mrb[75].mxu1  ;;  %v2618_v54 = vpop.f32.mrb[75].mxu0 }
 0x18d   : > { %v1707_v55 = vmax.f32 %v1675_v47, 0.0  ;;  %v1089_v15 = vadd.f32 %v2504_v48, %v3109_v21  ;;  %v2507_v58 = vadd.f32 %v2506_v53, %v2505_v9  ;;  %v2619_v62 = vadd.f32 %v2618_v54, %v2617_v8 }
 0x18f   : > { %v2267_v28 = vpack.c.bf16 %v1707_v55, %v1706_v52  ;;  %v1637_v63 = vadd.f32 %v2616_v49, %v1089_v15  ;;  %v1092_v4 = vadd.f32 %v2507_v58, %v3113_v27 }
 0x191   : > { %2307 = vst [vmem:[%s3169_s21 + $0x48] sm:$0xff] %v2267_v28   ;;  %v1676_v32 = vadd.f32 %v3159_v59, %v1637_v63  ;;  %v1638_v56 = vadd.f32 %v2619_v62, %v1092_v4  ;;  %v2508_v5 = vpop.f32.mrb[76].mxu1  ;;  %v2620_v36 = vpop.f32.mrb[76].mxu0 }
 0x192   : > { %v2509_v14 = vpop.f32.mrb[77].mxu1  ;;  %v2621_v6 = vpop.f32.mrb[77].mxu0 }
 0x193   : > { %v1677_v7 = vadd.f32 %v3159_v59, %v1638_v56  ;;  %v2510_v12 = vadd.f32 %v2509_v14, %v2508_v5  ;;  %v2622_v0 = vadd.f32 %v2621_v6, %v2620_v36  ;;  %v2511_v21 = vpop.f32.mrb[78].mxu1  ;;  %v2623_v38 = vpop.f32.mrb[78].mxu0  ;;  %v1708_v13 = vmax.f32 %v1676_v32, 0.0 }
 0x194   : > { %v2512_v60 = vpop.f32.mrb[79].mxu1  ;;  %v2624_v16 = vpop.f32.mrb[79].mxu0 }
 0x195   : > { %v1709_v17 = vmax.f32 %v1677_v7, 0.0  ;;  %v1097_v27 = vadd.f32 %v2510_v12, %v3117_v33  ;;  %v2513_v22 = vadd.f32 %v2512_v60, %v2511_v21  ;;  %v2625_v23 = vadd.f32 %v2624_v16, %v2623_v38 }
 0x197   : > { %v2272_v24 = vpack.c.bf16 %v1709_v17, %v1708_v13  ;;  %v1639_v25 = vadd.f32 %v2622_v0, %v1097_v27  ;;  %v1100_v61 = vadd.f32 %v2513_v22, %v3121_v39 }
 0x199   : > { %2308 = vst [vmem:[%s3169_s21 + $0x50] sm:$0xff] %v2272_v24   ;;  %v1678_v30 = vadd.f32 %v3159_v59, %v1639_v25  ;;  %v1640_v31 = vadd.f32 %v2625_v23, %v1100_v61  ;;  %v2514_v2 = vpop.f32.mrb[80].mxu1  ;;  %v2626_v20 = vpop.f32.mrb[80].mxu0 }
 0x19a   : > { %v2515_v34 = vpop.f32.mrb[81].mxu1  ;;  %v2627_v3 = vpop.f32.mrb[81].mxu0 }
 0x19b   : > { %v1679_v10 = vadd.f32 %v3159_v59, %v1640_v31  ;;  %v2516_v35 = vadd.f32 %v2515_v34, %v2514_v2  ;;  %v2628_v44 = vadd.f32 %v2627_v3, %v2626_v20  ;;  %v2517_v33 = vpop.f32.mrb[82].mxu1  ;;  %v2629_v40 = vpop.f32.mrb[82].mxu0  ;;  %v1710_v41 = vmax.f32 %v1678_v30, 0.0 }
 0x19c   : > { %v2518_v42 = vpop.f32.mrb[83].mxu1  ;;  %v2630_v18 = vpop.f32.mrb[83].mxu0 }
 0x19d   : > { %v1711_v26 = vmax.f32 %v1679_v10, 0.0  ;;  %v1105_v39 = vadd.f32 %v2516_v35, %v3125_v45  ;;  %v2519_v43 = vadd.f32 %v2518_v42, %v2517_v33  ;;  %v2631_v50 = vadd.f32 %v2630_v18, %v2629_v40 }
 0x19f   : > { %v2277_v46 = vpack.c.bf16 %v1711_v26, %v1710_v41  ;;  %v1641_v47 = vadd.f32 %v2628_v44, %v1105_v39  ;;  %v1108_v48 = vadd.f32 %v2519_v43, %v3129_v51 }
 0x1a1   : > { %2309 = vst [vmem:[%s3169_s21 + $0x58] sm:$0xff] %v2277_v46   ;;  %v1680_v49 = vadd.f32 %v3159_v59, %v1641_v47  ;;  %v1642_v9 = vadd.f32 %v2631_v50, %v1108_v48  ;;  %v2520_v8 = vpop.f32.mrb[84].mxu1  ;;  %v2632_v52 = vpop.f32.mrb[84].mxu0 }
 0x1a2   : > { %v2521_v53 = vpop.f32.mrb[85].mxu1  ;;  %v2633_v54 = vpop.f32.mrb[85].mxu0 }
 0x1a3   : > { %v1681_v55 = vadd.f32 %v3159_v59, %v1642_v9  ;;  %v2522_v15 = vadd.f32 %v2521_v53, %v2520_v8  ;;  %v2634_v58 = vadd.f32 %v2633_v54, %v2632_v52  ;;  %v2523_v45 = vpop.f32.mrb[86].mxu1  ;;  %v2635_v62 = vpop.f32.mrb[86].mxu0  ;;  %v1712_v28 = vmax.f32 %v1680_v49, 0.0 }
 0x1a4   : > { %v2524_v63 = vpop.f32.mrb[87].mxu1  ;;  %v2636_v4 = vpop.f32.mrb[87].mxu0 }
 0x1a5   : > { %v1713_v32 = vmax.f32 %v1681_v55, 0.0  ;;  %v1113_v51 = vadd.f32 %v2522_v15, %v3133_v57  ;;  %v2525_v56 = vadd.f32 %v2524_v63, %v2523_v45  ;;  %v2637_v5 = vadd.f32 %v2636_v4, %v2635_v62 }
 0x1a7   : > { %v2282_v36 = vpack.c.bf16 %v1713_v32, %v1712_v28  ;;  %v1643_v14 = vadd.f32 %v2634_v58, %v1113_v51  ;;  %v1116_v6 = vadd.f32 %v2525_v56, %v3137_v1 }
 0x1a9   : > { %2310 = vst [vmem:[%s3169_s21 + $0x60] sm:$0xff] %v2282_v36   ;;  %v1682_v7 = vadd.f32 %v3159_v59, %v1643_v14  ;;  %v1644_v12 = vadd.f32 %v2637_v5, %v1116_v6  ;;  %v2526_v0 = vpop.f32.mrb[88].mxu1  ;;  %v2638_v21 = vpop.f32.mrb[88].mxu0 }
 0x1aa   : > { %v2527_v38 = vpop.f32.mrb[89].mxu1  ;;  %v2639_v13 = vpop.f32.mrb[89].mxu0 }
 0x1ab   : > { %v1683_v60 = vadd.f32 %v3159_v59, %v1644_v12  ;;  %v2528_v16 = vadd.f32 %v2527_v38, %v2526_v0  ;;  %v2640_v17 = vadd.f32 %v2639_v13, %v2638_v21  ;;  %v2529_v57 = vpop.f32.mrb[90].mxu1  ;;  %v2641_v27 = vpop.f32.mrb[90].mxu0  ;;  %v1714_v22 = vmax.f32 %v1682_v7, 0.0 }
 0x1ac   : > { %v2530_v23 = vpop.f32.mrb[91].mxu1  ;;  %v2642_v24 = vpop.f32.mrb[91].mxu0 }
 0x1ad   : > { %v1715_v25 = vmax.f32 %v1683_v60, 0.0  ;;  %v1121_v1 = vadd.f32 %v2528_v16, %v3141_v11  ;;  %v2531_v61 = vadd.f32 %v2530_v23, %v2529_v57  ;;  %v2643_v30 = vadd.f32 %v2642_v24, %v2641_v27 }
 0x1af   : > { %v2287_v31 = vpack.c.bf16 %v1715_v25, %v1714_v22  ;;  %v1645_v2 = vadd.f32 %v2640_v17, %v1121_v1  ;;  %v1124_v20 = vadd.f32 %v2531_v61, %v3145_v19 }
 0x1b1   : > { %2311 = vst [vmem:[%s3169_s21 + $0x68] sm:$0xff] %v2287_v31   ;;  %v1684_v34 = vadd.f32 %v3159_v59, %v1645_v2  ;;  %v1646_v3 = vadd.f32 %v2643_v30, %v1124_v20  ;;  %v2532_v10 = vpop.f32.mrb[92].mxu1  ;;  %v2644_v35 = vpop.f32.mrb[92].mxu0 }
 0x1b2   : > { %v2533_v44 = vpop.f32.mrb[93].mxu1  ;;  %v2645_v33 = vpop.f32.mrb[93].mxu0 }
 0x1b3   : > { %v1685_v40 = vadd.f32 %v3159_v59, %v1646_v3  ;;  %v2534_v41 = vadd.f32 %v2533_v44, %v2532_v10  ;;  %v2646_v42 = vadd.f32 %v2645_v33, %v2644_v35  ;;  %v2535_v11 = vpop.f32.mrb[94].mxu1  ;;  %v2647_v18 = vpop.f32.mrb[94].mxu0  ;;  %v1716_v26 = vmax.f32 %v1684_v34, 0.0 }
 0x1b4   : > { %v2536_v39 = vpop.f32.mrb[95].mxu1  ;;  %v2648_v43 = vpop.f32.mrb[95].mxu0 }
 0x1b5   : > { %v1717_v19 = vmax.f32 %v1685_v40, 0.0  ;;  %v1129_v50 = vadd.f32 %v2534_v41, %v3149_v29  ;;  %v2537_v46 = vadd.f32 %v2536_v39, %v2535_v11  ;;  %v2649_v47 = vadd.f32 %v2648_v43, %v2647_v18 }
 0x1b7   : > { %v2292_v48 = vpack.c.bf16 %v1717_v19, %v1716_v26  ;;  %v1647_v49 = vadd.f32 %v2646_v42, %v1129_v50  ;;  %v1132_v9 = vadd.f32 %v2537_v46, %v3153_v37 }
 0x1b9   : > { %2312 = vst [vmem:[%s3169_s21 + $0x70] sm:$0xff] %v2292_v48   ;;  %v1686_v8 = vadd.f32 %v3159_v59, %v1647_v49  ;;  %v1648_v52 = vadd.f32 %v2649_v47, %v1132_v9 }
 0x1bb   : > { %v1687_v53 = vadd.f32 %v3159_v59, %v1648_v52  ;;  %v1718_v54 = vmax.f32 %v1686_v8, 0.0 }
 0x1bd   : > { %v1719_v55 = vmax.f32 %v1687_v53, 0.0 }
 0x1bf   : > { %v2297_v15 = vpack.c.bf16 %v1719_v55, %v1718_v54 }
 0x1c1   : > { %2313 = vst [vmem:[%s3169_s21 + $0x78] sm:$0xff] %v2297_v15  }
 0x1c2 PF: > { %s13_s12 = sadd.s32 1, %s2837_s12  }
 0x1c3   : > { %p10_p4 = scmp.ge.s32.totalorder %s13_s12, 4  }
 0x1c5   :  { %12 = sbr.rel (!%p10_p4) target bundleno = 1 (0x1), region = 64 }

// kernel: _lambda_.10
= control target key start
LH: loop header
LB: loop body
LE: loop exit
PB: predicated region body
PF: predicated region fallthrough
CT: control target
= control target key end

     0   :  { %s1216_s12 = smov 0   ;;  %s1218_s13 = smov 0   ;;  %s1351_s0 = inlined_call_operand.vmem [shape: bf16[1024,32], index: 0, kind: input, shape index: {}]   ;;  %s1352_s1 = inlined_call_operand.vmem [shape: bf16[32,128], index: 1, kind: input, shape index: {}]   ;;  %s1353_s2 = inlined_call_operand.vmem [shape: f32[1,128], index: 2, kind: input, shape index: {}]   ;;  %s1354_s3 = inlined_call_operand.vmem [shape: bf16[1024,128], index: 3, kind: output, shape index: {}]  }
   0x1   :  { %s1220_s14 = smov 0  }
   0x2 LB: > { %s25_s15 = sadd.s32 1, %s1190_s13  ;;  %p871_p0 = scmp.ge.s32.totalorder %s1194_s14, 1  ;;  %s1194_s14 = sphi %s1220_s14, %s13_s14   ;;  %s1190_s13 = sphi %s1218_s13, %s1356_s13   ;;  %s1186_s12 = sphi %s1216_s12, %s1355_s12  }
   0x3   : > { %p27_p1 = scmp.ge.s32.totalorder %s25_s15, 4  ;;  %p169_p2 = scmp.lt.s32.totalorder %s1194_s14, 5 }
   0x5   : > { %s1358_s15 = smov (%p27_p1, %s25_s15), 0  ;;  %p170_p3 = pnand %p871_p0, %p169_p2 }
   0x6   : > { %v1154_v0 = vld [vmem:[%s1352_s1] sm:$0xff] (!%p170_p3)   ;;  %s872_s18 = sshll.u32 (!%p170_p3), %s1186_s12, 5  ;;  %v1155_v1 = vld [vmem:[%s1352_s1 + $0x8] sm:$0xff] (!%p170_p3)   ;;  %vm361_vm0 = vcmask (!%p170_p3), 261120  }
   0x7   : > { %173 = sbr.rel (%p170_p3) target bundleno = 266 (0x10a), region = 32  ;;  %p204_p4 = scmp.lt.s32.totalorder (!%p170_p3), %s872_s18, 127  ;;  %1090 = vmatprep.subr.bf16.mxu0 (!%p170_p3), %v1154_v0  ;;  %1126 = vmatprep.subr.bf16.mxu1 (!%p170_p3), %v1154_v0  ;;  %v1285_v18 = vld [vmem:[%s1353_s2] ss:$0 sm:$0xff] (!%p170_p3) }
   0x8   : > { %1091 = vmatpush3.bf16.msra.mxu0 (!%p170_p3), %v1154_v0  ;;  %1128 = vmatpush3.bf16.msra.mxu1 (!%p170_p3), %v1154_v0 }
   0x9   : > { %1092 = vmatprep.subr.bf16.mxu0 (!%p170_p3), %v1155_v1  ;;  %1127 = vmatprep.subr.bf16.mxu1 (!%p170_p3), %v1155_v1 }
   0xc   : > { %1093 = vmatpush3.bf16.msra.mxu0 (!%p170_p3), %v1155_v1  ;;  %1129 = vmatpush3.bf16.msra.mxu1 (!%p170_p3), %v1155_v1 }
   0xe   : > { %s1360_s18 = smov (!%p204_p4, %s872_s18), 127 }
   0xf   : > { %s873_s21 = sshll.u32 %s1360_s18, 2 }
  0x10   : > { %s1248_s24 = scalar_lea.vmem %s1351_s0, %s873_s21  ;;  %s1300_s29 = scalar_lea.vmem %s1354_s3, %s873_s21 }
  0x11   : > { %v1156_v2 = vld [vmem:[%s1248_s24] sm:$0xff]   ;;  %v1158_v4 = vld [vmem:[%s1248_s24 + $0x8] sm:$0xff]   ;;  %v1160_v6 = vld [vmem:[%s1248_s24 + $0x10] sm:$0xff]  }
  0x12   : > { %v1157_v3 = vld [vmem:[%s1248_s24 + $0x40] sm:$0xff]   ;;  %1094 = vmatprep.mubr.msk.bf16.mxu0 %vm361_vm0, %v1156_v2  ;;  %v1159_v5 = vld [vmem:[%s1248_s24 + $0x48] sm:$0xff]   ;;  %v1161_v7 = vld [vmem:[%s1248_s24 + $0x50] sm:$0xff]  }
  0x13   : > { %1110 = vmatprep.mubr.msk.bf16.mxu1 %vm361_vm0, %v1157_v3  ;;  %1095 = vmatmul.mubr.msk.bf16.vlgmr.msra.gmra.mrb[0].mxu0 %vm361_vm0, %v1158_v4  ;;  %v1162_v8 = vld [vmem:[%s1248_s24 + $0x18] sm:$0xff]   ;;  %v1164_v10 = vld [vmem:[%s1248_s24 + $0x20] sm:$0xff]   ;;  %v1166_v12 = vld [vmem:[%s1248_s24 + $0x28] sm:$0xff]  }
  0x14   : > { %1111 = vmatmul.mubr.msk.bf16.vlgmr.msra.gmra.mrb[0].mxu1 %vm361_vm0, %v1159_v5  ;;  %1098 = vmatprep.mubr.msk.bf16.mxu0 %vm361_vm0, %v1160_v6  ;;  %v1163_v9 = vld [vmem:[%s1248_s24 + $0x58] sm:$0xff]   ;;  %v1165_v11 = vld [vmem:[%s1248_s24 + $0x60] sm:$0xff]   ;;  %v1167_v13 = vld [vmem:[%s1248_s24 + $0x68] sm:$0xff]  }
  0x15   : > { %1114 = vmatprep.mubr.msk.bf16.mxu1 %vm361_vm0, %v1161_v7  ;;  %v1168_v14 = vld [vmem:[%s1248_s24 + $0x30] sm:$0xff]   ;;  %v1170_v16 = vld [vmem:[%s1248_s24 + $0x38] sm:$0xff]  }
  0x16   : > { %v1169_v15 = vld [vmem:[%s1248_s24 + $0x70] sm:$0xff]   ;;  %v1171_v17 = vld [vmem:[%s1248_s24 + $0x78] sm:$0xff]  }
  0x1b   : > { %1099 = vmatmul.mubr.msk.bf16.gmra.mrb[4].mxu0 %vm361_vm0, %v1162_v8 }
  0x1c   : > { %1115 = vmatmul.mubr.msk.bf16.gmra.mrb[4].mxu1 %vm361_vm0, %v1163_v9  ;;  %1102 = vmatprep.mubr.msk.bf16.mxu0 %vm361_vm0, %v1164_v10 }
  0x1d   : > { %1118 = vmatprep.mubr.msk.bf16.mxu1 %vm361_vm0, %v1165_v11 }
  0x23   : > { %1103 = vmatmul.mubr.msk.bf16.gmra.mrb[8].mxu0 %vm361_vm0, %v1166_v12 }
  0x24   : > { %1119 = vmatmul.mubr.msk.bf16.gmra.mrb[8].mxu1 %vm361_vm0, %v1167_v13  ;;  %1106 = vmatprep.mubr.msk.bf16.mxu0 %vm361_vm0, %v1168_v14 }
  0x25   : > { %1122 = vmatprep.mubr.msk.bf16.mxu1 %vm361_vm0, %v1169_v15 }
  0x2b   : > { %1107 = vmatmul.mubr.msk.bf16.gmra.mrb[12].mxu0 %vm361_vm0, %v1170_v16 }
  0x2c   : > { %1123 = vmatmul.mubr.msk.bf16.gmra.mrb[12].mxu1 %vm361_vm0, %v1171_v17 }
  0xe6   : > { %v1096_v19 = vpop.f32.mrb[0].mxu0 }
  0xe7   : > { %v453_v20 = vadd.f32 %v1096_v19, %v1285_v18  ;;  %v1112_v21 = vpop.f32.mrb[0].mxu1  ;;  %v444_v22 = vpop.f32.mrb[1].mxu0 }
  0xe8   : > { %v517_v23 = vadd.f32 %v1112_v21, %v1285_v18  ;;  %v445_v24 = vadd.f32 %v1285_v18, %v444_v22  ;;  %v508_v25 = vpop.f32.mrb[1].mxu1  ;;  %v1097_v26 = vpop.f32.mrb[2].mxu0 }
  0xe9   : > { %v509_v27 = vadd.f32 %v1285_v18, %v508_v25  ;;  %v456_v28 = vadd.f32 %v1097_v26, %v1285_v18  ;;  %v1113_v29 = vpop.f32.mrb[2].mxu1  ;;  %v447_v30 = vpop.f32.mrb[3].mxu0  ;;  %v573_v34 = vmax.f32 %v453_v20, 0.0 }
  0xea   : > { %v520_v31 = vadd.f32 %v1113_v29, %v1285_v18  ;;  %v448_v32 = vadd.f32 %v1285_v18, %v447_v30  ;;  %v511_v33 = vpop.f32.mrb[3].mxu1  ;;  %v589_v37 = vmax.f32 %v517_v23, 0.0  ;;  %v571_v38 = vmax.f32 %v445_v24, 0.0 }
  0xeb   : > { %v574_v35 = vmax.f32 %v456_v28, 0.0  ;;  %v512_v36 = vadd.f32 %v1285_v18, %v511_v33  ;;  %v587_v41 = vmax.f32 %v509_v27, 0.0 }
  0xec   : > { %v590_v39 = vmax.f32 %v520_v31, 0.0  ;;  %v572_v40 = vmax.f32 %v448_v32, 0.0 }
  0xed   : > { %v985_v42 = vpack.c.bf16 %v574_v35, %v573_v34  ;;  %v588_v43 = vmax.f32 %v512_v36, 0.0 }
  0xee   : > { %v1025_v44 = vpack.c.bf16 %v590_v39, %v589_v37  ;;  %v980_v45 = vpack.c.bf16 %v572_v40, %v571_v38  ;;  %v1100_v46 = vpop.f32.mrb[4].mxu0 }
  0xef   : > { %1057 = vst [vmem:[%s1300_s29 + $0x8] sm:$0xff] %v985_v42   ;;  %v1020_v47 = vpack.c.bf16 %v588_v43, %v587_v41  ;;  %v469_v48 = vadd.f32 %v1100_v46, %v1285_v18  ;;  %v1116_v49 = vpop.f32.mrb[4].mxu1  ;;  %v460_v50 = vpop.f32.mrb[5].mxu0 }
  0xf0   : > { %1065 = vst [vmem:[%s1300_s29 + $0x48] sm:$0xff] %v1025_v44   ;;  %981 = vst [vmem:[%s1300_s29] sm:$0xff] %v980_v45   ;;  %v533_v51 = vadd.f32 %v1116_v49, %v1285_v18  ;;  %v461_v52 = vadd.f32 %v1285_v18, %v460_v50  ;;  %v524_v53 = vpop.f32.mrb[5].mxu1  ;;  %v1101_v54 = vpop.f32.mrb[6].mxu0 }
  0xf1   : > { %1064 = vst [vmem:[%s1300_s29 + $0x40] sm:$0xff] %v1020_v47   ;;  %v525_v55 = vadd.f32 %v1285_v18, %v524_v53  ;;  %v472_v56 = vadd.f32 %v1101_v54, %v1285_v18  ;;  %v1117_v57 = vpop.f32.mrb[6].mxu1  ;;  %v463_v58 = vpop.f32.mrb[7].mxu0  ;;  %v577_v62 = vmax.f32 %v469_v48, 0.0 }
  0xf2   : > { %v536_v59 = vadd.f32 %v1117_v57, %v1285_v18  ;;  %v464_v60 = vadd.f32 %v1285_v18, %v463_v58  ;;  %v527_v61 = vpop.f32.mrb[7].mxu1  ;;  %v593_v1 = vmax.f32 %v533_v51, 0.0  ;;  %v575_v2 = vmax.f32 %v461_v52, 0.0 }
  0xf3   : > { %v578_v63 = vmax.f32 %v472_v56, 0.0  ;;  %v528_v0 = vadd.f32 %v1285_v18, %v527_v61  ;;  %v591_v5 = vmax.f32 %v525_v55, 0.0 }
  0xf4   : > { %v594_v3 = vmax.f32 %v536_v59, 0.0  ;;  %v576_v4 = vmax.f32 %v464_v60, 0.0 }
  0xf5   : > { %v995_v6 = vpack.c.bf16 %v578_v63, %v577_v62  ;;  %v592_v7 = vmax.f32 %v528_v0, 0.0 }
  0xf6   : > { %v1035_v8 = vpack.c.bf16 %v594_v3, %v593_v1  ;;  %v990_v9 = vpack.c.bf16 %v576_v4, %v575_v2  ;;  %v1104_v10 = vpop.f32.mrb[8].mxu0 }
  0xf7   : > { %1059 = vst [vmem:[%s1300_s29 + $0x18] sm:$0xff] %v995_v6   ;;  %v1030_v11 = vpack.c.bf16 %v592_v7, %v591_v5  ;;  %v485_v12 = vadd.f32 %v1104_v10, %v1285_v18  ;;  %v1120_v13 = vpop.f32.mrb[8].mxu1  ;;  %v476_v14 = vpop.f32.mrb[9].mxu0 }
  0xf8   : > { %1067 = vst [vmem:[%s1300_s29 + $0x58] sm:$0xff] %v1035_v8   ;;  %1058 = vst [vmem:[%s1300_s29 + $0x10] sm:$0xff] %v990_v9   ;;  %v549_v15 = vadd.f32 %v1120_v13, %v1285_v18  ;;  %v477_v16 = vadd.f32 %v1285_v18, %v476_v14  ;;  %v540_v17 = vpop.f32.mrb[9].mxu1  ;;  %v1105_v19 = vpop.f32.mrb[10].mxu0 }
  0xf9   : > { %1066 = vst [vmem:[%s1300_s29 + $0x50] sm:$0xff] %v1030_v11   ;;  %v541_v20 = vadd.f32 %v1285_v18, %v540_v17  ;;  %v488_v21 = vadd.f32 %v1105_v19, %v1285_v18  ;;  %v1121_v22 = vpop.f32.mrb[10].mxu1  ;;  %v479_v23 = vpop.f32.mrb[11].mxu0  ;;  %v581_v27 = vmax.f32 %v485_v12, 0.0 }
  0xfa   : > { %v552_v24 = vadd.f32 %v1121_v22, %v1285_v18  ;;  %v480_v25 = vadd.f32 %v1285_v18, %v479_v23  ;;  %v543_v26 = vpop.f32.mrb[11].mxu1  ;;  %v597_v30 = vmax.f32 %v549_v15, 0.0  ;;  %v579_v31 = vmax.f32 %v477_v16, 0.0 }
  0xfb   : > { %v582_v28 = vmax.f32 %v488_v21, 0.0  ;;  %v544_v29 = vadd.f32 %v1285_v18, %v543_v26  ;;  %v595_v34 = vmax.f32 %v541_v20, 0.0 }
  0xfc   : > { %v598_v32 = vmax.f32 %v552_v24, 0.0  ;;  %v580_v33 = vmax.f32 %v480_v25, 0.0 }
  0xfd   : > { %v1005_v35 = vpack.c.bf16 %v582_v28, %v581_v27  ;;  %v596_v36 = vmax.f32 %v544_v29, 0.0 }
  0xfe   : > { %v1045_v37 = vpack.c.bf16 %v598_v32, %v597_v30  ;;  %v1000_v38 = vpack.c.bf16 %v580_v33, %v579_v31  ;;  %v1108_v39 = vpop.f32.mrb[12].mxu0 }
  0xff   : > { %1061 = vst [vmem:[%s1300_s29 + $0x28] sm:$0xff] %v1005_v35   ;;  %v1040_v40 = vpack.c.bf16 %v596_v36, %v595_v34  ;;  %v501_v41 = vadd.f32 %v1108_v39, %v1285_v18  ;;  %v1124_v42 = vpop.f32.mrb[12].mxu1  ;;  %v492_v43 = vpop.f32.mrb[13].mxu0 }
 0x100   : > { %1069 = vst [vmem:[%s1300_s29 + $0x68] sm:$0xff] %v1045_v37   ;;  %1060 = vst [vmem:[%s1300_s29 + $0x20] sm:$0xff] %v1000_v38   ;;  %v565_v44 = vadd.f32 %v1124_v42, %v1285_v18  ;;  %v493_v45 = vadd.f32 %v1285_v18, %v492_v43  ;;  %v556_v46 = vpop.f32.mrb[13].mxu1  ;;  %v1109_v47 = vpop.f32.mrb[14].mxu0 }
 0x101   : > { %1068 = vst [vmem:[%s1300_s29 + $0x60] sm:$0xff] %v1040_v40   ;;  %v557_v48 = vadd.f32 %v1285_v18, %v556_v46  ;;  %v504_v49 = vadd.f32 %v1109_v47, %v1285_v18  ;;  %v1125_v50 = vpop.f32.mrb[14].mxu1  ;;  %v495_v51 = vpop.f32.mrb[15].mxu0  ;;  %v585_v55 = vmax.f32 %v501_v41, 0.0 }
 0x102   : > { %v568_v52 = vadd.f32 %v1125_v50, %v1285_v18  ;;  %v496_v53 = vadd.f32 %v1285_v18, %v495_v51  ;;  %v559_v54 = vpop.f32.mrb[15].mxu1  ;;  %v601_v58 = vmax.f32 %v565_v44, 0.0  ;;  %v583_v59 = vmax.f32 %v493_v45, 0.0 }
 0x103   : > { %v586_v56 = vmax.f32 %v504_v49, 0.0  ;;  %v560_v57 = vadd.f32 %v1285_v18, %v559_v54  ;;  %v599_v62 = vmax.f32 %v557_v48, 0.0 }
 0x104   : > { %v602_v60 = vmax.f32 %v568_v52, 0.0  ;;  %v584_v61 = vmax.f32 %v496_v53, 0.0 }
 0x105   : > { %v1015_v63 = vpack.c.bf16 %v586_v56, %v585_v55  ;;  %v600_v0 = vmax.f32 %v560_v57, 0.0 }
 0x106   : > { %v1055_v1 = vpack.c.bf16 %v602_v60, %v601_v58  ;;  %v1010_v2 = vpack.c.bf16 %v584_v61, %v583_v59 }
 0x107   : > { %1063 = vst [vmem:[%s1300_s29 + $0x38] sm:$0xff] %v1015_v63   ;;  %v1050_v3 = vpack.c.bf16 %v600_v0, %v599_v62 }
 0x108   : > { %1071 = vst [vmem:[%s1300_s29 + $0x78] sm:$0xff] %v1055_v1   ;;  %1062 = vst [vmem:[%s1300_s29 + $0x30] sm:$0xff] %v1010_v2  }
 0x109   : > { %1070 = vst [vmem:[%s1300_s29 + $0x70] sm:$0xff] %v1050_v3  }
 0x10a PF: > { %s13_s14 = sadd.s32 1, %s1194_s14   ;;  %s1355_s12 = smov %s1190_s13 }
 0x10b   : > { %p10_p5 = scmp.ge.s32.totalorder %s13_s14, 6   ;;  %s1356_s13 = smov %s1358_s15 }
 0x10d   :  { %12 = sbr.rel (!%p10_p5) target bundleno = 2 (0x2), region = 68 }

// kernel: _lambda_.11
= control target key start
LH: loop header
LB: loop body
LE: loop exit
PB: predicated region body
PF: predicated region fallthrough
CT: control target
= control target key end

     0   :  { %s1092_s12 = smov 0   ;;  %s1213_s0 = inlined_call_operand.vmem [shape: bf16[2,256,128], index: 0, kind: input, shape index: {}]   ;;  %s1214_s1 = inlined_call_operand.vmem [shape: bf16[1,128,128], index: 1, kind: input, shape index: {}]   ;;  %s1215_s2 = inlined_call_operand.vmem [shape: f32[1,128], index: 2, kind: input, shape index: {}]   ;;  %s1216_s3 = inlined_call_operand.vmem [shape: bf16[2,256,128], index: 3, kind: output, shape index: {}]  }
   0x1 LB: > { %s747_s13 = sadd.s32 4294967295, %s1070_s12   ;;  %p751_p0 = scmp.ge.s32.totalorder %s1070_s12, 1  ;;  %s1070_s12 = sphi %s1092_s12, %s13_s12  }
   0x2   : > { %p137_p1 = scmp.lt.s32.totalorder %s1070_s12, 3 }
   0x4   : > { %p138_p2 = pnand %p751_p0, %p137_p1 }
   0x5   : > { %v1040_v0 = vld [vmem:[%s1214_s1] sm:$0xff] (!%p138_p2)   ;;  %p161_p3 = scmp.lt.s32.totalorder (!%p138_p2), %s747_s13, 1  ;;  %v1041_v1 = vld [vmem:[%s1214_s1 + $0x8] sm:$0xff] (!%p138_p2)   ;;  %v1042_v2 = vld [vmem:[%s1214_s1 + $0x10] sm:$0xff] (!%p138_p2)  }
   0x6   : > { %141 = sbr.rel (%p138_p2) target bundleno = 282 (0x11a), region = 32  ;;  %968 = vmatprep.subr.bf16.mxu0 (!%p138_p2), %v1040_v0  ;;  %1016 = vmatprep.subr.bf16.mxu1 (!%p138_p2), %v1040_v0  ;;  %v1043_v3 = vld [vmem:[%s1214_s1 + $0x18] sm:$0xff] (!%p138_p2)   ;;  %v1044_v6 = vld [vmem:[%s1214_s1 + $0x20] sm:$0xff] (!%p138_p2)   ;;  %v1045_v7 = vld [vmem:[%s1214_s1 + $0x28] sm:$0xff] (!%p138_p2)  }
   0x7   : > { %969 = vmatpush3.bf16.msra.mxu0 (!%p138_p2), %v1040_v0  ;;  %1024 = vmatpush3.bf16.msra.mxu1 (!%p138_p2), %v1040_v0  ;;  %v1046_v8 = vld [vmem:[%s1214_s1 + $0x30] sm:$0xff] (!%p138_p2)   ;;  %v1047_v9 = vld [vmem:[%s1214_s1 + $0x38] sm:$0xff] (!%p138_p2)   ;;  %v1153_v25 = vld [vmem:[%s1215_s2] ss:$0 sm:$0xff] (!%p138_p2) }
   0x8   : > { %970 = vmatprep.subr.bf16.mxu0 (!%p138_p2), %v1041_v1  ;;  %1017 = vmatprep.subr.bf16.mxu1 (!%p138_p2), %v1041_v1 }
   0xb   : > { %971 = vmatpush3.bf16.msra.mxu0 (!%p138_p2), %v1041_v1  ;;  %1025 = vmatpush3.bf16.msra.mxu1 (!%p138_p2), %v1041_v1 }
   0xc   : > { %972 = vmatprep.subr.bf16.mxu0 (!%p138_p2), %v1042_v2  ;;  %1018 = vmatprep.subr.bf16.mxu1 (!%p138_p2), %v1042_v2 }
   0xd   : > { %s1218_s13 = smov (!%p161_p3, %s747_s13), 1 }
   0xe   : > { %s815_s20 = sshll.u32 %s1218_s13, 7 }
   0xf   : > { %s1117_s23 = scalar_lea.vmem %s1213_s0, %s815_s20  ;;  %973 = vmatpush3.bf16.msra.mxu0 %v1042_v2  ;;  %1026 = vmatpush3.bf16.msra.mxu1 %v1042_v2  ;;  %s1166_s11 = scalar_lea.vmem %s1216_s3, %s815_s20 }
  0x10   : > { %v1048_v4 = vld [vmem:[%s1117_s23] sm:$0xff]   ;;  %974 = vmatprep.subr.bf16.mxu0 %v1043_v3  ;;  %1019 = vmatprep.subr.bf16.mxu1 %v1043_v3  ;;  %v1050_v10 = vld [vmem:[%s1117_s23 + $0x8] sm:$0xff]   ;;  %v1052_v12 = vld [vmem:[%s1117_s23 + $0x10] sm:$0xff]  }
  0x11   : > { %v1049_v5 = vld [vmem:[%s1117_s23 + $0x40] sm:$0xff]   ;;  %984 = vmatprep.mubr.bf16.mxu0 %v1048_v4  ;;  %v1051_v11 = vld [vmem:[%s1117_s23 + $0x48] sm:$0xff]   ;;  %v1053_v13 = vld [vmem:[%s1117_s23 + $0x50] sm:$0xff]  }
  0x12   : > { %1000 = vmatprep.mubr.bf16.mxu1 %v1049_v5  ;;  %v1054_v14 = vld [vmem:[%s1117_s23 + $0x18] sm:$0xff]   ;;  %v1056_v16 = vld [vmem:[%s1117_s23 + $0x20] sm:$0xff]   ;;  %v1058_v18 = vld [vmem:[%s1117_s23 + $0x28] sm:$0xff]  }
  0x13   : > { %975 = vmatpush3.bf16.msra.mxu0 %v1043_v3  ;;  %1027 = vmatpush3.bf16.msra.mxu1 %v1043_v3  ;;  %v1055_v15 = vld [vmem:[%s1117_s23 + $0x58] sm:$0xff]   ;;  %v1057_v17 = vld [vmem:[%s1117_s23 + $0x60] sm:$0xff]   ;;  %v1059_v19 = vld [vmem:[%s1117_s23 + $0x68] sm:$0xff]  }
  0x14   : > { %976 = vmatprep.subr.bf16.mxu0 %v1044_v6  ;;  %1020 = vmatprep.subr.bf16.mxu1 %v1044_v6  ;;  %v1060_v20 = vld [vmem:[%s1117_s23 + $0x30] sm:$0xff]   ;;  %v1062_v22 = vld [vmem:[%s1117_s23 + $0x38] sm:$0xff]  }
  0x15   : > { %v1061_v21 = vld [vmem:[%s1117_s23 + $0x70] sm:$0xff]   ;;  %v1063_v23 = vld [vmem:[%s1117_s23 + $0x78] sm:$0xff]  }
  0x17   : > { %977 = vmatpush3.bf16.msra.mxu0 %v1044_v6  ;;  %1028 = vmatpush3.bf16.msra.mxu1 %v1044_v6 }
  0x18   : > { %978 = vmatprep.subr.bf16.mxu0 %v1045_v7  ;;  %1021 = vmatprep.subr.bf16.mxu1 %v1045_v7 }
  0x1b   : > { %979 = vmatpush3.bf16.msra.mxu0 %v1045_v7  ;;  %1029 = vmatpush3.bf16.msra.mxu1 %v1045_v7 }
  0x1c   : > { %980 = vmatprep.subr.bf16.mxu0 %v1046_v8  ;;  %1022 = vmatprep.subr.bf16.mxu1 %v1046_v8 }
  0x1f   : > { %981 = vmatpush3.bf16.msra.mxu0 %v1046_v8  ;;  %1030 = vmatpush3.bf16.msra.mxu1 %v1046_v8 }
  0x20   : > { %982 = vmatprep.subr.bf16.mxu0 %v1047_v9  ;;  %1023 = vmatprep.subr.bf16.mxu1 %v1047_v9 }
  0x23   : > { %983 = vmatpush3.bf16.msra.mxu0 %v1047_v9  ;;  %1031 = vmatpush3.bf16.msra.mxu1 %v1047_v9 }
  0x26   : > { %985 = vmatmul.mubr.bf16.vlgmr.msra.gmra.mrb[0].mxu0 %v1050_v10  ;;  %1001 = vmatmul.mubr.bf16.vlgmr.msra.gmra.mrb[0].mxu1 %v1051_v11 }
  0x27   : > { %988 = vmatprep.mubr.bf16.mxu0 %v1052_v12  ;;  %1004 = vmatprep.mubr.bf16.mxu1 %v1053_v13 }
  0x2e   : > { %989 = vmatmul.mubr.bf16.gmra.mrb[4].mxu0 %v1054_v14  ;;  %1005 = vmatmul.mubr.bf16.gmra.mrb[4].mxu1 %v1055_v15 }
  0x2f   : > { %992 = vmatprep.mubr.bf16.mxu0 %v1056_v16  ;;  %1008 = vmatprep.mubr.bf16.mxu1 %v1057_v17 }
  0x36   : > { %993 = vmatmul.mubr.bf16.gmra.mrb[8].mxu0 %v1058_v18  ;;  %1009 = vmatmul.mubr.bf16.gmra.mrb[8].mxu1 %v1059_v19 }
  0x37   : > { %996 = vmatprep.mubr.bf16.mxu0 %v1060_v20  ;;  %1012 = vmatprep.mubr.bf16.mxu1 %v1061_v21 }
  0x3e   : > { %997 = vmatmul.mubr.bf16.gmra.mrb[12].mxu0 %v1062_v22  ;;  %1013 = vmatmul.mubr.bf16.gmra.mrb[12].mxu1 %v1063_v23 }
  0xf9   : > { %v986_v24 = vpop.f32.mrb[0].mxu0  ;;  %v1002_v26 = vpop.f32.mrb[0].mxu1 }
  0xfa   : > { %v405_v27 = vpop.f32.mrb[1].mxu0  ;;  %v469_v28 = vpop.f32.mrb[1].mxu1  ;;  %v414_v31 = vadd.f32 %v986_v24, %v1153_v25  ;;  %v478_v32 = vadd.f32 %v1002_v26, %v1153_v25 }
  0xfb   : > { %v987_v29 = vpop.f32.mrb[2].mxu0  ;;  %v1003_v30 = vpop.f32.mrb[2].mxu1  ;;  %v406_v37 = vadd.f32 %v1153_v25, %v405_v27  ;;  %v470_v38 = vadd.f32 %v1153_v25, %v469_v28 }
  0xfc   : > { %v417_v33 = vadd.f32 %v987_v29, %v1153_v25  ;;  %v481_v34 = vadd.f32 %v1003_v30, %v1153_v25  ;;  %v408_v35 = vpop.f32.mrb[3].mxu0  ;;  %v472_v36 = vpop.f32.mrb[3].mxu1 }
  0xfd   : > { %v409_v39 = vadd.f32 %v1153_v25, %v408_v35  ;;  %v473_v40 = vadd.f32 %v1153_v25, %v472_v36 }
  0xfe   : > { %v857_v41 = vpack.c.bf16 %v417_v33, %v414_v31  ;;  %v897_v42 = vpack.c.bf16 %v481_v34, %v478_v32 }
  0xff   : > { %v852_v43 = vpack.c.bf16 %v409_v39, %v406_v37  ;;  %v892_v44 = vpack.c.bf16 %v473_v40, %v470_v38 }
 0x100   : > { %929 = vst [vmem:[%s1166_s11 + $0x8] sm:$0xff] %v857_v41   ;;  %937 = vst [vmem:[%s1166_s11 + $0x48] sm:$0xff] %v897_v42  }
 0x101   : > { %853 = vst [vmem:[%s1166_s11] sm:$0xff] %v852_v43   ;;  %936 = vst [vmem:[%s1166_s11 + $0x40] sm:$0xff] %v892_v44   ;;  %v990_v45 = vpop.f32.mrb[4].mxu0  ;;  %v1006_v46 = vpop.f32.mrb[4].mxu1 }
 0x102   : > { %v421_v47 = vpop.f32.mrb[5].mxu0  ;;  %v485_v48 = vpop.f32.mrb[5].mxu1  ;;  %v430_v51 = vadd.f32 %v990_v45, %v1153_v25  ;;  %v494_v52 = vadd.f32 %v1006_v46, %v1153_v25 }
 0x103   : > { %v991_v49 = vpop.f32.mrb[6].mxu0  ;;  %v1007_v50 = vpop.f32.mrb[6].mxu1  ;;  %v422_v57 = vadd.f32 %v1153_v25, %v421_v47  ;;  %v486_v58 = vadd.f32 %v1153_v25, %v485_v48 }
 0x104   : > { %v433_v53 = vadd.f32 %v991_v49, %v1153_v25  ;;  %v497_v54 = vadd.f32 %v1007_v50, %v1153_v25  ;;  %v424_v55 = vpop.f32.mrb[7].mxu0  ;;  %v488_v56 = vpop.f32.mrb[7].mxu1 }
 0x105   : > { %v425_v59 = vadd.f32 %v1153_v25, %v424_v55  ;;  %v489_v60 = vadd.f32 %v1153_v25, %v488_v56 }
 0x106   : > { %v867_v61 = vpack.c.bf16 %v433_v53, %v430_v51  ;;  %v907_v62 = vpack.c.bf16 %v497_v54, %v494_v52 }
 0x107   : > { %v862_v63 = vpack.c.bf16 %v425_v59, %v422_v57  ;;  %v902_v0 = vpack.c.bf16 %v489_v60, %v486_v58 }
 0x108   : > { %931 = vst [vmem:[%s1166_s11 + $0x18] sm:$0xff] %v867_v61   ;;  %939 = vst [vmem:[%s1166_s11 + $0x58] sm:$0xff] %v907_v62  }
 0x109   : > { %930 = vst [vmem:[%s1166_s11 + $0x10] sm:$0xff] %v862_v63   ;;  %938 = vst [vmem:[%s1166_s11 + $0x50] sm:$0xff] %v902_v0   ;;  %v994_v1 = vpop.f32.mrb[8].mxu0  ;;  %v1010_v2 = vpop.f32.mrb[8].mxu1 }
 0x10a   : > { %v437_v3 = vpop.f32.mrb[9].mxu0  ;;  %v501_v4 = vpop.f32.mrb[9].mxu1  ;;  %v446_v7 = vadd.f32 %v994_v1, %v1153_v25  ;;  %v510_v8 = vadd.f32 %v1010_v2, %v1153_v25 }
 0x10b   : > { %v995_v5 = vpop.f32.mrb[10].mxu0  ;;  %v1011_v6 = vpop.f32.mrb[10].mxu1  ;;  %v438_v13 = vadd.f32 %v1153_v25, %v437_v3  ;;  %v502_v14 = vadd.f32 %v1153_v25, %v501_v4 }
 0x10c   : > { %v449_v9 = vadd.f32 %v995_v5, %v1153_v25  ;;  %v513_v10 = vadd.f32 %v1011_v6, %v1153_v25  ;;  %v440_v11 = vpop.f32.mrb[11].mxu0  ;;  %v504_v12 = vpop.f32.mrb[11].mxu1 }
 0x10d   : > { %v441_v15 = vadd.f32 %v1153_v25, %v440_v11  ;;  %v505_v16 = vadd.f32 %v1153_v25, %v504_v12 }
 0x10e   : > { %v877_v17 = vpack.c.bf16 %v449_v9, %v446_v7  ;;  %v917_v18 = vpack.c.bf16 %v513_v10, %v510_v8 }
 0x10f   : > { %v872_v19 = vpack.c.bf16 %v441_v15, %v438_v13  ;;  %v912_v20 = vpack.c.bf16 %v505_v16, %v502_v14 }
 0x110   : > { %933 = vst [vmem:[%s1166_s11 + $0x28] sm:$0xff] %v877_v17   ;;  %941 = vst [vmem:[%s1166_s11 + $0x68] sm:$0xff] %v917_v18  }
 0x111   : > { %932 = vst [vmem:[%s1166_s11 + $0x20] sm:$0xff] %v872_v19   ;;  %940 = vst [vmem:[%s1166_s11 + $0x60] sm:$0xff] %v912_v20   ;;  %v998_v21 = vpop.f32.mrb[12].mxu0  ;;  %v1014_v22 = vpop.f32.mrb[12].mxu1 }
 0x112   : > { %v453_v23 = vpop.f32.mrb[13].mxu0  ;;  %v517_v24 = vpop.f32.mrb[13].mxu1  ;;  %v462_v28 = vadd.f32 %v998_v21, %v1153_v25  ;;  %v526_v29 = vadd.f32 %v1014_v22, %v1153_v25 }
 0x113   : > { %v999_v26 = vpop.f32.mrb[14].mxu0  ;;  %v1015_v27 = vpop.f32.mrb[14].mxu1  ;;  %v454_v34 = vadd.f32 %v1153_v25, %v453_v23  ;;  %v518_v35 = vadd.f32 %v1153_v25, %v517_v24 }
 0x114   : > { %v465_v30 = vadd.f32 %v999_v26, %v1153_v25  ;;  %v529_v31 = vadd.f32 %v1015_v27, %v1153_v25  ;;  %v456_v32 = vpop.f32.mrb[15].mxu0  ;;  %v520_v33 = vpop.f32.mrb[15].mxu1 }
 0x115   : > { %v457_v36 = vadd.f32 %v1153_v25, %v456_v32  ;;  %v521_v37 = vadd.f32 %v1153_v25, %v520_v33 }
 0x116   : > { %v887_v38 = vpack.c.bf16 %v465_v30, %v462_v28  ;;  %v927_v39 = vpack.c.bf16 %v529_v31, %v526_v29 }
 0x117   : > { %v882_v40 = vpack.c.bf16 %v457_v36, %v454_v34  ;;  %v922_v41 = vpack.c.bf16 %v521_v37, %v518_v35 }
 0x118   : > { %935 = vst [vmem:[%s1166_s11 + $0x38] sm:$0xff] %v887_v38   ;;  %943 = vst [vmem:[%s1166_s11 + $0x78] sm:$0xff] %v927_v39  }
 0x119   : > { %934 = vst [vmem:[%s1166_s11 + $0x30] sm:$0xff] %v882_v40   ;;  %942 = vst [vmem:[%s1166_s11 + $0x70] sm:$0xff] %v922_v41  }
 0x11a PF: > { %s13_s12 = sadd.s32 1, %s1070_s12  }
 0x11b   : > { %p10_p4 = scmp.ge.s32.totalorder %s13_s12, 4  }
 0x11d   :  { %12 = sbr.rel (!%p10_p4) target bundleno = 1 (0x1), region = 62 }

// kernel: _lambda_.14
= control target key start
LH: loop header
LB: loop body
LE: loop exit
PB: predicated region body
PF: predicated region fallthrough
CT: control target
= control target key end

     0   :  { %s6906_s12 = smov 0   ;;  %s6908_s13 = smov 0   ;;  %s8497_s0 = inlined_call_operand.vmem [shape: bf16[512,1152], index: 0, kind: input, shape index: {}]   ;;  %s8498_s1 = inlined_call_operand.vmem [shape: bf16[1152,384], index: 1, kind: input, shape index: {}]   ;;  %s8499_s2 = inlined_call_operand.vmem [shape: f32[1,384], index: 2, kind: input, shape index: {}]   ;;  %s8500_s3 = inlined_call_operand.vmem [shape: bf16[512,384], index: 3, kind: output, shape index: {}]  }
   0x1   :  { %s6910_s14 = smov 0  }
   0x2 LB: > { %s25_s15 = sadd.s32 1, %s6879_s13  ;;  %p4964_p0 = scmp.ge.s32.totalorder %s6883_s14, 1  ;;  %s6883_s14 = sphi %s6910_s14, %s13_s14   ;;  %s6879_s13 = sphi %s6908_s13, %s8535_s13   ;;  %s6875_s12 = sphi %s6906_s12, %s8534_s12  }
   0x3   : > { %p27_p1 = scmp.ge.s32.totalorder %s25_s15, 2  ;;  %p174_p2 = scmp.lt.s32.totalorder %s6883_s14, 3 }
   0x5   : > { %s8537_s15 = smov (%p27_p1, %s25_s15), 0  ;;  %p175_p3 = pnand %p4964_p0, %p174_p2 }
   0x7   : > { %178 = sbr.rel (%p175_p3) target bundleno = 886 (0x376), region = 32 }
   0xe   : > { %v6342_v0 = vld [vmem:[%s8498_s1 + $0x4] ss:$12 sps:$4 sm:$0xff]   ;;  %v8501_v2 = vmov 0   ;;  %v6346_v3 = vld [vmem:[%s8498_s1] ss:$12 sps:$4 sm:$0xff]   ;;  %s4965_s7 = sshll.u32 %s6875_s12, 5 }
   0xf   : > { %v6344_v1 = vld [vmem:[%s8498_s1 + $0x604] ss:$12 sps:$4 sm:$0xff]   ;;  %3501 = vmatprep.mubr.bf16.mxu1 %v8501_v2  ;;  %2597 = vmatprep.subr.bf16.mxu0 %v6342_v0  ;;  %v6347_v4 = vld [vmem:[%s8498_s1 + $0x600] ss:$12 sps:$4 sm:$0xff]   ;;  %v6348_v5 = vld [vmem:[%s8498_s1 + $0x1c] ss:$12 sps:$4 sm:$0xff]  }
  0x10   : > { %5979 = vmatprep.subr.bf16.mxu1 %v6344_v1  ;;  %2598 = vmatpush1.bf16.msra.mxu0 %v6346_v3  ;;  %v6350_v6 = vld [vmem:[%s8498_s1 + $0x61c] ss:$12 sps:$4 sm:$0xff]   ;;  %v6352_v7 = vld [vmem:[%s8498_s1 + $0x18] ss:$12 sps:$4 sm:$0xff]   ;;  %v6354_v9 = vld [vmem:[%s8498_s1 + $0x34] ss:$12 sps:$4 sm:$0xff]  }
  0x11   : > { %5987 = vmatpush1.bf16.msra.mxu1 %v6347_v4  ;;  %2599 = vmatprep.subr.bf16.mxu0 %v6348_v5  ;;  %v6353_v8 = vld [vmem:[%s8498_s1 + $0x618] ss:$12 sps:$4 sm:$0xff]   ;;  %v6356_v10 = vld [vmem:[%s8498_s1 + $0x634] ss:$12 sps:$4 sm:$0xff]   ;;  %v6358_v11 = vld [vmem:[%s8498_s1 + $0x30] ss:$12 sps:$4 sm:$0xff]  }
  0x12   : > { %5980 = vmatprep.subr.bf16.mxu1 %v6350_v6  ;;  %v6359_v12 = vld [vmem:[%s8498_s1 + $0x630] ss:$12 sps:$4 sm:$0xff]   ;;  %v6360_v13 = vld [vmem:[%s8498_s1 + $0x4c] ss:$12 sps:$4 sm:$0xff]   ;;  %p214_p4 = scmp.lt.s32.totalorder %s4965_s7, 63 }
  0x13   : > { %v6362_v14 = vld [vmem:[%s8498_s1 + $0x64c] ss:$12 sps:$4 sm:$0xff]   ;;  %v6364_v15 = vld [vmem:[%s8498_s1 + $0x48] ss:$12 sps:$4 sm:$0xff]   ;;  %v6366_v17 = vld [vmem:[%s8498_s1 + $0x64] ss:$12 sps:$4 sm:$0xff]  }
  0x14   : > { %2600 = vmatpush1.bf16.msra.mxu0 %v6352_v7  ;;  %v6365_v16 = vld [vmem:[%s8498_s1 + $0x648] ss:$12 sps:$4 sm:$0xff]   ;;  %v6368_v18 = vld [vmem:[%s8498_s1 + $0x664] ss:$12 sps:$4 sm:$0xff]   ;;  %s8539_s7 = smov (!%p214_p4, %s4965_s7), 63 }
  0x15   : > { %5988 = vmatpush1.bf16.msra.mxu1 %v6353_v8  ;;  %2601 = vmatprep.subr.bf16.mxu0 %v6354_v9  ;;  %v6370_v19 = vld [vmem:[%s8498_s1 + $0x60] ss:$12 sps:$4 sm:$0xff]   ;;  %v6372_v21 = vld [vmem:[%s8498_s1 + $0x7c] ss:$12 sps:$4 sm:$0xff]   ;;  %s6315_s11 = smul.u32 36, %s8539_s7 }
  0x16   : > { %5981 = vmatprep.subr.bf16.mxu1 %v6356_v10  ;;  %v6371_v20 = vld [vmem:[%s8498_s1 + $0x660] ss:$12 sps:$4 sm:$0xff]   ;;  %v6374_v22 = vld [vmem:[%s8498_s1 + $0x67c] ss:$12 sps:$4 sm:$0xff]   ;;  %v6376_v23 = vld [vmem:[%s8498_s1 + $0x78] ss:$12 sps:$4 sm:$0xff]  }
  0x17   : > { %v6377_v24 = vld [vmem:[%s8498_s1 + $0x678] ss:$12 sps:$4 sm:$0xff]   ;;  %v6378_v25 = vld [vmem:[%s8498_s1 + $0x94] ss:$12 sps:$4 sm:$0xff]   ;;  %s7012_s25 = scalar_lea.vmem %s8497_s0, %s6315_s11  ;;  %v6382_v27 = vld [vmem:[%s8498_s1 + $0x90] ss:$12 sps:$4 sm:$0xff]  }
  0x18   : > { %2602 = vmatpush1.bf16.msra.mxu0 %v6358_v11  ;;  %v6380_v26 = vld [vmem:[%s8498_s1 + $0x694] ss:$12 sps:$4 sm:$0xff]   ;;  %v6383_v28 = vld [vmem:[%s8498_s1 + $0x690] ss:$12 sps:$4 sm:$0xff]   ;;  %v6384_v29 = vld [vmem:[%s8498_s1 + $0xac] ss:$12 sps:$4 sm:$0xff]  }
  0x19   : > { %5989 = vmatpush1.bf16.msra.mxu1 %v6359_v12  ;;  %2603 = vmatprep.subr.bf16.mxu0 %v6360_v13  ;;  %v6386_v30 = vld [vmem:[%s8498_s1 + $0x6ac] ss:$12 sps:$4 sm:$0xff]   ;;  %v6388_v31 = vld [vmem:[%s8498_s1 + $0xa8] ss:$12 sps:$4 sm:$0xff]   ;;  %v6390_v33 = vld [vmem:[%s8498_s1 + $0xc4] ss:$12 sps:$4 sm:$0xff]  }
  0x1a   : > { %5982 = vmatprep.subr.bf16.mxu1 %v6362_v14  ;;  %v6389_v32 = vld [vmem:[%s8498_s1 + $0x6a8] ss:$12 sps:$4 sm:$0xff]   ;;  %v6394_v36 = vld [vmem:[%s8498_s1 + $0xc0] ss:$12 sps:$4 sm:$0xff]   ;;  %v6398_v40 = vld [vmem:[%s8498_s1 + $0xd8] ss:$12 sps:$4 sm:$0xff]  }
  0x1b   : > { %v6393_v34 = vld [vmem:[%s8498_s1 + $0xc8] ss:$12 sps:$4 sm:$0xff]   ;;  %v6399_v39 = vld [vmem:[%s8498_s1 + $0xe0] ss:$12 sps:$4 sm:$0xff]   ;;  %v6407_v43 = vld [vmem:[%s8498_s1 + $0xf8] ss:$12 sps:$4 sm:$0xff]  }
  0x1c   : > { %2604 = vmatpush1.bf16.msra.mxu0 %v6364_v15  ;;  %v6392_v35 = vld [vmem:[%s7012_s25 + $0x2f0] ss:$36 sps:$4 sm:$0xff]   ;;  %v6396_v38 = vld [vmem:[%s8498_s1 + $0xdc] ss:$12 sps:$4 sm:$0xff]   ;;  %v6400_v41 = vld [vmem:[%s8498_s1 + $0x20] ss:$12 sps:$4 sm:$0xff]  }
  0x1d   : > { %5990 = vmatpush1.bf16.msra.mxu1 %v6365_v16  ;;  %2605 = vmatprep.subr.bf16.mxu0 %v6366_v17  ;;  %v6395_v37 = vld [vmem:[%s8498_s1 + $0x8] ss:$12 sps:$4 sm:$0xff]   ;;  %v6403_v44 = vld [vmem:[%s7012_s25 + $0x338] ss:$36 sps:$4 sm:$0xff]   ;;  %v6410_v50 = vld [vmem:[%s8498_s1 + $0x124] ss:$12 sps:$4 sm:$0xff]  }
  0x1e   : > { %5983 = vmatprep.subr.bf16.mxu1 %v6368_v18  ;;  %v6401_v42 = vld [vmem:[%s8498_s1 + $0xf4] ss:$12 sps:$4 sm:$0xff]   ;;  %v6404_v45 = vld [vmem:[%s8498_s1 + $0xf0] ss:$12 sps:$4 sm:$0xff]   ;;  %v6409_v46 = vld [vmem:[%s8498_s1 + $0x38] ss:$12 sps:$4 sm:$0xff]  }
  0x1f   : > { %v6405_v47 = vld [vmem:[%s8498_s1 + $0x10c] ss:$12 sps:$4 sm:$0xff]   ;;  %v6414_v48 = vld [vmem:[%s8498_s1 + $0x110] ss:$12 sps:$4 sm:$0xff]   ;;  %v6408_v49 = vld [vmem:[%s8498_s1 + $0x108] ss:$12 sps:$4 sm:$0xff]  }
  0x20   : > { %2606 = vmatpush1.bf16.msra.mxu0 %v6370_v19  ;;  %v6415_v51 = vld [vmem:[%s8498_s1 + $0x50] ss:$12 sps:$4 sm:$0xff]   ;;  %v6412_v52 = vld [vmem:[%s7012_s25 + $0x380] ss:$36 sps:$4 sm:$0xff]   ;;  %v6422_v53 = vld [vmem:[%s8498_s1 + $0x128] ss:$12 sps:$4 sm:$0xff]  }
  0x21   : > { %5991 = vmatpush1.bf16.msra.mxu1 %v6371_v20  ;;  %2607 = vmatprep.subr.bf16.mxu0 %v6372_v21  ;;  %v6413_v54 = vld [vmem:[%s8498_s1 + $0x120] ss:$12 sps:$4 sm:$0xff]   ;;  %v6416_v55 = vld [vmem:[%s8498_s1 + $0x13c] ss:$12 sps:$4 sm:$0xff]   ;;  %v6418_v59 = vld [vmem:[%s8498_s1 + $0x138] ss:$12 sps:$4 sm:$0xff]  }
  0x22   : > { %5984 = vmatprep.subr.bf16.mxu1 %v6374_v22  ;;  %v6431_v56 = vld [vmem:[%s7012_s25 + $0x4] ss:$36 sps:$4 sm:$0xff]   ;;  %v6428_v58 = vld [vmem:[%s8498_s1 + $0x140] ss:$12 sps:$4 sm:$0xff]   ;;  %v6423_v0 = vld [vmem:[%s8498_s1 + $0x150] ss:$12 sps:$4 sm:$0xff]  }
  0x23   : > { %v6424_v57 = vld [vmem:[%s8498_s1 + $0x68] ss:$12 sps:$4 sm:$0xff]   ;;  %2629 = vmatprep.mubr.bf16.mxu0 %v6431_v56  ;;  %v6432_v61 = vld [vmem:[%s8498_s1 + $0x80] ss:$12 sps:$4 sm:$0xff]   ;;  %v6437_v63 = vld [vmem:[%s8498_s1 + $0x158] ss:$12 sps:$4 sm:$0xff]  }
  0x24   : > { %2608 = vmatpush1.bf16.msra.mxu0 %v6376_v23  ;;  %v6419_v60 = vld [vmem:[%s8498_s1 + $0x154] ss:$12 sps:$4 sm:$0xff]   ;;  %v6421_v62 = vld [vmem:[%s7012_s25 + $0x3c8] ss:$36 sps:$4 sm:$0xff]   ;;  %v6438_v3 = vld [vmem:[%s8498_s1 + $0x98] ss:$12 sps:$4 sm:$0xff]  }
  0x25   : > { %5992 = vmatpush1.bf16.msra.mxu1 %v6377_v24  ;;  %2609 = vmatprep.subr.bf16.mxu0 %v6378_v25  ;;  %v6425_v1 = vld [vmem:[%s8498_s1 + $0x16c] ss:$12 sps:$4 sm:$0xff]   ;;  %v6446_v4 = vld [vmem:[%s8498_s1 + $0x170] ss:$12 sps:$4 sm:$0xff]   ;;  %v6427_v5 = vld [vmem:[%s8498_s1 + $0x168] ss:$12 sps:$4 sm:$0xff]  }
  0x26   : > { %5985 = vmatprep.subr.bf16.mxu1 %v6380_v26  ;;  %v6429_v6 = vld [vmem:[%s7012_s25] ss:$36 sps:$4 sm:$0xff]   ;;  %v6447_v8 = vld [vmem:[%s8498_s1 + $0xb0] ss:$12 sps:$4 sm:$0xff]   ;;  %v6454_v10 = vld [vmem:[%s8498_s1 + $0x248] ss:$12 sps:$4 sm:$0xff]  }
  0x27   : > { %v6435_v7 = vld [vmem:[%s8498_s1 + $0x184] ss:$12 sps:$4 sm:$0xff]   ;;  %v6433_v9 = vld [vmem:[%s8498_s1 + $0x180] ss:$12 sps:$4 sm:$0xff]   ;;  %v6444_v13 = vld [vmem:[%s8498_s1 + $0x19c] ss:$12 sps:$4 sm:$0xff]  }
  0x28   : > { %2610 = vmatpush1.bf16.msra.mxu0 %v6382_v27  ;;  %v6436_v11 = vld [vmem:[%s7012_s25 + $0x410] ss:$36 sps:$4 sm:$0xff]   ;;  %v6442_v14 = vld [vmem:[%s8498_s1 + $0x198] ss:$12 sps:$4 sm:$0xff]   ;;  %v6441_v16 = vld [vmem:[%s7012_s25 + $0x48] ss:$36 sps:$4 sm:$0xff]  }
  0x29   : > { %5993 = vmatpush1.bf16.msra.mxu1 %v6383_v28  ;;  %2611 = vmatprep.subr.bf16.mxu0 %v6384_v29  ;;  %v6439_v12 = vld [vmem:[%s7012_s25 + $0x4c] ss:$36 sps:$4 sm:$0xff]   ;;  %v6453_v15 = vld [vmem:[%s8498_s1 + $0x1b4] ss:$12 sps:$4 sm:$0xff]   ;;  %v6445_v17 = vld [vmem:[%s7012_s25 + $0x458] ss:$36 sps:$4 sm:$0xff]  }
  0x2a   : > { %5986 = vmatprep.subr.bf16.mxu1 %v6386_v30  ;;  %v6448_v18 = vld [vmem:[%s7012_s25 + $0x94] ss:$36 sps:$4 sm:$0xff]   ;;  %v6451_v19 = vld [vmem:[%s8498_s1 + $0x1b0] ss:$12 sps:$4 sm:$0xff]   ;;  %v6468_v26 = vld [vmem:[%s8498_s1 + $0x260] ss:$12 sps:$4 sm:$0xff]  }
  0x2b   : > { %v6461_v20 = vld [vmem:[%s8498_s1 + $0x1cc] ss:$12 sps:$4 sm:$0xff]   ;;  %v6459_v21 = vld [vmem:[%s8498_s1 + $0x1c8] ss:$12 sps:$4 sm:$0xff]   ;;  %v6467_v22 = vld [vmem:[%s8498_s1 + $0x1e4] ss:$12 sps:$4 sm:$0xff]  }
  0x2c   : > { %2612 = vmatpush1.bf16.msra.mxu0 %v6388_v31  ;;  %v6450_v23 = vld [vmem:[%s7012_s25 + $0x90] ss:$36 sps:$4 sm:$0xff]   ;;  %v6456_v25 = vld [vmem:[%s7012_s25 + $0xdc] ss:$36 sps:$4 sm:$0xff]   ;;  %v6482_v30 = vld [vmem:[%s8498_s1 + $0x278] ss:$12 sps:$4 sm:$0xff]  }
  0x2d   : > { %5994 = vmatpush1.bf16.msra.mxu1 %v6389_v32  ;;  %2613 = vmatprep.subr.bf16.mxu0 %v6390_v33  ;;  %v6455_v24 = vld [vmem:[%s8498_s1 + $0x188] ss:$12 sps:$4 sm:$0xff]   ;;  %v6465_v27 = vld [vmem:[%s8498_s1 + $0x1e0] ss:$12 sps:$4 sm:$0xff]   ;;  %v6473_v31 = vld [vmem:[%s8498_s1 + $0x1f8] ss:$12 sps:$4 sm:$0xff]  }
  0x2e   : > { %5459 = vmatprep.subr.bf16.mxu1 %v6393_v34  ;;  %v6475_v28 = vld [vmem:[%s8498_s1 + $0x1fc] ss:$12 sps:$4 sm:$0xff]   ;;  %v6469_v29 = vld [vmem:[%s8498_s1 + $0x1a0] ss:$12 sps:$4 sm:$0xff]   ;;  %s6316_s22 = smul.u32 12, %s8539_s7 }
  0x2f   : > { %v6458_v32 = vld [vmem:[%s7012_s25 + $0xd8] ss:$36 sps:$4 sm:$0xff]   ;;  %v6462_v33 = vld [vmem:[%s7012_s25 + $0x124] ss:$36 sps:$4 sm:$0xff]  }
  0x30   : > { %3502 = vmatmul.mubr.bf16.vlgmr.msra.gmra.mrb[0].mxu1 %v6392_v35  ;;  %2614 = vmatpush1.bf16.msra.mxu0 %v6394_v36  ;;  %v6479_v34 = vld [vmem:[%s8498_s1 + $0x210] ss:$12 sps:$4 sm:$0xff]   ;;  %v6481_v35 = vld [vmem:[%s8498_s1 + $0x214] ss:$12 sps:$4 sm:$0xff]   ;;  %v6483_v36 = vld [vmem:[%s8498_s1 + $0x1b8] ss:$12 sps:$4 sm:$0xff]   ;;  %s8268_s24 = scalar_lea.vmem %s8500_s3, %s6316_s22 }
  0x31   : > { %5460 = vmatpush3.bf16.msra.mxu1 %v6395_v37  ;;  %2615 = vmatprep.subr.bf16.mxu0 %v6396_v38  ;;  %v6496_v37 = vld [vmem:[%s8498_s1 + $0x290] ss:$12 sps:$4 sm:$0xff]   ;;  %v6489_v38 = vld [vmem:[%s8498_s1 + $0x22c] ss:$12 sps:$4 sm:$0xff]  }
  0x32   : > { %5461 = vmatprep.subr.bf16.mxu1 %v6399_v39  ;;  %3511 = vmatprep.mubr.bf16.mxu1 %v8501_v2  ;;  %v6497_v39 = vld [vmem:[%s8498_s1 + $0x1d0] ss:$12 sps:$4 sm:$0xff]  }
  0x34   : > { %2616 = vmatpush1.bf16.msra.mxu0 %v6398_v40  ;;  %v6487_v40 = vld [vmem:[%s8498_s1 + $0x228] ss:$12 sps:$4 sm:$0xff]  }
  0x35   : > { %5462 = vmatpush3.bf16.msra.mxu1 %v6400_v41  ;;  %2617 = vmatprep.subr.bf16.mxu0 %v6401_v42  ;;  %v6510_v41 = vld [vmem:[%s8498_s1 + $0x2a8] ss:$12 sps:$4 sm:$0xff]   ;;  %v6464_v42 = vld [vmem:[%s7012_s25 + $0x120] ss:$36 sps:$4 sm:$0xff]  }
  0x36   : > { %5463 = vmatprep.subr.bf16.mxu1 %v6407_v43  ;;  %v6470_v43 = vld [vmem:[%s7012_s25 + $0x16c] ss:$36 sps:$4 sm:$0xff]  }
  0x38   : > { %3512 = vmatmul.mubr.bf16.gmra.mrb[4].mxu1 %v6403_v44  ;;  %2618 = vmatpush1.bf16.msra.mxu0 %v6404_v45  ;;  %v6495_v44 = vld [vmem:[%s8498_s1 + $0x244] ss:$12 sps:$4 sm:$0xff]   ;;  %v6511_v45 = vld [vmem:[%s8498_s1 + $0x1e8] ss:$12 sps:$4 sm:$0xff]  }
  0x39   : > { %5464 = vmatpush3.bf16.msra.mxu1 %v6409_v46  ;;  %2619 = vmatprep.subr.bf16.mxu0 %v6405_v47  ;;  %v6493_v46 = vld [vmem:[%s8498_s1 + $0x240] ss:$12 sps:$4 sm:$0xff]   ;;  %v6503_v47 = vld [vmem:[%s8498_s1 + $0x25c] ss:$12 sps:$4 sm:$0xff]  }
  0x3a   : > { %3521 = vmatprep.mubr.bf16.mxu1 %v8501_v2  ;;  %5465 = vmatprep.subr.bf16.mxu1 %v6414_v48  ;;  %v6524_v48 = vld [vmem:[%s8498_s1 + $0x2c0] ss:$12 sps:$4 sm:$0xff]  }
  0x3c   : > { %2620 = vmatpush1.bf16.msra.mxu0 %v6408_v49  ;;  %v6525_v49 = vld [vmem:[%s8498_s1 + $0x200] ss:$12 sps:$4 sm:$0xff]  }
  0x3d   : > { %5466 = vmatpush3.bf16.msra.mxu1 %v6415_v51  ;;  %2621 = vmatprep.subr.bf16.mxu0 %v6410_v50  ;;  %v6501_v50 = vld [vmem:[%s8498_s1 + $0x258] ss:$12 sps:$4 sm:$0xff]   ;;  %v6472_v51 = vld [vmem:[%s7012_s25 + $0x168] ss:$36 sps:$4 sm:$0xff]  }
  0x3e   : > { %5467 = vmatprep.subr.bf16.mxu1 %v6422_v53  ;;  %v6507_v53 = vld [vmem:[%s8498_s1 + $0x270] ss:$12 sps:$4 sm:$0xff]  }
  0x40   : > { %3522 = vmatmul.mubr.bf16.gmra.mrb[8].mxu1 %v6412_v52  ;;  %2622 = vmatpush1.bf16.msra.mxu0 %v6413_v54  ;;  %v6476_v52 = vld [vmem:[%s7012_s25 + $0x1b4] ss:$36 sps:$4 sm:$0xff]  }
  0x41   : > { %3531 = vmatprep.mubr.bf16.mxu1 %v8501_v2  ;;  %2623 = vmatprep.subr.bf16.mxu0 %v6416_v55  ;;  %v6509_v54 = vld [vmem:[%s8498_s1 + $0x274] ss:$12 sps:$4 sm:$0xff]   ;;  %v6517_v55 = vld [vmem:[%s8498_s1 + $0x28c] ss:$12 sps:$4 sm:$0xff]  }
  0x42   : > { %5468 = vmatpush3.bf16.msra.mxu1 %v6424_v57  ;;  %v6539_v57 = vld [vmem:[%s8498_s1 + $0x218] ss:$12 sps:$4 sm:$0xff]  }
  0x43   : > { %5469 = vmatprep.subr.bf16.mxu1 %v6428_v58  ;;  %v6515_v58 = vld [vmem:[%s8498_s1 + $0x288] ss:$12 sps:$4 sm:$0xff]  }
  0x44   : > { %2624 = vmatpush1.bf16.msra.mxu0 %v6418_v59  ;;  %v6478_v59 = vld [vmem:[%s7012_s25 + $0x1b0] ss:$36 sps:$4 sm:$0xff]  }
  0x45   : > { %2625 = vmatprep.subr.bf16.mxu0 %v6419_v60  ;;  %v6484_v60 = vld [vmem:[%s7012_s25 + $0x1fc] ss:$36 sps:$4 sm:$0xff]  }
  0x46   : > { %5470 = vmatpush3.bf16.msra.mxu1 %v6432_v61  ;;  %v6521_v61 = vld [vmem:[%s8498_s1 + $0x2a0] ss:$12 sps:$4 sm:$0xff]  }
  0x47   : > { %5471 = vmatprep.subr.bf16.mxu1 %v6437_v63  ;;  %v6531_v63 = vld [vmem:[%s8498_s1 + $0x2bc] ss:$12 sps:$4 sm:$0xff]  }
  0x48   : > { %3532 = vmatmul.mubr.bf16.gmra.mrb[12].mxu1 %v6421_v62  ;;  %2626 = vmatpush1.bf16.msra.mxu0 %v6423_v0  ;;  %v6523_v62 = vld [vmem:[%s8498_s1 + $0x2a4] ss:$12 sps:$4 sm:$0xff]  }
  0x49   : > { %3541 = vmatprep.mubr.bf16.mxu1 %v8501_v2  ;;  %2627 = vmatprep.subr.bf16.mxu0 %v6425_v1  ;;  %v6552_v0 = vld [vmem:[%s8498_s1 + $0x2f0] ss:$12 sps:$4 sm:$0xff]  }
  0x4a   : > { %5472 = vmatpush3.bf16.msra.mxu1 %v6438_v3  ;;  %v6553_v1 = vld [vmem:[%s8498_s1 + $0x230] ss:$12 sps:$4 sm:$0xff]   ;;  %v6529_v3 = vld [vmem:[%s8498_s1 + $0x2b8] ss:$12 sps:$4 sm:$0xff]  }
  0x4b   : > { %5473 = vmatprep.subr.bf16.mxu1 %v6446_v4  ;;  %v6486_v4 = vld [vmem:[%s7012_s25 + $0x1f8] ss:$36 sps:$4 sm:$0xff]  }
  0x4c   : > { %2628 = vmatpush1.bf16.msra.mxu0 %v6427_v5  ;;  %v6490_v5 = vld [vmem:[%s7012_s25 + $0x244] ss:$36 sps:$4 sm:$0xff]  }
  0x4d   : > { %2790 = vmatprep.subr.bf16.mxu0 %v6435_v7  ;;  %v6566_v7 = vld [vmem:[%s8498_s1 + $0x3c8] ss:$12 sps:$4 sm:$0xff]  }
  0x4e   : > { %5474 = vmatpush3.bf16.msra.mxu1 %v6447_v8  ;;  %v6535_v8 = vld [vmem:[%s8498_s1 + $0x2d0] ss:$12 sps:$4 sm:$0xff]  }
  0x4f   : > { %5571 = vmatprep.subr.bf16.mxu1 %v6454_v10  ;;  %2630 = vmatmul.mubr.bf16.vlgmr.msra.gmra.mrb[0].mxu0 %v6429_v6  ;;  %v6543_v10 = vld [vmem:[%s8498_s1 + $0x2e8] ss:$12 sps:$4 sm:$0xff]  }
  0x50   : > { %3542 = vmatmul.mubr.bf16.gmra.mrb[16].mxu1 %v6436_v11  ;;  %2791 = vmatpush1.bf16.msra.mxu0 %v6433_v9  ;;  %v6545_v9 = vld [vmem:[%s8498_s1 + $0x2ec] ss:$12 sps:$4 sm:$0xff]   ;;  %v6492_v11 = vld [vmem:[%s7012_s25 + $0x240] ss:$36 sps:$4 sm:$0xff]  }
  0x51   : > { %2639 = vmatprep.mubr.bf16.mxu0 %v6439_v12  ;;  %3551 = vmatprep.mubr.bf16.mxu1 %v8501_v2 }
  0x52   : > { %2792 = vmatprep.subr.bf16.mxu0 %v6444_v13  ;;  %v6551_v13 = vld [vmem:[%s8498_s1 + $0x304] ss:$12 sps:$4 sm:$0xff]  }
  0x54   : > { %2793 = vmatpush1.bf16.msra.mxu0 %v6442_v14  ;;  %v6500_v14 = vld [vmem:[%s7012_s25 + $0x288] ss:$36 sps:$4 sm:$0xff]  }
  0x55   : > { %2794 = vmatprep.subr.bf16.mxu0 %v6453_v15  ;;  %v6504_v15 = vld [vmem:[%s7012_s25 + $0x2d4] ss:$36 sps:$4 sm:$0xff]  }
  0x57   : > { %2640 = vmatmul.mubr.bf16.gmra.mrb[4].mxu0 %v6441_v16 }
  0x58   : > { %3552 = vmatmul.mubr.bf16.gmra.mrb[20].mxu1 %v6445_v17  ;;  %2649 = vmatprep.mubr.bf16.mxu0 %v6448_v18  ;;  %v6512_v17 = vld [vmem:[%s7012_s25 + $0x31c] ss:$36 sps:$4 sm:$0xff]  }
  0x59   : > { %3594 = vmatprep.mubr.bf16.mxu1 %v6431_v56  ;;  %2795 = vmatpush1.bf16.msra.mxu0 %v6451_v19  ;;  %v6538_v56 = vld [vmem:[%s8498_s1 + $0x2d8] ss:$12 sps:$4 sm:$0xff]  }
  0x5a   : > { %2796 = vmatprep.subr.bf16.mxu0 %v6461_v20  ;;  %v6518_v19 = vld [vmem:[%s7012_s25 + $0x364] ss:$36 sps:$4 sm:$0xff]  }
  0x5b   : > { %v6520_v20 = vld [vmem:[%s7012_s25 + $0x360] ss:$36 sps:$4 sm:$0xff]  }
  0x5d   : > { %2797 = vmatpush1.bf16.msra.mxu0 %v6459_v21  ;;  %v6526_v21 = vld [vmem:[%s7012_s25 + $0x3ac] ss:$36 sps:$4 sm:$0xff]  }
  0x5e   : > { %2798 = vmatprep.subr.bf16.mxu0 %v6467_v22  ;;  %v6528_v22 = vld [vmem:[%s7012_s25 + $0x3a8] ss:$36 sps:$4 sm:$0xff]  }
  0x5f   : > { %2650 = vmatmul.mubr.bf16.gmra.mrb[8].mxu0 %v6450_v23 }
  0x60   : > { %3595 = vmatmul.mubr.bf16.vlgmr.msra.gmra.mrb[24].mxu1 %v6429_v6  ;;  %2659 = vmatprep.mubr.bf16.mxu0 %v6456_v25  ;;  %v6537_v6 = vld [vmem:[%s8498_s1 + $0x2d4] ss:$12 sps:$4 sm:$0xff]  }
  0x61   : > { %5572 = vmatpush3.bf16.msra.mxu1 %v6455_v24  ;;  %3602 = vmatprep.mubr.bf16.mxu1 %v6439_v12  ;;  %v6498_v12 = vld [vmem:[%s7012_s25 + $0x28c] ss:$36 sps:$4 sm:$0xff]  }
  0x62   : > { %5573 = vmatprep.subr.bf16.mxu1 %v6468_v26  ;;  %2799 = vmatpush1.bf16.msra.mxu0 %v6465_v27  ;;  %v6534_v24 = vld [vmem:[%s7012_s25 + $0x3f0] ss:$36 sps:$4 sm:$0xff]   ;;  %v6542_v26 = vld [vmem:[%s7012_s25 + $0x438] ss:$36 sps:$4 sm:$0xff]  }
  0x63   : > { %2800 = vmatprep.subr.bf16.mxu0 %v6475_v28  ;;  %v6548_v27 = vld [vmem:[%s7012_s25 + $0xc] ss:$36 sps:$4 sm:$0xff]  }
  0x64   : > { %v6546_v28 = vld [vmem:[%s7012_s25 + $0x8] ss:$36 sps:$4 sm:$0xff]  }
  0x65   : > { %5574 = vmatpush3.bf16.msra.mxu1 %v6469_v29  ;;  %v6549_v29 = vld [vmem:[%s8498_s1 + $0x300] ss:$12 sps:$4 sm:$0xff]  }
  0x66   : > { %5575 = vmatprep.subr.bf16.mxu1 %v6482_v30  ;;  %2801 = vmatpush1.bf16.msra.mxu0 %v6473_v31  ;;  %v6554_v30 = vld [vmem:[%s7012_s25 + $0x54] ss:$36 sps:$4 sm:$0xff]   ;;  %v6559_v31 = vld [vmem:[%s8498_s1 + $0x31c] ss:$12 sps:$4 sm:$0xff]  }
  0x67   : > { %2660 = vmatmul.mubr.bf16.gmra.mrb[12].mxu0 %v6458_v32  ;;  %2802 = vmatprep.subr.bf16.mxu0 %v6481_v35  ;;  %v6560_v35 = vld [vmem:[%s7012_s25 + $0x9c] ss:$36 sps:$4 sm:$0xff]  }
  0x68   : > { %3603 = vmatmul.mubr.bf16.gmra.mrb[28].mxu1 %v6441_v16  ;;  %2669 = vmatprep.mubr.bf16.mxu0 %v6462_v33  ;;  %v6506_v16 = vld [vmem:[%s7012_s25 + $0x2d0] ss:$36 sps:$4 sm:$0xff]  }
  0x69   : > { %3610 = vmatprep.mubr.bf16.mxu1 %v6448_v18  ;;  %5576 = vmatpush3.bf16.msra.mxu1 %v6483_v36  ;;  %v6514_v18 = vld [vmem:[%s7012_s25 + $0x318] ss:$36 sps:$4 sm:$0xff]  }
  0x6a   : > { %2803 = vmatpush1.bf16.msra.mxu0 %v6479_v34  ;;  %5577 = vmatprep.subr.bf16.mxu1 %v6496_v37  ;;  %v6556_v34 = vld [vmem:[%s7012_s25 + $0x50] ss:$36 sps:$4 sm:$0xff]   ;;  %v6573_v37 = vld [vmem:[%s8498_s1 + $0x34c] ss:$12 sps:$4 sm:$0xff]  }
  0x6b   : > { %2804 = vmatprep.subr.bf16.mxu0 %v6489_v38  ;;  %v6563_v36 = vld [vmem:[%s8498_s1 + $0x330] ss:$12 sps:$4 sm:$0xff]   ;;  %v6571_v38 = vld [vmem:[%s8498_s1 + $0x348] ss:$12 sps:$4 sm:$0xff]  }
  0x6d   : > { %5578 = vmatpush3.bf16.msra.mxu1 %v6497_v39  ;;  %v6579_v39 = vld [vmem:[%s8498_s1 + $0x364] ss:$12 sps:$4 sm:$0xff]  }
  0x6e   : > { %2805 = vmatpush1.bf16.msra.mxu0 %v6487_v40  ;;  %5579 = vmatprep.subr.bf16.mxu1 %v6510_v41  ;;  %v6562_v40 = vld [vmem:[%s7012_s25 + $0x98] ss:$36 sps:$4 sm:$0xff]   ;;  %v6567_v41 = vld [vmem:[%s8498_s1 + $0x308] ss:$12 sps:$4 sm:$0xff]  }
  0x6f   : > { %2670 = vmatmul.mubr.bf16.gmra.mrb[16].mxu0 %v6464_v42  ;;  %2806 = vmatprep.subr.bf16.mxu0 %v6495_v44  ;;  %v6580_v44 = vld [vmem:[%s8498_s1 + $0x3e0] ss:$12 sps:$4 sm:$0xff]  }
  0x70   : > { %3611 = vmatmul.mubr.bf16.gmra.mrb[32].mxu1 %v6450_v23  ;;  %2679 = vmatprep.mubr.bf16.mxu0 %v6470_v43  ;;  %v6532_v23 = vld [vmem:[%s7012_s25 + $0x3f4] ss:$36 sps:$4 sm:$0xff]  }
  0x71   : > { %3618 = vmatprep.mubr.bf16.mxu1 %v6456_v25  ;;  %5580 = vmatpush3.bf16.msra.mxu1 %v6511_v45  ;;  %v6540_v25 = vld [vmem:[%s7012_s25 + $0x43c] ss:$36 sps:$4 sm:$0xff]  }
  0x72   : > { %2807 = vmatpush1.bf16.msra.mxu0 %v6493_v46  ;;  %5581 = vmatprep.subr.bf16.mxu1 %v6524_v48  ;;  %v6581_v45 = vld [vmem:[%s8498_s1 + $0x320] ss:$12 sps:$4 sm:$0xff]   ;;  %v6587_v46 = vld [vmem:[%s8498_s1 + $0x37c] ss:$12 sps:$4 sm:$0xff]   ;;  %v6594_v48 = vld [vmem:[%s8498_s1 + $0x3f8] ss:$12 sps:$4 sm:$0xff]  }
  0x73   : > { %2808 = vmatprep.subr.bf16.mxu0 %v6503_v47  ;;  %v6585_v47 = vld [vmem:[%s8498_s1 + $0x378] ss:$12 sps:$4 sm:$0xff]  }
  0x75   : > { %5582 = vmatpush3.bf16.msra.mxu1 %v6525_v49  ;;  %v6570_v49 = vld [vmem:[%s7012_s25 + $0xe0] ss:$36 sps:$4 sm:$0xff]  }
  0x76   : > { %2809 = vmatpush1.bf16.msra.mxu0 %v6501_v50  ;;  %5583 = vmatprep.subr.bf16.mxu1 %v6538_v56  ;;  %v6574_v50 = vld [vmem:[%s7012_s25 + $0x12c] ss:$36 sps:$4 sm:$0xff]  }
  0x77   : > { %2680 = vmatmul.mubr.bf16.gmra.mrb[20].mxu0 %v6472_v51  ;;  %2810 = vmatprep.subr.bf16.mxu0 %v6509_v54  ;;  %v6608_v54 = vld [vmem:[%s8498_s1 + $0x410] ss:$12 sps:$4 sm:$0xff]  }
  0x78   : > { %3619 = vmatmul.mubr.bf16.gmra.mrb[36].mxu1 %v6458_v32  ;;  %2689 = vmatprep.mubr.bf16.mxu0 %v6476_v52  ;;  %v6557_v32 = vld [vmem:[%s8498_s1 + $0x318] ss:$12 sps:$4 sm:$0xff]   ;;  %v6609_v56 = vld [vmem:[%s8498_s1 + $0x350] ss:$12 sps:$4 sm:$0xff]  }
  0x79   : > { %3626 = vmatprep.mubr.bf16.mxu1 %v6462_v33  ;;  %5584 = vmatpush3.bf16.msra.mxu1 %v6539_v57  ;;  %v6565_v33 = vld [vmem:[%s8498_s1 + $0x334] ss:$12 sps:$4 sm:$0xff]  }
  0x7a   : > { %2811 = vmatpush1.bf16.msra.mxu0 %v6507_v53  ;;  %5585 = vmatprep.subr.bf16.mxu1 %v6552_v0  ;;  %v6595_v53 = vld [vmem:[%s8498_s1 + $0x338] ss:$12 sps:$4 sm:$0xff]   ;;  %v6599_v57 = vld [vmem:[%s8498_s1 + $0x3a8] ss:$12 sps:$4 sm:$0xff]   ;;  %v6636_v0 = vld [vmem:[%s8498_s1 + $0x440] ss:$12 sps:$4 sm:$0xff]  }
  0x7b   : > { %2812 = vmatprep.subr.bf16.mxu0 %v6517_v55  ;;  %v6601_v55 = vld [vmem:[%s8498_s1 + $0x3ac] ss:$12 sps:$4 sm:$0xff]  }
  0x7d   : > { %5586 = vmatpush3.bf16.msra.mxu1 %v6553_v1  ;;  %v6615_v1 = vld [vmem:[%s8498_s1 + $0x3dc] ss:$12 sps:$4 sm:$0xff]  }
  0x7e   : > { %2813 = vmatpush1.bf16.msra.mxu0 %v6515_v58  ;;  %5683 = vmatprep.subr.bf16.mxu1 %v6566_v7  ;;  %v6622_v58 = vld [vmem:[%s8498_s1 + $0x428] ss:$12 sps:$4 sm:$0xff]   ;;  %v6588_v7 = vld [vmem:[%s7012_s25 + $0x1bc] ss:$36 sps:$4 sm:$0xff]  }
  0x7f   : > { %2690 = vmatmul.mubr.bf16.gmra.mrb[24].mxu0 %v6478_v59  ;;  %2814 = vmatprep.subr.bf16.mxu0 %v6523_v62  ;;  %v6605_v62 = vld [vmem:[%s8498_s1 + $0x3c0] ss:$12 sps:$4 sm:$0xff]  }
  0x80   : > { %3627 = vmatmul.mubr.bf16.gmra.mrb[40].mxu1 %v6464_v42  ;;  %2699 = vmatprep.mubr.bf16.mxu0 %v6484_v60  ;;  %v6568_v42 = vld [vmem:[%s7012_s25 + $0xe4] ss:$36 sps:$4 sm:$0xff]  }
  0x81   : > { %3634 = vmatprep.mubr.bf16.mxu1 %v6470_v43  ;;  %v6577_v43 = vld [vmem:[%s8498_s1 + $0x360] ss:$12 sps:$4 sm:$0xff]  }
  0x82   : > { %2815 = vmatpush1.bf16.msra.mxu0 %v6521_v61  ;;  %v6607_v61 = vld [vmem:[%s8498_s1 + $0x3c4] ss:$12 sps:$4 sm:$0xff]  }
  0x83   : > { %2816 = vmatprep.subr.bf16.mxu0 %v6531_v63  ;;  %v6623_v63 = vld [vmem:[%s8498_s1 + $0x368] ss:$12 sps:$4 sm:$0xff]  }
  0x86   : > { %2817 = vmatpush1.bf16.msra.mxu0 %v6529_v3  ;;  %v6637_v3 = vld [vmem:[%s8498_s1 + $0x380] ss:$12 sps:$4 sm:$0xff]  }
  0x87   : > { %2700 = vmatmul.mubr.bf16.gmra.mrb[28].mxu0 %v6486_v4  ;;  %2818 = vmatprep.subr.bf16.mxu0 %v6537_v6  ;;  %v6584_v6 = vld [vmem:[%s7012_s25 + $0x170] ss:$36 sps:$4 sm:$0xff]  }
  0x88   : > { %3635 = vmatmul.mubr.bf16.gmra.mrb[44].mxu1 %v6472_v51  ;;  %2709 = vmatprep.mubr.bf16.mxu0 %v6490_v5  ;;  %v6593_v51 = vld [vmem:[%s8498_s1 + $0x394] ss:$12 sps:$4 sm:$0xff]  }
  0x89   : > { %3642 = vmatprep.mubr.bf16.mxu1 %v6476_v52  ;;  %v6591_v52 = vld [vmem:[%s8498_s1 + $0x390] ss:$12 sps:$4 sm:$0xff]  }
  0x8a   : > { %2819 = vmatpush1.bf16.msra.mxu0 %v6535_v8  ;;  %v6621_v8 = vld [vmem:[%s8498_s1 + $0x3f4] ss:$12 sps:$4 sm:$0xff]  }
  0x8b   : > { %2820 = vmatprep.subr.bf16.mxu0 %v6545_v9  ;;  %v6619_v9 = vld [vmem:[%s8498_s1 + $0x3f0] ss:$12 sps:$4 sm:$0xff]  }
  0x8e   : > { %2821 = vmatpush1.bf16.msra.mxu0 %v6543_v10  ;;  %v6651_v10 = vld [vmem:[%s8498_s1 + $0x398] ss:$12 sps:$4 sm:$0xff]  }
  0x8f   : > { %2710 = vmatmul.mubr.bf16.gmra.mrb[32].mxu0 %v6492_v11  ;;  %2983 = vmatprep.subr.bf16.mxu0 %v6551_v13  ;;  %v6665_v13 = vld [vmem:[%s8498_s1 + $0x3b0] ss:$12 sps:$4 sm:$0xff]  }
  0x90   : > { %3643 = vmatmul.mubr.bf16.gmra.mrb[48].mxu1 %v6478_v59  ;;  %2719 = vmatprep.mubr.bf16.mxu0 %v6498_v12  ;;  %v6576_v59 = vld [vmem:[%s7012_s25 + $0x128] ss:$36 sps:$4 sm:$0xff]  }
  0x91   : > { %3650 = vmatprep.mubr.bf16.mxu1 %v6484_v60  ;;  %v6582_v60 = vld [vmem:[%s7012_s25 + $0x174] ss:$36 sps:$4 sm:$0xff]  }
  0x97   : > { %2720 = vmatmul.mubr.bf16.gmra.mrb[36].mxu0 %v6500_v14 }
  0x98   : > { %3651 = vmatmul.mubr.bf16.gmra.mrb[52].mxu1 %v6486_v4  ;;  %2729 = vmatprep.mubr.bf16.mxu0 %v6504_v15  ;;  %v6613_v4 = vld [vmem:[%s8498_s1 + $0x3d8] ss:$12 sps:$4 sm:$0xff]  }
  0x99   : > { %3658 = vmatprep.mubr.bf16.mxu1 %v6490_v5  ;;  %v6650_v5 = vld [vmem:[%s8498_s1 + $0x458] ss:$12 sps:$4 sm:$0xff]  }
  0x9f   : > { %2730 = vmatmul.mubr.bf16.gmra.mrb[40].mxu0 %v6506_v16 }
  0xa0   : > { %3659 = vmatmul.mubr.bf16.gmra.mrb[56].mxu1 %v6492_v11  ;;  %2739 = vmatprep.mubr.bf16.mxu0 %v6512_v17  ;;  %v6664_v11 = vld [vmem:[%s8498_s1 + $0x470] ss:$12 sps:$4 sm:$0xff]  }
  0xa1   : > { %3666 = vmatprep.mubr.bf16.mxu1 %v6498_v12  ;;  %v6629_v12 = vld [vmem:[%s8498_s1 + $0x40c] ss:$12 sps:$4 sm:$0xff]  }
  0xa7   : > { %2740 = vmatmul.mubr.bf16.gmra.mrb[44].mxu0 %v6514_v18 }
  0xa8   : > { %3667 = vmatmul.mubr.bf16.gmra.mrb[60].mxu1 %v6500_v14  ;;  %2749 = vmatprep.mubr.bf16.mxu0 %v6518_v19  ;;  %v6627_v14 = vld [vmem:[%s8498_s1 + $0x408] ss:$12 sps:$4 sm:$0xff]  }
  0xa9   : > { %3674 = vmatprep.mubr.bf16.mxu1 %v6504_v15  ;;  %v6678_v15 = vld [vmem:[%s8498_s1 + $0x548] ss:$12 sps:$4 sm:$0xff]  }
  0xaf   : > { %2750 = vmatmul.mubr.bf16.gmra.mrb[48].mxu0 %v6520_v20 }
  0xb0   : > { %3675 = vmatmul.mubr.bf16.gmra.mrb[64].mxu1 %v6506_v16  ;;  %2759 = vmatprep.mubr.bf16.mxu0 %v6526_v21  ;;  %v6590_v16 = vld [vmem:[%s7012_s25 + $0x1b8] ss:$36 sps:$4 sm:$0xff]  }
  0xb1   : > { %3682 = vmatprep.mubr.bf16.mxu1 %v6512_v17  ;;  %v6596_v17 = vld [vmem:[%s7012_s25 + $0x204] ss:$36 sps:$4 sm:$0xff]  }
  0xb7   : > { %2760 = vmatmul.mubr.bf16.gmra.mrb[52].mxu0 %v6528_v22 }
  0xb8   : > { %3683 = vmatmul.mubr.bf16.gmra.mrb[68].mxu1 %v6514_v18  ;;  %2769 = vmatprep.mubr.bf16.mxu0 %v6532_v23  ;;  %v6635_v18 = vld [vmem:[%s8498_s1 + $0x424] ss:$12 sps:$4 sm:$0xff]  }
  0xb9   : > { %3690 = vmatprep.mubr.bf16.mxu1 %v6518_v19  ;;  %v6633_v19 = vld [vmem:[%s8498_s1 + $0x420] ss:$12 sps:$4 sm:$0xff]  }
  0xbf   : > { %2770 = vmatmul.mubr.bf16.gmra.mrb[56].mxu0 %v6534_v24 }
  0xc0   : > { %3691 = vmatmul.mubr.bf16.gmra.mrb[72].mxu1 %v6520_v20  ;;  %2779 = vmatprep.mubr.bf16.mxu0 %v6540_v25  ;;  %v6643_v20 = vld [vmem:[%s8498_s1 + $0x43c] ss:$12 sps:$4 sm:$0xff]  }
  0xc1   : > { %3698 = vmatprep.mubr.bf16.mxu1 %v6526_v21 }
  0xc7   : > { %2780 = vmatmul.mubr.bf16.gmra.mrb[60].mxu0 %v6542_v26 }
  0xc8   : > { %3699 = vmatmul.mubr.bf16.gmra.mrb[76].mxu1 %v6528_v22  ;;  %2822 = vmatprep.mubr.bf16.mxu0 %v6548_v27  ;;  %v6641_v22 = vld [vmem:[%s8498_s1 + $0x438] ss:$12 sps:$4 sm:$0xff]  }
  0xc9   : > { %3706 = vmatprep.mubr.bf16.mxu1 %v6532_v23 }
  0xcf   : > { %2823 = vmatmul.mubr.bf16.vlgmr.msra.gmra.mrb[0].mxu0 %v6546_v28 }
  0xd0   : > { %3707 = vmatmul.mubr.bf16.gmra.mrb[80].mxu1 %v6534_v24  ;;  %2984 = vmatpush1.bf16.msra.mxu0 %v6549_v29  ;;  %v6598_v24 = vld [vmem:[%s7012_s25 + $0x200] ss:$36 sps:$4 sm:$0xff]   ;;  %v6647_v29 = vld [vmem:[%s8498_s1 + $0x450] ss:$12 sps:$4 sm:$0xff]  }
  0xd1   : > { %2832 = vmatprep.mubr.bf16.mxu0 %v6554_v30  ;;  %3714 = vmatprep.mubr.bf16.mxu1 %v6540_v25 }
  0xd2   : > { %2985 = vmatprep.subr.bf16.mxu0 %v6559_v31 }
  0xd4   : > { %2986 = vmatpush1.bf16.msra.mxu0 %v6557_v32  ;;  %v6655_v32 = vld [vmem:[%s8498_s1 + $0x468] ss:$12 sps:$4 sm:$0xff]  }
  0xd5   : > { %2987 = vmatprep.subr.bf16.mxu0 %v6565_v33 }
  0xd7   : > { %2833 = vmatmul.mubr.bf16.gmra.mrb[4].mxu0 %v6556_v34 }
  0xd8   : > { %3715 = vmatmul.mubr.bf16.gmra.mrb[84].mxu1 %v6542_v26  ;;  %2842 = vmatprep.mubr.bf16.mxu0 %v6560_v35  ;;  %v6602_v26 = vld [vmem:[%s7012_s25 + $0x24c] ss:$36 sps:$4 sm:$0xff]  }
  0xd9   : > { %3755 = vmatprep.mubr.bf16.mxu1 %v6548_v27  ;;  %2988 = vmatpush1.bf16.msra.mxu0 %v6563_v36  ;;  %v6610_v36 = vld [vmem:[%s7012_s25 + $0x294] ss:$36 sps:$4 sm:$0xff]  }
  0xda   : > { %2989 = vmatprep.subr.bf16.mxu0 %v6573_v37 }
  0xdd   : > { %2990 = vmatpush1.bf16.msra.mxu0 %v6571_v38  ;;  %v6663_v38 = vld [vmem:[%s8498_s1 + $0x484] ss:$12 sps:$4 sm:$0xff]  }
  0xde   : > { %2991 = vmatprep.subr.bf16.mxu0 %v6579_v39 }
  0xdf   : > { %2843 = vmatmul.mubr.bf16.gmra.mrb[8].mxu0 %v6562_v40 }
  0xe0   : > { %3756 = vmatmul.mubr.bf16.vlgmr.msra.gmra.mrb[88].mxu1 %v6546_v28  ;;  %2852 = vmatprep.mubr.bf16.mxu0 %v6568_v42  ;;  %v6649_v28 = vld [vmem:[%s8498_s1 + $0x454] ss:$12 sps:$4 sm:$0xff]  }
  0xe1   : > { %5684 = vmatpush3.bf16.msra.mxu1 %v6567_v41  ;;  %3763 = vmatprep.mubr.bf16.mxu1 %v6554_v30  ;;  %v6657_v30 = vld [vmem:[%s8498_s1 + $0x46c] ss:$12 sps:$4 sm:$0xff]   ;;  %v6612_v41 = vld [vmem:[%s7012_s25 + $0x290] ss:$36 sps:$4 sm:$0xff]  }
  0xe2   : > { %5685 = vmatprep.subr.bf16.mxu1 %v6580_v44  ;;  %2992 = vmatpush1.bf16.msra.mxu0 %v6577_v43  ;;  %v6616_v43 = vld [vmem:[%s7012_s25 + $0x2dc] ss:$36 sps:$4 sm:$0xff]  }
  0xe3   : > { %2993 = vmatprep.subr.bf16.mxu0 %v6587_v46 }
  0xe5   : > { %5686 = vmatpush3.bf16.msra.mxu1 %v6581_v45 }
  0xe6   : > { %5687 = vmatprep.subr.bf16.mxu1 %v6594_v48  ;;  %2994 = vmatpush1.bf16.msra.mxu0 %v6585_v47  ;;  %v6618_v47 = vld [vmem:[%s7012_s25 + $0x2d8] ss:$36 sps:$4 sm:$0xff]  }
  0xe7   : > { %2853 = vmatmul.mubr.bf16.gmra.mrb[12].mxu0 %v6570_v49  ;;  %2995 = vmatprep.subr.bf16.mxu0 %v6593_v51 }
  0xe8   : > { %3764 = vmatmul.mubr.bf16.gmra.mrb[92].mxu1 %v6556_v34  ;;  %2862 = vmatprep.mubr.bf16.mxu0 %v6574_v50  ;;  %v6604_v34 = vld [vmem:[%s7012_s25 + $0x248] ss:$36 sps:$4 sm:$0xff]  }
  0xe9   : > { %3771 = vmatprep.mubr.bf16.mxu1 %v6560_v35  ;;  %5688 = vmatpush3.bf16.msra.mxu1 %v6595_v53  ;;  %v6626_v53 = vld [vmem:[%s7012_s25 + $0x320] ss:$36 sps:$4 sm:$0xff]  }
  0xea   : > { %2996 = vmatpush1.bf16.msra.mxu0 %v6591_v52  ;;  %5689 = vmatprep.subr.bf16.mxu1 %v6608_v54 }
  0xeb   : > { %2997 = vmatprep.subr.bf16.mxu0 %v6601_v55  ;;  %v6630_v55 = vld [vmem:[%s7012_s25 + $0x36c] ss:$36 sps:$4 sm:$0xff]  }
  0xed   : > { %5690 = vmatpush3.bf16.msra.mxu1 %v6609_v56 }
  0xee   : > { %2998 = vmatpush1.bf16.msra.mxu0 %v6599_v57  ;;  %5691 = vmatprep.subr.bf16.mxu1 %v6622_v58 }
  0xef   : > { %2863 = vmatmul.mubr.bf16.gmra.mrb[16].mxu0 %v6576_v59  ;;  %2999 = vmatprep.subr.bf16.mxu0 %v6607_v61  ;;  %v6638_v61 = vld [vmem:[%s7012_s25 + $0x3b4] ss:$36 sps:$4 sm:$0xff]  }
  0xf0   : > { %3772 = vmatmul.mubr.bf16.gmra.mrb[96].mxu1 %v6562_v40  ;;  %2872 = vmatprep.mubr.bf16.mxu0 %v6582_v60 }
  0xf1   : > { %3779 = vmatprep.mubr.bf16.mxu1 %v6568_v42  ;;  %5692 = vmatpush3.bf16.msra.mxu1 %v6623_v63 }
  0xf2   : > { %3000 = vmatpush1.bf16.msra.mxu0 %v6605_v62  ;;  %5693 = vmatprep.subr.bf16.mxu1 %v6636_v0 }
  0xf3   : > { %3001 = vmatprep.subr.bf16.mxu0 %v6615_v1  ;;  %v6640_v1 = vld [vmem:[%s7012_s25 + $0x3b0] ss:$36 sps:$4 sm:$0xff]  }
  0xf5   : > { %5694 = vmatpush3.bf16.msra.mxu1 %v6637_v3 }
  0xf6   : > { %3002 = vmatpush1.bf16.msra.mxu0 %v6613_v4  ;;  %5695 = vmatprep.subr.bf16.mxu1 %v6650_v5  ;;  %v6644_v5 = vld [vmem:[%s7012_s25 + $0x3fc] ss:$36 sps:$4 sm:$0xff]  }
  0xf7   : > { %2873 = vmatmul.mubr.bf16.gmra.mrb[20].mxu0 %v6584_v6  ;;  %3003 = vmatprep.subr.bf16.mxu0 %v6621_v8 }
  0xf8   : > { %3780 = vmatmul.mubr.bf16.gmra.mrb[100].mxu1 %v6570_v49  ;;  %2882 = vmatprep.mubr.bf16.mxu0 %v6588_v7  ;;  %v6624_v49 = vld [vmem:[%s7012_s25 + $0x324] ss:$36 sps:$4 sm:$0xff]  }
  0xf9   : > { %3787 = vmatprep.mubr.bf16.mxu1 %v6574_v50  ;;  %5696 = vmatpush3.bf16.msra.mxu1 %v6651_v10  ;;  %v6646_v10 = vld [vmem:[%s7012_s25 + $0x3f8] ss:$36 sps:$4 sm:$0xff]  }
  0xfa   : > { %3004 = vmatpush1.bf16.msra.mxu0 %v6619_v9  ;;  %5697 = vmatprep.subr.bf16.mxu1 %v6664_v11 }
  0xfb   : > { %3005 = vmatprep.subr.bf16.mxu0 %v6629_v12 }
  0xfd   : > { %5698 = vmatpush3.bf16.msra.mxu1 %v6665_v13  ;;  %v6652_v13 = vld [vmem:[%s7012_s25 + $0x444] ss:$36 sps:$4 sm:$0xff]  }
  0xfe   : > { %3006 = vmatpush1.bf16.msra.mxu0 %v6627_v14  ;;  %5795 = vmatprep.subr.bf16.mxu1 %v6678_v15 }
  0xff   : > { %2883 = vmatmul.mubr.bf16.gmra.mrb[24].mxu0 %v6590_v16  ;;  %3007 = vmatprep.subr.bf16.mxu0 %v6635_v18  ;;  %v6654_v18 = vld [vmem:[%s7012_s25 + $0x440] ss:$36 sps:$4 sm:$0xff]  }
 0x100   : > { %3788 = vmatmul.mubr.bf16.gmra.mrb[104].mxu1 %v6576_v59  ;;  %2892 = vmatprep.mubr.bf16.mxu0 %v6596_v17  ;;  %v6632_v59 = vld [vmem:[%s7012_s25 + $0x368] ss:$36 sps:$4 sm:$0xff]  }
 0x101   : > { %3795 = vmatprep.mubr.bf16.mxu1 %v6582_v60 }
 0x102   : > { %3008 = vmatpush1.bf16.msra.mxu0 %v6633_v19 }
 0x103   : > { %v7462_v21 = vpop.f32.mrb[0].mxu1  ;;  %3009 = vmatprep.subr.bf16.mxu0 %v6643_v20 }
 0x104   : > { %v7467_v23 = vpop.f32.mrb[1].mxu1 }
 0x105   : > { %v7470_v25 = vpop.f32.mrb[2].mxu1 }
 0x106   : > { %v7473_v27 = vpop.f32.mrb[3].mxu1  ;;  %3010 = vmatpush1.bf16.msra.mxu0 %v6641_v22  ;;  %v6660_v22 = vld [vmem:[%s7012_s25 + $0x14] ss:$36 sps:$4 sm:$0xff]  }
 0x107   : > { %2893 = vmatmul.mubr.bf16.gmra.mrb[28].mxu0 %v6598_v24  ;;  %3011 = vmatprep.subr.bf16.mxu0 %v6649_v28 }
 0x108   : > { %3796 = vmatmul.mubr.bf16.gmra.mrb[108].mxu1 %v6584_v6  ;;  %2902 = vmatprep.mubr.bf16.mxu0 %v6602_v26 }
 0x109   : > { %3803 = vmatprep.mubr.bf16.mxu1 %v6588_v7 }
 0x10a   : > { %3012 = vmatpush1.bf16.msra.mxu0 %v6647_v29 }
 0x10b   : > { %v7484_v31 = vpop.f32.mrb[4].mxu1  ;;  %3013 = vmatprep.subr.bf16.mxu0 %v6657_v30  ;;  %v6658_v30 = vld [vmem:[%s7012_s25 + $0x10] ss:$36 sps:$4 sm:$0xff]  }
 0x10c   : > { %v7489_v33 = vpop.f32.mrb[5].mxu1 }
 0x10d   : > { %v7492_v35 = vpop.f32.mrb[6].mxu1 }
 0x10e   : > { %v7495_v37 = vpop.f32.mrb[7].mxu1  ;;  %3014 = vmatpush1.bf16.msra.mxu0 %v6655_v32 }
 0x10f   : > { %2903 = vmatmul.mubr.bf16.gmra.mrb[32].mxu0 %v6604_v34  ;;  %3176 = vmatprep.subr.bf16.mxu0 %v6663_v38  ;;  %v6666_v38 = vld [vmem:[%s7012_s25 + $0x5c] ss:$36 sps:$4 sm:$0xff]  }
 0x110   : > { %3804 = vmatmul.mubr.bf16.gmra.mrb[112].mxu1 %v6590_v16  ;;  %2912 = vmatprep.mubr.bf16.mxu0 %v6610_v36 }
 0x111   : > { %3811 = vmatprep.mubr.bf16.mxu1 %v6596_v17 }
 0x113   : > { %v7500_v39 = vpop.f32.mrb[8].mxu1 }
 0x114   : > { %v7502_v40 = vpop.f32.mrb[9].mxu1 }
 0x115   : > { %8503 = vst [vmem:[#allocation2_spill] sm:$0xff] %v7502_v40  ;;  %v7505_v42 = vpop.f32.mrb[10].mxu1 }
 0x116   : > { %8504 = vst [vmem:[#allocation3_spill] sm:$0xff] %v7505_v42  ;;  %v7508_v44 = vpop.f32.mrb[11].mxu1 }
 0x117   : > { %8505 = vst [vmem:[#allocation4_spill] sm:$0xff] %v7508_v44  ;;  %2913 = vmatmul.mubr.bf16.gmra.mrb[36].mxu0 %v6612_v41 }
 0x118   : > { %3812 = vmatmul.mubr.bf16.gmra.mrb[116].mxu1 %v6598_v24  ;;  %2922 = vmatprep.mubr.bf16.mxu0 %v6616_v43 }
 0x119   : > { %3819 = vmatprep.mubr.bf16.mxu1 %v6602_v26 }
 0x11b   : > { %v7510_v45 = vpop.f32.mrb[12].mxu1 }
 0x11c   : > { %8506 = vst [vmem:[#allocation5_spill] sm:$0xff] %v7510_v45  ;;  %v7512_v46 = vpop.f32.mrb[13].mxu1  ;;  %v6756_v45 = vld [vmem:[%s7012_s25 + $0x404] ss:$36 sps:$4 sm:$0xff]  }
 0x11d   : > { %8507 = vst [vmem:[#allocation6_spill] sm:$0xff] %v7512_v46  ;;  %v7515_v48 = vpop.f32.mrb[14].mxu1 }
 0x11e   : > { %8508 = vst [vmem:[#allocation7_spill] sm:$0xff] %v7515_v48  ;;  %v7518_v50 = vpop.f32.mrb[15].mxu1 }
 0x11f   : > { %8509 = vst [vmem:[#allocation8_spill] sm:$0xff] %v7518_v50  ;;  %2923 = vmatmul.mubr.bf16.gmra.mrb[40].mxu0 %v6618_v47 }
 0x120   : > { %3820 = vmatmul.mubr.bf16.gmra.mrb[120].mxu1 %v6604_v34  ;;  %2932 = vmatprep.mubr.bf16.mxu0 %v6624_v49 }
 0x121   : > { %3827 = vmatprep.mubr.bf16.mxu1 %v6610_v36  ;;  %v6661_v36 = vld [vmem:[%s8498_s1 + $0x480] ss:$12 sps:$4 sm:$0xff]  }
 0x123   : > { %v7520_v51 = vpop.f32.mrb[16].mxu1 }
 0x124   : > { %8510 = vst [vmem:[#allocation9_spill] sm:$0xff] %v7520_v51  ;;  %v7522_v52 = vpop.f32.mrb[17].mxu1  ;;  %v6750_v51 = vld [vmem:[%s7012_s25 + $0x3bc] ss:$36 sps:$4 sm:$0xff]  }
 0x125   : > { %8511 = vst [vmem:[#allocation10_spill] sm:$0xff] %v7522_v52  ;;  %v7525_v54 = vpop.f32.mrb[18].mxu1 }
 0x126   : > { %8512 = vst [vmem:[#allocation11_spill] sm:$0xff] %v7525_v54  ;;  %v7528_v56 = vpop.f32.mrb[19].mxu1 }
 0x127   : > { %8513 = vst [vmem:[#allocation12_spill] sm:$0xff] %v7528_v56  ;;  %2933 = vmatmul.mubr.bf16.gmra.mrb[44].mxu0 %v6626_v53 }
 0x128   : > { %3828 = vmatmul.mubr.bf16.gmra.mrb[124].mxu1 %v6612_v41  ;;  %2942 = vmatprep.mubr.bf16.mxu0 %v6630_v55 }
 0x129   : > { %3835 = vmatprep.mubr.bf16.mxu1 %v6616_v43  ;;  %v6671_v43 = vld [vmem:[%s8498_s1 + $0x49c] ss:$12 sps:$4 sm:$0xff]  }
 0x12b   : > { %v7530_v57 = vpop.f32.mrb[20].mxu1 }
 0x12c   : > { %8514 = vst [vmem:[#allocation13_spill] sm:$0xff] %v7530_v57  ;;  %v7532_v58 = vpop.f32.mrb[21].mxu1 }
 0x12d   : > { %8515 = vst [vmem:[#allocation14_spill] sm:$0xff] %v7532_v58  ;;  %v7535_v60 = vpop.f32.mrb[22].mxu1  ;;  %v6736_v58 = vld [vmem:[%s7012_s25 + $0x32c] ss:$36 sps:$4 sm:$0xff]  }
 0x12e   : > { %8516 = vst [vmem:[#allocation15_spill] sm:$0xff] %v7535_v60  ;;  %v7538_v62 = vpop.f32.mrb[23].mxu1 }
 0x12f   : > { %8517 = vst [vmem:[#allocation16_spill] sm:$0xff] %v7538_v62  ;;  %2943 = vmatmul.mubr.bf16.gmra.mrb[48].mxu0 %v6632_v59  ;;  %v6730_v62 = vld [vmem:[%s7012_s25 + $0x2e0] ss:$36 sps:$4 sm:$0xff]  }
 0x130   : > { %3836 = vmatmul.mubr.bf16.gmra.mrb[128].mxu1 %v6618_v47  ;;  %2952 = vmatprep.mubr.bf16.mxu0 %v6638_v61 }
 0x131   : > { %3843 = vmatprep.mubr.bf16.mxu1 %v6624_v49  ;;  %v6669_v49 = vld [vmem:[%s8498_s1 + $0x498] ss:$12 sps:$4 sm:$0xff]  }
 0x133   : > { %v5475_v63 = vpop.f32.mrb[24].mxu1 }
 0x134   : > { %v5476_v0 = vpop.f32.mrb[25].mxu1 }
 0x135   : > { %v7541_v3 = vadd.f32 %v5476_v0, %v5475_v63  ;;  %v5478_v4 = vpop.f32.mrb[26].mxu1 }
 0x136   : > { %v5479_v6 = vpop.f32.mrb[27].mxu1 }
 0x137   : > { %v7544_v7 = vadd.f32 %v5479_v6, %v5478_v4  ;;  %2953 = vmatmul.mubr.bf16.gmra.mrb[52].mxu0 %v6640_v1 }
 0x138   : > { %3844 = vmatmul.mubr.bf16.gmra.mrb[132].mxu1 %v6626_v53  ;;  %2962 = vmatprep.mubr.bf16.mxu0 %v6644_v5  ;;  %v6677_v53 = vld [vmem:[%s8498_s1 + $0x4b4] ss:$12 sps:$4 sm:$0xff]  }
 0x139   : > { %3851 = vmatprep.mubr.bf16.mxu1 %v6630_v55 }
 0x13b   : > { %v5481_v8 = vpop.f32.mrb[28].mxu1 }
 0x13c   : > { %v5482_v9 = vpop.f32.mrb[29].mxu1 }
 0x13d   : > { %v7547_v11 = vadd.f32 %v5482_v9, %v5481_v8  ;;  %v5484_v12 = vpop.f32.mrb[30].mxu1  ;;  %v6685_v8 = vld [vmem:[%s8498_s1 + $0x4cc] ss:$12 sps:$4 sm:$0xff]   ;;  %v6683_v9 = vld [vmem:[%s8498_s1 + $0x4c8] ss:$12 sps:$4 sm:$0xff]  }
 0x13e   : > { %v5485_v14 = vpop.f32.mrb[31].mxu1 }
 0x13f   : > { %v7550_v15 = vadd.f32 %v5485_v14, %v5484_v12  ;;  %2963 = vmatmul.mubr.bf16.gmra.mrb[56].mxu0 %v6646_v10  ;;  %v6691_v12 = vld [vmem:[%s8498_s1 + $0x4e4] ss:$12 sps:$4 sm:$0xff]  }
 0x140   : > { %3852 = vmatmul.mubr.bf16.gmra.mrb[136].mxu1 %v6632_v59  ;;  %2972 = vmatprep.mubr.bf16.mxu0 %v6652_v13  ;;  %v7595_v14 = vld [vmem:[%s7012_s25 + $0xa0] ss:$36 sps:$4 sm:$0xff]  }
 0x141   : > { %3859 = vmatprep.mubr.bf16.mxu1 %v6638_v61  ;;  %v6668_v61 = vld [vmem:[%s7012_s25 + $0x58] ss:$36 sps:$4 sm:$0xff]  }
 0x143   : > { %v5487_v16 = vpop.f32.mrb[32].mxu1 }
 0x144   : > { %v5488_v17 = vpop.f32.mrb[33].mxu1 }
 0x145   : > { %v7553_v19 = vadd.f32 %v5488_v17, %v5487_v16  ;;  %v5490_v20 = vpop.f32.mrb[34].mxu1 }
 0x146   : > { %v5491_v24 = vpop.f32.mrb[35].mxu1 }
 0x147   : > { %v7556_v26 = vadd.f32 %v5491_v24, %v5490_v20  ;;  %2973 = vmatmul.mubr.bf16.gmra.mrb[60].mxu0 %v6654_v18  ;;  %v7603_v20 = vld [vmem:[%s7012_s25 + $0xec] ss:$36 sps:$4 sm:$0xff]  }
 0x148   : > { %3860 = vmatmul.mubr.bf16.gmra.mrb[140].mxu1 %v6640_v1  ;;  %3015 = vmatprep.mubr.bf16.mxu0 %v6660_v22  ;;  %v6672_v1 = vld [vmem:[%s7012_s25 + $0xa4] ss:$36 sps:$4 sm:$0xff]   ;;  %v6692_v24 = vld [vmem:[%s8498_s1 + $0x560] ss:$12 sps:$4 sm:$0xff]  }
 0x149   : > { %3867 = vmatprep.mubr.bf16.mxu1 %v6644_v5  ;;  %v6675_v5 = vld [vmem:[%s8498_s1 + $0x4b0] ss:$12 sps:$4 sm:$0xff]  }
 0x14b   : > { %v5493_v28 = vpop.f32.mrb[36].mxu1 }
 0x14c   : > { %v5494_v29 = vpop.f32.mrb[37].mxu1 }
 0x14d   : > { %v7559_v32 = vadd.f32 %v5494_v29, %v5493_v28  ;;  %v5496_v34 = vpop.f32.mrb[38].mxu1  ;;  %v6689_v29 = vld [vmem:[%s8498_s1 + $0x4e0] ss:$12 sps:$4 sm:$0xff]  }
 0x14e   : > { %v5497_v41 = vpop.f32.mrb[39].mxu1 }
 0x14f   : > { %v7568_v47 = vadd.f32 %v5497_v41, %v5496_v34  ;;  %3016 = vmatmul.mubr.bf16.vlgmr.msra.gmra.mrb[0].mxu0 %v6658_v30  ;;  %v6699_v34 = vld [vmem:[%s8498_s1 + $0x4fc] ss:$12 sps:$4 sm:$0xff]   ;;  %v6706_v41 = vld [vmem:[%s8498_s1 + $0x578] ss:$12 sps:$4 sm:$0xff]  }
 0x150   : > { %3868 = vmatmul.mubr.bf16.gmra.mrb[144].mxu1 %v6646_v10  ;;  %3177 = vmatpush1.bf16.msra.mxu0 %v6661_v36  ;;  %v6693_v36 = vld [vmem:[%s8498_s1 + $0x4a0] ss:$12 sps:$4 sm:$0xff]  }
 0x151   : > { %3025 = vmatprep.mubr.bf16.mxu0 %v6666_v38  ;;  %3875 = vmatprep.mubr.bf16.mxu1 %v6652_v13 }
 0x152   : > { %3178 = vmatprep.subr.bf16.mxu0 %v6671_v43 }
 0x153   : > { %v5499_v55 = vpop.f32.mrb[40].mxu1 }
 0x154   : > { %v5500_v59 = vpop.f32.mrb[41].mxu1  ;;  %3179 = vmatpush1.bf16.msra.mxu0 %v6669_v49 }
 0x155   : > { %v7577_v63 = vadd.f32 %v5500_v59, %v5499_v55  ;;  %v5502_v0 = vpop.f32.mrb[42].mxu1  ;;  %3180 = vmatprep.subr.bf16.mxu0 %v6677_v53  ;;  %v7628_v53 = vld [vmem:[%s7012_s25 + $0xe8] ss:$36 sps:$4 sm:$0xff]  }
 0x156   : > { %v5503_v4 = vpop.f32.mrb[43].mxu1 }
 0x157   : > { %v7583_v6 = vadd.f32 %v5503_v4, %v5502_v0  ;;  %3026 = vmatmul.mubr.bf16.gmra.mrb[4].mxu0 %v6668_v61  ;;  %v7633_v0 = vld [vmem:[%s7012_s25 + $0x134] ss:$36 sps:$4 sm:$0xff]  }
 0x158   : > { %3876 = vmatmul.mubr.bf16.gmra.mrb[148].mxu1 %v6654_v18  ;;  %3035 = vmatprep.mubr.bf16.mxu0 %v6672_v1  ;;  %v6679_v18 = vld [vmem:[%s8498_s1 + $0x488] ss:$12 sps:$4 sm:$0xff]  }
 0x159   : > { %3916 = vmatprep.mubr.bf16.mxu1 %v6660_v22  ;;  %3181 = vmatpush1.bf16.msra.mxu0 %v6675_v5  ;;  %v6705_v4 = vld [vmem:[%s8498_s1 + $0x514] ss:$12 sps:$4 sm:$0xff]   ;;  %v6707_v5 = vld [vmem:[%s8498_s1 + $0x4b8] ss:$12 sps:$4 sm:$0xff]  }
 0x15a   : > { %3182 = vmatprep.subr.bf16.mxu0 %v6685_v8 }
 0x15b   : > { %v5505_v10 = vpop.f32.mrb[44].mxu1 }
 0x15c   : > { %v5506_v13 = vpop.f32.mrb[45].mxu1 }
 0x15d   : > { %v7597_v16 = vadd.f32 %v5506_v13, %v5505_v10  ;;  %v5508_v17 = vpop.f32.mrb[46].mxu1  ;;  %3183 = vmatpush1.bf16.msra.mxu0 %v6683_v9  ;;  %v6703_v9 = vld [vmem:[%s8498_s1 + $0x510] ss:$12 sps:$4 sm:$0xff]  }
 0x15e   : > { %v5509_v22 = vpop.f32.mrb[47].mxu1  ;;  %3184 = vmatprep.subr.bf16.mxu0 %v6691_v12  ;;  %v6720_v10 = vld [vmem:[%s8498_s1 + $0x590] ss:$12 sps:$4 sm:$0xff]   ;;  %v6713_v12 = vld [vmem:[%s8498_s1 + $0x52c] ss:$12 sps:$4 sm:$0xff]  }
 0x15f   : > { %v7608_v28 = vadd.f32 %v5509_v22, %v5508_v17  ;;  %3036 = vmatmul.mubr.bf16.gmra.mrb[8].mxu0 %v7595_v14  ;;  %v6721_v13 = vld [vmem:[%s8498_s1 + $0x4d0] ss:$12 sps:$4 sm:$0xff]  }
 0x160   : > { %3917 = vmatmul.mubr.bf16.vlgmr.msra.gmra.mrb[152].mxu1 %v6658_v30  ;;  %3045 = vmatprep.mubr.bf16.mxu0 %v7603_v20  ;;  %v6697_v30 = vld [vmem:[%s8498_s1 + $0x4f8] ss:$12 sps:$4 sm:$0xff]  }
 0x161   : > { %5796 = vmatpush3.bf16.msra.mxu1 %v6679_v18  ;;  %3924 = vmatprep.mubr.bf16.mxu1 %v6666_v38  ;;  %v6734_v18 = vld [vmem:[%s8498_s1 + $0x5a8] ss:$12 sps:$4 sm:$0xff]  }
 0x162   : > { %5797 = vmatprep.subr.bf16.mxu1 %v6692_v24  ;;  %3185 = vmatpush1.bf16.msra.mxu0 %v6689_v29  ;;  %v7664_v24 = vld [vmem:[%s7012_s25 + $0x130] ss:$36 sps:$4 sm:$0xff]  }
 0x163   : > { %v5511_v43 = vpop.f32.mrb[48].mxu1  ;;  %3186 = vmatprep.subr.bf16.mxu0 %v6699_v34  ;;  %v7669_v34 = vld [vmem:[%s7012_s25 + $0x17c] ss:$36 sps:$4 sm:$0xff]  }
 0x164   : > { %v5512_v49 = vpop.f32.mrb[49].mxu1 }
 0x165   : > { %v7630_v55 = vadd.f32 %v5512_v49, %v5511_v43  ;;  %v5514_v59 = vpop.f32.mrb[50].mxu1  ;;  %5798 = vmatpush3.bf16.msra.mxu1 %v6693_v36  ;;  %v6735_v43 = vld [vmem:[%s8498_s1 + $0x4e8] ss:$12 sps:$4 sm:$0xff]   ;;  %v6717_v49 = vld [vmem:[%s8498_s1 + $0x540] ss:$12 sps:$4 sm:$0xff]  }
 0x166   : > { %v5515_v38 = vpop.f32.mrb[51].mxu1  ;;  %5799 = vmatprep.subr.bf16.mxu1 %v6706_v41  ;;  %3187 = vmatpush1.bf16.msra.mxu0 %v6697_v30  ;;  %v6719_v41 = vld [vmem:[%s8498_s1 + $0x544] ss:$12 sps:$4 sm:$0xff]  }
 0x167   : > { %v7641_v8 = vadd.f32 %v5515_v38, %v5514_v59  ;;  %3046 = vmatmul.mubr.bf16.gmra.mrb[12].mxu0 %v7628_v53  ;;  %3188 = vmatprep.subr.bf16.mxu0 %v6705_v4  ;;  %v6748_v59 = vld [vmem:[%s8498_s1 + $0x5c0] ss:$12 sps:$4 sm:$0xff]   ;;  %v6727_v38 = vld [vmem:[%s8498_s1 + $0x55c] ss:$12 sps:$4 sm:$0xff]  }
 0x168   : > { %3925 = vmatmul.mubr.bf16.gmra.mrb[156].mxu1 %v6668_v61  ;;  %3055 = vmatprep.mubr.bf16.mxu0 %v7633_v0  ;;  %v6711_v61 = vld [vmem:[%s8498_s1 + $0x528] ss:$12 sps:$4 sm:$0xff]   ;;  %v6749_v4 = vld [vmem:[%s8498_s1 + $0x500] ss:$12 sps:$4 sm:$0xff]  }
 0x169   : > { %3932 = vmatprep.mubr.bf16.mxu1 %v6672_v1  ;;  %5800 = vmatpush3.bf16.msra.mxu1 %v6707_v5 }
 0x16a   : > { %3189 = vmatpush1.bf16.msra.mxu0 %v6703_v9  ;;  %5801 = vmatprep.subr.bf16.mxu1 %v6720_v10  ;;  %v6762_v9 = vld [vmem:[%s8498_s1 + $0x5d8] ss:$12 sps:$4 sm:$0xff]  }
 0x16b   : > { %v5517_v17 = vpop.f32.mrb[52].mxu1  ;;  %3190 = vmatprep.subr.bf16.mxu0 %v6713_v12  ;;  %v6696_v12 = vld [vmem:[%s7012_s25 + $0x178] ss:$36 sps:$4 sm:$0xff]  }
 0x16c   : > { %v5518_v22 = vpop.f32.mrb[53].mxu1 }
 0x16d   : > { %v7666_v1 = vadd.f32 %v5518_v22, %v5517_v17  ;;  %v5520_v29 = vpop.f32.mrb[54].mxu1  ;;  %5802 = vmatpush3.bf16.msra.mxu1 %v6721_v13  ;;  %v6700_v17 = vld [vmem:[%s7012_s25 + $0x1c4] ss:$36 sps:$4 sm:$0xff]  }
 0x16e   : > { %v5521_v36 = vpop.f32.mrb[55].mxu1  ;;  %3191 = vmatpush1.bf16.msra.mxu0 %v6711_v61  ;;  %5803 = vmatprep.subr.bf16.mxu1 %v6734_v18  ;;  %v6733_v18 = vld [vmem:[%s8498_s1 + $0x574] ss:$12 sps:$4 sm:$0xff]   ;;  %v6763_v22 = vld [vmem:[%s8498_s1 + $0x518] ss:$12 sps:$4 sm:$0xff]  }
 0x16f   : > { %v7677_v30 = vadd.f32 %v5521_v36, %v5520_v29  ;;  %3056 = vmatmul.mubr.bf16.gmra.mrb[16].mxu0 %v7664_v24  ;;  %3192 = vmatprep.subr.bf16.mxu0 %v6719_v41  ;;  %v6731_v36 = vld [vmem:[%s8498_s1 + $0x570] ss:$12 sps:$4 sm:$0xff]  }
 0x170   : > { %3933 = vmatmul.mubr.bf16.gmra.mrb[160].mxu1 %v7595_v14  ;;  %3065 = vmatprep.mubr.bf16.mxu0 %v7669_v34  ;;  %v6725_v14 = vld [vmem:[%s8498_s1 + $0x558] ss:$12 sps:$4 sm:$0xff]   ;;  %v6773_v41 = vld [vmem:[%s8498_s1 + $0x5f0] ss:$12 sps:$4 sm:$0xff]  }
 0x171   : > { %3940 = vmatprep.mubr.bf16.mxu1 %v7603_v20  ;;  %5804 = vmatpush3.bf16.msra.mxu1 %v6735_v43  ;;  %v6741_v43 = vld [vmem:[%s8498_s1 + $0x58c] ss:$12 sps:$4 sm:$0xff]  }
 0x172   : > { %3193 = vmatpush1.bf16.msra.mxu0 %v6717_v49  ;;  %5805 = vmatprep.subr.bf16.mxu1 %v6748_v59  ;;  %v6774_v49 = vld [vmem:[%s8498_s1 + $0x530] ss:$12 sps:$4 sm:$0xff]  }
 0x173   : > { %v5523_v5 = vpop.f32.mrb[56].mxu1  ;;  %3194 = vmatprep.subr.bf16.mxu0 %v6727_v38  ;;  %v7733_v38 = vld [vmem:[%s8498_s1 + $0x608] ss:$12 sps:$4 sm:$0xff]  }
 0x174   : > { %v5524_v10 = vpop.f32.mrb[57].mxu1 }
 0x175   : > { %v7702_v20 = vadd.f32 %v5524_v10, %v5523_v5  ;;  %v5526_v13 = vpop.f32.mrb[58].mxu1  ;;  %5806 = vmatpush3.bf16.msra.mxu1 %v6749_v4 }
 0x176   : > { %v5527_v61 = vpop.f32.mrb[59].mxu1  ;;  %3195 = vmatpush1.bf16.msra.mxu0 %v6725_v14  ;;  %5807 = vmatprep.subr.bf16.mxu1 %v6762_v9  ;;  %v6708_v9 = vld [vmem:[%s7012_s25 + $0x20c] ss:$36 sps:$4 sm:$0xff]  }
 0x177   : > { %v7711_v29 = vadd.f32 %v5527_v61, %v5526_v13  ;;  %3066 = vmatmul.mubr.bf16.gmra.mrb[20].mxu0 %v6696_v12  ;;  %3196 = vmatprep.subr.bf16.mxu0 %v6733_v18  ;;  %v6747_v13 = vld [vmem:[%s8498_s1 + $0x5a4] ss:$12 sps:$4 sm:$0xff]   ;;  %v6745_v18 = vld [vmem:[%s8498_s1 + $0x5a0] ss:$12 sps:$4 sm:$0xff]  }
 0x178   : > { %3941 = vmatmul.mubr.bf16.gmra.mrb[164].mxu1 %v7628_v53  ;;  %3075 = vmatprep.mubr.bf16.mxu0 %v6700_v17  ;;  %v6739_v53 = vld [vmem:[%s8498_s1 + $0x588] ss:$12 sps:$4 sm:$0xff]  }
 0x179   : > { %3948 = vmatprep.mubr.bf16.mxu1 %v7633_v0  ;;  %5808 = vmatpush3.bf16.msra.mxu1 %v6763_v22  ;;  %v6702_v0 = vld [vmem:[%s7012_s25 + $0x1c0] ss:$36 sps:$4 sm:$0xff]   ;;  %v6755_v22 = vld [vmem:[%s8498_s1 + $0x5bc] ss:$12 sps:$4 sm:$0xff]  }
 0x17a   : > { %3197 = vmatpush1.bf16.msra.mxu0 %v6731_v36  ;;  %5809 = vmatprep.subr.bf16.mxu1 %v6773_v41  ;;  %v6753_v41 = vld [vmem:[%s8498_s1 + $0x5b8] ss:$12 sps:$4 sm:$0xff]  }
 0x17b   : > { %v5529_v59 = vpop.f32.mrb[60].mxu1  ;;  %3198 = vmatprep.subr.bf16.mxu0 %v6741_v43 }
 0x17c   : > { %v5530_v4 = vpop.f32.mrb[61].mxu1 }
 0x17d   : > { %v7736_v5 = vadd.f32 %v5530_v4, %v5529_v59  ;;  %v5532_v14 = vpop.f32.mrb[62].mxu1  ;;  %5810 = vmatpush3.bf16.msra.mxu1 %v6774_v49  ;;  %v6710_v49 = vld [vmem:[%s7012_s25 + $0x208] ss:$36 sps:$4 sm:$0xff]  }
 0x17e   : > { %v5533_v10 = vpop.f32.mrb[63].mxu1  ;;  %3199 = vmatpush1.bf16.msra.mxu0 %v6739_v53  ;;  %5931 = vmatprep.subr.bf16.mxu1 %v7733_v38  ;;  %v6714_v53 = vld [vmem:[%s7012_s25 + $0x254] ss:$36 sps:$4 sm:$0xff]  }
 0x17f   : > { %v7742_v61 = vadd.f32 %v5533_v10, %v5532_v14  ;;  %3076 = vmatmul.mubr.bf16.gmra.mrb[24].mxu0 %v6702_v0  ;;  %3200 = vmatprep.subr.bf16.mxu0 %v6747_v13  ;;  %v6759_v10 = vld [vmem:[%s8498_s1 + $0x5d0] ss:$12 sps:$4 sm:$0xff]   ;;  %v6769_v13 = vld [vmem:[%s8498_s1 + $0x5ec] ss:$12 sps:$4 sm:$0xff]  }
 0x180   : > { %3949 = vmatmul.mubr.bf16.gmra.mrb[168].mxu1 %v7664_v24  ;;  %3085 = vmatprep.mubr.bf16.mxu0 %v6708_v9 }
 0x181   : > { %3956 = vmatprep.mubr.bf16.mxu1 %v7669_v34  ;;  %v6761_v34 = vld [vmem:[%s8498_s1 + $0x5d4] ss:$12 sps:$4 sm:$0xff]  }
 0x182   : > { %3201 = vmatpush1.bf16.msra.mxu0 %v6745_v18 }
 0x183   : > { %v5535_v36 = vpop.f32.mrb[64].mxu1  ;;  %3202 = vmatprep.subr.bf16.mxu0 %v6755_v22  ;;  %v6767_v22 = vld [vmem:[%s8498_s1 + $0x5e8] ss:$12 sps:$4 sm:$0xff]  }
 0x184   : > { %v5536_v43 = vpop.f32.mrb[65].mxu1 }
 0x185   : > { %v7757_v59 = vadd.f32 %v5536_v43, %v5535_v36  ;;  %v5538_v24 = vpop.f32.mrb[66].mxu1 }
 0x186   : > { %v5539_v4 = vpop.f32.mrb[67].mxu1  ;;  %3203 = vmatpush1.bf16.msra.mxu0 %v6753_v41  ;;  %v6716_v41 = vld [vmem:[%s7012_s25 + $0x250] ss:$36 sps:$4 sm:$0xff]  }
 0x187   : > { %v7763_v14 = vadd.f32 %v5539_v4, %v5538_v24  ;;  %3086 = vmatmul.mubr.bf16.gmra.mrb[28].mxu0 %v6710_v49  ;;  %3204 = vmatprep.subr.bf16.mxu0 %v6761_v34  ;;  %v6722_v24 = vld [vmem:[%s7012_s25 + $0x29c] ss:$36 sps:$4 sm:$0xff]  }
 0x188   : > { %3957 = vmatmul.mubr.bf16.gmra.mrb[172].mxu1 %v6696_v12  ;;  %3095 = vmatprep.mubr.bf16.mxu0 %v6714_v53 }
 0x189   : > { %3964 = vmatprep.mubr.bf16.mxu1 %v6700_v17  ;;  %v6838_v17 = vld [vmem:[%s8498_s1 + $0x604] ss:$12 sps:$4 sm:$0xff]  }
 0x18a   : > { %3205 = vmatpush1.bf16.msra.mxu0 %v6759_v10 }
 0x18b   : > { %v5541_v18 = vpop.f32.mrb[68].mxu1  ;;  %3206 = vmatprep.subr.bf16.mxu0 %v6769_v13  ;;  %v6724_v13 = vld [vmem:[%s7012_s25 + $0x298] ss:$36 sps:$4 sm:$0xff]  }
 0x18c   : > { %v5542_v36 = vpop.f32.mrb[69].mxu1 }
 0x18d   : > { %v7775_v43 = vadd.f32 %v5542_v36, %v5541_v18  ;;  %v5544_v12 = vpop.f32.mrb[70].mxu1 }
 0x18e   : > { %v5545_v4 = vpop.f32.mrb[71].mxu1  ;;  %3207 = vmatpush1.bf16.msra.mxu0 %v6767_v22 }
 0x18f   : > { %v7778_v2 = vadd.f32 %v5545_v4, %v5544_v12  ;;  %3096 = vmatmul.mubr.bf16.gmra.mrb[32].mxu0 %v6716_v41  ;;  %3369 = vmatprep.subr.bf16.mxu0 %v6838_v17  ;;  %v6728_v12 = vld [vmem:[%s7012_s25 + $0x2e4] ss:$36 sps:$4 sm:$0xff]  }
 0x190   : > { %3965 = vmatmul.mubr.bf16.gmra.mrb[176].mxu1 %v6702_v0  ;;  %3105 = vmatprep.mubr.bf16.mxu0 %v6722_v24 }
 0x191   : > { %3972 = vmatprep.mubr.bf16.mxu1 %v6708_v9 }
 0x193   : > { %v5547_v34 = vpop.f32.mrb[72].mxu1 }
 0x194   : > { %v5548_v10 = vpop.f32.mrb[73].mxu1 }
 0x195   : > { %v7784_v18 = vadd.f32 %v5548_v10, %v5547_v34  ;;  %v5550_v36 = vpop.f32.mrb[74].mxu1 }
 0x196   : > { %v5551_v4 = vpop.f32.mrb[75].mxu1 }
 0x197   : > { %v7787_v22 = vadd.f32 %v5551_v4, %v5550_v36  ;;  %3106 = vmatmul.mubr.bf16.gmra.mrb[36].mxu0 %v6724_v13  ;;  %v6738_v4 = vld [vmem:[%s7012_s25 + $0x328] ss:$36 sps:$4 sm:$0xff]  }
 0x198   : > { %3973 = vmatmul.mubr.bf16.gmra.mrb[180].mxu1 %v6710_v49  ;;  %3115 = vmatprep.mubr.bf16.mxu0 %v6728_v12 }
 0x199   : > { %3980 = vmatprep.mubr.bf16.mxu1 %v6714_v53  ;;  %v694_v53 = vlaneseq }
 0x19b   : > { %v5553_v0 = vpop.f32.mrb[76].mxu1 }
 0x19c   : > { %v5554_v9 = vpop.f32.mrb[77].mxu1 }
 0x19d   : > { %v7790_v17 = vadd.f32 %v5554_v9, %v5553_v0  ;;  %v5556_v60 = vpop.f32.mrb[78].mxu1  ;;  %v6742_v0 = vld [vmem:[%s7012_s25 + $0x374] ss:$36 sps:$4 sm:$0xff]  }
 0x19e   : > { %v5557_v34 = vpop.f32.mrb[79].mxu1 }
 0x19f   : > { %v7793_v10 = vadd.f32 %v5557_v34, %v5556_v60  ;;  %3116 = vmatmul.mubr.bf16.gmra.mrb[40].mxu0 %v6730_v62  ;;  %v7801_v60 = vshrl.u32 %v694_v53, 7  ;;  %v6744_v34 = vld [vmem:[%s7012_s25 + $0x370] ss:$36 sps:$4 sm:$0xff]  }
 0x1a0   : > { %3981 = vmatmul.mubr.bf16.gmra.mrb[184].mxu1 %v6716_v41  ;;  %3125 = vmatprep.mubr.bf16.mxu0 %v6736_v58 }
 0x1a1   : > { %3988 = vmatprep.mubr.bf16.mxu1 %v6722_v24  ;;  %v704_v52 = vsub.s32 2, %v7801_v60 }
 0x1a3   : > { %v5559_v36 = vpop.f32.mrb[80].mxu1 }
 0x1a4   : > { %v5560_v49 = vpop.f32.mrb[81].mxu1 }
 0x1a5   : > { %v7796_v57 = vadd.f32 %v5560_v49, %v5559_v36  ;;  %v5562_v56 = vpop.f32.mrb[82].mxu1 }
 0x1a6   : > { %v5563_v9 = vpop.f32.mrb[83].mxu1 }
 0x1a7   : > { %v7799_v54 = vadd.f32 %v5563_v9, %v5562_v56  ;;  %3126 = vmatmul.mubr.bf16.gmra.mrb[44].mxu0 %v6738_v4  ;;  %v692_v56 = vld [vmem:[%s8499_s2] sm:$0x7] }
 0x1a8   : > { %3989 = vmatmul.mubr.bf16.gmra.mrb[188].mxu1 %v6724_v13  ;;  %3135 = vmatprep.mubr.bf16.mxu0 %v6742_v0 }
 0x1a9   : > { %3996 = vmatprep.mubr.bf16.mxu1 %v6728_v12  ;;  %v7813_v12 = vrot.slane %v692_v56, %v704_v52 }
 0x1ab   : > { %v5565_v41 = vpop.f32.mrb[84].mxu1  ;;  %v3600_v52 = vadd.f32 %v7544_v7, %v7813_v12 }
 0x1ac   : > { %v5566_v24 = vpop.f32.mrb[85].mxu1 }
 0x1ad   : > { %v7805_v36 = vadd.f32 %v5566_v24, %v5565_v41  ;;  %v5568_v49 = vpop.f32.mrb[86].mxu1  ;;  %v6752_v41 = vld [vmem:[%s7012_s25 + $0x3b8] ss:$36 sps:$4 sm:$0xff]   ;;  %v3597_v24 = vadd.f32 %v7541_v3, %v7813_v12  ;;  %v6758_v3 = vld [vmem:[%s7012_s25 + $0x400] ss:$36 sps:$4 sm:$0xff]  }
 0x1ae   : > { %v5569_v13 = vpop.f32.mrb[87].mxu1 }
 0x1af   : > { %v7811_v53 = vadd.f32 %v5569_v13, %v5568_v49  ;;  %3136 = vmatmul.mubr.bf16.gmra.mrb[48].mxu0 %v6744_v34 }
 0x1b0   : > { %3997 = vmatmul.mubr.bf16.gmra.mrb[192].mxu1 %v6730_v62  ;;  %3145 = vmatprep.mubr.bf16.mxu0 %v6750_v51 }
 0x1b1   : > { %4004 = vmatprep.mubr.bf16.mxu1 %v6736_v58 }
 0x1b3   : > { %v5587_v9 = vpop.f32.mrb[88].mxu1 }
 0x1b4   : > { %v5588_v50 = vpop.f32.mrb[89].mxu1 }
 0x1b5   : > { %v5589_v48 = vadd.f32 %v5588_v50, %v5587_v9  ;;  %v5590_v46 = vpop.f32.mrb[90].mxu1  ;;  %v3605_v50 = vadd.f32 %v7547_v11, %v7813_v12  ;;  %v6766_v11 = vld [vmem:[%s7012_s25 + $0x448] ss:$36 sps:$4 sm:$0xff]  }
 0x1b6   : > { %v5591_v44 = vpop.f32.mrb[91].mxu1 }
 0x1b7   : > { %v7819_v49 = vadd.f32 %v5589_v48, %v3597_v24  ;;  %v5592_v62 = vadd.f32 %v5591_v44, %v5590_v46  ;;  %3146 = vmatmul.mubr.bf16.gmra.mrb[52].mxu0 %v6752_v41  ;;  %v6764_v24 = vld [vmem:[%s7012_s25 + $0x44c] ss:$36 sps:$4 sm:$0xff]   ;;  %v3608_v44 = vadd.f32 %v7550_v15, %v7813_v12 }
 0x1b8   : > { %4005 = vmatmul.mubr.bf16.gmra.mrb[196].mxu1 %v6738_v4  ;;  %3155 = vmatprep.mubr.bf16.mxu0 %v6756_v45 }
 0x1b9   : > { %v7823_v58 = vadd.f32 %v5592_v62, %v3600_v52  ;;  %4012 = vmatprep.mubr.bf16.mxu1 %v6742_v0  ;;  %v3613_v62 = vadd.f32 %v7553_v19, %v7813_v12  ;;  %v6770_v19 = vld [vmem:[%s7012_s25 + $0x18] ss:$36 sps:$4 sm:$0xff]  }
 0x1bb   : > { %v5593_v56 = vpop.f32.mrb[92].mxu1 }
 0x1bc   : > { %v5594_v13 = vpop.f32.mrb[93].mxu1 }
 0x1bd   : > { %v5595_v9 = vadd.f32 %v5594_v13, %v5593_v56  ;;  %v5596_v48 = vpop.f32.mrb[94].mxu1 }
 0x1be   : > { %v5597_v42 = vpop.f32.mrb[95].mxu1 }
 0x1bf   : > { %v7829_v7 = vadd.f32 %v5595_v9, %v3605_v50  ;;  %v5598_v46 = vadd.f32 %v5597_v42, %v5596_v48  ;;  %3156 = vmatmul.mubr.bf16.gmra.mrb[56].mxu0 %v6758_v3  ;;  %v6772_v50 = vld [vmem:[%s7012_s25 + $0x1c] ss:$36 sps:$4 sm:$0xff]   ;;  %v3616_v42 = vadd.f32 %v7556_v26, %v7813_v12  ;;  %v3624_v26 = vadd.f32 %v7568_v47, %v7813_v12 }
 0x1c0   : > { %4013 = vmatmul.mubr.bf16.gmra.mrb[200].mxu1 %v6744_v34  ;;  %3165 = vmatprep.mubr.bf16.mxu0 %v6764_v24 }
 0x1c1   : > { %v7833_v4 = vadd.f32 %v5598_v46, %v3608_v44  ;;  %4020 = vmatprep.mubr.bf16.mxu1 %v6750_v51  ;;  %v3621_v46 = vadd.f32 %v7559_v32, %v7813_v12  ;;  %v6839_v32 = vld [vmem:[%s8498_s1 + $0x600] ss:$12 sps:$4 sm:$0xff]  }
 0x1c3   : > { %v5599_v0 = vpop.f32.mrb[96].mxu1 }
 0x1c4   : > { %v5600_v52 = vpop.f32.mrb[97].mxu1 }
 0x1c5   : > { %v5601_v56 = vadd.f32 %v5600_v52, %v5599_v0  ;;  %v5602_v13 = vpop.f32.mrb[98].mxu1 }
 0x1c6   : > { %v5603_v9 = vpop.f32.mrb[99].mxu1 }
 0x1c7   : > { %v7839_v15 = vadd.f32 %v5601_v56, %v3613_v62  ;;  %v5604_v34 = vadd.f32 %v5603_v9, %v5602_v13  ;;  %3166 = vmatmul.mubr.bf16.gmra.mrb[60].mxu0 %v6766_v11  ;;  %v6775_v62 = vld [vmem:[%s7012_s25 + $0x64] ss:$36 sps:$4 sm:$0xff]  }
 0x1c8   : > { %4021 = vmatmul.mubr.bf16.gmra.mrb[204].mxu1 %v6752_v41  ;;  %3208 = vmatprep.mubr.bf16.mxu0 %v6772_v50  ;;  %v6840_v13 = vld [vmem:[%s8498_s1 + $0x61c] ss:$12 sps:$4 sm:$0xff]  }
 0x1c9   : > { %v7843_v51 = vadd.f32 %v5604_v34, %v3616_v42  ;;  %4028 = vmatprep.mubr.bf16.mxu1 %v6756_v45  ;;  %v7862_v42 = vld [vmem:[%s7012_s25 + $0x60] ss:$36 sps:$4 sm:$0xff]  }
 0x1cb   : > { %v5605_v48 = vpop.f32.mrb[100].mxu1 }
 0x1cc   : > { %v5606_v44 = vpop.f32.mrb[101].mxu1 }
 0x1cd   : > { %v5607_v0 = vadd.f32 %v5606_v44, %v5605_v48  ;;  %v5608_v52 = vpop.f32.mrb[102].mxu1  ;;  %v7867_v44 = vld [vmem:[%s7012_s25 + $0xac] ss:$36 sps:$4 sm:$0xff]  }
 0x1ce   : > { %v5609_v56 = vpop.f32.mrb[103].mxu1 }
 0x1cf   : > { %v7849_v40 = vadd.f32 %v5607_v0, %v3621_v46  ;;  %v5610_v41 = vadd.f32 %v5609_v56, %v5608_v52  ;;  %3209 = vmatmul.mubr.bf16.vlgmr.msra.gmra.mrb[0].mxu0 %v6770_v19  ;;  %v6842_v0 = vld [vmem:[%s8498_s1 + $0x634] ss:$12 sps:$4 sm:$0xff]  }
 0x1d0   : > { %4029 = vmatmul.mubr.bf16.gmra.mrb[208].mxu1 %v6758_v3  ;;  %3370 = vmatpush1.bf16.msra.mxu0 %v6839_v32  ;;  %v3629_v3 = vadd.f32 %v7577_v63, %v7813_v12  ;;  %v3632_v63 = vadd.f32 %v7583_v6, %v7813_v12  ;;  %v6844_v6 = vld [vmem:[%s8498_s1 + $0x64c] ss:$12 sps:$4 sm:$0xff]  }
 0x1d1   : > { %v7853_v45 = vadd.f32 %v5610_v41, %v3624_v26  ;;  %3218 = vmatprep.mubr.bf16.mxu0 %v6775_v62  ;;  %4036 = vmatprep.mubr.bf16.mxu1 %v6764_v24  ;;  %v6841_v24 = vld [vmem:[%s8498_s1 + $0x618] ss:$12 sps:$4 sm:$0xff]   ;;  %v6843_v41 = vld [vmem:[%s8498_s1 + $0x630] ss:$12 sps:$4 sm:$0xff]  }
 0x1d2   : > { %3371 = vmatprep.subr.bf16.mxu0 %v6840_v13 }
 0x1d3   : > { %v5611_v9 = vpop.f32.mrb[104].mxu1 }
 0x1d4   : > { %v5612_v47 = vpop.f32.mrb[105].mxu1  ;;  %3372 = vmatpush1.bf16.msra.mxu0 %v6841_v24  ;;  %v6845_v24 = vld [vmem:[%s8498_s1 + $0x648] ss:$12 sps:$4 sm:$0xff]  }
 0x1d5   : > { %v5613_v34 = vadd.f32 %v5612_v47, %v5611_v9  ;;  %v5614_v48 = vpop.f32.mrb[106].mxu1  ;;  %3373 = vmatprep.subr.bf16.mxu0 %v6842_v0  ;;  %v7890_v9 = vld [vmem:[%s7012_s25 + $0xa8] ss:$36 sps:$4 sm:$0xff]   ;;  %v3640_v0 = vadd.f32 %v7608_v28, %v7813_v12  ;;  %v6795_v28 = vld [vmem:[%s8498_s1 + $0x638] ss:$12 sps:$4 sm:$0xff]  }
 0x1d6   : > { %v5615_v46 = vpop.f32.mrb[107].mxu1 }
 0x1d7   : > { %v7875_v52 = vadd.f32 %v5613_v34, %v3629_v3  ;;  %v5616_v56 = vadd.f32 %v5615_v46, %v5614_v48  ;;  %3219 = vmatmul.mubr.bf16.gmra.mrb[4].mxu0 %v7862_v42  ;;  %v6788_v48 = vld [vmem:[%s8498_s1 + $0x620] ss:$12 sps:$4 sm:$0xff]  }
 0x1d8   : > { %4037 = vmatmul.mubr.bf16.gmra.mrb[212].mxu1 %v6766_v11  ;;  %3228 = vmatprep.mubr.bf16.mxu0 %v7867_v44  ;;  %v3637_v11 = vadd.f32 %v7597_v16, %v7813_v12 }
 0x1d9   : > { %v7880_v26 = vadd.f32 %v5616_v56, %v3632_v63  ;;  %4077 = vmatprep.mubr.bf16.mxu1 %v6772_v50  ;;  %3374 = vmatpush1.bf16.msra.mxu0 %v6843_v41  ;;  %v7895_v50 = vld [vmem:[%s7012_s25 + $0xf4] ss:$36 sps:$4 sm:$0xff]   ;;  %v6846_v63 = vld [vmem:[%s8498_s1 + $0x664] ss:$12 sps:$4 sm:$0xff]  }
 0x1da   : > { %3375 = vmatprep.subr.bf16.mxu0 %v6844_v6  ;;  %v7922_v6 = vld [vmem:[%s7012_s25 + $0xf0] ss:$36 sps:$4 sm:$0xff]  }
 0x1db   : > { %v5617_v32 = vpop.f32.mrb[108].mxu1 }
 0x1dc   : > { %v5618_v13 = vpop.f32.mrb[109].mxu1 }
 0x1dd   : > { %v5619_v47 = vadd.f32 %v5618_v13, %v5617_v32  ;;  %v5620_v3 = vpop.f32.mrb[110].mxu1  ;;  %3376 = vmatpush1.bf16.msra.mxu0 %v6845_v24  ;;  %v6847_v32 = vld [vmem:[%s8498_s1 + $0x660] ss:$12 sps:$4 sm:$0xff]   ;;  %v3648_v24 = vadd.f32 %v7641_v8, %v7813_v12 }
 0x1de   : > { %v5621_v34 = vpop.f32.mrb[111].mxu1  ;;  %3377 = vmatprep.subr.bf16.mxu0 %v6846_v63  ;;  %v6850_v8 = vld [vmem:[%s8498_s1 + $0x694] ss:$12 sps:$4 sm:$0xff]  }
 0x1df   : > { %v7903_v46 = vadd.f32 %v5619_v47, %v3637_v11  ;;  %v5622_v16 = vadd.f32 %v5621_v34, %v5620_v3  ;;  %3229 = vmatmul.mubr.bf16.gmra.mrb[8].mxu0 %v7890_v9  ;;  %v7930_v47 = vld [vmem:[%s7012_s25 + $0x13c] ss:$36 sps:$4 sm:$0xff]  }
 0x1e0   : > { %4078 = vmatmul.mubr.bf16.vlgmr.msra.gmra.mrb[216].mxu1 %v6770_v19  ;;  %3238 = vmatprep.mubr.bf16.mxu0 %v7895_v50 }
 0x1e1   : > { %v7911_v56 = vadd.f32 %v5622_v16, %v3640_v0  ;;  %5932 = vmatpush3.bf16.msra.mxu1 %v7733_v38  ;;  %4085 = vmatprep.mubr.bf16.mxu1 %v6775_v62  ;;  %v6848_v38 = vld [vmem:[%s8498_s1 + $0x67c] ss:$12 sps:$4 sm:$0xff]   ;;  %v3645_v62 = vadd.f32 %v7630_v55, %v7813_v12  ;;  %v6849_v55 = vld [vmem:[%s8498_s1 + $0x678] ss:$12 sps:$4 sm:$0xff]  }
 0x1e2   : > { %5933 = vmatprep.subr.bf16.mxu1 %v6788_v48  ;;  %3378 = vmatpush1.bf16.msra.mxu0 %v6847_v32  ;;  %v6802_v16 = vld [vmem:[%s8498_s1 + $0x650] ss:$12 sps:$4 sm:$0xff]  }
 0x1e3   : > { %v5623_v41 = vpop.f32.mrb[112].mxu1  ;;  %3379 = vmatprep.subr.bf16.mxu0 %v6848_v38 }
 0x1e4   : > { %v5624_v19 = vpop.f32.mrb[113].mxu1 }
 0x1e5   : > { %v5625_v13 = vadd.f32 %v5624_v19, %v5623_v41  ;;  %v5626_v11 = vpop.f32.mrb[114].mxu1  ;;  %5934 = vmatpush3.bf16.msra.mxu1 %v6788_v48  ;;  %v6809_v41 = vld [vmem:[%s8498_s1 + $0x668] ss:$12 sps:$4 sm:$0xff]   ;;  %v3653_v19 = vadd.f32 %v7666_v1, %v7813_v12 }
 0x1e6   : > { %v5627_v3 = vpop.f32.mrb[115].mxu1  ;;  %5935 = vmatprep.subr.bf16.mxu1 %v6795_v28  ;;  %3380 = vmatpush1.bf16.msra.mxu0 %v6849_v55  ;;  %v6816_v55 = vld [vmem:[%s8498_s1 + $0x680] ss:$12 sps:$4 sm:$0xff]   ;;  %v6853_v1 = vld [vmem:[%s8498_s1 + $0x6a8] ss:$12 sps:$4 sm:$0xff]  }
 0x1e7   : > { %v7932_v34 = vadd.f32 %v5625_v13, %v3645_v62  ;;  %v5628_v0 = vadd.f32 %v5627_v3, %v5626_v11  ;;  %3239 = vmatmul.mubr.bf16.gmra.mrb[12].mxu0 %v7922_v6  ;;  %3381 = vmatprep.subr.bf16.mxu0 %v6850_v8  ;;  %v6789_v13 = vld [vmem:[%s7012_s25 + $0x184] ss:$36 sps:$4 sm:$0xff]  }
 0x1e8   : > { %4086 = vmatmul.mubr.bf16.gmra.mrb[220].mxu1 %v7862_v42  ;;  %3248 = vmatprep.mubr.bf16.mxu0 %v7930_v47  ;;  %v6851_v42 = vld [vmem:[%s8498_s1 + $0x690] ss:$12 sps:$4 sm:$0xff]   ;;  %v6823_v8 = vld [vmem:[%s8498_s1 + $0x698] ss:$12 sps:$4 sm:$0xff]  }
 0x1e9   : > { %v7944_v48 = vadd.f32 %v5628_v0, %v3648_v24  ;;  %4093 = vmatprep.mubr.bf16.mxu1 %v7867_v44  ;;  %5936 = vmatpush3.bf16.msra.mxu1 %v6795_v28  ;;  %v6787_v44 = vld [vmem:[%s7012_s25 + $0x138] ss:$36 sps:$4 sm:$0xff]   ;;  %v3656_v24 = vadd.f32 %v7677_v30, %v7813_v12 }
 0x1ea   : > { %5937 = vmatprep.subr.bf16.mxu1 %v6802_v16  ;;  %3382 = vmatpush1.bf16.msra.mxu0 %v6851_v42  ;;  %v6852_v28 = vld [vmem:[%s8498_s1 + $0x6ac] ss:$12 sps:$4 sm:$0xff]   ;;  %v6791_v42 = vld [vmem:[%s7012_s25 + $0x180] ss:$36 sps:$4 sm:$0xff]  }
 0x1eb   : > { %v5629_v63 = vpop.f32.mrb[116].mxu1  ;;  %3383 = vmatprep.subr.bf16.mxu0 %v6852_v28 }
 0x1ec   : > { %v5630_v32 = vpop.f32.mrb[117].mxu1 }
 0x1ed   : > { %v5631_v38 = vadd.f32 %v5630_v32, %v5629_v63  ;;  %v5632_v62 = vpop.f32.mrb[118].mxu1  ;;  %5938 = vmatpush3.bf16.msra.mxu1 %v6802_v16  ;;  %v3661_v32 = vadd.f32 %v7702_v20, %v7813_v12 }
 0x1ee   : > { %v5633_v11 = vpop.f32.mrb[119].mxu1  ;;  %5939 = vmatprep.subr.bf16.mxu1 %v6809_v41  ;;  %3384 = vmatpush1.bf16.msra.mxu0 %v6853_v1 }
 0x1ef   : > { %v7964_v3 = vadd.f32 %v5631_v38, %v3653_v19  ;;  %v5634_v0 = vadd.f32 %v5633_v11, %v5632_v62  ;;  %3249 = vmatmul.mubr.bf16.gmra.mrb[16].mxu0 %v6787_v44  ;;  %v6828_v11 = vld [vmem:[%s8498_s1 + $0x6b0] ss:$12 sps:$4 sm:$0xff]  }
 0x1f0   : > { %4094 = vmatmul.mubr.bf16.gmra.mrb[224].mxu1 %v7890_v9  ;;  %3258 = vmatprep.mubr.bf16.mxu0 %v6789_v13  ;;  %v6792_v9 = vld [vmem:[%s7012_s25 + $0x1cc] ss:$36 sps:$4 sm:$0xff]  }
 0x1f1   : > { %v7975_v16 = vadd.f32 %v5634_v0, %v3656_v24  ;;  %4101 = vmatprep.mubr.bf16.mxu1 %v7895_v50  ;;  %5940 = vmatpush3.bf16.msra.mxu1 %v6809_v41  ;;  %v3664_v50 = vadd.f32 %v7711_v29, %v7813_v12  ;;  %v6794_v0 = vld [vmem:[%s7012_s25 + $0x1c8] ss:$36 sps:$4 sm:$0xff]  }
 0x1f2   : > { %5941 = vmatprep.subr.bf16.mxu1 %v6816_v55 }
 0x1f3   : > { %v5635_v30 = vpop.f32.mrb[120].mxu1 }
 0x1f4   : > { %v5636_v63 = vpop.f32.mrb[121].mxu1 }
 0x1f5   : > { %v5637_v28 = vadd.f32 %v5636_v63, %v5635_v30  ;;  %v5638_v19 = vpop.f32.mrb[122].mxu1  ;;  %5942 = vmatpush3.bf16.msra.mxu1 %v6816_v55  ;;  %v3669_v55 = vadd.f32 %v7736_v5, %v7813_v12  ;;  %v6796_v63 = vld [vmem:[%s7012_s25 + $0x214] ss:$36 sps:$4 sm:$0xff]  }
 0x1f6   : > { %v5639_v38 = vpop.f32.mrb[123].mxu1  ;;  %5943 = vmatprep.subr.bf16.mxu1 %v6823_v8 }
 0x1f7   : > { %v7987_v41 = vadd.f32 %v5637_v28, %v3661_v32  ;;  %v5640_v62 = vadd.f32 %v5639_v38, %v5638_v19  ;;  %3259 = vmatmul.mubr.bf16.gmra.mrb[20].mxu0 %v6791_v42  ;;  %v6798_v38 = vld [vmem:[%s7012_s25 + $0x210] ss:$36 sps:$4 sm:$0xff]  }
 0x1f8   : > { %4102 = vmatmul.mubr.bf16.gmra.mrb[228].mxu1 %v7922_v6  ;;  %3268 = vmatprep.mubr.bf16.mxu0 %v6792_v9  ;;  %v3672_v6 = vadd.f32 %v7742_v61, %v7813_v12 }
 0x1f9   : > { %v7993_v20 = vadd.f32 %v5640_v62, %v3664_v50  ;;  %4109 = vmatprep.mubr.bf16.mxu1 %v7930_v47  ;;  %5944 = vmatpush3.bf16.msra.mxu1 %v6823_v8  ;;  %v3677_v50 = vadd.f32 %v7757_v59, %v7813_v12  ;;  %v6801_v59 = vld [vmem:[%s7012_s25 + $0x258] ss:$36 sps:$4 sm:$0xff]  }
 0x1fa   : > { %5945 = vmatprep.subr.bf16.mxu1 %v6828_v11 }
 0x1fb   : > { %v5641_v24 = vpop.f32.mrb[124].mxu1 }
 0x1fc   : > { %v5642_v29 = vpop.f32.mrb[125].mxu1 }
 0x1fd   : > { %v5643_v1 = vadd.f32 %v5642_v29, %v5641_v24  ;;  %v5644_v30 = vpop.f32.mrb[126].mxu1  ;;  %5946 = vmatpush3.bf16.msra.mxu1 %v6828_v11  ;;  %v6799_v24 = vld [vmem:[%s7012_s25 + $0x25c] ss:$36 sps:$4 sm:$0xff]   ;;  %v3680_v29 = vadd.f32 %v7763_v14, %v7813_v12 }
 0x1fe   : > { %v5645_v32 = vpop.f32.mrb[127].mxu1 }
 0x1ff   : > { %v8002_v28 = vadd.f32 %v5643_v1, %v3669_v55  ;;  %v5646_v47 = vadd.f32 %v5645_v32, %v5644_v30  ;;  %3269 = vmatmul.mubr.bf16.gmra.mrb[24].mxu0 %v6794_v0  ;;  %v3685_v32 = vadd.f32 %v7775_v43, %v7813_v12  ;;  %v6805_v43 = vld [vmem:[%s7012_s25 + $0x2a0] ss:$36 sps:$4 sm:$0xff]  }
 0x200   : > { %4110 = vmatmul.mubr.bf16.gmra.mrb[232].mxu1 %v6787_v44  ;;  %3278 = vmatprep.mubr.bf16.mxu0 %v6796_v63 }
 0x201   : > { %v8004_v8 = vadd.f32 %v5646_v47, %v3672_v6  ;;  %4117 = vmatprep.mubr.bf16.mxu1 %v6789_v13 }
 0x203   : > { %v5647_v5 = vpop.f32.mrb[128].mxu1 }
 0x204   : > { %v5648_v19 = vpop.f32.mrb[129].mxu1 }
 0x205   : > { %v5649_v62 = vadd.f32 %v5648_v19, %v5647_v5  ;;  %v5650_v11 = vpop.f32.mrb[130].mxu1  ;;  %v6803_v5 = vld [vmem:[%s7012_s25 + $0x2a4] ss:$36 sps:$4 sm:$0xff]   ;;  %v3688_v19 = vadd.f32 %v7778_v2, %v7813_v12 }
 0x206   : > { %v5651_v61 = vpop.f32.mrb[131].mxu1 }
 0x207   : > { %v8012_v44 = vadd.f32 %v5649_v62, %v3677_v50  ;;  %v5652_v55 = vadd.f32 %v5651_v61, %v5650_v11  ;;  %3279 = vmatmul.mubr.bf16.gmra.mrb[28].mxu0 %v6798_v38  ;;  %v3693_v61 = vadd.f32 %v7784_v18, %v7813_v12  ;;  %v6808_v18 = vld [vmem:[%s7012_s25 + $0x2e8] ss:$36 sps:$4 sm:$0xff]  }
 0x208   : > { %4118 = vmatmul.mubr.bf16.gmra.mrb[236].mxu1 %v6791_v42  ;;  %3288 = vmatprep.mubr.bf16.mxu0 %v6799_v24 }
 0x209   : > { %v8014_v13 = vadd.f32 %v5652_v55, %v3680_v29  ;;  %4125 = vmatprep.mubr.bf16.mxu1 %v6792_v9 }
 0x20b   : > { %v5653_v1 = vpop.f32.mrb[132].mxu1 }
 0x20c   : > { %v5654_v30 = vpop.f32.mrb[133].mxu1 }
 0x20d   : > { %v5655_v6 = vadd.f32 %v5654_v30, %v5653_v1  ;;  %v5656_v47 = vpop.f32.mrb[134].mxu1  ;;  %v6806_v1 = vld [vmem:[%s7012_s25 + $0x2ec] ss:$36 sps:$4 sm:$0xff]   ;;  %v3696_v30 = vadd.f32 %v7787_v22, %v7813_v12 }
 0x20e   : > { %v5657_v14 = vpop.f32.mrb[135].mxu1 }
 0x20f   : > { %v8022_v42 = vadd.f32 %v5655_v6, %v3685_v32  ;;  %v5658_v50 = vadd.f32 %v5657_v14, %v5656_v47  ;;  %3289 = vmatmul.mubr.bf16.gmra.mrb[32].mxu0 %v6801_v59  ;;  %v3701_v14 = vadd.f32 %v7790_v17, %v7813_v12  ;;  %v6812_v17 = vld [vmem:[%s7012_s25 + $0x330] ss:$36 sps:$4 sm:$0xff]  }
 0x210   : > { %4126 = vmatmul.mubr.bf16.gmra.mrb[240].mxu1 %v6794_v0  ;;  %3298 = vmatprep.mubr.bf16.mxu0 %v6803_v5 }
 0x211   : > { %v8024_v9 = vadd.f32 %v5658_v50, %v3688_v19  ;;  %4133 = vmatprep.mubr.bf16.mxu1 %v6796_v63 }
 0x213   : > { %v5659_v62 = vpop.f32.mrb[136].mxu1 }
 0x214   : > { %v5660_v11 = vpop.f32.mrb[137].mxu1 }
 0x215   : > { %v5661_v29 = vadd.f32 %v5660_v11, %v5659_v62  ;;  %v5662_v55 = vpop.f32.mrb[138].mxu1  ;;  %v6810_v62 = vld [vmem:[%s7012_s25 + $0x334] ss:$36 sps:$4 sm:$0xff]   ;;  %v3704_v11 = vadd.f32 %v7793_v10, %v7813_v12 }
 0x216   : > { %v5663_v2 = vpop.f32.mrb[139].mxu1 }
 0x217   : > { %v8032_v0 = vadd.f32 %v5661_v29, %v3693_v61  ;;  %v5664_v32 = vadd.f32 %v5663_v2, %v5662_v55  ;;  %3299 = vmatmul.mubr.bf16.gmra.mrb[36].mxu0 %v6805_v43  ;;  %v3709_v2 = vadd.f32 %v7796_v57, %v7813_v12  ;;  %v6815_v57 = vld [vmem:[%s7012_s25 + $0x378] ss:$36 sps:$4 sm:$0xff]  }
 0x218   : > { %4134 = vmatmul.mubr.bf16.gmra.mrb[244].mxu1 %v6798_v38  ;;  %3308 = vmatprep.mubr.bf16.mxu0 %v6806_v1 }
 0x219   : > { %v8034_v63 = vadd.f32 %v5664_v32, %v3696_v30  ;;  %4141 = vmatprep.mubr.bf16.mxu1 %v6799_v24 }
 0x21b   : > { %v5665_v6 = vpop.f32.mrb[140].mxu1 }
 0x21c   : > { %v5666_v47 = vpop.f32.mrb[141].mxu1 }
 0x21d   : > { %v5667_v19 = vadd.f32 %v5666_v47, %v5665_v6  ;;  %v5668_v50 = vpop.f32.mrb[142].mxu1  ;;  %v6813_v6 = vld [vmem:[%s7012_s25 + $0x37c] ss:$36 sps:$4 sm:$0xff]   ;;  %v3712_v47 = vadd.f32 %v7799_v54, %v7813_v12  ;;  %v6817_v54 = vld [vmem:[%s7012_s25 + $0x3c4] ss:$36 sps:$4 sm:$0xff]  }
 0x21e   : > { %v5669_v22 = vpop.f32.mrb[143].mxu1 }
 0x21f   : > { %v8042_v38 = vadd.f32 %v5667_v19, %v3701_v14  ;;  %v5670_v61 = vadd.f32 %v5669_v22, %v5668_v50  ;;  %3309 = vmatmul.mubr.bf16.gmra.mrb[40].mxu0 %v6808_v18  ;;  %v3717_v22 = vadd.f32 %v7805_v36, %v7813_v12 }
 0x220   : > { %4142 = vmatmul.mubr.bf16.gmra.mrb[248].mxu1 %v6801_v59  ;;  %3318 = vmatprep.mubr.bf16.mxu0 %v6810_v62 }
 0x221   : > { %v8044_v24 = vadd.f32 %v5670_v61, %v3704_v11  ;;  %4149 = vmatprep.mubr.bf16.mxu1 %v6803_v5 }
 0x223   : > { %v5671_v29 = vpop.f32.mrb[144].mxu1 }
 0x224   : > { %v5672_v55 = vpop.f32.mrb[145].mxu1 }
 0x225   : > { %v5673_v30 = vadd.f32 %v5672_v55, %v5671_v29  ;;  %v5674_v32 = vpop.f32.mrb[146].mxu1  ;;  %v3720_v55 = vadd.f32 %v7811_v53, %v7813_v12 }
 0x226   : > { %v5675_v10 = vpop.f32.mrb[147].mxu1 }
 0x227   : > { %v8052_v59 = vadd.f32 %v5673_v30, %v3709_v2  ;;  %v5676_v14 = vadd.f32 %v5675_v10, %v5674_v32  ;;  %3319 = vmatmul.mubr.bf16.gmra.mrb[44].mxu0 %v6812_v17  ;;  %v6819_v32 = vld [vmem:[%s7012_s25 + $0x3c0] ss:$36 sps:$4 sm:$0xff]  }
 0x228   : > { %4150 = vmatmul.mubr.bf16.gmra.mrb[252].mxu1 %v6805_v43  ;;  %3328 = vmatprep.mubr.bf16.mxu0 %v6813_v6 }
 0x229   : > { %v8054_v5 = vadd.f32 %v5676_v14, %v3712_v47  ;;  %4157 = vmatprep.mubr.bf16.mxu1 %v6806_v1  ;;  %v6820_v14 = vld [vmem:[%s7012_s25 + $0x40c] ss:$36 sps:$4 sm:$0xff]  }
 0x22b   : > { %v5677_v19 = vpop.f32.mrb[148].mxu1 }
 0x22c   : > { %v5678_v50 = vpop.f32.mrb[149].mxu1 }
 0x22d   : > { %v5679_v11 = vadd.f32 %v5678_v50, %v5677_v19  ;;  %v5680_v61 = vpop.f32.mrb[150].mxu1 }
 0x22e   : > { %v5681_v29 = vpop.f32.mrb[151].mxu1 }
 0x22f   : > { %v8062_v43 = vadd.f32 %v5679_v11, %v3717_v22  ;;  %v5682_v2 = vadd.f32 %v5681_v29, %v5680_v61  ;;  %3329 = vmatmul.mubr.bf16.gmra.mrb[48].mxu0 %v6815_v57  ;;  %v6822_v22 = vld [vmem:[%s7012_s25 + $0x408] ss:$36 sps:$4 sm:$0xff]   ;;  %v6824_v29 = vld [vmem:[%s7012_s25 + $0x454] ss:$36 sps:$4 sm:$0xff]  }
 0x230   : > { %4158 = vmatmul.mubr.bf16.gmra.mrb[0].mxu1 %v6808_v18  ;;  %3338 = vmatprep.mubr.bf16.mxu0 %v6817_v54 }
 0x231   : > { %v8064_v1 = vadd.f32 %v5682_v2, %v3720_v55  ;;  %4165 = vmatprep.mubr.bf16.mxu1 %v6810_v62 }
 0x233   : > { %v5699_v30 = vpop.f32.mrb[152].mxu1 }
 0x234   : > { %v5700_v36 = vpop.f32.mrb[153].mxu1 }
 0x235   : > { %v5701_v10 = vadd.f32 %v5700_v36, %v5699_v30  ;;  %v5702_v47 = vpop.f32.mrb[154].mxu1  ;;  %v6826_v30 = vld [vmem:[%s7012_s25 + $0x450] ss:$36 sps:$4 sm:$0xff]  }
 0x236   : > { %v5703_v19 = vpop.f32.mrb[155].mxu1 }
 0x237   : > { %v8069_v53 = vadd.f32 %v5701_v10, %v7819_v49  ;;  %v5704_v12 = vadd.f32 %v5703_v19, %v5702_v47  ;;  %3339 = vmatmul.mubr.bf16.gmra.mrb[52].mxu0 %v6819_v32 }
 0x238   : > { %4166 = vmatmul.mubr.bf16.gmra.mrb[4].mxu1 %v6812_v17  ;;  %3348 = vmatprep.mubr.bf16.mxu0 %v6820_v14 }
 0x239   : > { %v8072_v18 = vadd.f32 %v5704_v12, %v7823_v58  ;;  %4173 = vmatprep.mubr.bf16.mxu1 %v6813_v6 }
 0x23b   : > { %v5705_v62 = vpop.f32.mrb[156].mxu1 }
 0x23c   : > { %v5706_v50 = vpop.f32.mrb[157].mxu1 }
 0x23d   : > { %v5707_v11 = vadd.f32 %v5706_v50, %v5705_v62  ;;  %v5708_v61 = vpop.f32.mrb[158].mxu1  ;;  %v6827_v62 = vld [vmem:[%s7012_s25 + $0x20] ss:$36 sps:$4 sm:$0xff]  }
 0x23e   : > { %v5709_v55 = vpop.f32.mrb[159].mxu1 }
 0x23f   : > { %v8077_v2 = vadd.f32 %v5707_v11, %v7829_v7  ;;  %v5710_v49 = vadd.f32 %v5709_v55, %v5708_v61  ;;  %3349 = vmatmul.mubr.bf16.gmra.mrb[56].mxu0 %v6822_v22 }
 0x240   : > { %4174 = vmatmul.mubr.bf16.gmra.mrb[8].mxu1 %v6815_v57  ;;  %3358 = vmatprep.mubr.bf16.mxu0 %v6824_v29 }
 0x241   : > { %v8080_v17 = vadd.f32 %v5710_v49, %v7833_v4  ;;  %4181 = vmatprep.mubr.bf16.mxu1 %v6817_v54  ;;  %v8518_v4 = vmov 0   ;;  %v6829_v49 = vld [vmem:[%s7012_s25 + $0x68] ss:$36 sps:$4 sm:$0xff]  }
 0x243   : > { %v5711_v58 = vpop.f32.mrb[160].mxu1 }
 0x244   : > { %v5712_v6 = vpop.f32.mrb[161].mxu1 }
 0x245   : > { %v5713_v36 = vadd.f32 %v5712_v6, %v5711_v58  ;;  %v5714_v10 = vpop.f32.mrb[162].mxu1 }
 0x246   : > { %v5715_v47 = vpop.f32.mrb[163].mxu1 }
 0x247   : > { %v8084_v19 = vadd.f32 %v5713_v36, %v7839_v15  ;;  %v5716_v7 = vadd.f32 %v5715_v47, %v5714_v10  ;;  %3359 = vmatmul.mubr.bf16.gmra.mrb[60].mxu0 %v6826_v30  ;;  %v6830_v47 = vld [vmem:[%s7012_s25 + $0xb0] ss:$36 sps:$4 sm:$0xff]  }
 0x248   : > { %4182 = vmatmul.mubr.bf16.gmra.mrb[12].mxu1 %v6819_v32  ;;  %3401 = vmatprep.mubr.bf16.mxu0 %v8518_v4 }
 0x249   : > { %v8087_v57 = vadd.f32 %v5716_v7, %v7843_v51  ;;  %4189 = vmatprep.mubr.bf16.mxu1 %v6820_v14 }
 0x24b   : > { %v5717_v54 = vpop.f32.mrb[164].mxu1 }
 0x24c   : > { %v5718_v12 = vpop.f32.mrb[165].mxu1 }
 0x24d   : > { %v5719_v50 = vadd.f32 %v5718_v12, %v5717_v54  ;;  %v5720_v11 = vpop.f32.mrb[166].mxu1 }
 0x24e   : > { %v5721_v61 = vpop.f32.mrb[167].mxu1 }
 0x24f   : > { %v8092_v55 = vadd.f32 %v5719_v50, %v7849_v40  ;;  %v5722_v15 = vadd.f32 %v5721_v61, %v5720_v11  ;;  %3402 = vmatmul.mubr.bf16.vlgmr.msra.gmra.mrb[0].mxu0 %v6827_v62  ;;  %v6831_v11 = vld [vmem:[%s7012_s25 + $0xf8] ss:$36 sps:$4 sm:$0xff]  }
 0x250   : > { %4190 = vmatmul.mubr.bf16.gmra.mrb[16].mxu1 %v6822_v22  ;;  %3411 = vmatprep.mubr.bf16.mxu0 %v8518_v4 }
 0x251   : > { %v8095_v32 = vadd.f32 %v5722_v15, %v7853_v45  ;;  %4197 = vmatprep.mubr.bf16.mxu1 %v6824_v29 }
 0x253   : > { %v5723_v51 = vpop.f32.mrb[168].mxu1 }
 0x254   : > { %v5724_v14 = vpop.f32.mrb[169].mxu1 }
 0x255   : > { %v5725_v58 = vadd.f32 %v5724_v14, %v5723_v51  ;;  %v5726_v6 = vpop.f32.mrb[170].mxu1  ;;  %v6832_v51 = vld [vmem:[%s7012_s25 + $0x140] ss:$36 sps:$4 sm:$0xff]  }
 0x256   : > { %v5727_v36 = vpop.f32.mrb[171].mxu1 }
 0x257   : > { %v8100_v10 = vadd.f32 %v5725_v58, %v7875_v52  ;;  %v5728_v40 = vadd.f32 %v5727_v36, %v5726_v6  ;;  %3412 = vmatmul.mubr.bf16.gmra.mrb[4].mxu0 %v6829_v49  ;;  %v6833_v36 = vld [vmem:[%s7012_s25 + $0x188] ss:$36 sps:$4 sm:$0xff]  }
 0x258   : > { %4198 = vmatmul.mubr.bf16.gmra.mrb[20].mxu1 %v6826_v30  ;;  %3421 = vmatprep.mubr.bf16.mxu0 %v8518_v4 }
 0x259   : > { %v8103_v22 = vadd.f32 %v5728_v40, %v7880_v26  ;;  %5947 = vmatprep.mubr.bf16.mxu1 %v6827_v62 }
 0x25b   : > { %v5729_v45 = vpop.f32.mrb[172].mxu1 }
 0x25c   : > { %v5730_v29 = vpop.f32.mrb[173].mxu1 }
 0x25d   : > { %v5731_v7 = vadd.f32 %v5730_v29, %v5729_v45  ;;  %v5732_v54 = vpop.f32.mrb[174].mxu1  ;;  %v6834_v29 = vld [vmem:[%s7012_s25 + $0x1d0] ss:$36 sps:$4 sm:$0xff]  }
 0x25e   : > { %v5733_v12 = vpop.f32.mrb[175].mxu1 }
 0x25f   : > { %v8108_v52 = vadd.f32 %v5731_v7, %v7903_v46  ;;  %v5734_v50 = vadd.f32 %v5733_v12, %v5732_v54  ;;  %3422 = vmatmul.mubr.bf16.gmra.mrb[8].mxu0 %v6830_v47 }
 0x260   : > { %5948 = vmatmul.mubr.bf16.vlgmr.msra.gmra.mrb[24].mxu1 %v6829_v49  ;;  %3431 = vmatprep.mubr.bf16.mxu0 %v8518_v4 }
 0x261   : > { %v8111_v26 = vadd.f32 %v5734_v50, %v7911_v56  ;;  %5951 = vmatprep.mubr.bf16.mxu1 %v6830_v47  ;;  %v6835_v50 = vld [vmem:[%s7012_s25 + $0x218] ss:$36 sps:$4 sm:$0xff]  }
 0x263   : > { %v5735_v30 = vpop.f32.mrb[176].mxu1 }
 0x264   : > { %v5736_v62 = vpop.f32.mrb[177].mxu1 }
 0x265   : > { %v5737_v61 = vadd.f32 %v5736_v62, %v5735_v30  ;;  %v5738_v15 = vpop.f32.mrb[178].mxu1 }
 0x266   : > { %v5739_v14 = vpop.f32.mrb[179].mxu1 }
 0x267   : > { %v8117_v46 = vadd.f32 %v5737_v61, %v7932_v34  ;;  %v5740_v58 = vadd.f32 %v5739_v14, %v5738_v15  ;;  %3432 = vmatmul.mubr.bf16.gmra.mrb[12].mxu0 %v6831_v11 }
 0x268   : > { %5952 = vmatmul.mubr.bf16.gmra.mrb[28].mxu1 %v6831_v11  ;;  %3441 = vmatprep.mubr.bf16.mxu0 %v8518_v4  ;;  %v6836_v11 = vld [vmem:[%s7012_s25 + $0x260] ss:$36 sps:$4 sm:$0xff]  }
 0x269   : > { %v8120_v56 = vadd.f32 %v5740_v58, %v7944_v48  ;;  %5955 = vmatprep.mubr.bf16.mxu1 %v6832_v51  ;;  %v6837_v58 = vld [vmem:[%s7012_s25 + $0x2a8] ss:$36 sps:$4 sm:$0xff]  }
 0x26b   : > { %v5741_v49 = vpop.f32.mrb[180].mxu1 }
 0x26c   : > { %v5742_v6 = vpop.f32.mrb[181].mxu1 }
 0x26d   : > { %v5743_v40 = vadd.f32 %v5742_v6, %v5741_v49  ;;  %v5744_v45 = vpop.f32.mrb[182].mxu1 }
 0x26e   : > { %v5745_v47 = vpop.f32.mrb[183].mxu1 }
 0x26f   : > { %v8126_v34 = vadd.f32 %v5743_v40, %v7964_v3  ;;  %v5746_v7 = vadd.f32 %v5745_v47, %v5744_v45  ;;  %3442 = vmatmul.mubr.bf16.gmra.mrb[16].mxu0 %v6832_v51 }
 0x270   : > { %5956 = vmatmul.mubr.bf16.gmra.mrb[32].mxu1 %v6833_v36  ;;  %3451 = vmatprep.mubr.bf16.mxu0 %v8518_v4 }
 0x271   : > { %v8129_v48 = vadd.f32 %v5746_v7, %v7975_v16  ;;  %5959 = vmatprep.mubr.bf16.mxu1 %v6834_v29 }
 0x273   : > { %v5747_v54 = vpop.f32.mrb[184].mxu1 }
 0x274   : > { %v5748_v12 = vpop.f32.mrb[185].mxu1 }
 0x275   : > { %v5749_v30 = vadd.f32 %v5748_v12, %v5747_v54  ;;  %v5750_v62 = vpop.f32.mrb[186].mxu1 }
 0x276   : > { %v5751_v61 = vpop.f32.mrb[187].mxu1 }
 0x277   : > { %v8135_v3 = vadd.f32 %v5749_v30, %v7987_v41  ;;  %v5752_v15 = vadd.f32 %v5751_v61, %v5750_v62  ;;  %3452 = vmatmul.mubr.bf16.gmra.mrb[20].mxu0 %v6833_v36  ;;  %v6856_v61 = vld [vmem:[%s7012_s25 + $0x380] ss:$36 sps:$4 sm:$0xff]  }
 0x278   : > { %5960 = vmatmul.mubr.bf16.gmra.mrb[36].mxu1 %v6835_v50  ;;  %3461 = vmatprep.mubr.bf16.mxu0 %v8518_v4 }
 0x279   : > { %v8138_v16 = vadd.f32 %v5752_v15, %v7993_v20  ;;  %5963 = vmatprep.mubr.bf16.mxu1 %v6836_v11  ;;  %v6854_v20 = vld [vmem:[%s7012_s25 + $0x2f0] ss:$36 sps:$4 sm:$0xff]  }
 0x27b   : > { %v5753_v51 = vpop.f32.mrb[188].mxu1 }
 0x27c   : > { %v5754_v14 = vpop.f32.mrb[189].mxu1 }
 0x27d   : > { %v5755_v49 = vadd.f32 %v5754_v14, %v5753_v51  ;;  %v5756_v6 = vpop.f32.mrb[190].mxu1 }
 0x27e   : > { %v5757_v40 = vpop.f32.mrb[191].mxu1 }
 0x27f   : > { %v8143_v45 = vadd.f32 %v5755_v49, %v8002_v28  ;;  %v5758_v41 = vadd.f32 %v5757_v40, %v5756_v6  ;;  %3462 = vmatmul.mubr.bf16.gmra.mrb[24].mxu0 %v6834_v29  ;;  %v6855_v29 = vld [vmem:[%s7012_s25 + $0x338] ss:$36 sps:$4 sm:$0xff]  }
 0x280   : > { %5964 = vmatmul.mubr.bf16.gmra.mrb[40].mxu1 %v6837_v58  ;;  %3471 = vmatprep.mubr.bf16.mxu0 %v8518_v4 }
 0x281   : > { %v8146_v36 = vadd.f32 %v5758_v41, %v8004_v8  ;;  %5967 = vmatprep.mubr.bf16.mxu1 %v6854_v20  ;;  %v6858_v41 = vld [vmem:[%s7012_s25 + $0x410] ss:$36 sps:$4 sm:$0xff]  }
 0x283   : > { %v5759_v47 = vpop.f32.mrb[192].mxu1 }
 0x284   : > { %v5760_v7 = vpop.f32.mrb[193].mxu1 }
 0x285   : > { %v5761_v54 = vadd.f32 %v5760_v7, %v5759_v47  ;;  %v5762_v12 = vpop.f32.mrb[194].mxu1 }
 0x286   : > { %v5763_v30 = vpop.f32.mrb[195].mxu1 }
 0x287   : > { %v8151_v28 = vadd.f32 %v5761_v54, %v8012_v44  ;;  %v5764_v62 = vadd.f32 %v5763_v30, %v5762_v12  ;;  %3472 = vmatmul.mubr.bf16.gmra.mrb[28].mxu0 %v6835_v50  ;;  %v6857_v50 = vld [vmem:[%s7012_s25 + $0x3c8] ss:$36 sps:$4 sm:$0xff]  }
 0x288   : > { %5968 = vmatmul.mubr.bf16.gmra.mrb[44].mxu1 %v6855_v29  ;;  %3481 = vmatprep.mubr.bf16.mxu0 %v8518_v4 }
 0x289   : > { %v8155_v8 = vadd.f32 %v5764_v62, %v8014_v13  ;;  %5971 = vmatprep.mubr.bf16.mxu1 %v6856_v61 }
 0x28b   : > { %v5765_v15 = vpop.f32.mrb[196].mxu1 }
 0x28c   : > { %v5766_v51 = vpop.f32.mrb[197].mxu1 }
 0x28d   : > { %v5767_v14 = vadd.f32 %v5766_v51, %v5765_v15  ;;  %v5768_v49 = vpop.f32.mrb[198].mxu1 }
 0x28e   : > { %v5769_v6 = vpop.f32.mrb[199].mxu1 }
 0x28f   : > { %v8160_v44 = vadd.f32 %v5767_v14, %v8022_v42  ;;  %v5770_v40 = vadd.f32 %v5769_v6, %v5768_v49  ;;  %3482 = vmatmul.mubr.bf16.gmra.mrb[32].mxu0 %v6836_v11  ;;  %v6859_v11 = vld [vmem:[%s7012_s25 + $0x458] ss:$36 sps:$4 sm:$0xff]  }
 0x290   : > { %5972 = vmatmul.mubr.bf16.gmra.mrb[48].mxu1 %v6857_v50  ;;  %3491 = vmatprep.mubr.bf16.mxu0 %v8518_v4 }
 0x291   : > { %v8164_v13 = vadd.f32 %v5770_v40, %v8024_v9  ;;  %5975 = vmatprep.mubr.bf16.mxu1 %v6858_v41 }
 0x293   : > { %v5771_v20 = vpop.f32.mrb[200].mxu1 }
 0x294   : > { %v5772_v47 = vpop.f32.mrb[201].mxu1 }
 0x295   : > { %v5773_v7 = vadd.f32 %v5772_v47, %v5771_v20  ;;  %v5774_v54 = vpop.f32.mrb[202].mxu1 }
 0x296   : > { %v5775_v12 = vpop.f32.mrb[203].mxu1 }
 0x297   : > { %v8169_v42 = vadd.f32 %v5773_v7, %v8032_v0  ;;  %v5776_v30 = vadd.f32 %v5775_v12, %v5774_v54  ;;  %3492 = vmatmul.mubr.bf16.gmra.mrb[36].mxu0 %v6837_v58 }
 0x298   : > { %5976 = vmatmul.mubr.bf16.gmra.mrb[52].mxu1 %v6859_v11 }
 0x299   : > { %v8173_v62 = vadd.f32 %v5776_v30, %v8034_v63 }
 0x29b   : > { %v5777_v9 = vpop.f32.mrb[204].mxu1 }
 0x29c   : > { %v5778_v29 = vpop.f32.mrb[205].mxu1 }
 0x29d   : > { %v5779_v4 = vadd.f32 %v5778_v29, %v5777_v9  ;;  %v5780_v61 = vpop.f32.mrb[206].mxu1 }
 0x29e   : > { %v5781_v15 = vpop.f32.mrb[207].mxu1 }
 0x29f   : > { %v8176_v51 = vadd.f32 %v5779_v4, %v8042_v38  ;;  %v5782_v14 = vadd.f32 %v5781_v15, %v5780_v61 }
 0x2a1   : > { %v8179_v49 = vadd.f32 %v5782_v14, %v8044_v24 }
 0x2a3   : > { %v5783_v0 = vpop.f32.mrb[208].mxu1 }
 0x2a4   : > { %v5784_v6 = vpop.f32.mrb[209].mxu1 }
 0x2a5   : > { %v5785_v58 = vadd.f32 %v5784_v6, %v5783_v0  ;;  %v5786_v40 = vpop.f32.mrb[210].mxu1 }
 0x2a6   : > { %v5787_v50 = vpop.f32.mrb[211].mxu1 }
 0x2a7   : > { %v8182_v63 = vadd.f32 %v5785_v58, %v8052_v59  ;;  %v5788_v41 = vadd.f32 %v5787_v50, %v5786_v40 }
 0x2a9   : > { %v8185_v20 = vadd.f32 %v5788_v41, %v8054_v5 }
 0x2ab   : > { %v5789_v47 = vpop.f32.mrb[212].mxu1 }
 0x2ac   : > { %v5790_v7 = vpop.f32.mrb[213].mxu1 }
 0x2ad   : > { %v5791_v38 = vadd.f32 %v5790_v7, %v5789_v47  ;;  %v5792_v54 = vpop.f32.mrb[214].mxu1 }
 0x2ae   : > { %v5793_v12 = vpop.f32.mrb[215].mxu1 }
 0x2af   : > { %v8188_v24 = vadd.f32 %v5791_v38, %v8062_v43  ;;  %v5794_v30 = vadd.f32 %v5793_v12, %v5792_v54 }
 0x2b1   : > { %v8191_v11 = vadd.f32 %v5794_v30, %v8064_v1 }
 0x2b3   : > { %v5811_v9 = vpop.f32.mrb[216].mxu1 }
 0x2b4   : > { %v5812_v29 = vpop.f32.mrb[217].mxu1 }
 0x2b5   : > { %v5813_v59 = vadd.f32 %v5812_v29, %v5811_v9  ;;  %v5814_v4 = vpop.f32.mrb[218].mxu1 }
 0x2b6   : > { %v5815_v61 = vpop.f32.mrb[219].mxu1 }
 0x2b7   : > { %v5816_v15 = vadd.f32 %v5815_v61, %v5814_v4  ;;  %v8194_v5 = vadd.f32 %v5813_v59, %v8069_v53 }
 0x2b9   : > { %v8197_v14 = vadd.f32 %v5816_v15, %v8072_v18 }
 0x2bb   : > { %v5817_v0 = vpop.f32.mrb[220].mxu1 }
 0x2bc   : > { %v5818_v6 = vpop.f32.mrb[221].mxu1 }
 0x2bd   : > { %v5819_v43 = vadd.f32 %v5818_v6, %v5817_v0  ;;  %v5820_v58 = vpop.f32.mrb[222].mxu1 }
 0x2be   : > { %v5821_v40 = vpop.f32.mrb[223].mxu1 }
 0x2bf   : > { %v5822_v50 = vadd.f32 %v5821_v40, %v5820_v58  ;;  %v8200_v1 = vadd.f32 %v5819_v43, %v8077_v2 }
 0x2c1   : > { %v8203_v41 = vadd.f32 %v5822_v50, %v8080_v17 }
 0x2c3   : > { %v5823_v47 = vpop.f32.mrb[224].mxu1 }
 0x2c4   : > { %v5824_v7 = vpop.f32.mrb[225].mxu1 }
 0x2c5   : > { %v5825_v38 = vadd.f32 %v5824_v7, %v5823_v47  ;;  %v5826_v53 = vpop.f32.mrb[226].mxu1 }
 0x2c6   : > { %v5827_v54 = vpop.f32.mrb[227].mxu1 }
 0x2c7   : > { %v5828_v12 = vadd.f32 %v5827_v54, %v5826_v53  ;;  %v8206_v18 = vadd.f32 %v5825_v38, %v8084_v19 }
 0x2c9   : > { %v8209_v30 = vadd.f32 %v5828_v12, %v8087_v57 }
 0x2cb   : > { %v5829_v9 = vpop.f32.mrb[228].mxu1 }
 0x2cc   : > { %v5830_v29 = vpop.f32.mrb[229].mxu1 }
 0x2cd   : > { %v5831_v59 = vadd.f32 %v5830_v29, %v5829_v9  ;;  %v5832_v2 = vpop.f32.mrb[230].mxu1 }
 0x2ce   : > { %v5833_v4 = vpop.f32.mrb[231].mxu1 }
 0x2cf   : > { %v5834_v61 = vadd.f32 %v5833_v4, %v5832_v2  ;;  %v8212_v17 = vadd.f32 %v5831_v59, %v8092_v55 }
 0x2d1   : > { %v8215_v15 = vadd.f32 %v5834_v61, %v8095_v32 }
 0x2d3   : > { %v5835_v0 = vpop.f32.mrb[232].mxu1 }
 0x2d4   : > { %v5836_v6 = vpop.f32.mrb[233].mxu1 }
 0x2d5   : > { %v5837_v43 = vadd.f32 %v5836_v6, %v5835_v0  ;;  %v5838_v19 = vpop.f32.mrb[234].mxu1 }
 0x2d6   : > { %v5839_v58 = vpop.f32.mrb[235].mxu1 }
 0x2d7   : > { %v5840_v40 = vadd.f32 %v5839_v58, %v5838_v19  ;;  %v8218_v57 = vadd.f32 %v5837_v43, %v8100_v10 }
 0x2d9   : > { %v8221_v50 = vadd.f32 %v5840_v40, %v8103_v22 }
 0x2db   : > { %v5841_v47 = vpop.f32.mrb[236].mxu1 }
 0x2dc   : > { %v5842_v7 = vpop.f32.mrb[237].mxu1 }
 0x2dd   : > { %v5843_v38 = vadd.f32 %v5842_v7, %v5841_v47  ;;  %v5844_v55 = vpop.f32.mrb[238].mxu1 }
 0x2de   : > { %v5845_v53 = vpop.f32.mrb[239].mxu1 }
 0x2df   : > { %v5846_v54 = vadd.f32 %v5845_v53, %v5844_v55  ;;  %v8224_v32 = vadd.f32 %v5843_v38, %v8108_v52  ;;  %v696_v52 = vsub.s32 0, %v7801_v60 }
 0x2e1   : > { %v8227_v12 = vadd.f32 %v5846_v54, %v8111_v26  ;;  %v700_v26 = vsub.s32 1, %v7801_v60 }
 0x2e3   : > { %v5847_v9 = vpop.f32.mrb[240].mxu1 }
 0x2e4   : > { %v5848_v29 = vpop.f32.mrb[241].mxu1 }
 0x2e5   : > { %v5849_v59 = vadd.f32 %v5848_v29, %v5847_v9  ;;  %v5850_v10 = vpop.f32.mrb[242].mxu1 }
 0x2e6   : > { %v5851_v2 = vpop.f32.mrb[243].mxu1 }
 0x2e7   : > { %v5852_v4 = vadd.f32 %v5851_v2, %v5850_v10  ;;  %v8230_v22 = vadd.f32 %v5849_v59, %v8117_v46  ;;  %v6860_v46 = vld [vmem:[%s8499_s2] sm:$0x7] }
 0x2e8   : > { %v8245_v7 = vrot.slane %v6860_v46, %v700_v26 }
 0x2e9   : > { %v8233_v61 = vadd.f32 %v5852_v4, %v8120_v56  ;;  %v8243_v56 = vrot.slane %v6860_v46, %v696_v52 }
 0x2eb   : > { %v5853_v0 = vpop.f32.mrb[244].mxu1 }
 0x2ec   : > { %v5854_v6 = vpop.f32.mrb[245].mxu1 }
 0x2ed   : > { %v5855_v43 = vadd.f32 %v5854_v6, %v5853_v0  ;;  %v5856_v19 = vpop.f32.mrb[246].mxu1 }
 0x2ee   : > { %v5857_v58 = vpop.f32.mrb[247].mxu1 }
 0x2ef   : > { %v5858_v40 = vadd.f32 %v5857_v58, %v5856_v19  ;;  %v8238_v47 = vadd.f32 %v5855_v43, %v8126_v34 }
 0x2f1   : > { %v8248_v38 = vadd.f32 %v5858_v40, %v8129_v48 }
 0x2f2   : > { %v3310_v55 = vpop.f32.mrb[40].mxu0 }
 0x2f3   : > { %v5859_v53 = vpop.f32.mrb[248].mxu1  ;;  %v6035_v60 = vadd.f32 %v3310_v55, %v8243_v56  ;;  %v3312_v54 = vpop.f32.mrb[41].mxu0 }
 0x2f4   : > { %v5860_v9 = vpop.f32.mrb[249].mxu1  ;;  %v6037_v34 = vadd.f32 %v3312_v54, %v8245_v7  ;;  %v3314_v59 = vpop.f32.mrb[42].mxu0 }
 0x2f5   : > { %v5861_v29 = vadd.f32 %v5860_v9, %v5859_v53  ;;  %v5862_v10 = vpop.f32.mrb[250].mxu1  ;;  %v6036_v2 = vadd.f32 %v6035_v60, %v7462_v21  ;;  %v6039_v4 = vadd.f32 %v3314_v59, %v8243_v56  ;;  %v3316_v0 = vpop.f32.mrb[43].mxu0 }
 0x2f6   : > { %v5863_v6 = vpop.f32.mrb[251].mxu1  ;;  %v6038_v48 = vadd.f32 %v6037_v34, %v7467_v23  ;;  %v6041_v52 = vadd.f32 %v3316_v0, %v8245_v7 }
 0x2f7   : > { %v5864_v43 = vadd.f32 %v5863_v6, %v5862_v10  ;;  %v8258_v19 = vadd.f32 %v5861_v29, %v8135_v3  ;;  %v4427_v26 = vmax.f32 %v6036_v2, 0.0  ;;  %v6040_v58 = vadd.f32 %v6039_v4, %v7470_v25 }
 0x2f8   : > { %v4428_v40 = vmax.f32 %v6038_v48, 0.0  ;;  %v6042_v46 = vadd.f32 %v6041_v52, %v7473_v27 }
 0x2f9   : > { %v8263_v21 = vadd.f32 %v5864_v43, %v8138_v16  ;;  %v4430_v23 = vmax.f32 %v6040_v58, 0.0 }
 0x2fa   : > { %v5435_v55 = vpack.c.bf16 %v4428_v40, %v4427_v26  ;;  %v4431_v53 = vmax.f32 %v6042_v46, 0.0  ;;  %v3320_v3 = vpop.f32.mrb[44].mxu0 }
 0x2fb   : > { %v5865_v60 = vpop.f32.mrb[252].mxu1  ;;  %v6043_v25 = vadd.f32 %v3320_v3, %v8243_v56  ;;  %v3322_v54 = vpop.f32.mrb[45].mxu0 }
 0x2fc   : > { %v5866_v9 = vpop.f32.mrb[253].mxu1  ;;  %4823 = vst [vmem:[%s8268_s24 + $0xf0] sm:$0xff] %v5435_v55  ;;  %v5437_v27 = vpack.c.bf16 %v4431_v53, %v4430_v23  ;;  %v6045_v16 = vadd.f32 %v3322_v54, %v8245_v7  ;;  %v3324_v29 = vpop.f32.mrb[46].mxu0 }
 0x2fd   : > { %v5867_v34 = vadd.f32 %v5866_v9, %v5865_v60  ;;  %v5868_v59 = vpop.f32.mrb[254].mxu1  ;;  %v6044_v10 = vadd.f32 %v6043_v25, %v7484_v31  ;;  %v6047_v2 = vadd.f32 %v3324_v29, %v8243_v56  ;;  %v3326_v4 = vpop.f32.mrb[47].mxu0 }
 0x2fe   : > { %v5869_v0 = vpop.f32.mrb[255].mxu1  ;;  %4825 = vst [vmem:[%s8268_s24 + $0xfc] sm:$0xff] %v5437_v27  ;;  %v6046_v6 = vadd.f32 %v6045_v16, %v7489_v33  ;;  %v6049_v48 = vadd.f32 %v3326_v4, %v8245_v7 }
 0x2ff   : > { %v5870_v52 = vadd.f32 %v5869_v0, %v5868_v59  ;;  %v8279_v43 = vadd.f32 %v5867_v34, %v8143_v45  ;;  %v4433_v26 = vmax.f32 %v6044_v10, 0.0  ;;  %v6048_v58 = vadd.f32 %v6047_v2, %v7492_v35  ;;  %v8519_v59 = vld [vmem:[#allocation2_spill] sm:$0xff] }
 0x300   : > { %v4434_v40 = vmax.f32 %v6046_v6, 0.0  ;;  %v6050_v31 = vadd.f32 %v6049_v48, %v7495_v37  ;;  %v8520_v48 = vld [vmem:[#allocation3_spill] sm:$0xff] }
 0x301   : > { %v8284_v46 = vadd.f32 %v5870_v52, %v8146_v36  ;;  %v4436_v23 = vmax.f32 %v6048_v58, 0.0  ;;  %v8521_v58 = vld [vmem:[#allocation4_spill] sm:$0xff] }
 0x302   : > { %v5439_v55 = vpack.c.bf16 %v4434_v40, %v4433_v26  ;;  %v4437_v53 = vmax.f32 %v6050_v31, 0.0  ;;  %v3330_v33 = vpop.f32.mrb[48].mxu0 }
 0x303   : > { %v5871_v3 = vpop.f32.mrb[0].mxu1  ;;  %v6051_v60 = vadd.f32 %v3330_v33, %v8243_v56  ;;  %v3332_v25 = vpop.f32.mrb[49].mxu0 }
 0x304   : > { %v5872_v45 = vpop.f32.mrb[1].mxu1  ;;  %4827 = vst [vmem:[%s8268_s24 + $0x108] sm:$0xff] %v5439_v55  ;;  %v5441_v54 = vpack.c.bf16 %v4437_v53, %v4436_v23  ;;  %v6053_v35 = vadd.f32 %v3332_v25, %v8245_v7  ;;  %v3334_v27 = vpop.f32.mrb[50].mxu0 }
 0x305   : > { %v5873_v9 = vadd.f32 %v5872_v45, %v5871_v3  ;;  %v5874_v37 = vpop.f32.mrb[2].mxu1  ;;  %v6052_v36 = vadd.f32 %v6051_v60, %v7500_v39  ;;  %v6055_v16 = vadd.f32 %v3334_v27, %v8243_v56  ;;  %v3336_v34 = vpop.f32.mrb[51].mxu0  ;;  %v8522_v27 = vld [vmem:[#allocation5_spill] sm:$0xff] }
 0x306   : > { %v5875_v29 = vpop.f32.mrb[3].mxu1  ;;  %4829 = vst [vmem:[%s8268_s24 + $0x114] sm:$0xff] %v5441_v54  ;;  %v6054_v10 = vadd.f32 %v6053_v35, %v8519_v59  ;;  %v6057_v2 = vadd.f32 %v3336_v34, %v8245_v7  ;;  %v8523_v34 = vld [vmem:[#allocation6_spill] sm:$0xff] }
 0x307   : > { %v5876_v4 = vadd.f32 %v5875_v29, %v5874_v37  ;;  %v8295_v0 = vadd.f32 %v5873_v9, %v8151_v28  ;;  %v4439_v6 = vmax.f32 %v6052_v36, 0.0  ;;  %v6056_v52 = vadd.f32 %v6055_v16, %v8520_v48 }
 0x308   : > { %v4440_v26 = vmax.f32 %v6054_v10, 0.0  ;;  %v6058_v39 = vadd.f32 %v6057_v2, %v8521_v58 }
 0x309   : > { %v8300_v40 = vadd.f32 %v5876_v4, %v8155_v8  ;;  %v4442_v31 = vmax.f32 %v6056_v52, 0.0 }
 0x30a   : > { %v5443_v23 = vpack.c.bf16 %v4440_v26, %v4439_v6  ;;  %v4443_v55 = vmax.f32 %v6058_v39, 0.0  ;;  %v3340_v53 = vpop.f32.mrb[52].mxu0  ;;  %v8524_v6 = vld [vmem:[#allocation7_spill] sm:$0xff]  ;;  %v8525_v26 = vld [vmem:[#allocation8_spill] sm:$0xff] }
 0x30b   : > { %v5877_v33 = vpop.f32.mrb[4].mxu1  ;;  %v6059_v3 = vadd.f32 %v3340_v53, %v8243_v56  ;;  %v3342_v60 = vpop.f32.mrb[53].mxu0 }
 0x30c   : > { %v5878_v28 = vpop.f32.mrb[5].mxu1  ;;  %4831 = vst [vmem:[%s8268_s24 + $0x120] sm:$0xff] %v5443_v23  ;;  %v5445_v25 = vpack.c.bf16 %v4443_v55, %v4442_v31  ;;  %v6061_v45 = vadd.f32 %v3342_v60, %v8245_v7  ;;  %v3344_v35 = vpop.f32.mrb[54].mxu0 }
 0x30d   : > { %v5879_v54 = vadd.f32 %v5878_v28, %v5877_v33  ;;  %v5880_v9 = vpop.f32.mrb[6].mxu1  ;;  %v6060_v8 = vadd.f32 %v6059_v3, %v8522_v27  ;;  %v6063_v37 = vadd.f32 %v3344_v35, %v8243_v56  ;;  %v3346_v36 = vpop.f32.mrb[55].mxu0 }
 0x30e   : > { %v5881_v16 = vpop.f32.mrb[7].mxu1  ;;  %4833 = vst [vmem:[%s8268_s24 + $0x12c] sm:$0xff] %v5445_v25  ;;  %v6062_v29 = vadd.f32 %v6061_v45, %v8523_v34  ;;  %v6065_v59 = vadd.f32 %v3346_v36, %v8245_v7  ;;  %v8527_v36 = vld [vmem:[#allocation10_spill] sm:$0xff] }
 0x30f   : > { %v5882_v10 = vadd.f32 %v5881_v16, %v5880_v9  ;;  %v8311_v2 = vadd.f32 %v5879_v54, %v8160_v44  ;;  %v4445_v4 = vmax.f32 %v6060_v8, 0.0  ;;  %v6064_v48 = vadd.f32 %v6063_v37, %v8524_v6  ;;  %v8526_v9 = vld [vmem:[#allocation9_spill] sm:$0xff] }
 0x310   : > { %v4446_v52 = vmax.f32 %v6062_v29, 0.0  ;;  %v6066_v58 = vadd.f32 %v6065_v59, %v8525_v26 }
 0x311   : > { %v8316_v39 = vadd.f32 %v5882_v10, %v8164_v13  ;;  %v4448_v31 = vmax.f32 %v6064_v48, 0.0 }
 0x312   : > { %v5447_v23 = vpack.c.bf16 %v4446_v52, %v4445_v4  ;;  %v4449_v55 = vmax.f32 %v6066_v58, 0.0  ;;  %v3350_v53 = vpop.f32.mrb[56].mxu0  ;;  %v8528_v4 = vld [vmem:[#allocation11_spill] sm:$0xff]  ;;  %v8529_v52 = vld [vmem:[#allocation12_spill] sm:$0xff] }
 0x313   : > { %v5883_v33 = vpop.f32.mrb[8].mxu1  ;;  %v6067_v3 = vadd.f32 %v3350_v53, %v8243_v56  ;;  %v3352_v60 = vpop.f32.mrb[57].mxu0 }
 0x314   : > { %v5884_v44 = vpop.f32.mrb[9].mxu1  ;;  %4835 = vst [vmem:[%s8268_s24 + $0x138] sm:$0xff] %v5447_v23  ;;  %v5449_v28 = vpack.c.bf16 %v4449_v55, %v4448_v31  ;;  %v6069_v25 = vadd.f32 %v3352_v60, %v8245_v7  ;;  %v3354_v54 = vpop.f32.mrb[58].mxu0 }
 0x315   : > { %v5885_v45 = vadd.f32 %v5884_v44, %v5883_v33  ;;  %v5886_v35 = vpop.f32.mrb[10].mxu1  ;;  %v6068_v13 = vadd.f32 %v6067_v3, %v8526_v9  ;;  %v6071_v27 = vadd.f32 %v3354_v54, %v8243_v56  ;;  %v3356_v8 = vpop.f32.mrb[59].mxu0 }
 0x316   : > { %v5887_v37 = vpop.f32.mrb[11].mxu1  ;;  %4837 = vst [vmem:[%s8268_s24 + $0x144] sm:$0xff] %v5449_v28  ;;  %v6070_v16 = vadd.f32 %v6069_v25, %v8527_v36  ;;  %v6073_v34 = vadd.f32 %v3356_v8, %v8245_v7  ;;  %v8531_v8 = vld [vmem:[#allocation14_spill] sm:$0xff] }
 0x317   : > { %v5888_v29 = vadd.f32 %v5887_v37, %v5886_v35  ;;  %v8327_v59 = vadd.f32 %v5885_v45, %v8169_v42  ;;  %v4451_v10 = vmax.f32 %v6068_v13, 0.0  ;;  %v6072_v6 = vadd.f32 %v6071_v27, %v8528_v4  ;;  %v8530_v35 = vld [vmem:[#allocation13_spill] sm:$0xff] }
 0x318   : > { %v4452_v48 = vmax.f32 %v6070_v16, 0.0  ;;  %v6074_v26 = vadd.f32 %v6073_v34, %v8529_v52 }
 0x319   : > { %v8332_v58 = vadd.f32 %v5888_v29, %v8173_v62  ;;  %v4454_v31 = vmax.f32 %v6072_v6, 0.0 }
 0x31a   : > { %v5451_v23 = vpack.c.bf16 %v4452_v48, %v4451_v10  ;;  %v4455_v55 = vmax.f32 %v6074_v26, 0.0  ;;  %v3360_v53 = vpop.f32.mrb[60].mxu0  ;;  %v8532_v10 = vld [vmem:[#allocation15_spill] sm:$0xff]  ;;  %v8533_v48 = vld [vmem:[#allocation16_spill] sm:$0xff] }
 0x31b   : > { %v5889_v33 = vpop.f32.mrb[12].mxu1  ;;  %v6075_v3 = vadd.f32 %v3360_v53, %v8243_v56  ;;  %v3362_v60 = vpop.f32.mrb[61].mxu0 }
 0x31c   : > { %v5890_v42 = vpop.f32.mrb[13].mxu1  ;;  %4839 = vst [vmem:[%s8268_s24 + $0x150] sm:$0xff] %v5451_v23  ;;  %v5453_v44 = vpack.c.bf16 %v4455_v55, %v4454_v31  ;;  %v6077_v28 = vadd.f32 %v3362_v60, %v8245_v7  ;;  %v3364_v45 = vpop.f32.mrb[62].mxu0 }
 0x31d   : > { %v5891_v25 = vadd.f32 %v5890_v42, %v5889_v33  ;;  %v5892_v54 = vpop.f32.mrb[14].mxu1  ;;  %v6076_v62 = vadd.f32 %v6075_v3, %v8530_v35  ;;  %v6079_v9 = vadd.f32 %v3364_v45, %v8243_v56  ;;  %v3366_v13 = vpop.f32.mrb[63].mxu0 }
 0x31e   : > { %v5893_v27 = vpop.f32.mrb[15].mxu1  ;;  %4841 = vst [vmem:[%s8268_s24 + $0x15c] sm:$0xff] %v5453_v44  ;;  %v6078_v37 = vadd.f32 %v6077_v28, %v8531_v8  ;;  %v6081_v36 = vadd.f32 %v3366_v13, %v8245_v7 }
 0x31f   : > { %v5894_v16 = vadd.f32 %v5893_v27, %v5892_v54  ;;  %v8343_v34 = vadd.f32 %v5891_v25, %v8176_v51  ;;  %v4457_v29 = vmax.f32 %v6076_v62, 0.0  ;;  %v6080_v4 = vadd.f32 %v6079_v9, %v8532_v10 }
 0x320   : > { %v4458_v6 = vmax.f32 %v6078_v37, 0.0  ;;  %v6082_v52 = vadd.f32 %v6081_v36, %v8533_v48 }
 0x321   : > { %v8348_v26 = vadd.f32 %v5894_v16, %v8179_v49  ;;  %v4460_v31 = vmax.f32 %v6080_v4, 0.0 }
 0x322   : > { %v5455_v23 = vpack.c.bf16 %v4458_v6, %v4457_v29  ;;  %v4461_v55 = vmax.f32 %v6082_v52, 0.0  ;;  %v3403_v53 = vpop.f32.mrb[0].mxu0 }
 0x323   : > { %v5895_v33 = vpop.f32.mrb[16].mxu1  ;;  %v5995_v3 = vadd.f32 %v3403_v53, %v8243_v56  ;;  %v3405_v60 = vpop.f32.mrb[1].mxu0 }
 0x324   : > { %v5896_v51 = vpop.f32.mrb[17].mxu1  ;;  %4843 = vst [vmem:[%s8268_s24 + $0x168] sm:$0xff] %v5455_v23  ;;  %v5457_v42 = vpack.c.bf16 %v4461_v55, %v4460_v31  ;;  %v5996_v44 = vadd.f32 %v3405_v60, %v8245_v7  ;;  %v3407_v25 = vpop.f32.mrb[2].mxu0 }
 0x325   : > { %v5897_v28 = vadd.f32 %v5896_v51, %v5895_v33  ;;  %v5898_v45 = vpop.f32.mrb[18].mxu1  ;;  %v4367_v49 = vmax.f32 %v5995_v3, 0.0  ;;  %v5997_v54 = vadd.f32 %v3407_v25, %v8243_v56  ;;  %v3409_v35 = vpop.f32.mrb[3].mxu0 }
 0x326   : > { %v5899_v62 = vpop.f32.mrb[19].mxu1  ;;  %4845 = vst [vmem:[%s8268_s24 + $0x174] sm:$0xff] %v5457_v42  ;;  %v4368_v9 = vmax.f32 %v5996_v44, 0.0  ;;  %v5998_v13 = vadd.f32 %v3409_v35, %v8245_v7 }
 0x327   : > { %v5900_v27 = vadd.f32 %v5899_v62, %v5898_v45  ;;  %v8357_v8 = vadd.f32 %v5897_v28, %v8182_v63  ;;  %v4370_v37 = vmax.f32 %v5997_v54, 0.0 }
 0x328   : > { %v5395_v36 = vpack.c.bf16 %v4368_v9, %v4367_v49  ;;  %v4371_v16 = vmax.f32 %v5998_v13, 0.0 }
 0x329   : > { %v8360_v29 = vadd.f32 %v5900_v27, %v8185_v20 }
 0x32a   : > { %4783 = vst [vmem:[%s8268_s24] sm:$0xff] %v5395_v36  ;;  %v5397_v10 = vpack.c.bf16 %v4371_v16, %v4370_v37  ;;  %v3413_v4 = vpop.f32.mrb[4].mxu0 }
 0x32b   : > { %v5901_v6 = vpop.f32.mrb[20].mxu1  ;;  %v5999_v48 = vadd.f32 %v3413_v4, %v8243_v56  ;;  %v3415_v52 = vpop.f32.mrb[5].mxu0 }
 0x32c   : > { %v5902_v31 = vpop.f32.mrb[21].mxu1  ;;  %4785 = vst [vmem:[%s8268_s24 + $0xc] sm:$0xff] %v5397_v10  ;;  %v6000_v23 = vadd.f32 %v3415_v52, %v8245_v7  ;;  %v3417_v55 = vpop.f32.mrb[6].mxu0 }
 0x32d   : > { %v5903_v63 = vadd.f32 %v5902_v31, %v5901_v6  ;;  %v5904_v53 = vpop.f32.mrb[22].mxu1  ;;  %v4373_v33 = vmax.f32 %v5999_v48, 0.0  ;;  %v6001_v3 = vadd.f32 %v3417_v55, %v8243_v56  ;;  %v3419_v20 = vpop.f32.mrb[7].mxu0 }
 0x32e   : > { %v5905_v60 = vpop.f32.mrb[23].mxu1  ;;  %v4374_v51 = vmax.f32 %v6000_v23, 0.0  ;;  %v6002_v42 = vadd.f32 %v3419_v20, %v8245_v7 }
 0x32f   : > { %v5906_v44 = vadd.f32 %v5905_v60, %v5904_v53  ;;  %v8369_v28 = vadd.f32 %v5903_v63, %v8188_v24  ;;  %v4376_v25 = vmax.f32 %v6001_v3, 0.0 }
 0x330   : > { %v5399_v45 = vpack.c.bf16 %v4374_v51, %v4373_v33  ;;  %v4377_v49 = vmax.f32 %v6002_v42, 0.0 }
 0x331   : > { %v8372_v54 = vadd.f32 %v5906_v44, %v8191_v11 }
 0x332   : > { %4787 = vst [vmem:[%s8268_s24 + $0x18] sm:$0xff] %v5399_v45  ;;  %v5401_v35 = vpack.c.bf16 %v4377_v49, %v4376_v25  ;;  %v3423_v62 = vpop.f32.mrb[8].mxu0 }
 0x333   : > { %v5949_v9 = vpop.f32.mrb[24].mxu1  ;;  %v6003_v13 = vadd.f32 %v3423_v62, %v8243_v56  ;;  %v3425_v37 = vpop.f32.mrb[9].mxu0 }
 0x334   : > { %v4249_v27 = vadd.f32 %v5949_v9, %v8200_v1  ;;  %v4240_v36 = vpop.f32.mrb[25].mxu1  ;;  %4789 = vst [vmem:[%s8268_s24 + $0x24] sm:$0xff] %v5401_v35  ;;  %v6004_v24 = vadd.f32 %v3425_v37, %v8245_v7  ;;  %v3427_v10 = vpop.f32.mrb[10].mxu0 }
 0x335   : > { %v4241_v16 = vadd.f32 %v4240_v36, %v8194_v5  ;;  %v5950_v4 = vpop.f32.mrb[26].mxu1  ;;  %v4379_v6 = vmax.f32 %v6003_v13, 0.0  ;;  %v6005_v48 = vadd.f32 %v3427_v10, %v8243_v56  ;;  %v3429_v31 = vpop.f32.mrb[11].mxu0 }
 0x336   : > { %v4375_v11 = vmax.f32 %v4249_v27, 0.0  ;;  %v4252_v52 = vadd.f32 %v5950_v4, %v8203_v41  ;;  %v4243_v1 = vpop.f32.mrb[27].mxu1  ;;  %v4380_v23 = vmax.f32 %v6004_v24, 0.0  ;;  %v6006_v55 = vadd.f32 %v3429_v31, %v8245_v7 }
 0x337   : > { %v4369_v63 = vmax.f32 %v4241_v16, 0.0  ;;  %v4244_v53 = vadd.f32 %v4243_v1, %v8197_v14  ;;  %v4382_v33 = vmax.f32 %v6005_v48, 0.0 }
 0x338   : > { %v5400_v5 = vpack.c.bf16 %v4375_v11, %v4375_v11  ;;  %v4378_v3 = vmax.f32 %v4252_v52, 0.0  ;;  %v5403_v20 = vpack.c.bf16 %v4380_v23, %v4379_v6  ;;  %v4383_v51 = vmax.f32 %v6006_v55, 0.0 }
 0x339   : > { %v5396_v60 = vpack.c.bf16 %v4369_v63, %v4369_v63  ;;  %v4372_v41 = vmax.f32 %v4244_v53, 0.0 }
 0x33a   : > { %4788 = vst [vmem:[%s8268_s24 + $0x20] sm:$0xf] %v5400_v5  ;;  %v5402_v42 = vpack.c.bf16 %v4378_v3, %v4378_v3  ;;  %4791 = vst [vmem:[%s8268_s24 + $0x30] sm:$0xff] %v5403_v20  ;;  %v5405_v44 = vpack.c.bf16 %v4383_v51, %v4382_v33  ;;  %v3433_v45 = vpop.f32.mrb[12].mxu0 }
 0x33b   : > { %4784 = vst [vmem:[%s8268_s24 + $0x8] sm:$0xf] %v5396_v60  ;;  %v5398_v25 = vpack.c.bf16 %v4372_v41, %v4372_v41  ;;  %v5953_v49 = vpop.f32.mrb[28].mxu1  ;;  %v6007_v14 = vadd.f32 %v3433_v45, %v8243_v56  ;;  %v3435_v62 = vpop.f32.mrb[13].mxu0 }
 0x33c   : > { %4790 = vst [vmem:[%s8268_s24 + $0x2c] sm:$0xf] %v5402_v42  ;;  %v4265_v35 = vadd.f32 %v5953_v49, %v8212_v17  ;;  %v4256_v9 = vpop.f32.mrb[29].mxu1  ;;  %4793 = vst [vmem:[%s8268_s24 + $0x3c] sm:$0xff] %v5405_v44  ;;  %v6008_v13 = vadd.f32 %v3435_v62, %v8245_v7  ;;  %v3437_v37 = vpop.f32.mrb[14].mxu0 }
 0x33d   : > { %4786 = vst [vmem:[%s8268_s24 + $0x14] sm:$0xf] %v5398_v25  ;;  %v4257_v27 = vadd.f32 %v4256_v9, %v8206_v18  ;;  %v5954_v36 = vpop.f32.mrb[30].mxu1  ;;  %v4385_v24 = vmax.f32 %v6007_v14, 0.0  ;;  %v6009_v10 = vadd.f32 %v3437_v37, %v8243_v56  ;;  %v3439_v6 = vpop.f32.mrb[15].mxu0 }
 0x33e   : > { %v4387_v16 = vmax.f32 %v4265_v35, 0.0  ;;  %v4268_v4 = vadd.f32 %v5954_v36, %v8215_v15  ;;  %v4259_v17 = vpop.f32.mrb[31].mxu1  ;;  %v4386_v11 = vmax.f32 %v6008_v13, 0.0  ;;  %v6010_v52 = vadd.f32 %v3439_v6, %v8245_v7 }
 0x33f   : > { %v4381_v48 = vmax.f32 %v4257_v27, 0.0  ;;  %v4260_v31 = vadd.f32 %v4259_v17, %v8209_v30  ;;  %v4388_v1 = vmax.f32 %v6009_v10, 0.0 }
 0x340   : > { %v5408_v18 = vpack.c.bf16 %v4387_v16, %v4387_v16  ;;  %v4390_v23 = vmax.f32 %v4268_v4, 0.0  ;;  %v5407_v63 = vpack.c.bf16 %v4386_v11, %v4385_v24  ;;  %v4389_v53 = vmax.f32 %v6010_v52, 0.0 }
 0x341   : > { %v5404_v55 = vpack.c.bf16 %v4381_v48, %v4381_v48  ;;  %v4384_v15 = vmax.f32 %v4260_v31, 0.0 }
 0x342   : > { %4796 = vst [vmem:[%s8268_s24 + $0x50] sm:$0xf] %v5408_v18  ;;  %v5410_v5 = vpack.c.bf16 %v4390_v23, %v4390_v23  ;;  %4795 = vst [vmem:[%s8268_s24 + $0x48] sm:$0xff] %v5407_v63  ;;  %v5409_v33 = vpack.c.bf16 %v4389_v53, %v4388_v1  ;;  %v3443_v20 = vpop.f32.mrb[16].mxu0 }
 0x343   : > { %4792 = vst [vmem:[%s8268_s24 + $0x38] sm:$0xf] %v5404_v55  ;;  %v5406_v3 = vpack.c.bf16 %v4384_v15, %v4384_v15  ;;  %v5957_v60 = vpop.f32.mrb[32].mxu1  ;;  %v6011_v30 = vadd.f32 %v3443_v20, %v8243_v56  ;;  %v3445_v41 = vpop.f32.mrb[17].mxu0 }
 0x344   : > { %4798 = vst [vmem:[%s8268_s24 + $0x5c] sm:$0xf] %v5410_v5  ;;  %v4281_v51 = vadd.f32 %v5957_v60, %v8224_v32  ;;  %v4272_v42 = vpop.f32.mrb[33].mxu1  ;;  %4797 = vst [vmem:[%s8268_s24 + $0x54] sm:$0xff] %v5409_v33  ;;  %v6012_v44 = vadd.f32 %v3445_v41, %v8245_v7  ;;  %v3447_v45 = vpop.f32.mrb[18].mxu0 }
 0x345   : > { %4794 = vst [vmem:[%s8268_s24 + $0x44] sm:$0xf] %v5406_v3  ;;  %v4273_v25 = vadd.f32 %v4272_v42, %v8218_v57  ;;  %v5958_v49 = vpop.f32.mrb[34].mxu1  ;;  %v4391_v14 = vmax.f32 %v6011_v30, 0.0  ;;  %v6013_v62 = vadd.f32 %v3447_v45, %v8243_v56  ;;  %v3449_v13 = vpop.f32.mrb[19].mxu0 }
 0x346   : > { %v4399_v35 = vmax.f32 %v4281_v51, 0.0  ;;  %v4284_v9 = vadd.f32 %v5958_v49, %v8227_v12  ;;  %v4275_v32 = vpop.f32.mrb[35].mxu1  ;;  %v4392_v27 = vmax.f32 %v6012_v44, 0.0  ;;  %v6014_v36 = vadd.f32 %v3449_v13, %v8245_v7 }
 0x347   : > { %v4393_v37 = vmax.f32 %v4273_v25, 0.0  ;;  %v4276_v24 = vadd.f32 %v4275_v32, %v8221_v50  ;;  %v4394_v16 = vmax.f32 %v6013_v62, 0.0 }
 0x348   : > { %v5416_v57 = vpack.c.bf16 %v4399_v35, %v4399_v35  ;;  %v4402_v10 = vmax.f32 %v4284_v9, 0.0  ;;  %v5411_v4 = vpack.c.bf16 %v4392_v27, %v4391_v14  ;;  %v4395_v17 = vmax.f32 %v6014_v36, 0.0 }
 0x349   : > { %v5412_v6 = vpack.c.bf16 %v4393_v37, %v4393_v37  ;;  %v4396_v12 = vmax.f32 %v4276_v24, 0.0 }
 0x34a   : > { %4804 = vst [vmem:[%s8268_s24 + $0x80] sm:$0xf] %v5416_v57  ;;  %v5418_v11 = vpack.c.bf16 %v4402_v10, %v4402_v10  ;;  %4799 = vst [vmem:[%s8268_s24 + $0x60] sm:$0xff] %v5411_v4  ;;  %v5413_v48 = vpack.c.bf16 %v4395_v17, %v4394_v16  ;;  %v3453_v31 = vpop.f32.mrb[20].mxu0 }
 0x34b   : > { %4800 = vst [vmem:[%s8268_s24 + $0x68] sm:$0xf] %v5412_v6  ;;  %v5414_v52 = vpack.c.bf16 %v4396_v12, %v4396_v12  ;;  %v5961_v18 = vpop.f32.mrb[36].mxu1  ;;  %v6015_v50 = vadd.f32 %v3453_v31, %v8243_v56  ;;  %v3455_v23 = vpop.f32.mrb[21].mxu0 }
 0x34c   : > { %4806 = vst [vmem:[%s8268_s24 + $0x8c] sm:$0xf] %v5418_v11  ;;  %v4297_v1 = vadd.f32 %v5961_v18, %v8238_v47  ;;  %v4288_v63 = vpop.f32.mrb[37].mxu1  ;;  %4801 = vst [vmem:[%s8268_s24 + $0x6c] sm:$0xff] %v5413_v48  ;;  %v6016_v55 = vadd.f32 %v3455_v23, %v8245_v7  ;;  %v3457_v15 = vpop.f32.mrb[22].mxu0 }
 0x34d   : > { %4802 = vst [vmem:[%s8268_s24 + $0x74] sm:$0xf] %v5414_v52  ;;  %v4289_v53 = vadd.f32 %v4288_v63, %v8230_v22  ;;  %v5962_v5 = vpop.f32.mrb[38].mxu1  ;;  %v4397_v33 = vmax.f32 %v6015_v50, 0.0  ;;  %v6017_v20 = vadd.f32 %v3457_v15, %v8243_v56  ;;  %v3459_v30 = vpop.f32.mrb[23].mxu0 }
 0x34e   : > { %v4411_v3 = vmax.f32 %v4297_v1, 0.0  ;;  %v4300_v60 = vadd.f32 %v5962_v5, %v8248_v38  ;;  %v4291_v47 = vpop.f32.mrb[39].mxu1  ;;  %v4398_v51 = vmax.f32 %v6016_v55, 0.0  ;;  %v6018_v42 = vadd.f32 %v3459_v30, %v8245_v7 }
 0x34f   : > { %v4405_v41 = vmax.f32 %v4289_v53, 0.0  ;;  %v4292_v44 = vadd.f32 %v4291_v47, %v8233_v61  ;;  %v4400_v25 = vmax.f32 %v6017_v20, 0.0 }
 0x350   : > { %v5424_v22 = vpack.c.bf16 %v4411_v3, %v4411_v3  ;;  %v4414_v45 = vmax.f32 %v4300_v60, 0.0  ;;  %v5415_v49 = vpack.c.bf16 %v4398_v51, %v4397_v33  ;;  %v4401_v35 = vmax.f32 %v6018_v42, 0.0 }
 0x351   : > { %v5420_v14 = vpack.c.bf16 %v4405_v41, %v4405_v41  ;;  %v4408_v38 = vmax.f32 %v4292_v44, 0.0 }
 0x352   : > { %4812 = vst [vmem:[%s8268_s24 + $0xb0] sm:$0xf] %v5424_v22  ;;  %v5426_v62 = vpack.c.bf16 %v4414_v45, %v4414_v45  ;;  %4803 = vst [vmem:[%s8268_s24 + $0x78] sm:$0xff] %v5415_v49  ;;  %v5417_v9 = vpack.c.bf16 %v4401_v35, %v4400_v25  ;;  %v3463_v32 = vpop.f32.mrb[24].mxu0 }
 0x353   : > { %4808 = vst [vmem:[%s8268_s24 + $0x98] sm:$0xf] %v5420_v14  ;;  %v5422_v13 = vpack.c.bf16 %v4408_v38, %v4408_v38  ;;  %v5965_v27 = vpop.f32.mrb[40].mxu1  ;;  %v6019_v61 = vadd.f32 %v3463_v32, %v8243_v56  ;;  %v3465_v36 = vpop.f32.mrb[25].mxu0 }
 0x354   : > { %4814 = vst [vmem:[%s8268_s24 + $0xbc] sm:$0xf] %v5426_v62  ;;  %v4313_v37 = vadd.f32 %v5965_v27, %v8279_v43  ;;  %v4304_v24 = vpop.f32.mrb[41].mxu1  ;;  %4805 = vst [vmem:[%s8268_s24 + $0x84] sm:$0xff] %v5417_v9  ;;  %v6020_v57 = vadd.f32 %v3465_v36, %v8245_v7  ;;  %v3467_v10 = vpop.f32.mrb[26].mxu0 }
 0x355   : > { %4810 = vst [vmem:[%s8268_s24 + $0xa4] sm:$0xf] %v5422_v13  ;;  %v4305_v16 = vadd.f32 %v4304_v24, %v8258_v19  ;;  %v5966_v4 = vpop.f32.mrb[42].mxu1  ;;  %v4403_v6 = vmax.f32 %v6019_v61, 0.0  ;;  %v6021_v12 = vadd.f32 %v3467_v10, %v8243_v56  ;;  %v3469_v48 = vpop.f32.mrb[27].mxu0 }
 0x356   : > { %v4423_v17 = vmax.f32 %v4313_v37, 0.0  ;;  %v4316_v11 = vadd.f32 %v5966_v4, %v8284_v46  ;;  %v4307_v43 = vpop.f32.mrb[43].mxu1  ;;  %v4404_v52 = vmax.f32 %v6020_v57, 0.0  ;;  %v6022_v18 = vadd.f32 %v3469_v48, %v8245_v7 }
 0x357   : > { %v4417_v31 = vmax.f32 %v4305_v16, 0.0  ;;  %v4308_v50 = vadd.f32 %v4307_v43, %v8263_v21  ;;  %v4406_v1 = vmax.f32 %v6021_v12, 0.0 }
 0x358   : > { %v5432_v19 = vpack.c.bf16 %v4423_v17, %v4423_v17  ;;  %v4426_v23 = vmax.f32 %v4316_v11, 0.0  ;;  %v5419_v63 = vpack.c.bf16 %v4404_v52, %v4403_v6  ;;  %v4407_v53 = vmax.f32 %v6022_v18, 0.0 }
 0x359   : > { %v5428_v55 = vpack.c.bf16 %v4417_v31, %v4417_v31  ;;  %v4420_v46 = vmax.f32 %v4308_v50, 0.0 }
 0x35a   : > { %4820 = vst [vmem:[%s8268_s24 + $0xe0] sm:$0xf] %v5432_v19  ;;  %v5434_v15 = vpack.c.bf16 %v4426_v23, %v4426_v23  ;;  %4807 = vst [vmem:[%s8268_s24 + $0x90] sm:$0xff] %v5419_v63  ;;  %v5421_v5 = vpack.c.bf16 %v4407_v53, %v4406_v1  ;;  %v3473_v3 = vpop.f32.mrb[28].mxu0 }
 0x35b   : > { %4816 = vst [vmem:[%s8268_s24 + $0xc8] sm:$0xf] %v5428_v55  ;;  %v5430_v33 = vpack.c.bf16 %v4420_v46, %v4420_v46  ;;  %v5969_v20 = vpop.f32.mrb[44].mxu1  ;;  %v6023_v21 = vadd.f32 %v3473_v3, %v8243_v56  ;;  %v3475_v30 = vpop.f32.mrb[29].mxu0 }
 0x35c   : > { %4822 = vst [vmem:[%s8268_s24 + $0xec] sm:$0xf] %v5434_v15  ;;  %v4329_v60 = vadd.f32 %v5969_v20, %v8311_v2  ;;  %v4320_v47 = vpop.f32.mrb[45].mxu1  ;;  %4809 = vst [vmem:[%s8268_s24 + $0x9c] sm:$0xff] %v5421_v5  ;;  %v6024_v51 = vadd.f32 %v3475_v30, %v8245_v7  ;;  %v3477_v42 = vpop.f32.mrb[30].mxu0 }
 0x35d   : > { %4818 = vst [vmem:[%s8268_s24 + $0xd4] sm:$0xf] %v5430_v33  ;;  %v4321_v41 = vadd.f32 %v4320_v47, %v8295_v0  ;;  %v5970_v44 = vpop.f32.mrb[46].mxu1  ;;  %v4409_v22 = vmax.f32 %v6023_v21, 0.0  ;;  %v6025_v45 = vadd.f32 %v3477_v42, %v8243_v56  ;;  %v3479_v14 = vpop.f32.mrb[31].mxu0 }
 0x35e   : > { %v4435_v25 = vmax.f32 %v4329_v60, 0.0  ;;  %v4332_v49 = vadd.f32 %v5970_v44, %v8316_v39  ;;  %v4323_v2 = vpop.f32.mrb[47].mxu1  ;;  %v4410_v35 = vmax.f32 %v6024_v51, 0.0  ;;  %v6026_v62 = vadd.f32 %v3479_v14, %v8245_v7 }
 0x35f   : > { %v4429_v38 = vmax.f32 %v4321_v41, 0.0  ;;  %v4324_v9 = vadd.f32 %v4323_v2, %v8300_v40  ;;  %v4412_v13 = vmax.f32 %v6025_v45, 0.0 }
 0x360   : > { %v5440_v0 = vpack.c.bf16 %v4435_v25, %v4435_v25  ;;  %v4438_v32 = vmax.f32 %v4332_v49, 0.0  ;;  %v5423_v27 = vpack.c.bf16 %v4410_v35, %v4409_v22  ;;  %v4413_v37 = vmax.f32 %v6026_v62, 0.0 }
 0x361   : > { %v5436_v61 = vpack.c.bf16 %v4429_v38, %v4429_v38  ;;  %v4432_v39 = vmax.f32 %v4324_v9, 0.0 }
 0x362   : > { %4828 = vst [vmem:[%s8268_s24 + $0x110] sm:$0xf] %v5440_v0  ;;  %v5442_v36 = vpack.c.bf16 %v4438_v32, %v4438_v32  ;;  %4811 = vst [vmem:[%s8268_s24 + $0xa8] sm:$0xff] %v5423_v27  ;;  %v5425_v24 = vpack.c.bf16 %v4413_v37, %v4412_v13  ;;  %v3483_v16 = vpop.f32.mrb[32].mxu0 }
 0x363   : > { %4824 = vst [vmem:[%s8268_s24 + $0xf8] sm:$0xf] %v5436_v61  ;;  %v5438_v57 = vpack.c.bf16 %v4432_v39, %v4432_v39  ;;  %v5973_v10 = vpop.f32.mrb[48].mxu1  ;;  %v6027_v40 = vadd.f32 %v3483_v16, %v8243_v56  ;;  %v3485_v6 = vpop.f32.mrb[33].mxu0 }
 0x364   : > { %4830 = vst [vmem:[%s8268_s24 + $0x11c] sm:$0xf] %v5442_v36  ;;  %v4345_v4 = vadd.f32 %v5973_v10, %v8343_v34  ;;  %v4336_v17 = vpop.f32.mrb[49].mxu1  ;;  %4813 = vst [vmem:[%s8268_s24 + $0xb4] sm:$0xff] %v5425_v24  ;;  %v6028_v12 = vadd.f32 %v3485_v6, %v8245_v7  ;;  %v3487_v48 = vpop.f32.mrb[34].mxu0 }
 0x365   : > { %4826 = vst [vmem:[%s8268_s24 + $0x104] sm:$0xf] %v5438_v57  ;;  %v4337_v11 = vadd.f32 %v4336_v17, %v8327_v59  ;;  %v5974_v43 = vpop.f32.mrb[50].mxu1  ;;  %v4415_v52 = vmax.f32 %v6027_v40, 0.0  ;;  %v6029_v18 = vadd.f32 %v3487_v48, %v8243_v56  ;;  %v3489_v19 = vpop.f32.mrb[35].mxu0 }
 0x366   : > { %v4447_v31 = vmax.f32 %v4345_v4, 0.0  ;;  %v4348_v50 = vadd.f32 %v5974_v43, %v8348_v26  ;;  %v4339_v34 = vpop.f32.mrb[51].mxu1  ;;  %v4416_v1 = vmax.f32 %v6028_v12, 0.0  ;;  %v6030_v63 = vadd.f32 %v3489_v19, %v8245_v7 }
 0x367   : > { %v4441_v23 = vmax.f32 %v4337_v11, 0.0  ;;  %v4340_v55 = vadd.f32 %v4339_v34, %v8332_v58  ;;  %v4418_v53 = vmax.f32 %v6029_v18, 0.0 }
 0x368   : > { %v5448_v59 = vpack.c.bf16 %v4447_v31, %v4447_v31  ;;  %v4450_v46 = vmax.f32 %v4348_v50, 0.0  ;;  %v5427_v15 = vpack.c.bf16 %v4416_v1, %v4415_v52  ;;  %v4419_v33 = vmax.f32 %v6030_v63, 0.0 }
 0x369   : > { %v5444_v5 = vpack.c.bf16 %v4441_v23, %v4441_v23  ;;  %v4444_v26 = vmax.f32 %v4340_v55, 0.0 }
 0x36a   : > { %4836 = vst [vmem:[%s8268_s24 + $0x140] sm:$0xf] %v5448_v59  ;;  %v5450_v3 = vpack.c.bf16 %v4450_v46, %v4450_v46  ;;  %4815 = vst [vmem:[%s8268_s24 + $0xc0] sm:$0xff] %v5427_v15  ;;  %v5429_v20 = vpack.c.bf16 %v4419_v33, %v4418_v53  ;;  %v3493_v60 = vpop.f32.mrb[36].mxu0 }
 0x36b   : > { %4832 = vst [vmem:[%s8268_s24 + $0x128] sm:$0xf] %v5444_v5  ;;  %v5446_v21 = vpack.c.bf16 %v4444_v26, %v4444_v26  ;;  %v5977_v30 = vpop.f32.mrb[52].mxu1  ;;  %v6031_v58 = vadd.f32 %v3493_v60, %v8243_v56  ;;  %v3495_v51 = vpop.f32.mrb[37].mxu0 }
 0x36c   : > { %4838 = vst [vmem:[%s8268_s24 + $0x14c] sm:$0xf] %v5450_v3  ;;  %v4361_v47 = vadd.f32 %v5977_v30, %v8369_v28  ;;  %v4352_v41 = vpop.f32.mrb[53].mxu1  ;;  %4817 = vst [vmem:[%s8268_s24 + $0xcc] sm:$0xff] %v5429_v20  ;;  %v6032_v42 = vadd.f32 %v3495_v51, %v8245_v7  ;;  %v3497_v22 = vpop.f32.mrb[38].mxu0 }
 0x36d   : > { %4834 = vst [vmem:[%s8268_s24 + $0x134] sm:$0xf] %v5446_v21  ;;  %v4353_v44 = vadd.f32 %v4352_v41, %v8357_v8  ;;  %v5978_v25 = vpop.f32.mrb[54].mxu1  ;;  %v4421_v45 = vmax.f32 %v6031_v58, 0.0  ;;  %v6033_v14 = vadd.f32 %v3497_v22, %v8243_v56  ;;  %v3499_v35 = vpop.f32.mrb[39].mxu0 }
 0x36e   : > { %v4459_v49 = vmax.f32 %v4361_v47, 0.0  ;;  %v4364_v2 = vadd.f32 %v5978_v25, %v8372_v54  ;;  %v4355_v28 = vpop.f32.mrb[55].mxu1  ;;  %v4422_v38 = vmax.f32 %v6032_v42, 0.0  ;;  %v6034_v9 = vadd.f32 %v3499_v35, %v8245_v7 }
 0x36f   : > { %v4453_v62 = vmax.f32 %v4353_v44, 0.0  ;;  %v4356_v8 = vadd.f32 %v4355_v28, %v8360_v29  ;;  %v4424_v13 = vmax.f32 %v6033_v14, 0.0 }
 0x370   : > { %v5456_v0 = vpack.c.bf16 %v4459_v49, %v4459_v49  ;;  %v4462_v32 = vmax.f32 %v4364_v2, 0.0  ;;  %v5431_v27 = vpack.c.bf16 %v4422_v38, %v4421_v45  ;;  %v4425_v61 = vmax.f32 %v6034_v9, 0.0 }
 0x371   : > { %v5452_v56 = vpack.c.bf16 %v4453_v62, %v4453_v62  ;;  %v4456_v54 = vmax.f32 %v4356_v8, 0.0 }
 0x372   : > { %4844 = vst [vmem:[%s8268_s24 + $0x170] sm:$0xf] %v5456_v0  ;;  %v5458_v37 = vpack.c.bf16 %v4462_v32, %v4462_v32  ;;  %4819 = vst [vmem:[%s8268_s24 + $0xd8] sm:$0xff] %v5431_v27  ;;  %v5433_v39 = vpack.c.bf16 %v4425_v61, %v4424_v13 }
 0x373   : > { %4840 = vst [vmem:[%s8268_s24 + $0x158] sm:$0xf] %v5452_v56  ;;  %v5454_v36 = vpack.c.bf16 %v4456_v54, %v4456_v54 }
 0x374   : > { %4846 = vst [vmem:[%s8268_s24 + $0x17c] sm:$0xf] %v5458_v37  ;;  %4821 = vst [vmem:[%s8268_s24 + $0xe4] sm:$0xff] %v5433_v39 }
 0x375   : > { %4842 = vst [vmem:[%s8268_s24 + $0x164] sm:$0xf] %v5454_v36 }
 0x376 PF: > { %s13_s14 = sadd.s32 1, %s6883_s14   ;;  %s8534_s12 = smov %s6879_s13 }
 0x377   : > { %p10_p5 = scmp.ge.s32.totalorder %s13_s14, 4   ;;  %s8535_s13 = smov %s8537_s15 }
 0x379   :  { %12 = sbr.rel (!%p10_p5) target bundleno = 2 (0x2), region = 68 }

// kernel: _lambda_.17
= control target key start
LH: loop header
LB: loop body
LE: loop exit
PB: predicated region body
PF: predicated region fallthrough
CT: control target
= control target key end

     0   :  { %s4146_s12 = smov 0   ;;  %s5035_s0 = inlined_call_operand.vmem [shape: bf16[2,384,384], index: 0, kind: input, shape index: {}]   ;;  %s5036_s1 = inlined_call_operand.vmem [shape: bf16[3,384,128], index: 1, kind: input, shape index: {}]   ;;  %s5037_s2 = inlined_call_operand.vmem [shape: f32[1,128], index: 2, kind: input, shape index: {}]   ;;  %s5038_s3 = inlined_call_operand.vmem [shape: bf16[2,256,128], index: 3, kind: output, shape index: {}]  }
   0x1 LB: > { %s2754_s13 = sadd.s32 4294967295, %s4124_s12   ;;  %p2758_p0 = scmp.ge.s32.totalorder %s4124_s12, 1  ;;  %s4124_s12 = sphi %s4146_s12, %s13_s12  }
   0x2   : > { %p137_p1 = scmp.lt.s32.totalorder %s4124_s12, 3 }
   0x4   : > { %p138_p2 = pnand %p2758_p0, %p137_p1 }
   0x6   : > { %141 = sbr.rel (%p138_p2) target bundleno = 555 (0x22b), region = 32 }
   0xd   : > { %v3938_v0 = vld [vmem:[%s5036_s1 + $0x100] sm:$0xff]   ;;  %v3941_v3 = vld [vmem:[%s5036_s1 + $0x108] sm:$0xff]   ;;  %v3944_v6 = vld [vmem:[%s5036_s1 + $0x110] sm:$0xff]   ;;  %p161_p3 = scmp.lt.s32.totalorder %s2754_s13, 1 }
   0xe   : > { %v4160_v1 = vld [vmem:[%s5036_s1 + $0x140] sm:$0xff]   ;;  %3201 = vmatprep.subr.bf16.mxu0 %v3938_v0  ;;  %v4173_v4 = vld [vmem:[%s5036_s1 + $0x148] sm:$0xff]   ;;  %v4185_v7 = vld [vmem:[%s5036_s1 + $0x150] sm:$0xff]  }
   0xf   : > { %v3940_v2 = vld [vmem:[%s5036_s1 + $0xc0] sm:$0xff]   ;;  %3753 = vmatprep.subr.bf16.mxu1 %v4160_v1  ;;  %v3943_v5 = vld [vmem:[%s5036_s1 + $0xc8] sm:$0xff]   ;;  %v3946_v8 = vld [vmem:[%s5036_s1 + $0xd0] sm:$0xff]   ;;  %s5044_s13 = smov (!%p161_p3, %s2754_s13), 1 }
  0x10   : > { %3202 = vmatpush3.bf16.msra.mxu0 %v3940_v2  ;;  %3761 = vmatpush3.bf16.msra.mxu1 %v4160_v1  ;;  %v3947_v9 = vld [vmem:[%s5036_s1 + $0x118] sm:$0xff]   ;;  %v3950_v12 = vld [vmem:[%s5036_s1 + $0x120] sm:$0xff]   ;;  %v3953_v15 = vld [vmem:[%s5036_s1 + $0x128] sm:$0xff]   ;;  %s3929_s23 = smul.u32 576, %s5044_s13  ;;  %s3073_s17 = sshll.u32 %s5044_s13, 7 }
  0x11   : > { %3203 = vmatprep.subr.bf16.mxu0 %v3941_v3  ;;  %3754 = vmatprep.subr.bf16.mxu1 %v4173_v4  ;;  %v4198_v10 = vld [vmem:[%s5036_s1 + $0x158] sm:$0xff]   ;;  %v4213_v13 = vld [vmem:[%s5036_s1 + $0x160] sm:$0xff]   ;;  %v4230_v16 = vld [vmem:[%s5036_s1 + $0x168] sm:$0xff]   ;;  %s4946_s20 = scalar_lea.vmem %s5038_s3, %s3073_s17 }
  0x12   : > { %v3949_v11 = vld [vmem:[%s5036_s1 + $0xd8] sm:$0xff]   ;;  %v3952_v14 = vld [vmem:[%s5036_s1 + $0xe0] sm:$0xff]   ;;  %v3955_v17 = vld [vmem:[%s5036_s1 + $0xe8] sm:$0xff]   ;;  %s4252_s7 = scalar_lea.vmem %s5035_s0, %s3929_s23 }
  0x13   : > { %v3956_v18 = vld [vmem:[%s5036_s1 + $0x130] sm:$0xff]   ;;  %v3959_v21 = vld [vmem:[%s5036_s1 + $0x138] sm:$0xff]   ;;  %v3967_v26 = vld [vmem:[%s5036_s1 + $0x40] sm:$0xff]  }
  0x14   : > { %3204 = vmatpush3.bf16.msra.mxu0 %v3943_v5  ;;  %3762 = vmatpush3.bf16.msra.mxu1 %v4173_v4  ;;  %v4244_v19 = vld [vmem:[%s5036_s1 + $0x170] sm:$0xff]   ;;  %v4261_v22 = vld [vmem:[%s5036_s1 + $0x178] sm:$0xff]   ;;  %v4280_v27 = vld [vmem:[%s4252_s7 + $0x60] ss:$12 sps:$4 sm:$0xff]  }
  0x15   : > { %3205 = vmatprep.subr.bf16.mxu0 %v3944_v6  ;;  %3755 = vmatprep.subr.bf16.mxu1 %v4185_v7  ;;  %v3958_v20 = vld [vmem:[%s5036_s1 + $0xf0] sm:$0xff]   ;;  %v3961_v25 = vld [vmem:[%s5036_s1 + $0xf8] sm:$0xff]   ;;  %v4284_v28 = vld [vmem:[%s4252_s7 + $0x140] ss:$12 sps:$4 sm:$0xff]  }
  0x16   : > { %v4265_v23 = vld [vmem:[%s4252_s7 + $0x64] ss:$12 sps:$4 sm:$0xff]   ;;  %v4268_v24 = vld [vmem:[%s4252_s7 + $0x128] ss:$12 sps:$4 sm:$0xff]   ;;  %v3978_v38 = vld [vmem:[%s5036_s1 + $0x58] sm:$0xff]  }
  0x17   : > { %781 = vmatprep.mubr.bf16.mxu0 %v4265_v23  ;;  %3641 = vmatprep.mubr.bf16.mxu1 %v4268_v24  ;;  %v3968_v29 = vld [vmem:[%s5036_s1] sm:$0xff]   ;;  %v3969_v30 = vld [vmem:[%s5036_s1 + $0x48] sm:$0xff]   ;;  %v3976_v35 = vld [vmem:[%s5036_s1 + $0x50] sm:$0xff]  }
  0x18   : > { %3206 = vmatpush3.bf16.msra.mxu0 %v3946_v8  ;;  %3763 = vmatpush3.bf16.msra.mxu1 %v4185_v7  ;;  %v4295_v31 = vld [vmem:[%s4252_s7 + $0x7c] ss:$12 sps:$4 sm:$0xff]   ;;  %v4298_v32 = vld [vmem:[%s4252_s7 + $0x158] ss:$12 sps:$4 sm:$0xff]   ;;  %v3977_v37 = vld [vmem:[%s5036_s1 + $0x10] sm:$0xff]  }
  0x19   : > { %3207 = vmatprep.subr.bf16.mxu0 %v3947_v9  ;;  %3756 = vmatprep.subr.bf16.mxu1 %v4198_v10  ;;  %v3970_v33 = vld [vmem:[%s5036_s1 + $0x8] sm:$0xff]   ;;  %v4308_v34 = vld [vmem:[%s4252_s7 + $0x78] ss:$12 sps:$4 sm:$0xff]   ;;  %v4315_v36 = vld [vmem:[%s4252_s7 + $0x170] ss:$12 sps:$4 sm:$0xff]  }
  0x1a   : > { %v4325_v39 = vld [vmem:[%s4252_s7 + $0x94] ss:$12 sps:$4 sm:$0xff]   ;;  %v3979_v41 = vld [vmem:[%s5036_s1 + $0x18] sm:$0xff]   ;;  %v3987_v46 = vld [vmem:[%s5036_s1 + $0x68] sm:$0xff]  }
  0x1b   : > { %v3982_v40 = vld [vmem:[%s4252_s7 + $0x188] ss:$12 sps:$4 sm:$0xff]   ;;  %v4337_v42 = vld [vmem:[%s4252_s7 + $0x90] ss:$12 sps:$4 sm:$0xff]   ;;  %v3984_v43 = vld [vmem:[%s4252_s7 + $0x1a0] ss:$12 sps:$4 sm:$0xff]  }
  0x1c   : > { %3208 = vmatpush3.bf16.msra.mxu0 %v3949_v11  ;;  %3764 = vmatpush3.bf16.msra.mxu1 %v4198_v10  ;;  %v3985_v44 = vld [vmem:[%s5036_s1 + $0x60] sm:$0xff]   ;;  %v4352_v47 = vld [vmem:[%s4252_s7 + $0xac] ss:$12 sps:$4 sm:$0xff]   ;;  %v3994_v50 = vld [vmem:[%s5036_s1 + $0x70] sm:$0xff]  }
  0x1d   : > { %3209 = vmatprep.subr.bf16.mxu0 %v3950_v12  ;;  %3757 = vmatprep.subr.bf16.mxu1 %v4213_v13  ;;  %v3986_v45 = vld [vmem:[%s5036_s1 + $0x20] sm:$0xff]   ;;  %v3988_v49 = vld [vmem:[%s5036_s1 + $0x28] sm:$0xff]   ;;  %v3993_v52 = vld [vmem:[%s4252_s7 + $0x1d0] ss:$12 sps:$4 sm:$0xff]  }
  0x1e   : > { %v3991_v48 = vld [vmem:[%s4252_s7 + $0x1b8] ss:$12 sps:$4 sm:$0xff]   ;;  %v4365_v51 = vld [vmem:[%s4252_s7 + $0xa8] ss:$12 sps:$4 sm:$0xff]   ;;  %v4000_v59 = vld [vmem:[%s4252_s7] ss:$12 sps:$4 sm:$0xff]  }
  0x1f   : > { %v3995_v53 = vld [vmem:[%s5036_s1 + $0x30] sm:$0xff]   ;;  %v3996_v54 = vld [vmem:[%s5036_s1 + $0x78] sm:$0xff]   ;;  %v4004_v58 = vld [vmem:[%s5036_s1 + $0x80] sm:$0xff]  }
  0x20   : > { %3210 = vmatpush3.bf16.msra.mxu0 %v3952_v14  ;;  %3765 = vmatpush3.bf16.msra.mxu1 %v4213_v13  ;;  %v4377_v55 = vld [vmem:[%s4252_s7 + $0xc4] ss:$12 sps:$4 sm:$0xff]   ;;  %v3997_v57 = vld [vmem:[%s5036_s1 + $0x38] sm:$0xff]   ;;  %v4392_v60 = vld [vmem:[%s4252_s7 + $0xc0] ss:$12 sps:$4 sm:$0xff]  }
  0x21   : > { %3211 = vmatprep.subr.bf16.mxu0 %v3953_v15  ;;  %3758 = vmatprep.subr.bf16.mxu1 %v4230_v16  ;;  %v4002_v56 = vld [vmem:[%s4252_s7 + $0x4] ss:$12 sps:$4 sm:$0xff]   ;;  %v4396_v61 = vld [vmem:[%s4252_s7 + $0xdc] ss:$12 sps:$4 sm:$0xff]   ;;  %v4414_v3 = vld [vmem:[%s4252_s7 + $0xf4] ss:$12 sps:$4 sm:$0xff]  }
  0x22   : > { %v4007_v62 = vld [vmem:[%s4252_s7 + $0x1c] ss:$12 sps:$4 sm:$0xff]   ;;  %v4027_v0 = vld [vmem:[%s5036_s1 + $0x90] sm:$0xff]   ;;  %v4010_v2 = vld [vmem:[%s4252_s7 + $0x18] ss:$12 sps:$4 sm:$0xff]  }
  0x23   : > { %v4017_v63 = vld [vmem:[%s5036_s1 + $0x88] sm:$0xff]   ;;  %v4034_v5 = vld [vmem:[%s5036_s1 + $0x98] sm:$0xff]   ;;  %v4054_v12 = vld [vmem:[%s5036_s1 + $0x1c0] sm:$0xff]  }
  0x24   : > { %3212 = vmatpush3.bf16.msra.mxu0 %v3955_v17  ;;  %3766 = vmatpush3.bf16.msra.mxu1 %v4230_v16  ;;  %v4424_v6 = vld [vmem:[%s4252_s7 + $0xf0] ss:$12 sps:$4 sm:$0xff]   ;;  %v4431_v9 = vld [vmem:[%s4252_s7 + $0x10c] ss:$12 sps:$4 sm:$0xff]   ;;  %v4023_v15 = vld [vmem:[%s4252_s7 + $0x48] ss:$12 sps:$4 sm:$0xff]  }
  0x25   : > { %3213 = vmatprep.subr.bf16.mxu0 %v3956_v18  ;;  %3759 = vmatprep.subr.bf16.mxu1 %v4244_v19  ;;  %v4016_v8 = vld [vmem:[%s4252_s7 + $0x30] ss:$12 sps:$4 sm:$0xff]   ;;  %v4048_v11 = vld [vmem:[%s5036_s1 + $0xa8] sm:$0xff]  }
  0x26   : > { %v4056_v14 = vld [vmem:[%s5036_s1 + $0xb0] sm:$0xff]   ;;  %v4456_v17 = vld [vmem:[%s4252_s7 + $0x120] ss:$12 sps:$4 sm:$0xff]   ;;  %v4459_v18 = vld [vmem:[%s4252_s7 + $0x13c] ss:$12 sps:$4 sm:$0xff]  }
  0x28   : > { %3214 = vmatpush3.bf16.msra.mxu0 %v3958_v20  ;;  %3767 = vmatpush3.bf16.msra.mxu1 %v4244_v19  ;;  %v4469_v20 = vld [vmem:[%s4252_s7 + $0x138] ss:$12 sps:$4 sm:$0xff]  }
  0x29   : > { %3215 = vmatprep.subr.bf16.mxu0 %v3959_v21  ;;  %3760 = vmatprep.subr.bf16.mxu1 %v4261_v22  ;;  %v4472_v21 = vld [vmem:[%s4252_s7 + $0x154] ss:$12 sps:$4 sm:$0xff]  }
  0x2c   : > { %3216 = vmatpush3.bf16.msra.mxu0 %v3961_v25  ;;  %3768 = vmatpush3.bf16.msra.mxu1 %v4261_v22  ;;  %v4488_v25 = vld [vmem:[%s4252_s7 + $0x16c] ss:$12 sps:$4 sm:$0xff]  }
  0x2d   : > { %3609 = vmatprep.subr.bf16.mxu0 %v4160_v1  ;;  %3337 = vmatprep.subr.bf16.mxu1 %v3967_v26  ;;  %v4495_v26 = vld [vmem:[%s4252_s7 + $0x168] ss:$12 sps:$4 sm:$0xff]  }
  0x2f   : > { %782 = vmatmul.mubr.bf16.vlgmr.msra.gmra.mrb[0].mxu0 %v4280_v27  ;;  %3642 = vmatmul.mubr.bf16.vlgmr.msra.gmra.mrb[0].mxu1 %v4284_v28 }
  0x30   : > { %3610 = vmatpush3.bf16.msra.mxu0 %v4160_v1  ;;  %3338 = vmatpush3.bf16.msra.mxu1 %v3968_v29  ;;  %v4409_v1 = vld [vmem:[%s4252_s7 + $0xd8] ss:$12 sps:$4 sm:$0xff]   ;;  %v4505_v29 = vld [vmem:[%s4252_s7 + $0x180] ss:$12 sps:$4 sm:$0xff]  }
  0x31   : > { %3339 = vmatprep.subr.bf16.mxu1 %v3969_v30  ;;  %789 = vmatprep.mubr.bf16.mxu0 %v4295_v31  ;;  %v4508_v30 = vld [vmem:[%s4252_s7 + $0x19c] ss:$12 sps:$4 sm:$0xff]  }
  0x32   : > { %3645 = vmatprep.mubr.bf16.mxu1 %v4298_v32  ;;  %3611 = vmatprep.subr.bf16.mxu0 %v4173_v4 }
  0x34   : > { %3340 = vmatpush3.bf16.msra.mxu1 %v3970_v33  ;;  %3612 = vmatpush3.bf16.msra.mxu0 %v4173_v4  ;;  %v4013_v4 = vld [vmem:[%s4252_s7 + $0x34] ss:$12 sps:$4 sm:$0xff]  }
  0x35   : > { %3341 = vmatprep.subr.bf16.mxu1 %v3976_v35  ;;  %3613 = vmatprep.subr.bf16.mxu0 %v4185_v7  ;;  %v4518_v33 = vld [vmem:[%s4252_s7 + $0x1b4] ss:$12 sps:$4 sm:$0xff]   ;;  %v4528_v35 = vld [vmem:[%s4252_s7 + $0x1cc] ss:$12 sps:$4 sm:$0xff]  }
  0x37   : > { %790 = vmatmul.mubr.bf16.gmra.mrb[4].mxu0 %v4308_v34  ;;  %3646 = vmatmul.mubr.bf16.gmra.mrb[4].mxu1 %v4315_v36 }
  0x38   : > { %3342 = vmatpush3.bf16.msra.mxu1 %v3977_v37  ;;  %797 = vmatprep.mubr.bf16.mxu0 %v4325_v39  ;;  %v4535_v37 = vld [vmem:[%s4252_s7 + $0x1c8] ss:$12 sps:$4 sm:$0xff]  }
  0x39   : > { %3343 = vmatprep.subr.bf16.mxu1 %v3978_v38  ;;  %3649 = vmatprep.mubr.bf16.mxu1 %v3982_v40  ;;  %v4538_v38 = vld [vmem:[%s4252_s7 + $0x68] ss:$12 sps:$4 sm:$0xff]   ;;  %v4055_v40 = vld [vmem:[%s5036_s1 + $0x180] sm:$0xff]  }
  0x3a   : > { %3614 = vmatpush3.bf16.msra.mxu0 %v4185_v7  ;;  %v4041_v7 = vld [vmem:[%s5036_s1 + $0xa0] sm:$0xff]  }
  0x3b   : > { %3615 = vmatprep.subr.bf16.mxu0 %v4198_v10 }
  0x3c   : > { %3344 = vmatpush3.bf16.msra.mxu1 %v3979_v41  ;;  %v4551_v41 = vld [vmem:[%s4252_s7 + $0x98] ss:$12 sps:$4 sm:$0xff]  }
  0x3d   : > { %3345 = vmatprep.subr.bf16.mxu1 %v3985_v44  ;;  %v4061_v44 = vld [vmem:[%s5036_s1 + $0x1d0] sm:$0xff]  }
  0x3e   : > { %3616 = vmatpush3.bf16.msra.mxu0 %v4198_v10  ;;  %v4020_v10 = vld [vmem:[%s4252_s7 + $0x4c] ss:$12 sps:$4 sm:$0xff]  }
  0x3f   : > { %798 = vmatmul.mubr.bf16.gmra.mrb[8].mxu0 %v4337_v42  ;;  %3650 = vmatmul.mubr.bf16.gmra.mrb[8].mxu1 %v3984_v43  ;;  %v4058_v43 = vld [vmem:[%s5036_s1 + $0x188] sm:$0xff]  }
  0x40   : > { %3346 = vmatpush3.bf16.msra.mxu1 %v3986_v45  ;;  %805 = vmatprep.mubr.bf16.mxu0 %v4352_v47  ;;  %v4567_v45 = vld [vmem:[%s4252_s7 + $0xb0] ss:$12 sps:$4 sm:$0xff]  }
  0x41   : > { %3347 = vmatprep.subr.bf16.mxu1 %v3987_v46  ;;  %3653 = vmatprep.mubr.bf16.mxu1 %v3991_v48  ;;  %v4062_v46 = vld [vmem:[%s5036_s1 + $0x190] sm:$0xff]   ;;  %v4063_v48 = vld [vmem:[%s5036_s1 + $0x1d8] sm:$0xff]  }
  0x42   : > { %3617 = vmatprep.subr.bf16.mxu0 %v4213_v13 }
  0x43   : > { %3618 = vmatpush3.bf16.msra.mxu0 %v4213_v13  ;;  %v4443_v13 = vld [vmem:[%s4252_s7 + $0x108] ss:$12 sps:$4 sm:$0xff]  }
  0x44   : > { %3348 = vmatpush3.bf16.msra.mxu1 %v3988_v49  ;;  %3619 = vmatprep.subr.bf16.mxu0 %v4230_v16  ;;  %v4064_v49 = vld [vmem:[%s5036_s1 + $0x198] sm:$0xff]  }
  0x45   : > { %3349 = vmatprep.subr.bf16.mxu1 %v3994_v50  ;;  %v4067_v50 = vld [vmem:[%s5036_s1 + $0x1e0] sm:$0xff]  }
  0x47   : > { %806 = vmatmul.mubr.bf16.gmra.mrb[12].mxu0 %v4365_v51  ;;  %3654 = vmatmul.mubr.bf16.gmra.mrb[12].mxu1 %v3993_v52  ;;  %v4068_v52 = vld [vmem:[%s5036_s1 + $0x1a0] sm:$0xff]  }
  0x48   : > { %3350 = vmatpush3.bf16.msra.mxu1 %v3995_v53  ;;  %813 = vmatprep.mubr.bf16.mxu0 %v4377_v55  ;;  %v4595_v53 = vld [vmem:[%s4252_s7 + $0xf8] ss:$12 sps:$4 sm:$0xff]  }
  0x49   : > { %3351 = vmatprep.subr.bf16.mxu1 %v3996_v54  ;;  %1311 = vmatprep.mubr.bf16.mxu1 %v4002_v56  ;;  %v4070_v54 = vld [vmem:[%s5036_s1 + $0x1e8] sm:$0xff]  }
  0x4a   : > { %3620 = vmatpush3.bf16.msra.mxu0 %v4230_v16  ;;  %v4450_v16 = vld [vmem:[%s4252_s7 + $0x124] ss:$12 sps:$4 sm:$0xff]   ;;  %v4071_v56 = vld [vmem:[%s5036_s1 + $0x1a8] sm:$0xff]  }
  0x4b   : > { %3621 = vmatprep.subr.bf16.mxu0 %v4244_v19 }
  0x4c   : > { %3352 = vmatpush3.bf16.msra.mxu1 %v3997_v57  ;;  %v4074_v57 = vld [vmem:[%s5036_s1 + $0x1f0] sm:$0xff]  }
  0x4d   : > { %3657 = vmatprep.subr.bf16.mxu1 %v4004_v58 }
  0x4e   : > { %3622 = vmatpush3.bf16.msra.mxu0 %v4244_v19  ;;  %v4069_v19 = vld [vmem:[%s5036_s1 + $0xb8] sm:$0xff]  }
  0x4f   : > { %814 = vmatmul.mubr.bf16.gmra.mrb[16].mxu0 %v4392_v60  ;;  %1312 = vmatmul.mubr.bf16.vlgmr.msra.gmra.mrb[16].mxu1 %v4000_v59  ;;  %v4075_v59 = vld [vmem:[%s5036_s1 + $0x1b0] sm:$0xff]  }
  0x50   : > { %3658 = vmatpush3.bf16.msra.mxu1 %v4004_v58  ;;  %821 = vmatprep.mubr.bf16.mxu0 %v4396_v61  ;;  %v4073_v58 = vld [vmem:[%s4252_s7 + $0x110] ss:$12 sps:$4 sm:$0xff]  }
  0x51   : > { %1319 = vmatprep.mubr.bf16.mxu1 %v4007_v62  ;;  %3659 = vmatprep.subr.bf16.mxu1 %v4017_v63  ;;  %v4078_v62 = vld [vmem:[%s4252_s7 + $0x8] ss:$12 sps:$4 sm:$0xff]  }
  0x52   : > { %3623 = vmatprep.subr.bf16.mxu0 %v4261_v22 }
  0x53   : > { %3624 = vmatpush3.bf16.msra.mxu0 %v4261_v22  ;;  %v4481_v22 = vld [vmem:[%s5036_s1 + $0x200] sm:$0xff]  }
  0x54   : > { %3660 = vmatpush3.bf16.msra.mxu1 %v4017_v63  ;;  %3473 = vmatprep.subr.bf16.mxu0 %v4054_v12  ;;  %v4076_v63 = vld [vmem:[%s5036_s1 + $0x1f8] sm:$0xff]   ;;  %v4090_v12 = vld [vmem:[%s4252_s7 + $0xc8] ss:$12 sps:$4 sm:$0xff]  }
  0x55   : > { %3661 = vmatprep.subr.bf16.mxu1 %v4027_v0 }
  0x57   : > { %822 = vmatmul.mubr.bf16.gmra.mrb[20].mxu0 %v4409_v1  ;;  %1320 = vmatmul.mubr.bf16.gmra.mrb[20].mxu1 %v4010_v2  ;;  %v4079_v2 = vld [vmem:[%s4252_s7 + $0x20] ss:$12 sps:$4 sm:$0xff]  }
  0x58   : > { %829 = vmatprep.mubr.bf16.mxu0 %v4414_v3  ;;  %1327 = vmatprep.mubr.bf16.mxu1 %v4013_v4  ;;  %v4081_v4 = vld [vmem:[%s4252_s7 + $0x38] ss:$12 sps:$4 sm:$0xff]  }
  0x59   : > { %3662 = vmatpush3.bf16.msra.mxu1 %v4027_v0  ;;  %v4077_v0 = vld [vmem:[%s5036_s1 + $0x1b8] sm:$0xff]  }
  0x5a   : > { %3663 = vmatprep.subr.bf16.mxu1 %v4034_v5 }
  0x5d   : > { %3664 = vmatpush3.bf16.msra.mxu1 %v4034_v5  ;;  %v4083_v5 = vld [vmem:[%s5036_s1 + $0x208] sm:$0xff]  }
  0x5e   : > { %3665 = vmatprep.subr.bf16.mxu1 %v4041_v7 }
  0x5f   : > { %830 = vmatmul.mubr.bf16.gmra.mrb[24].mxu0 %v4424_v6  ;;  %1328 = vmatmul.mubr.bf16.gmra.mrb[24].mxu1 %v4016_v8  ;;  %v4085_v8 = vld [vmem:[%s5036_s1 + $0x218] sm:$0xff]  }
  0x60   : > { %837 = vmatprep.mubr.bf16.mxu0 %v4431_v9  ;;  %1335 = vmatprep.mubr.bf16.mxu1 %v4020_v10 }
  0x61   : > { %3666 = vmatpush3.bf16.msra.mxu1 %v4041_v7  ;;  %v4082_v7 = vld [vmem:[%s4252_s7 + $0x50] ss:$12 sps:$4 sm:$0xff]  }
  0x62   : > { %3667 = vmatprep.subr.bf16.mxu1 %v4048_v11 }
  0x65   : > { %3668 = vmatpush3.bf16.msra.mxu1 %v4048_v11 }
  0x66   : > { %3669 = vmatprep.subr.bf16.mxu1 %v4056_v14 }
  0x67   : > { %838 = vmatmul.mubr.bf16.gmra.mrb[28].mxu0 %v4443_v13  ;;  %1336 = vmatmul.mubr.bf16.gmra.mrb[28].mxu1 %v4023_v15 }
  0x68   : > { %845 = vmatprep.mubr.bf16.mxu0 %v4450_v16  ;;  %1343 = vmatprep.mubr.bf16.mxu1 %v4265_v23  ;;  %v4484_v23 = vld [vmem:[%s4252_s7 + $0x150] ss:$12 sps:$4 sm:$0xff]  }
  0x69   : > { %3670 = vmatpush3.bf16.msra.mxu1 %v4056_v14  ;;  %v4091_v14 = vld [vmem:[%s4252_s7 + $0xe0] ss:$12 sps:$4 sm:$0xff]  }
  0x6a   : > { %3671 = vmatprep.subr.bf16.mxu1 %v4069_v19 }
  0x6d   : > { %3672 = vmatpush3.bf16.msra.mxu1 %v4069_v19 }
  0x6e   : > { %3705 = vmatprep.subr.bf16.mxu1 %v4481_v22 }
  0x6f   : > { %846 = vmatmul.mubr.bf16.gmra.mrb[32].mxu0 %v4456_v17  ;;  %1344 = vmatmul.mubr.bf16.gmra.mrb[32].mxu1 %v4280_v27  ;;  %v4498_v27 = vld [vmem:[%s4252_s7 + $0x184] ss:$12 sps:$4 sm:$0xff]  }
  0x70   : > { %853 = vmatprep.mubr.bf16.mxu0 %v4459_v18  ;;  %1351 = vmatprep.mubr.bf16.mxu1 %v4295_v31  ;;  %v4515_v31 = vld [vmem:[%s4252_s7 + $0x198] ss:$12 sps:$4 sm:$0xff]  }
  0x77   : > { %854 = vmatmul.mubr.bf16.gmra.mrb[36].mxu0 %v4469_v20  ;;  %1352 = vmatmul.mubr.bf16.gmra.mrb[36].mxu1 %v4308_v34  ;;  %v4525_v34 = vld [vmem:[%s4252_s7 + $0x1b0] ss:$12 sps:$4 sm:$0xff]  }
  0x78   : > { %861 = vmatprep.mubr.bf16.mxu0 %v4472_v21  ;;  %1359 = vmatprep.mubr.bf16.mxu1 %v4325_v39  ;;  %v4545_v39 = vld [vmem:[%s4252_s7 + $0x80] ss:$12 sps:$4 sm:$0xff]  }
  0x7f   : > { %862 = vmatmul.mubr.bf16.gmra.mrb[40].mxu0 %v4484_v23  ;;  %1360 = vmatmul.mubr.bf16.gmra.mrb[40].mxu1 %v4337_v42  ;;  %v4057_v42 = vld [vmem:[%s5036_s1 + $0x1c8] sm:$0xff]  }
  0x80   : > { %869 = vmatprep.mubr.bf16.mxu0 %v4488_v25  ;;  %1367 = vmatprep.mubr.bf16.mxu1 %v4352_v47  ;;  %v4573_v47 = vld [vmem:[%s4252_s7 + $0xc8] ss:$12 sps:$4 sm:$0xff]  }
  0x87   : > { %870 = vmatmul.mubr.bf16.gmra.mrb[44].mxu0 %v4495_v26  ;;  %1368 = vmatmul.mubr.bf16.gmra.mrb[44].mxu1 %v4365_v51  ;;  %v4589_v51 = vld [vmem:[%s4252_s7 + $0xe0] ss:$12 sps:$4 sm:$0xff]  }
  0x88   : > { %877 = vmatprep.mubr.bf16.mxu0 %v4498_v27  ;;  %1375 = vmatprep.mubr.bf16.mxu1 %v4377_v55 }
  0x8f   : > { %878 = vmatmul.mubr.bf16.gmra.mrb[48].mxu0 %v4505_v29  ;;  %1376 = vmatmul.mubr.bf16.gmra.mrb[48].mxu1 %v4392_v60 }
  0x90   : > { %885 = vmatprep.mubr.bf16.mxu0 %v4508_v30  ;;  %1383 = vmatprep.mubr.bf16.mxu1 %v4396_v61 }
  0x97   : > { %886 = vmatmul.mubr.bf16.gmra.mrb[52].mxu0 %v4515_v31  ;;  %1384 = vmatmul.mubr.bf16.gmra.mrb[52].mxu1 %v4409_v1 }
  0x98   : > { %893 = vmatprep.mubr.bf16.mxu0 %v4518_v33  ;;  %1391 = vmatprep.mubr.bf16.mxu1 %v4414_v3 }
  0x9f   : > { %894 = vmatmul.mubr.bf16.gmra.mrb[56].mxu0 %v4525_v34  ;;  %1392 = vmatmul.mubr.bf16.gmra.mrb[56].mxu1 %v4424_v6 }
  0xa0   : > { %901 = vmatprep.mubr.bf16.mxu0 %v4528_v35  ;;  %1399 = vmatprep.mubr.bf16.mxu1 %v4431_v9 }
  0xa7   : > { %902 = vmatmul.mubr.bf16.gmra.mrb[60].mxu0 %v4535_v37  ;;  %1400 = vmatmul.mubr.bf16.gmra.mrb[60].mxu1 %v4443_v13 }
  0xa8   : > { %3625 = vmatprep.mubr.bf16.mxu0 %v4538_v38  ;;  %1407 = vmatprep.mubr.bf16.mxu1 %v4450_v16 }
  0xaf   : > { %3626 = vmatmul.mubr.bf16.vlgmr.msra.gmra.mrb[64].mxu0 %v4545_v39  ;;  %1408 = vmatmul.mubr.bf16.gmra.mrb[64].mxu1 %v4456_v17 }
  0xb0   : > { %3474 = vmatpush3.bf16.msra.mxu0 %v4055_v40  ;;  %3629 = vmatprep.mubr.bf16.mxu0 %v4551_v41 }
  0xb1   : > { %3475 = vmatprep.subr.bf16.mxu0 %v4057_v42  ;;  %1415 = vmatprep.mubr.bf16.mxu1 %v4459_v18 }
  0xb4   : > { %3476 = vmatpush3.bf16.msra.mxu0 %v4058_v43 }
  0xb5   : > { %3477 = vmatprep.subr.bf16.mxu0 %v4061_v44 }
  0xb7   : > { %3630 = vmatmul.mubr.bf16.gmra.mrb[68].mxu0 %v4567_v45  ;;  %1416 = vmatmul.mubr.bf16.gmra.mrb[68].mxu1 %v4469_v20 }
  0xb8   : > { %3478 = vmatpush3.bf16.msra.mxu0 %v4062_v46  ;;  %3633 = vmatprep.mubr.bf16.mxu0 %v4573_v47  ;;  %v4097_v46 = vld [vmem:[%s4252_s7 + $0x170] ss:$12 sps:$4 sm:$0xff]  }
  0xb9   : > { %3479 = vmatprep.subr.bf16.mxu0 %v4063_v48  ;;  %1423 = vmatprep.mubr.bf16.mxu1 %v4472_v21 }
  0xbc   : > { %3480 = vmatpush3.bf16.msra.mxu0 %v4064_v49 }
  0xbd   : > { %3481 = vmatprep.subr.bf16.mxu0 %v4067_v50 }
  0xbf   : > { %3634 = vmatmul.mubr.bf16.gmra.mrb[72].mxu0 %v4589_v51  ;;  %1424 = vmatmul.mubr.bf16.gmra.mrb[72].mxu1 %v4484_v23 }
  0xc0   : > { %3482 = vmatpush3.bf16.msra.mxu0 %v4068_v52  ;;  %3637 = vmatprep.mubr.bf16.mxu0 %v4595_v53  ;;  %v4100_v52 = vld [vmem:[%s4252_s7 + $0x188] ss:$12 sps:$4 sm:$0xff]  }
  0xc1   : > { %3483 = vmatprep.subr.bf16.mxu0 %v4070_v54  ;;  %1431 = vmatprep.mubr.bf16.mxu1 %v4488_v25 }
  0xc4   : > { %3484 = vmatpush3.bf16.msra.mxu0 %v4071_v56 }
  0xc5   : > { %3485 = vmatprep.subr.bf16.mxu0 %v4074_v57 }
  0xc7   : > { %3638 = vmatmul.mubr.bf16.gmra.mrb[76].mxu0 %v4073_v58  ;;  %1432 = vmatmul.mubr.bf16.gmra.mrb[76].mxu1 %v4495_v26 }
  0xc8   : > { %3486 = vmatpush3.bf16.msra.mxu0 %v4075_v59  ;;  %3673 = vmatprep.mubr.bf16.mxu1 %v4078_v62  ;;  %v4101_v62 = vld [vmem:[%s4252_s7 + $0x1e0] ss:$12 sps:$4 sm:$0xff]  }
  0xc9   : > { %3487 = vmatprep.subr.bf16.mxu0 %v4076_v63  ;;  %2146 = vmatprep.mubr.bf16.mxu0 %v4377_v55  ;;  %v4084_v55 = vld [vmem:[%s5036_s1 + $0x210] sm:$0xff]   ;;  %v4102_v63 = vld [vmem:[%s4252_s7 + $0x1a0] ss:$12 sps:$4 sm:$0xff]  }
  0xcc   : > { %3488 = vmatpush3.bf16.msra.mxu0 %v4077_v0 }
  0xcf   : > { %3674 = vmatmul.mubr.bf16.vlgmr.msra.gmra.mrb[80].mxu1 %v4079_v2  ;;  %2147 = vmatmul.mubr.bf16.vlgmr.msra.gmra.mrb[80].mxu0 %v4392_v60  ;;  %v4086_v60 = vld [vmem:[%s5036_s1 + $0x220] sm:$0xff]  }
  0xd0   : > { %3706 = vmatpush3.bf16.msra.mxu1 %v4481_v22  ;;  %3677 = vmatprep.mubr.bf16.mxu1 %v4081_v4 }
  0xd1   : > { %2154 = vmatprep.mubr.bf16.mxu0 %v4396_v61  ;;  %3707 = vmatprep.subr.bf16.mxu1 %v4083_v5  ;;  %v4087_v61 = vld [vmem:[%s5036_s1 + $0x228] sm:$0xff]  }
  0xd4   : > { %3708 = vmatpush3.bf16.msra.mxu1 %v4083_v5 }
  0xd5   : > { %3709 = vmatprep.subr.bf16.mxu1 %v4084_v55 }
  0xd7   : > { %3678 = vmatmul.mubr.bf16.gmra.mrb[84].mxu1 %v4082_v7  ;;  %2155 = vmatmul.mubr.bf16.gmra.mrb[84].mxu0 %v4409_v1  ;;  %v4088_v1 = vld [vmem:[%s5036_s1 + $0x230] sm:$0xff]   ;;  %v4105_v7 = vld [vmem:[%s4252_s7 + $0x1b8] ss:$12 sps:$4 sm:$0xff]  }
  0xd8   : > { %3681 = vmatprep.mubr.bf16.mxu1 %v4538_v38  ;;  %2162 = vmatprep.mubr.bf16.mxu0 %v4414_v3  ;;  %v4089_v3 = vld [vmem:[%s5036_s1 + $0x238] sm:$0xff]   ;;  %v4095_v38 = vld [vmem:[%s4252_s7 + $0x140] ss:$12 sps:$4 sm:$0xff]  }
  0xd9   : > { %3710 = vmatpush3.bf16.msra.mxu1 %v4084_v55  ;;  %v4103_v55 = vld [vmem:[%s4252_s7 + $0x1fc] ss:$12 sps:$4 sm:$0xff]  }
  0xda   : > { %3711 = vmatprep.subr.bf16.mxu1 %v4085_v8 }
  0xdd   : > { %3712 = vmatpush3.bf16.msra.mxu1 %v4085_v8 }
  0xde   : > { %3713 = vmatprep.subr.bf16.mxu1 %v4086_v60 }
  0xdf   : > { %3682 = vmatmul.mubr.bf16.gmra.mrb[88].mxu1 %v4545_v39  ;;  %2163 = vmatmul.mubr.bf16.gmra.mrb[88].mxu0 %v4424_v6 }
  0xe0   : > { %3685 = vmatprep.mubr.bf16.mxu1 %v4551_v41  ;;  %2170 = vmatprep.mubr.bf16.mxu0 %v4431_v9  ;;  %v4096_v41 = vld [vmem:[%s4252_s7 + $0x158] ss:$12 sps:$4 sm:$0xff]  }
  0xe1   : > { %3714 = vmatpush3.bf16.msra.mxu1 %v4086_v60 }
  0xe2   : > { %3715 = vmatprep.subr.bf16.mxu1 %v4087_v61 }
  0xe5   : > { %3716 = vmatpush3.bf16.msra.mxu1 %v4087_v61 }
  0xe6   : > { %3717 = vmatprep.subr.bf16.mxu1 %v4088_v1 }
  0xe7   : > { %3686 = vmatmul.mubr.bf16.gmra.mrb[92].mxu1 %v4567_v45  ;;  %2171 = vmatmul.mubr.bf16.gmra.mrb[92].mxu0 %v4443_v13 }
  0xe8   : > { %3689 = vmatprep.mubr.bf16.mxu1 %v4573_v47  ;;  %2178 = vmatprep.mubr.bf16.mxu0 %v4450_v16 }
  0xe9   : > { %3718 = vmatpush3.bf16.msra.mxu1 %v4088_v1 }
  0xea   : > { %3719 = vmatprep.subr.bf16.mxu1 %v4089_v3 }
  0xed   : > { %3720 = vmatpush3.bf16.msra.mxu1 %v4089_v3 }
  0xef   : > { %3690 = vmatmul.mubr.bf16.gmra.mrb[0].mxu1 %v4589_v51  ;;  %2179 = vmatmul.mubr.bf16.gmra.mrb[96].mxu0 %v4456_v17  ;;  %v4092_v17 = vld [vmem:[%s4252_s7 + $0xf8] ss:$12 sps:$4 sm:$0xff]  }
  0xf0   : > { %3693 = vmatprep.mubr.bf16.mxu1 %v4595_v53  ;;  %2186 = vmatprep.mubr.bf16.mxu0 %v4459_v18  ;;  %v4098_v51 = vld [vmem:[%s4252_s7 + $0x1e4] ss:$12 sps:$4 sm:$0xff]  }
  0xf7   : > { %3694 = vmatmul.mubr.bf16.gmra.mrb[4].mxu1 %v4073_v58  ;;  %2187 = vmatmul.mubr.bf16.gmra.mrb[100].mxu0 %v4469_v20 }
  0xf8   : > { %3697 = vmatprep.mubr.bf16.mxu1 %v4268_v24  ;;  %2194 = vmatprep.mubr.bf16.mxu0 %v4472_v21  ;;  %v4093_v21 = vld [vmem:[%s4252_s7 + $0x110] ss:$12 sps:$4 sm:$0xff]  }
  0xff   : > { %3698 = vmatmul.mubr.bf16.gmra.mrb[8].mxu1 %v4284_v28  ;;  %2195 = vmatmul.mubr.bf16.gmra.mrb[104].mxu0 %v4484_v23 }
 0x100   : > { %3701 = vmatprep.mubr.bf16.mxu1 %v4298_v32  ;;  %2202 = vmatprep.mubr.bf16.mxu0 %v4488_v25  ;;  %v4094_v25 = vld [vmem:[%s4252_s7 + $0x128] ss:$12 sps:$4 sm:$0xff]  }
 0x102   : > { %v3217_v6 = vpop.f32.mrb[0].mxu0 }
 0x103   : > { %v3218_v9 = vpop.f32.mrb[1].mxu0 }
 0x104   : > { %v4672_v10 = vadd.f32 %v3218_v9, %v3217_v6  ;;  %v3220_v11 = vpop.f32.mrb[2].mxu0 }
 0x105   : > { %v3221_v13 = vpop.f32.mrb[3].mxu0 }
 0x106   : > { %v4675_v24 = vadd.f32 %v3221_v13, %v3220_v11  ;;  %v4106_v11 = vld [vmem:[%s4252_s7 + $0x1f8] ss:$12 sps:$4 sm:$0xff]  }
 0x107   : > { %3702 = vmatmul.mubr.bf16.gmra.mrb[12].mxu1 %v4315_v36  ;;  %2203 = vmatmul.mubr.bf16.gmra.mrb[108].mxu0 %v4495_v26 }
 0x108   : > { %2210 = vmatprep.mubr.bf16.mxu0 %v4498_v27  ;;  %3721 = vmatprep.mubr.bf16.mxu1 %v4090_v12  ;;  %v4107_v12 = vld [vmem:[%s4252_s7 + $0x1d0] ss:$12 sps:$4 sm:$0xff]  }
 0x10a   : > { %v3223_v28 = vpop.f32.mrb[4].mxu0 }
 0x10b   : > { %v3224_v32 = vpop.f32.mrb[5].mxu0 }
 0x10c   : > { %v4681_v15 = vadd.f32 %v3224_v32, %v3223_v28  ;;  %v3226_v16 = vpop.f32.mrb[6].mxu0 }
 0x10d   : > { %v3227_v18 = vpop.f32.mrb[7].mxu0 }
 0x10e   : > { %v4684_v19 = vadd.f32 %v3227_v18, %v3226_v16  ;;  %v4108_v16 = vld [vmem:[%s4252_s7 + $0x214] ss:$12 sps:$4 sm:$0xff]  }
 0x10f   : > { %2211 = vmatmul.mubr.bf16.gmra.mrb[112].mxu0 %v4505_v29  ;;  %3722 = vmatmul.mubr.bf16.vlgmr.msra.gmra.mrb[80].mxu1 %v4091_v14 }
 0x110   : > { %2218 = vmatprep.mubr.bf16.mxu0 %v4508_v30  ;;  %3725 = vmatprep.mubr.bf16.mxu1 %v4092_v17  ;;  %v4110_v17 = vld [vmem:[%s4252_s7 + $0x1e8] ss:$12 sps:$4 sm:$0xff]  }
 0x112   : > { %v3229_v36 = vpop.f32.mrb[8].mxu0 }
 0x113   : > { %v3230_v20 = vpop.f32.mrb[9].mxu0 }
 0x114   : > { %v4689_v22 = vadd.f32 %v3230_v20, %v3229_v36  ;;  %v3232_v23 = vpop.f32.mrb[10].mxu0 }
 0x115   : > { %v3233_v26 = vpop.f32.mrb[11].mxu0 }
 0x116   : > { %v4692_v27 = vadd.f32 %v3233_v26, %v3232_v23 }
 0x117   : > { %2219 = vmatmul.mubr.bf16.gmra.mrb[116].mxu0 %v4515_v31  ;;  %3726 = vmatmul.mubr.bf16.gmra.mrb[84].mxu1 %v4093_v21 }
 0x118   : > { %2226 = vmatprep.mubr.bf16.mxu0 %v4518_v33  ;;  %3729 = vmatprep.mubr.bf16.mxu1 %v4094_v25 }
 0x11a   : > { %v3235_v29 = vpop.f32.mrb[12].mxu0 }
 0x11b   : > { %v3236_v30 = vpop.f32.mrb[13].mxu0 }
 0x11c   : > { %v4697_v39 = vadd.f32 %v3236_v30, %v3235_v29  ;;  %v3238_v40 = vpop.f32.mrb[14].mxu0  ;;  %v4111_v30 = vld [vmem:[%s4252_s7 + $0x210] ss:$12 sps:$4 sm:$0xff]  }
 0x11d   : > { %v3239_v42 = vpop.f32.mrb[15].mxu0 }
 0x11e   : > { %v4700_v43 = vadd.f32 %v3239_v42, %v3238_v40 }
 0x11f   : > { %2227 = vmatmul.mubr.bf16.gmra.mrb[120].mxu0 %v4525_v34  ;;  %3730 = vmatmul.mubr.bf16.gmra.mrb[88].mxu1 %v4095_v38  ;;  %v4112_v38 = vld [vmem:[%s4252_s7 + $0x200] ss:$12 sps:$4 sm:$0xff]  }
 0x120   : > { %2234 = vmatprep.mubr.bf16.mxu0 %v4528_v35  ;;  %3733 = vmatprep.mubr.bf16.mxu1 %v4096_v41 }
 0x122   : > { %v3241_v31 = vpop.f32.mrb[16].mxu0  ;;  %v3353_v33 = vpop.f32.mrb[16].mxu1 }
 0x123   : > { %v3242_v44 = vpop.f32.mrb[17].mxu0  ;;  %v3354_v45 = vpop.f32.mrb[17].mxu1 }
 0x124   : > { %v4705_v47 = vadd.f32 %v3242_v44, %v3241_v31  ;;  %v3244_v48 = vpop.f32.mrb[18].mxu0  ;;  %v4707_v49 = vadd.f32 %v3354_v45, %v3353_v33  ;;  %v3356_v50 = vpop.f32.mrb[18].mxu1  ;;  %v4113_v33 = vld [vmem:[%s4252_s7 + $0x22c] ss:$12 sps:$4 sm:$0xff]  }
 0x125   : > { %v3245_v34 = vpop.f32.mrb[19].mxu0  ;;  %v3357_v53 = vpop.f32.mrb[19].mxu1  ;;  %v4115_v44 = vld [vmem:[%s4252_s7 + $0x218] ss:$12 sps:$4 sm:$0xff]  }
 0x126   : > { %v4711_v54 = vadd.f32 %v3245_v34, %v3244_v48  ;;  %v4713_v35 = vadd.f32 %v3357_v53, %v3356_v50 }
 0x127   : > { %2235 = vmatmul.mubr.bf16.gmra.mrb[124].mxu0 %v4535_v37  ;;  %3734 = vmatmul.mubr.bf16.gmra.mrb[92].mxu1 %v4097_v46 }
 0x128   : > { %2242 = vmatprep.mubr.bf16.mxu0 %v4098_v51  ;;  %3737 = vmatprep.mubr.bf16.mxu1 %v4100_v52 }
 0x12a   : > { %v3247_v56 = vpop.f32.mrb[20].mxu0  ;;  %v3359_v57 = vpop.f32.mrb[20].mxu1 }
 0x12b   : > { %v3248_v58 = vpop.f32.mrb[21].mxu0  ;;  %v3360_v59 = vpop.f32.mrb[21].mxu1 }
 0x12c   : > { %v4718_v0 = vadd.f32 %v3248_v58, %v3247_v56  ;;  %v3250_v2 = vpop.f32.mrb[22].mxu0  ;;  %v4720_v4 = vadd.f32 %v3360_v59, %v3359_v57  ;;  %v3362_v5 = vpop.f32.mrb[22].mxu1  ;;  %v4116_v56 = vld [vmem:[%s4252_s7 + $0x228] ss:$12 sps:$4 sm:$0xff]   ;;  %v4117_v57 = vld [vmem:[%s4252_s7 + $0x230] ss:$12 sps:$4 sm:$0xff]  }
 0x12d   : > { %v3251_v37 = vpop.f32.mrb[23].mxu0  ;;  %v3363_v8 = vpop.f32.mrb[23].mxu1 }
 0x12e   : > { %v4724_v60 = vadd.f32 %v3251_v37, %v3250_v2  ;;  %v4726_v61 = vadd.f32 %v3363_v8, %v3362_v5 }
 0x12f   : > { %2243 = vmatmul.mubr.bf16.gmra.mrb[128].mxu0 %v4101_v62  ;;  %3738 = vmatmul.mubr.bf16.gmra.mrb[0].mxu1 %v4102_v63 }
 0x130   : > { %2250 = vmatprep.mubr.bf16.mxu0 %v4103_v55  ;;  %3741 = vmatprep.mubr.bf16.mxu1 %v4105_v7 }
 0x132   : > { %v3253_v1 = vpop.f32.mrb[24].mxu0  ;;  %v3365_v3 = vpop.f32.mrb[24].mxu1 }
 0x133   : > { %v3254_v6 = vpop.f32.mrb[25].mxu0  ;;  %v3366_v9 = vpop.f32.mrb[25].mxu1 }
 0x134   : > { %v4730_v13 = vadd.f32 %v3254_v6, %v3253_v1  ;;  %v3256_v28 = vpop.f32.mrb[26].mxu0  ;;  %v4732_v32 = vadd.f32 %v3366_v9, %v3365_v3  ;;  %v3368_v14 = vpop.f32.mrb[26].mxu1 }
 0x135   : > { %v3257_v18 = vpop.f32.mrb[27].mxu0  ;;  %v3369_v36 = vpop.f32.mrb[27].mxu1 }
 0x136   : > { %v4736_v20 = vadd.f32 %v3257_v18, %v3256_v28  ;;  %v4738_v21 = vadd.f32 %v3369_v36, %v3368_v14 }
 0x137   : > { %2251 = vmatmul.mubr.bf16.gmra.mrb[132].mxu0 %v4106_v11  ;;  %3742 = vmatmul.mubr.bf16.gmra.mrb[4].mxu1 %v4107_v12 }
 0x138   : > { %2258 = vmatprep.mubr.bf16.mxu0 %v4108_v16  ;;  %3745 = vmatprep.mubr.bf16.mxu1 %v4110_v17 }
 0x13a   : > { %v3259_v23 = vpop.f32.mrb[28].mxu0  ;;  %v3371_v25 = vpop.f32.mrb[28].mxu1 }
 0x13b   : > { %v3260_v26 = vpop.f32.mrb[29].mxu0  ;;  %v3372_v29 = vpop.f32.mrb[29].mxu1 }
 0x13c   : > { %v4742_v40 = vadd.f32 %v3260_v26, %v3259_v23  ;;  %v3262_v41 = vpop.f32.mrb[30].mxu0  ;;  %v4744_v42 = vadd.f32 %v3372_v29, %v3371_v25  ;;  %v3374_v31 = vpop.f32.mrb[30].mxu1 }
 0x13d   : > { %v3263_v45 = vpop.f32.mrb[31].mxu0  ;;  %v3375_v46 = vpop.f32.mrb[31].mxu1 }
 0x13e   : > { %v4748_v48 = vadd.f32 %v3263_v45, %v3262_v41  ;;  %v4750_v50 = vadd.f32 %v3375_v46, %v3374_v31 }
 0x13f   : > { %2259 = vmatmul.mubr.bf16.gmra.mrb[136].mxu0 %v4111_v30  ;;  %3746 = vmatmul.mubr.bf16.gmra.mrb[8].mxu1 %v4112_v38 }
 0x140   : > { %2266 = vmatprep.mubr.bf16.mxu0 %v4113_v33  ;;  %3749 = vmatprep.mubr.bf16.mxu1 %v4115_v44 }
 0x142   : > { %v3265_v51 = vpop.f32.mrb[32].mxu0  ;;  %v3377_v52 = vpop.f32.mrb[32].mxu1 }
 0x143   : > { %v3266_v34 = vpop.f32.mrb[33].mxu0  ;;  %v3378_v53 = vpop.f32.mrb[33].mxu1 }
 0x144   : > { %v3267_v58 = vadd.f32 %v3266_v34, %v3265_v51  ;;  %v3268_v59 = vpop.f32.mrb[34].mxu0  ;;  %v4754_v62 = vadd.f32 %v3378_v53, %v3377_v52  ;;  %v3380_v63 = vpop.f32.mrb[34].mxu1 }
 0x145   : > { %v3269_v2 = vpop.f32.mrb[35].mxu0  ;;  %v3381_v5 = vpop.f32.mrb[35].mxu1 }
 0x146   : > { %v3270_v55 = vadd.f32 %v3269_v2, %v3268_v59  ;;  %v4756_v7 = vadd.f32 %v3381_v5, %v3380_v63 }
 0x147   : > { %2267 = vmatmul.mubr.bf16.gmra.mrb[140].mxu0 %v4116_v56  ;;  %3750 = vmatmul.mubr.bf16.gmra.mrb[12].mxu1 %v4117_v57 }
 0x14a   : > { %v3271_v37 = vpop.f32.mrb[36].mxu0  ;;  %v3383_v8 = vpop.f32.mrb[36].mxu1 }
 0x14b   : > { %v3272_v1 = vpop.f32.mrb[37].mxu0  ;;  %v3384_v3 = vpop.f32.mrb[37].mxu1 }
 0x14c   : > { %v3273_v6 = vadd.f32 %v3272_v1, %v3271_v37  ;;  %v3274_v9 = vpop.f32.mrb[38].mxu0  ;;  %v4758_v11 = vadd.f32 %v3384_v3, %v3383_v8  ;;  %v3386_v12 = vpop.f32.mrb[38].mxu1 }
 0x14d   : > { %v3275_v28 = vpop.f32.mrb[39].mxu0  ;;  %v3387_v14 = vpop.f32.mrb[39].mxu1 }
 0x14e   : > { %v3276_v16 = vadd.f32 %v3275_v28, %v3274_v9  ;;  %v4760_v17 = vadd.f32 %v3387_v14, %v3386_v12 }
 0x152   : > { %v3277_v18 = vpop.f32.mrb[40].mxu0  ;;  %v3389_v36 = vpop.f32.mrb[40].mxu1 }
 0x153   : > { %v3278_v23 = vpop.f32.mrb[41].mxu0  ;;  %v3390_v25 = vpop.f32.mrb[41].mxu1 }
 0x154   : > { %v3279_v26 = vadd.f32 %v3278_v23, %v3277_v18  ;;  %v3280_v29 = vpop.f32.mrb[42].mxu0  ;;  %v4762_v30 = vadd.f32 %v3390_v25, %v3389_v36  ;;  %v3392_v38 = vpop.f32.mrb[42].mxu1 }
 0x155   : > { %v3281_v41 = vpop.f32.mrb[43].mxu0  ;;  %v3393_v31 = vpop.f32.mrb[43].mxu1 }
 0x156   : > { %v3282_v33 = vadd.f32 %v3281_v41, %v3280_v29  ;;  %v4764_v44 = vadd.f32 %v3393_v31, %v3392_v38 }
 0x15a   : > { %v3283_v45 = vpop.f32.mrb[44].mxu0  ;;  %v3395_v46 = vpop.f32.mrb[44].mxu1 }
 0x15b   : > { %v3284_v51 = vpop.f32.mrb[45].mxu0  ;;  %v3396_v52 = vpop.f32.mrb[45].mxu1 }
 0x15c   : > { %v3285_v34 = vadd.f32 %v3284_v51, %v3283_v45  ;;  %v3286_v53 = vpop.f32.mrb[46].mxu0  ;;  %v4766_v56 = vadd.f32 %v3396_v52, %v3395_v46  ;;  %v3398_v57 = vpop.f32.mrb[46].mxu1 }
 0x15d   : > { %v3287_v59 = vpop.f32.mrb[47].mxu0  ;;  %v3399_v63 = vpop.f32.mrb[47].mxu1 }
 0x15e   : > { %v3288_v2 = vadd.f32 %v3287_v59, %v3286_v53  ;;  %v4768_v5 = vadd.f32 %v3399_v63, %v3398_v57 }
 0x162   : > { %v3289_v37 = vpop.f32.mrb[48].mxu0  ;;  %v3401_v8 = vpop.f32.mrb[48].mxu1 }
 0x163   : > { %v3290_v1 = vpop.f32.mrb[49].mxu0  ;;  %v3402_v3 = vpop.f32.mrb[49].mxu1 }
 0x164   : > { %v4770_v9 = vadd.f32 %v3290_v1, %v3289_v37  ;;  %v3403_v12 = vadd.f32 %v3402_v3, %v3401_v8  ;;  %v3292_v28 = vpop.f32.mrb[50].mxu0  ;;  %v3404_v14 = vpop.f32.mrb[50].mxu1 }
 0x165   : > { %v3293_v18 = vpop.f32.mrb[51].mxu0  ;;  %v3405_v36 = vpop.f32.mrb[51].mxu1 }
 0x166   : > { %v4772_v23 = vadd.f32 %v3403_v12, %v3267_v58  ;;  %v4774_v25 = vadd.f32 %v3293_v18, %v3292_v28  ;;  %v3406_v29 = vadd.f32 %v3405_v36, %v3404_v14 }
 0x168   : > { %v4776_v38 = vadd.f32 %v3406_v29, %v3270_v55 }
 0x16a   : > { %v3295_v41 = vpop.f32.mrb[52].mxu0  ;;  %v3407_v31 = vpop.f32.mrb[52].mxu1 }
 0x16b   : > { %v3296_v45 = vpop.f32.mrb[53].mxu0  ;;  %v3408_v46 = vpop.f32.mrb[53].mxu1 }
 0x16c   : > { %v4778_v51 = vadd.f32 %v3296_v45, %v3295_v41  ;;  %v3409_v52 = vadd.f32 %v3408_v46, %v3407_v31  ;;  %v3298_v53 = vpop.f32.mrb[54].mxu0  ;;  %v3410_v57 = vpop.f32.mrb[54].mxu1 }
 0x16d   : > { %v3299_v59 = vpop.f32.mrb[55].mxu0  ;;  %v3411_v63 = vpop.f32.mrb[55].mxu1 }
 0x16e   : > { %v4780_v37 = vadd.f32 %v3409_v52, %v3273_v6  ;;  %v4782_v58 = vadd.f32 %v3299_v59, %v3298_v53  ;;  %v3412_v8 = vadd.f32 %v3411_v63, %v3410_v57 }
 0x170   : > { %v4784_v1 = vadd.f32 %v3412_v8, %v3276_v16 }
 0x172   : > { %5039 = vst [vmem:[#allocation2_spill] sm:$0xff] %v4784_v1  ;;  %v3301_v55 = vpop.f32.mrb[56].mxu0  ;;  %v3413_v3 = vpop.f32.mrb[56].mxu1 }
 0x173   : > { %v3302_v12 = vpop.f32.mrb[57].mxu0  ;;  %v3414_v28 = vpop.f32.mrb[57].mxu1 }
 0x174   : > { %v4786_v14 = vadd.f32 %v3302_v12, %v3301_v55  ;;  %v3415_v18 = vadd.f32 %v3414_v28, %v3413_v3  ;;  %v3304_v36 = vpop.f32.mrb[58].mxu0  ;;  %v3416_v29 = vpop.f32.mrb[58].mxu1 }
 0x175   : > { %v3305_v41 = vpop.f32.mrb[59].mxu0  ;;  %v3417_v31 = vpop.f32.mrb[59].mxu1 }
 0x176   : > { %v4788_v45 = vadd.f32 %v3415_v18, %v3279_v26  ;;  %v4790_v6 = vadd.f32 %v3305_v41, %v3304_v36  ;;  %v3418_v46 = vadd.f32 %v3417_v31, %v3416_v29 }
 0x178   : > { %v4792_v52 = vadd.f32 %v3418_v46, %v3282_v33 }
 0x17a   : > { %5040 = vst [vmem:[#allocation3_spill] sm:$0xff] %v4792_v52  ;;  %v3307_v16 = vpop.f32.mrb[60].mxu0  ;;  %v3419_v53 = vpop.f32.mrb[60].mxu1 }
 0x17b   : > { %v3308_v57 = vpop.f32.mrb[61].mxu0  ;;  %v3420_v59 = vpop.f32.mrb[61].mxu1 }
 0x17c   : > { %v4794_v63 = vadd.f32 %v3308_v57, %v3307_v16  ;;  %v3421_v8 = vadd.f32 %v3420_v59, %v3419_v53  ;;  %v3310_v55 = vpop.f32.mrb[62].mxu0  ;;  %v3422_v3 = vpop.f32.mrb[62].mxu1 }
 0x17d   : > { %v3311_v12 = vpop.f32.mrb[63].mxu0  ;;  %v3423_v28 = vpop.f32.mrb[63].mxu1 }
 0x17e   : > { %v4796_v1 = vadd.f32 %v3421_v8, %v3285_v34  ;;  %v4798_v26 = vadd.f32 %v3311_v12, %v3310_v55  ;;  %v3424_v18 = vadd.f32 %v3423_v28, %v3422_v3 }
 0x180   : > { %v4800_v36 = vadd.f32 %v3424_v18, %v3288_v2 }
 0x182   : > { %v3627_v33 = vpop.f32.mrb[64].mxu0  ;;  %v3425_v29 = vpop.f32.mrb[64].mxu1 }
 0x183   : > { %v953_v41 = vadd.f32 %v3627_v33, %v4681_v15  ;;  %v944_v31 = vpop.f32.mrb[65].mxu0  ;;  %v3426_v46 = vpop.f32.mrb[65].mxu1 }
 0x184   : > { %v945_v16 = vadd.f32 %v4672_v10, %v944_v31  ;;  %v3427_v53 = vadd.f32 %v3426_v46, %v3425_v29  ;;  %v3628_v57 = vpop.f32.mrb[66].mxu0  ;;  %v3428_v59 = vpop.f32.mrb[66].mxu1 }
 0x185   : > { %v4805_v52 = vadd.f32 %v4720_v4, %v953_v41  ;;  %v956_v34 = vadd.f32 %v3628_v57, %v4684_v19  ;;  %v947_v8 = vpop.f32.mrb[67].mxu0  ;;  %v3429_v55 = vpop.f32.mrb[67].mxu1 }
 0x186   : > { %v4809_v2 = vadd.f32 %v4707_v49, %v945_v16  ;;  %v4812_v3 = vadd.f32 %v3427_v53, %v4770_v9  ;;  %v948_v15 = vadd.f32 %v4675_v24, %v947_v8  ;;  %v3430_v12 = vadd.f32 %v3429_v55, %v3428_v59 }
 0x187   : > { %v4816_v10 = vadd.f32 %v4726_v61, %v956_v34 }
 0x188   : > { %v4819_v28 = vadd.f32 %v4713_v35, %v948_v15  ;;  %v4822_v4 = vadd.f32 %v3430_v12, %v4774_v25 }
 0x18a   : > { %v3631_v19 = vpop.f32.mrb[68].mxu0  ;;  %v3431_v18 = vpop.f32.mrb[68].mxu1 }
 0x18b   : > { %v969_v49 = vadd.f32 %v3631_v19, %v4697_v39  ;;  %v960_v33 = vpop.f32.mrb[69].mxu0  ;;  %v3432_v29 = vpop.f32.mrb[69].mxu1 }
 0x18c   : > { %v961_v9 = vadd.f32 %v4689_v22, %v960_v33  ;;  %v3433_v41 = vadd.f32 %v3432_v29, %v3431_v18  ;;  %v3632_v24 = vpop.f32.mrb[70].mxu0  ;;  %v3434_v31 = vpop.f32.mrb[70].mxu1 }
 0x18d   : > { %v4827_v61 = vadd.f32 %v4744_v42, %v969_v49  ;;  %v972_v35 = vadd.f32 %v3632_v24, %v4700_v43  ;;  %v963_v46 = vpop.f32.mrb[71].mxu0  ;;  %v3435_v16 = vpop.f32.mrb[71].mxu1 }
 0x18e   : > { %v4831_v25 = vadd.f32 %v4732_v32, %v961_v9  ;;  %v4834_v53 = vadd.f32 %v3433_v41, %v4778_v51  ;;  %v964_v39 = vadd.f32 %v4692_v27, %v963_v46  ;;  %v3436_v57 = vadd.f32 %v3435_v16, %v3434_v31 }
 0x18f   : > { %v4838_v22 = vadd.f32 %v4750_v50, %v972_v35 }
 0x190   : > { %v4841_v59 = vadd.f32 %v4738_v21, %v964_v39  ;;  %v4844_v42 = vadd.f32 %v3436_v57, %v4782_v58 }
 0x192   : > { %v3635_v43 = vpop.f32.mrb[72].mxu0  ;;  %v3437_v34 = vpop.f32.mrb[72].mxu1 }
 0x193   : > { %v985_v32 = vadd.f32 %v3635_v43, %v4718_v0  ;;  %v976_v8 = vpop.f32.mrb[73].mxu0  ;;  %v3438_v55 = vpop.f32.mrb[73].mxu1 }
 0x194   : > { %v977_v51 = vadd.f32 %v4705_v47, %v976_v8  ;;  %v3439_v15 = vadd.f32 %v3438_v55, %v3437_v34  ;;  %v3636_v27 = vpop.f32.mrb[74].mxu0  ;;  %v3440_v12 = vpop.f32.mrb[74].mxu1 }
 0x195   : > { %v4849_v50 = vadd.f32 %v4758_v11, %v985_v32  ;;  %v988_v21 = vadd.f32 %v3636_v27, %v4724_v60  ;;  %v979_v19 = vpop.f32.mrb[75].mxu0  ;;  %v3441_v18 = vpop.f32.mrb[75].mxu1 }
 0x196   : > { %v4853_v58 = vadd.f32 %v4754_v62, %v977_v51  ;;  %v4856_v49 = vadd.f32 %v3439_v15, %v4786_v14  ;;  %v980_v0 = vadd.f32 %v4711_v54, %v979_v19  ;;  %v3442_v33 = vadd.f32 %v3441_v18, %v3440_v12 }
 0x197   : > { %v4860_v47 = vadd.f32 %v4760_v17, %v988_v21 }
 0x198   : > { %v1349_v29 = vadd.f32 %v4756_v7, %v980_v0  ;;  %v4864_v11 = vadd.f32 %v3442_v33, %v4790_v6 }
 0x19a   : > { %v3639_v60 = vpop.f32.mrb[76].mxu0  ;;  %v3443_v9 = vpop.f32.mrb[76].mxu1 }
 0x19b   : > { %v1001_v41 = vadd.f32 %v3639_v60, %v4742_v40  ;;  %v992_v62 = vpop.f32.mrb[77].mxu0  ;;  %v3444_v24 = vpop.f32.mrb[77].mxu1 }
 0x19c   : > { %v993_v14 = vadd.f32 %v4730_v13, %v992_v62  ;;  %v3445_v31 = vadd.f32 %v3444_v24, %v3443_v9  ;;  %v3640_v35 = vpop.f32.mrb[78].mxu0  ;;  %v3446_v54 = vpop.f32.mrb[78].mxu1 }
 0x19d   : > { %v4869_v46 = vadd.f32 %v4766_v56, %v1001_v41  ;;  %v1004_v17 = vadd.f32 %v3640_v35, %v4748_v48  ;;  %v995_v7 = vpop.f32.mrb[79].mxu0  ;;  %v3447_v16 = vpop.f32.mrb[79].mxu1 }
 0x19e   : > { %v1362_v6 = vadd.f32 %v4762_v30, %v993_v14  ;;  %v4874_v39 = vadd.f32 %v3445_v31, %v4794_v63  ;;  %v996_v40 = vadd.f32 %v4736_v20, %v995_v7  ;;  %v3448_v57 = vadd.f32 %v3447_v16, %v3446_v54 }
 0x19f   : > { %v4878_v13 = vadd.f32 %v4768_v5, %v1004_v17 }
 0x1a0   : > { %v1365_v43 = vadd.f32 %v4764_v44, %v996_v40  ;;  %v4882_v56 = vadd.f32 %v3448_v57, %v4798_v26 }
 0x1a2   : > { %v3489_v34 = vpop.f32.mrb[80].mxu0 }
 0x1a3   : > { %v3490_v48 = vpop.f32.mrb[81].mxu0 }
 0x1a4   : > { %v3491_v32 = vadd.f32 %v3490_v48, %v3489_v34  ;;  %v3492_v8 = vpop.f32.mrb[82].mxu0 }
 0x1a5   : > { %v3493_v55 = vpop.f32.mrb[83].mxu0 }
 0x1a6   : > { %v3494_v30 = vadd.f32 %v3493_v55, %v3492_v8  ;;  %v4885_v63 = vadd.f32 %v3491_v32, %v4809_v2 }
 0x1a8   : > { %v4888_v20 = vadd.f32 %v3494_v30, %v4819_v28 }
 0x1aa   : > { %v3495_v51 = vpop.f32.mrb[84].mxu0 }
 0x1ab   : > { %v3496_v5 = vpop.f32.mrb[85].mxu0 }
 0x1ac   : > { %v3497_v15 = vadd.f32 %v3496_v5, %v3495_v51  ;;  %v3498_v27 = vpop.f32.mrb[86].mxu0 }
 0x1ad   : > { %v3499_v44 = vpop.f32.mrb[87].mxu0 }
 0x1ae   : > { %v3500_v12 = vadd.f32 %v3499_v44, %v3498_v27  ;;  %v3771_v26 = vadd.f32 %v3497_v15, %v4805_v52 }
 0x1b0   : > { %v3779_v21 = vadd.f32 %v3500_v12, %v4816_v10 }
 0x1b2   : > { %v3501_v19 = vpop.f32.mrb[88].mxu0 }
 0x1b3   : > { %v3502_v18 = vpop.f32.mrb[89].mxu0 }
 0x1b4   : > { %v3503_v0 = vadd.f32 %v3502_v18, %v3501_v19  ;;  %v3504_v33 = vpop.f32.mrb[90].mxu0 }
 0x1b5   : > { %v3505_v60 = vpop.f32.mrb[91].mxu0 }
 0x1b6   : > { %v3506_v2 = vadd.f32 %v3505_v60, %v3504_v33  ;;  %v4893_v9 = vadd.f32 %v3503_v0, %v4831_v25 }
 0x1b8   : > { %v4896_v28 = vadd.f32 %v3506_v2, %v4841_v59 }
 0x1ba   : > { %v3507_v41 = vpop.f32.mrb[92].mxu0 }
 0x1bb   : > { %v3508_v62 = vpop.f32.mrb[93].mxu0 }
 0x1bc   : > { %v3509_v24 = vadd.f32 %v3508_v62, %v3507_v41  ;;  %v3510_v14 = vpop.f32.mrb[94].mxu0 }
 0x1bd   : > { %v3511_v31 = vpop.f32.mrb[95].mxu0 }
 0x1be   : > { %v3512_v52 = vadd.f32 %v3511_v31, %v3510_v14  ;;  %v4899_v10 = vadd.f32 %v3509_v24, %v4827_v61 }
 0x1c0   : > { %v4902_v35 = vadd.f32 %v3512_v52, %v4838_v22 }
 0x1c2   : > { %v3513_v54 = vpop.f32.mrb[96].mxu0 }
 0x1c3   : > { %v3514_v17 = vpop.f32.mrb[97].mxu0 }
 0x1c4   : > { %v3515_v7 = vadd.f32 %v3514_v17, %v3513_v54  ;;  %v3516_v25 = vpop.f32.mrb[98].mxu0 }
 0x1c5   : > { %v3517_v16 = vpop.f32.mrb[99].mxu0 }
 0x1c6   : > { %v3518_v40 = vadd.f32 %v3517_v16, %v3516_v25  ;;  %v4905_v59 = vadd.f32 %v3515_v7, %v4853_v58 }
 0x1c8   : > { %v4907_v57 = vadd.f32 %v3518_v40, %v1349_v29 }
 0x1ca   : > { %v3519_v34 = vpop.f32.mrb[100].mxu0 }
 0x1cb   : > { %v3520_v48 = vpop.f32.mrb[101].mxu0 }
 0x1cc   : > { %v3521_v32 = vadd.f32 %v3520_v48, %v3519_v34  ;;  %v3522_v8 = vpop.f32.mrb[102].mxu0 }
 0x1cd   : > { %v3523_v61 = vpop.f32.mrb[103].mxu0 }
 0x1ce   : > { %v3524_v55 = vadd.f32 %v3523_v61, %v3522_v8  ;;  %v4910_v22 = vadd.f32 %v3521_v32, %v4849_v50 }
 0x1d0   : > { %v4913_v30 = vadd.f32 %v3524_v55, %v4860_v47 }
 0x1d2   : > { %v3525_v51 = vpop.f32.mrb[104].mxu0 }
 0x1d3   : > { %v3526_v5 = vpop.f32.mrb[105].mxu0 }
 0x1d4   : > { %v3527_v15 = vadd.f32 %v3526_v5, %v3525_v51  ;;  %v3528_v27 = vpop.f32.mrb[106].mxu0 }
 0x1d5   : > { %v3529_v58 = vpop.f32.mrb[107].mxu0 }
 0x1d6   : > { %v3530_v44 = vadd.f32 %v3529_v58, %v3528_v27  ;;  %v4915_v29 = vadd.f32 %v3527_v15, %v1362_v6  ;;  %v4928_v6 = vld [vmem:[%s5037_s2] ss:$0 sm:$0xff] }
 0x1d8   : > { %v4917_v12 = vadd.f32 %v3530_v44, %v1365_v43 }
 0x1da   : > { %v3531_v19 = vpop.f32.mrb[108].mxu0 }
 0x1db   : > { %v3532_v18 = vpop.f32.mrb[109].mxu0 }
 0x1dc   : > { %v3533_v0 = vadd.f32 %v3532_v18, %v3531_v19  ;;  %v3534_v33 = vpop.f32.mrb[110].mxu0 }
 0x1dd   : > { %v3535_v60 = vpop.f32.mrb[111].mxu0 }
 0x1de   : > { %v3536_v50 = vadd.f32 %v3535_v60, %v3534_v33  ;;  %v4920_v2 = vadd.f32 %v3533_v0, %v4869_v46 }
 0x1e0   : > { %v4923_v47 = vadd.f32 %v3536_v50, %v4878_v13 }
 0x1e2   : > { %v3537_v41 = vpop.f32.mrb[112].mxu0  ;;  %v3723_v62 = vpop.f32.mrb[80].mxu1 }
 0x1e3   : > { %v3772_v43 = vadd.f32 %v3771_v26, %v3723_v62  ;;  %v3538_v24 = vpop.f32.mrb[113].mxu0  ;;  %v2309_v14 = vpop.f32.mrb[81].mxu1 }
 0x1e4   : > { %v3539_v31 = vadd.f32 %v3538_v24, %v3537_v41  ;;  %v3776_v52 = vadd.f32 %v4885_v63, %v2309_v14  ;;  %v3540_v54 = vpop.f32.mrb[114].mxu0  ;;  %v3724_v46 = vpop.f32.mrb[82].mxu1  ;;  %v5041_v14 = vld [vmem:[#allocation2_spill] sm:$0xff] }
 0x1e5   : > { %v2477_v17 = vadd.f32 %v3772_v43, %v4928_v6  ;;  %v3780_v13 = vadd.f32 %v3779_v21, %v3724_v46  ;;  %v3541_v7 = vpop.f32.mrb[115].mxu0  ;;  %v2312_v25 = vpop.f32.mrb[83].mxu1 }
 0x1e6   : > { %v2475_v16 = vadd.f32 %v3776_v52, %v4928_v6  ;;  %v3542_v40 = vadd.f32 %v3541_v7, %v3540_v54  ;;  %v3784_v34 = vadd.f32 %v4888_v20, %v2312_v25  ;;  %v4935_v48 = vadd.f32 %v4772_v23, %v3539_v31 }
 0x1e7   : > { %v2478_v26 = vadd.f32 %v3780_v13, %v4928_v6  ;;  %v2509_v8 = vmax.f32 %v2477_v17, 0.0 }
 0x1e8   : > { %v2476_v63 = vadd.f32 %v3784_v34, %v4928_v6  ;;  %v4941_v32 = vadd.f32 %v4776_v38, %v3542_v40  ;;  %v2507_v61 = vmax.f32 %v2475_v16, 0.0 }
 0x1e9   : > { %v2510_v21 = vmax.f32 %v2478_v26, 0.0 }
 0x1ea   : > { %v2508_v20 = vmax.f32 %v2476_v63, 0.0  ;;  %v3543_v23 = vpop.f32.mrb[116].mxu0  ;;  %v3727_v55 = vpop.f32.mrb[84].mxu1 }
 0x1eb   : > { %v3114_v51 = vpack.c.bf16 %v2510_v21, %v2509_v8  ;;  %v3788_v5 = vadd.f32 %v4899_v10, %v3727_v55  ;;  %v3544_v15 = vpop.f32.mrb[117].mxu0  ;;  %v2325_v27 = vpop.f32.mrb[85].mxu1 }
 0x1ec   : > { %v3109_v38 = vpack.c.bf16 %v2508_v20, %v2507_v61  ;;  %v3545_v58 = vadd.f32 %v3544_v15, %v3543_v23  ;;  %v3792_v44 = vadd.f32 %v4893_v9, %v2325_v27  ;;  %v3546_v19 = vpop.f32.mrb[118].mxu0  ;;  %v3728_v18 = vpop.f32.mrb[86].mxu1  ;;  %v5042_v15 = vld [vmem:[#allocation3_spill] sm:$0xff] }
 0x1ed   : > { %3186 = vst [vmem:[%s4946_s20 + $0x8] sm:$0xff] %v3114_v51   ;;  %v2481_v0 = vadd.f32 %v3788_v5, %v4928_v6  ;;  %v3796_v33 = vadd.f32 %v4902_v35, %v3728_v18  ;;  %v3547_v60 = vpop.f32.mrb[119].mxu0  ;;  %v2328_v50 = vpop.f32.mrb[87].mxu1 }
 0x1ee   : > { %3110 = vst [vmem:[%s4946_s20] sm:$0xff] %v3109_v38   ;;  %v2479_v41 = vadd.f32 %v3792_v44, %v4928_v6  ;;  %v3548_v62 = vadd.f32 %v3547_v60, %v3546_v19  ;;  %v3800_v10 = vadd.f32 %v4896_v28, %v2328_v50  ;;  %v4957_v43 = vadd.f32 %v4780_v37, %v3545_v58 }
 0x1ef   : > { %v2482_v9 = vadd.f32 %v3796_v33, %v4928_v6  ;;  %v2513_v35 = vmax.f32 %v2481_v0, 0.0 }
 0x1f0   : > { %v2480_v24 = vadd.f32 %v3800_v10, %v4928_v6  ;;  %v4962_v31 = vadd.f32 %v5041_v14, %v3548_v62  ;;  %v2511_v54 = vmax.f32 %v2479_v41, 0.0 }
 0x1f1   : > { %v2514_v52 = vmax.f32 %v2482_v9, 0.0 }
 0x1f2   : > { %v2512_v46 = vmax.f32 %v2480_v24, 0.0  ;;  %v3549_v17 = vpop.f32.mrb[120].mxu0  ;;  %v3731_v13 = vpop.f32.mrb[88].mxu1 }
 0x1f3   : > { %v3124_v7 = vpack.c.bf16 %v2514_v52, %v2513_v35  ;;  %v3804_v28 = vadd.f32 %v4910_v22, %v3731_v13  ;;  %v3550_v37 = vpop.f32.mrb[121].mxu0  ;;  %v2341_v25 = vpop.f32.mrb[89].mxu1 }
 0x1f4   : > { %v3119_v16 = vpack.c.bf16 %v2512_v46, %v2511_v54  ;;  %v3551_v40 = vadd.f32 %v3550_v37, %v3549_v17  ;;  %v3808_v34 = vadd.f32 %v4905_v59, %v2341_v25  ;;  %v3552_v26 = vpop.f32.mrb[122].mxu0  ;;  %v3732_v63 = vpop.f32.mrb[90].mxu1 }
 0x1f5   : > { %3188 = vst [vmem:[%s4946_s20 + $0x18] sm:$0xff] %v3124_v7   ;;  %v2485_v8 = vadd.f32 %v3804_v28, %v4928_v6  ;;  %v3812_v21 = vadd.f32 %v4913_v30, %v3732_v63  ;;  %v3553_v61 = vpop.f32.mrb[123].mxu0  ;;  %v2344_v20 = vpop.f32.mrb[91].mxu1 }
 0x1f6   : > { %3187 = vst [vmem:[%s4946_s20 + $0x10] sm:$0xff] %v3119_v16   ;;  %v2483_v23 = vadd.f32 %v3808_v34, %v4928_v6  ;;  %v3554_v55 = vadd.f32 %v3553_v61, %v3552_v26  ;;  %v3816_v22 = vadd.f32 %v4907_v57, %v2344_v20  ;;  %v4973_v51 = vadd.f32 %v4788_v45, %v3551_v40 }
 0x1f7   : > { %v2486_v59 = vadd.f32 %v3812_v21, %v4928_v6  ;;  %v2517_v30 = vmax.f32 %v2485_v8, 0.0 }
 0x1f8   : > { %v2484_v5 = vadd.f32 %v3816_v22, %v4928_v6  ;;  %v4978_v27 = vadd.f32 %v5042_v15, %v3554_v55  ;;  %v2515_v58 = vmax.f32 %v2483_v23, 0.0 }
 0x1f9   : > { %v2518_v38 = vmax.f32 %v2486_v59, 0.0 }
 0x1fa   : > { %v2516_v44 = vmax.f32 %v2484_v5, 0.0  ;;  %v3555_v19 = vpop.f32.mrb[124].mxu0  ;;  %v3735_v18 = vpop.f32.mrb[92].mxu1 }
 0x1fb   : > { %v3134_v0 = vpack.c.bf16 %v2518_v38, %v2517_v30  ;;  %v3820_v57 = vadd.f32 %v4920_v2, %v3735_v18  ;;  %v3556_v45 = vpop.f32.mrb[125].mxu0  ;;  %v2357_v33 = vpop.f32.mrb[93].mxu1 }
 0x1fc   : > { %v3129_v60 = vpack.c.bf16 %v2516_v44, %v2515_v58  ;;  %v3557_v50 = vadd.f32 %v3556_v45, %v3555_v19  ;;  %v3824_v41 = vadd.f32 %v4915_v29, %v2357_v33  ;;  %v3558_v62 = vpop.f32.mrb[126].mxu0  ;;  %v3736_v10 = vpop.f32.mrb[94].mxu1 }
 0x1fd   : > { %3190 = vst [vmem:[%s4946_s20 + $0x28] sm:$0xff] %v3134_v0   ;;  %v2489_v9 = vadd.f32 %v3820_v57, %v4928_v6  ;;  %v3828_v24 = vadd.f32 %v4923_v47, %v3736_v10  ;;  %v3559_v14 = vpop.f32.mrb[127].mxu0  ;;  %v2360_v35 = vpop.f32.mrb[95].mxu1 }
 0x1fe   : > { %3189 = vst [vmem:[%s4946_s20 + $0x20] sm:$0xff] %v3129_v60   ;;  %v2487_v52 = vadd.f32 %v3824_v41, %v4928_v6  ;;  %v3560_v54 = vadd.f32 %v3559_v14, %v3558_v62  ;;  %v3832_v2 = vadd.f32 %v4917_v12, %v2360_v35  ;;  %v3846_v46 = vadd.f32 %v4796_v1, %v3557_v50 }
 0x1ff   : > { %v2490_v17 = vadd.f32 %v3828_v24, %v4928_v6  ;;  %v2521_v7 = vmax.f32 %v2489_v9, 0.0 }
 0x200   : > { %v2488_v29 = vadd.f32 %v3832_v2, %v4928_v6  ;;  %v3852_v13 = vadd.f32 %v4800_v36, %v3560_v54  ;;  %v2519_v47 = vmax.f32 %v2487_v52, 0.0 }
 0x201   : > { %v2522_v28 = vmax.f32 %v2490_v17, 0.0 }
 0x202   : > { %v2520_v37 = vmax.f32 %v2488_v29, 0.0  ;;  %v3561_v25 = vpop.f32.mrb[128].mxu0  ;;  %v3739_v16 = vpop.f32.mrb[0].mxu1 }
 0x203   : > { %v3144_v40 = vpack.c.bf16 %v2522_v28, %v2521_v7  ;;  %v3835_v34 = vadd.f32 %v4957_v43, %v3739_v16  ;;  %v3562_v12 = vpop.f32.mrb[129].mxu0  ;;  %v2373_v26 = vpop.f32.mrb[1].mxu1 }
 0x204   : > { %v3139_v1 = vpack.c.bf16 %v2520_v37, %v2519_v47  ;;  %v3563_v63 = vadd.f32 %v3562_v12, %v3561_v25  ;;  %v3838_v8 = vadd.f32 %v4935_v48, %v2373_v26  ;;  %v3564_v21 = vpop.f32.mrb[130].mxu0  ;;  %v3740_v61 = vpop.f32.mrb[2].mxu1 }
 0x205   : > { %3192 = vst [vmem:[%s4946_s20 + $0x38] sm:$0xff] %v3144_v40   ;;  %v2493_v36 = vadd.f32 %v3835_v34, %v4928_v6  ;;  %v3841_v20 = vadd.f32 %v4962_v31, %v3740_v61  ;;  %v3565_v23 = vpop.f32.mrb[131].mxu0  ;;  %v2376_v55 = vpop.f32.mrb[3].mxu1 }
 0x206   : > { %3191 = vst [vmem:[%s4946_s20 + $0x30] sm:$0xff] %v3139_v1   ;;  %v2491_v22 = vadd.f32 %v3838_v8, %v4928_v6  ;;  %v3566_v59 = vadd.f32 %v3565_v23, %v3564_v21  ;;  %v3844_v43 = vadd.f32 %v4941_v32, %v2376_v55  ;;  %v3861_v5 = vadd.f32 %v4812_v3, %v3563_v63 }
 0x207   : > { %v2494_v15 = vadd.f32 %v3841_v20, %v4928_v6  ;;  %v2525_v38 = vmax.f32 %v2493_v36, 0.0 }
 0x208   : > { %v2492_v48 = vadd.f32 %v3844_v43, %v4928_v6  ;;  %v3867_v30 = vadd.f32 %v4822_v4, %v3566_v59  ;;  %v2523_v31 = vmax.f32 %v2491_v22, 0.0 }
 0x209   : > { %v2526_v58 = vmax.f32 %v2494_v15, 0.0 }
 0x20a   : > { %v2524_v44 = vmax.f32 %v2492_v48, 0.0  ;;  %v3567_v19 = vpop.f32.mrb[132].mxu0  ;;  %v3743_v18 = vpop.f32.mrb[4].mxu1 }
 0x20b   : > { %v3154_v0 = vpack.c.bf16 %v2526_v58, %v2525_v38  ;;  %v3847_v57 = vadd.f32 %v3846_v46, %v3743_v18  ;;  %v3568_v45 = vpop.f32.mrb[133].mxu0  ;;  %v2389_v32 = vpop.f32.mrb[5].mxu1 }
 0x20c   : > { %v3149_v33 = vpack.c.bf16 %v2524_v44, %v2523_v31  ;;  %v3569_v3 = vadd.f32 %v3568_v45, %v3567_v19  ;;  %v3850_v60 = vadd.f32 %v4973_v51, %v2389_v32  ;;  %v3570_v50 = vpop.f32.mrb[134].mxu0  ;;  %v3744_v41 = vpop.f32.mrb[6].mxu1 }
 0x20d   : > { %3194 = vst [vmem:[%s4946_s20 + $0x48] sm:$0xff] %v3154_v0   ;;  %v2497_v4 = vadd.f32 %v3847_v57, %v4928_v6  ;;  %v3853_v62 = vadd.f32 %v3852_v13, %v3744_v41  ;;  %v3571_v10 = vpop.f32.mrb[135].mxu0  ;;  %v2392_v9 = vpop.f32.mrb[7].mxu1 }
 0x20e   : > { %3193 = vst [vmem:[%s4946_s20 + $0x40] sm:$0xff] %v3149_v33   ;;  %v2495_v24 = vadd.f32 %v3850_v60, %v4928_v6  ;;  %v3572_v14 = vadd.f32 %v3571_v10, %v3570_v50  ;;  %v3856_v35 = vadd.f32 %v4978_v27, %v2392_v9  ;;  %v3858_v52 = vadd.f32 %v4834_v53, %v3569_v3 }
 0x20f   : > { %v2498_v54 = vadd.f32 %v3853_v62, %v4928_v6  ;;  %v2529_v46 = vmax.f32 %v2497_v4, 0.0 }
 0x210   : > { %v2496_v51 = vadd.f32 %v3856_v35, %v4928_v6  ;;  %v3864_v2 = vadd.f32 %v4844_v42, %v3572_v14  ;;  %v2527_v29 = vmax.f32 %v2495_v24, 0.0 }
 0x211   : > { %v2530_v17 = vmax.f32 %v2498_v54, 0.0 }
 0x212   : > { %v2528_v13 = vmax.f32 %v2496_v51, 0.0  ;;  %v3573_v7 = vpop.f32.mrb[136].mxu0  ;;  %v3747_v28 = vpop.f32.mrb[8].mxu1 }
 0x213   : > { %v3164_v47 = vpack.c.bf16 %v2530_v17, %v2529_v46  ;;  %v3859_v37 = vadd.f32 %v3858_v52, %v3747_v28  ;;  %v3574_v25 = vpop.f32.mrb[137].mxu0  ;;  %v2405_v27 = vpop.f32.mrb[9].mxu1 }
 0x214   : > { %v3159_v16 = vpack.c.bf16 %v2528_v13, %v2527_v29  ;;  %v3575_v53 = vadd.f32 %v3574_v25, %v3573_v7  ;;  %v3862_v40 = vadd.f32 %v3861_v5, %v2405_v27  ;;  %v3576_v34 = vpop.f32.mrb[138].mxu0  ;;  %v3748_v12 = vpop.f32.mrb[10].mxu1 }
 0x215   : > { %3196 = vst [vmem:[%s4946_s20 + $0x58] sm:$0xff] %v3164_v47   ;;  %v2501_v42 = vadd.f32 %v3859_v37, %v4928_v6  ;;  %v3865_v26 = vadd.f32 %v3864_v2, %v3748_v12  ;;  %v3577_v1 = vpop.f32.mrb[139].mxu0  ;;  %v2408_v63 = vpop.f32.mrb[11].mxu1 }
 0x216   : > { %3195 = vst [vmem:[%s4946_s20 + $0x50] sm:$0xff] %v3159_v16   ;;  %v2499_v8 = vadd.f32 %v3862_v40, %v4928_v6  ;;  %v3578_v21 = vadd.f32 %v3577_v1, %v3576_v34  ;;  %v3868_v61 = vadd.f32 %v3867_v30, %v2408_v63  ;;  %v3873_v36 = vadd.f32 %v4856_v49, %v3575_v53 }
 0x217   : > { %v2502_v20 = vadd.f32 %v3865_v26, %v4928_v6  ;;  %v2533_v22 = vmax.f32 %v2501_v42, 0.0 }
 0x218   : > { %v2500_v23 = vadd.f32 %v3868_v61, %v4928_v6  ;;  %v3879_v55 = vadd.f32 %v4864_v11, %v3578_v21  ;;  %v2531_v43 = vmax.f32 %v2499_v8, 0.0 }
 0x219   : > { %v2534_v59 = vmax.f32 %v2502_v20, 0.0 }
 0x21a   : > { %v2532_v5 = vmax.f32 %v2500_v23, 0.0  ;;  %v3579_v15 = vpop.f32.mrb[140].mxu0  ;;  %v3751_v48 = vpop.f32.mrb[12].mxu1 }
 0x21b   : > { %v3174_v38 = vpack.c.bf16 %v2534_v59, %v2533_v22  ;;  %v3580_v58 = vpop.f32.mrb[141].mxu0  ;;  %v2421_v31 = vpop.f32.mrb[13].mxu1 }
 0x21c   : > { %v3169_v30 = vpack.c.bf16 %v2532_v5, %v2531_v43  ;;  %v3581_v44 = vadd.f32 %v3580_v58, %v3579_v15  ;;  %v3874_v49 = vadd.f32 %v3873_v36, %v2421_v31  ;;  %v3582_v19 = vpop.f32.mrb[142].mxu0  ;;  %v3752_v18 = vpop.f32.mrb[14].mxu1 }
 0x21d   : > { %3198 = vst [vmem:[%s4946_s20 + $0x68] sm:$0xff] %v3174_v38   ;;  %v3583_v0 = vpop.f32.mrb[143].mxu0  ;;  %v2424_v57 = vpop.f32.mrb[15].mxu1 }
 0x21e   : > { %3197 = vst [vmem:[%s4946_s20 + $0x60] sm:$0xff] %v3169_v30   ;;  %v3870_v11 = vadd.f32 %v4874_v39, %v3581_v44  ;;  %v2503_v45 = vadd.f32 %v3874_v49, %v4928_v6  ;;  %v3584_v32 = vadd.f32 %v3583_v0, %v3582_v19  ;;  %v3880_v33 = vadd.f32 %v3879_v55, %v2424_v57 }
 0x220   : > { %v3871_v3 = vadd.f32 %v3870_v11, %v3751_v48  ;;  %v3876_v60 = vadd.f32 %v4882_v56, %v3584_v32  ;;  %v2504_v50 = vadd.f32 %v3880_v33, %v4928_v6  ;;  %v2535_v4 = vmax.f32 %v2503_v45, 0.0 }
 0x222   : > { %v2505_v41 = vadd.f32 %v3871_v3, %v4928_v6  ;;  %v3877_v62 = vadd.f32 %v3876_v60, %v3752_v18  ;;  %v2536_v10 = vmax.f32 %v2504_v50, 0.0 }
 0x224   : > { %v2506_v9 = vadd.f32 %v3877_v62, %v4928_v6  ;;  %v3179_v24 = vpack.c.bf16 %v2536_v10, %v2535_v4  ;;  %v2537_v14 = vmax.f32 %v2505_v41, 0.0 }
 0x226   : > { %v2538_v39 = vmax.f32 %v2506_v9, 0.0  ;;  %3199 = vst [vmem:[%s4946_s20 + $0x70] sm:$0xff] %v3179_v24  }
 0x228   : > { %v3184_v35 = vpack.c.bf16 %v2538_v39, %v2537_v14 }
 0x22a   : > { %3200 = vst [vmem:[%s4946_s20 + $0x78] sm:$0xff] %v3184_v35  }
 0x22b PF: > { %s13_s12 = sadd.s32 1, %s4124_s12  }
 0x22c   : > { %p10_p4 = scmp.ge.s32.totalorder %s13_s12, 4  }
 0x22e   :  { %12 = sbr.rel (!%p10_p4) target bundleno = 1 (0x1), region = 64 }

// kernel: _lambda_.15
= control target key start
LH: loop header
LB: loop body
LE: loop exit
PB: predicated region body
PF: predicated region fallthrough
CT: control target
= control target key end

     0   :  { %s4388_s15 = smov 0   ;;  %s5308_s0 = inlined_call_operand.vmem [shape: bf16[2,384,384], index: 0, kind: input, shape index: {}]   ;;  %s5309_s1 = inlined_call_operand.vmem [shape: bf16[3,384,128], index: 1, kind: input, shape index: {}]   ;;  %s5310_s2 = inlined_call_operand.vmem [shape: f32[1,128], index: 2, kind: input, shape index: {}]   ;;  %s5311_s3 = inlined_call_operand.vmem [shape: bf16[2,256,128], index: 3, kind: input, shape index: {}]   ;;  %s5312_s4 = inlined_call_operand.vmem [shape: bf16[2,256,128], index: 4, kind: output, shape index: {}]  }
   0x1 LB: > { %s2909_s16 = sadd.s32 4294967295, %s4361_s15   ;;  %p2913_p0 = scmp.ge.s32.totalorder %s4361_s15, 1  ;;  %s4361_s15 = sphi %s4388_s15, %s14_s15  }
   0x2   : > { %p172_p1 = scmp.lt.s32.totalorder %s4361_s15, 3 }
   0x4   : > { %p173_p2 = pnand %p2913_p0, %p172_p1 }
   0x6   : > { %176 = sbr.rel (%p173_p2) target bundleno = 557 (0x22d), region = 36 }
   0xd   : > { %v4175_v0 = vld [vmem:[%s5309_s1 + $0x100] sm:$0xff]   ;;  %v4178_v3 = vld [vmem:[%s5309_s1 + $0x108] sm:$0xff]   ;;  %v4181_v6 = vld [vmem:[%s5309_s1 + $0x110] sm:$0xff]   ;;  %p203_p3 = scmp.lt.s32.totalorder %s2909_s16, 1 }
   0xe   : > { %v4402_v1 = vld [vmem:[%s5309_s1 + $0x140] sm:$0xff]   ;;  %3438 = vmatprep.subr.bf16.mxu0 %v4175_v0  ;;  %v4415_v4 = vld [vmem:[%s5309_s1 + $0x148] sm:$0xff]   ;;  %v4427_v7 = vld [vmem:[%s5309_s1 + $0x150] sm:$0xff]  }
   0xf   : > { %v4177_v2 = vld [vmem:[%s5309_s1 + $0xc0] sm:$0xff]   ;;  %3990 = vmatprep.subr.bf16.mxu1 %v4402_v1  ;;  %v4180_v5 = vld [vmem:[%s5309_s1 + $0xc8] sm:$0xff]   ;;  %v4183_v8 = vld [vmem:[%s5309_s1 + $0xd0] sm:$0xff]   ;;  %s5318_s16 = smov (!%p203_p3, %s2909_s16), 1 }
  0x10   : > { %3439 = vmatpush3.bf16.msra.mxu0 %v4177_v2  ;;  %3998 = vmatpush3.bf16.msra.mxu1 %v4402_v1  ;;  %v4184_v9 = vld [vmem:[%s5309_s1 + $0x118] sm:$0xff]   ;;  %v4187_v12 = vld [vmem:[%s5309_s1 + $0x120] sm:$0xff]   ;;  %v4190_v15 = vld [vmem:[%s5309_s1 + $0x128] sm:$0xff]   ;;  %s4166_s27 = smul.u32 576, %s5318_s16 }
  0x11   : > { %3440 = vmatprep.subr.bf16.mxu0 %v4178_v3  ;;  %3991 = vmatprep.subr.bf16.mxu1 %v4415_v4  ;;  %v4440_v10 = vld [vmem:[%s5309_s1 + $0x158] sm:$0xff]   ;;  %v4455_v13 = vld [vmem:[%s5309_s1 + $0x160] sm:$0xff]   ;;  %v4472_v16 = vld [vmem:[%s5309_s1 + $0x168] sm:$0xff]  }
  0x12   : > { %v4186_v11 = vld [vmem:[%s5309_s1 + $0xd8] sm:$0xff]   ;;  %v4189_v14 = vld [vmem:[%s5309_s1 + $0xe0] sm:$0xff]   ;;  %v4192_v17 = vld [vmem:[%s5309_s1 + $0xe8] sm:$0xff]   ;;  %s4494_s12 = scalar_lea.vmem %s5308_s0, %s4166_s27 }
  0x13   : > { %v4193_v18 = vld [vmem:[%s5309_s1 + $0x130] sm:$0xff]   ;;  %v4196_v21 = vld [vmem:[%s5309_s1 + $0x138] sm:$0xff]   ;;  %v4204_v26 = vld [vmem:[%s5309_s1 + $0x40] sm:$0xff]  }
  0x14   : > { %3441 = vmatpush3.bf16.msra.mxu0 %v4180_v5  ;;  %3999 = vmatpush3.bf16.msra.mxu1 %v4415_v4  ;;  %v4486_v19 = vld [vmem:[%s5309_s1 + $0x170] sm:$0xff]   ;;  %v4503_v22 = vld [vmem:[%s5309_s1 + $0x178] sm:$0xff]   ;;  %v4522_v27 = vld [vmem:[%s4494_s12 + $0x60] ss:$12 sps:$4 sm:$0xff]  }
  0x15   : > { %3442 = vmatprep.subr.bf16.mxu0 %v4181_v6  ;;  %3992 = vmatprep.subr.bf16.mxu1 %v4427_v7  ;;  %v4195_v20 = vld [vmem:[%s5309_s1 + $0xf0] sm:$0xff]   ;;  %v4198_v25 = vld [vmem:[%s5309_s1 + $0xf8] sm:$0xff]   ;;  %v4526_v28 = vld [vmem:[%s4494_s12 + $0x140] ss:$12 sps:$4 sm:$0xff]  }
  0x16   : > { %v4507_v23 = vld [vmem:[%s4494_s12 + $0x64] ss:$12 sps:$4 sm:$0xff]   ;;  %v4510_v24 = vld [vmem:[%s4494_s12 + $0x128] ss:$12 sps:$4 sm:$0xff]   ;;  %v4215_v38 = vld [vmem:[%s5309_s1 + $0x58] sm:$0xff]  }
  0x17   : > { %828 = vmatprep.mubr.bf16.mxu0 %v4507_v23  ;;  %3878 = vmatprep.mubr.bf16.mxu1 %v4510_v24  ;;  %v4205_v29 = vld [vmem:[%s5309_s1] sm:$0xff]   ;;  %v4206_v30 = vld [vmem:[%s5309_s1 + $0x48] sm:$0xff]   ;;  %v4213_v35 = vld [vmem:[%s5309_s1 + $0x50] sm:$0xff]  }
  0x18   : > { %3443 = vmatpush3.bf16.msra.mxu0 %v4183_v8  ;;  %4000 = vmatpush3.bf16.msra.mxu1 %v4427_v7  ;;  %v4537_v31 = vld [vmem:[%s4494_s12 + $0x7c] ss:$12 sps:$4 sm:$0xff]   ;;  %v4540_v32 = vld [vmem:[%s4494_s12 + $0x158] ss:$12 sps:$4 sm:$0xff]   ;;  %v4214_v37 = vld [vmem:[%s5309_s1 + $0x10] sm:$0xff]  }
  0x19   : > { %3444 = vmatprep.subr.bf16.mxu0 %v4184_v9  ;;  %3993 = vmatprep.subr.bf16.mxu1 %v4440_v10  ;;  %v4207_v33 = vld [vmem:[%s5309_s1 + $0x8] sm:$0xff]   ;;  %v4550_v34 = vld [vmem:[%s4494_s12 + $0x78] ss:$12 sps:$4 sm:$0xff]   ;;  %v4557_v36 = vld [vmem:[%s4494_s12 + $0x170] ss:$12 sps:$4 sm:$0xff]  }
  0x1a   : > { %v4567_v39 = vld [vmem:[%s4494_s12 + $0x94] ss:$12 sps:$4 sm:$0xff]   ;;  %v4216_v41 = vld [vmem:[%s5309_s1 + $0x18] sm:$0xff]   ;;  %v4224_v46 = vld [vmem:[%s5309_s1 + $0x68] sm:$0xff]  }
  0x1b   : > { %v4219_v40 = vld [vmem:[%s4494_s12 + $0x188] ss:$12 sps:$4 sm:$0xff]   ;;  %v4579_v42 = vld [vmem:[%s4494_s12 + $0x90] ss:$12 sps:$4 sm:$0xff]   ;;  %v4221_v43 = vld [vmem:[%s4494_s12 + $0x1a0] ss:$12 sps:$4 sm:$0xff]  }
  0x1c   : > { %3445 = vmatpush3.bf16.msra.mxu0 %v4186_v11  ;;  %4001 = vmatpush3.bf16.msra.mxu1 %v4440_v10  ;;  %v4222_v44 = vld [vmem:[%s5309_s1 + $0x60] sm:$0xff]   ;;  %v4594_v47 = vld [vmem:[%s4494_s12 + $0xac] ss:$12 sps:$4 sm:$0xff]   ;;  %v4231_v50 = vld [vmem:[%s5309_s1 + $0x70] sm:$0xff]  }
  0x1d   : > { %3446 = vmatprep.subr.bf16.mxu0 %v4187_v12  ;;  %3994 = vmatprep.subr.bf16.mxu1 %v4455_v13  ;;  %v4223_v45 = vld [vmem:[%s5309_s1 + $0x20] sm:$0xff]   ;;  %v4225_v49 = vld [vmem:[%s5309_s1 + $0x28] sm:$0xff]   ;;  %v4230_v52 = vld [vmem:[%s4494_s12 + $0x1d0] ss:$12 sps:$4 sm:$0xff]  }
  0x1e   : > { %v4228_v48 = vld [vmem:[%s4494_s12 + $0x1b8] ss:$12 sps:$4 sm:$0xff]   ;;  %v4607_v51 = vld [vmem:[%s4494_s12 + $0xa8] ss:$12 sps:$4 sm:$0xff]   ;;  %v4237_v59 = vld [vmem:[%s4494_s12] ss:$12 sps:$4 sm:$0xff]  }
  0x1f   : > { %v4232_v53 = vld [vmem:[%s5309_s1 + $0x30] sm:$0xff]   ;;  %v4233_v54 = vld [vmem:[%s5309_s1 + $0x78] sm:$0xff]   ;;  %v4241_v58 = vld [vmem:[%s5309_s1 + $0x80] sm:$0xff]  }
  0x20   : > { %3447 = vmatpush3.bf16.msra.mxu0 %v4189_v14  ;;  %4002 = vmatpush3.bf16.msra.mxu1 %v4455_v13  ;;  %v4619_v55 = vld [vmem:[%s4494_s12 + $0xc4] ss:$12 sps:$4 sm:$0xff]   ;;  %v4234_v57 = vld [vmem:[%s5309_s1 + $0x38] sm:$0xff]   ;;  %v4634_v60 = vld [vmem:[%s4494_s12 + $0xc0] ss:$12 sps:$4 sm:$0xff]  }
  0x21   : > { %3448 = vmatprep.subr.bf16.mxu0 %v4190_v15  ;;  %3995 = vmatprep.subr.bf16.mxu1 %v4472_v16  ;;  %v4239_v56 = vld [vmem:[%s4494_s12 + $0x4] ss:$12 sps:$4 sm:$0xff]   ;;  %v4638_v61 = vld [vmem:[%s4494_s12 + $0xdc] ss:$12 sps:$4 sm:$0xff]   ;;  %v4656_v3 = vld [vmem:[%s4494_s12 + $0xf4] ss:$12 sps:$4 sm:$0xff]  }
  0x22   : > { %v4244_v62 = vld [vmem:[%s4494_s12 + $0x1c] ss:$12 sps:$4 sm:$0xff]   ;;  %v4264_v0 = vld [vmem:[%s5309_s1 + $0x90] sm:$0xff]   ;;  %v4247_v2 = vld [vmem:[%s4494_s12 + $0x18] ss:$12 sps:$4 sm:$0xff]  }
  0x23   : > { %v4254_v63 = vld [vmem:[%s5309_s1 + $0x88] sm:$0xff]   ;;  %v4271_v5 = vld [vmem:[%s5309_s1 + $0x98] sm:$0xff]   ;;  %v4291_v12 = vld [vmem:[%s5309_s1 + $0x1c0] sm:$0xff]  }
  0x24   : > { %3449 = vmatpush3.bf16.msra.mxu0 %v4192_v17  ;;  %4003 = vmatpush3.bf16.msra.mxu1 %v4472_v16  ;;  %v4666_v6 = vld [vmem:[%s4494_s12 + $0xf0] ss:$12 sps:$4 sm:$0xff]   ;;  %v4673_v9 = vld [vmem:[%s4494_s12 + $0x10c] ss:$12 sps:$4 sm:$0xff]   ;;  %v4260_v15 = vld [vmem:[%s4494_s12 + $0x48] ss:$12 sps:$4 sm:$0xff]  }
  0x25   : > { %3450 = vmatprep.subr.bf16.mxu0 %v4193_v18  ;;  %3996 = vmatprep.subr.bf16.mxu1 %v4486_v19  ;;  %v4253_v8 = vld [vmem:[%s4494_s12 + $0x30] ss:$12 sps:$4 sm:$0xff]   ;;  %v4285_v11 = vld [vmem:[%s5309_s1 + $0xa8] sm:$0xff]  }
  0x26   : > { %v4293_v14 = vld [vmem:[%s5309_s1 + $0xb0] sm:$0xff]   ;;  %v4698_v17 = vld [vmem:[%s4494_s12 + $0x120] ss:$12 sps:$4 sm:$0xff]   ;;  %v4701_v18 = vld [vmem:[%s4494_s12 + $0x13c] ss:$12 sps:$4 sm:$0xff]  }
  0x28   : > { %3451 = vmatpush3.bf16.msra.mxu0 %v4195_v20  ;;  %4004 = vmatpush3.bf16.msra.mxu1 %v4486_v19  ;;  %v4711_v20 = vld [vmem:[%s4494_s12 + $0x138] ss:$12 sps:$4 sm:$0xff]  }
  0x29   : > { %3452 = vmatprep.subr.bf16.mxu0 %v4196_v21  ;;  %3997 = vmatprep.subr.bf16.mxu1 %v4503_v22  ;;  %v4714_v21 = vld [vmem:[%s4494_s12 + $0x154] ss:$12 sps:$4 sm:$0xff]  }
  0x2c   : > { %3453 = vmatpush3.bf16.msra.mxu0 %v4198_v25  ;;  %4005 = vmatpush3.bf16.msra.mxu1 %v4503_v22  ;;  %v4730_v25 = vld [vmem:[%s4494_s12 + $0x16c] ss:$12 sps:$4 sm:$0xff]  }
  0x2d   : > { %3846 = vmatprep.subr.bf16.mxu0 %v4402_v1  ;;  %3574 = vmatprep.subr.bf16.mxu1 %v4204_v26  ;;  %v4737_v26 = vld [vmem:[%s4494_s12 + $0x168] ss:$12 sps:$4 sm:$0xff]  }
  0x2f   : > { %829 = vmatmul.mubr.bf16.vlgmr.msra.gmra.mrb[0].mxu0 %v4522_v27  ;;  %3879 = vmatmul.mubr.bf16.vlgmr.msra.gmra.mrb[0].mxu1 %v4526_v28 }
  0x30   : > { %3847 = vmatpush3.bf16.msra.mxu0 %v4402_v1  ;;  %3575 = vmatpush3.bf16.msra.mxu1 %v4205_v29  ;;  %v4651_v1 = vld [vmem:[%s4494_s12 + $0xd8] ss:$12 sps:$4 sm:$0xff]   ;;  %v4747_v29 = vld [vmem:[%s4494_s12 + $0x180] ss:$12 sps:$4 sm:$0xff]  }
  0x31   : > { %3576 = vmatprep.subr.bf16.mxu1 %v4206_v30  ;;  %836 = vmatprep.mubr.bf16.mxu0 %v4537_v31  ;;  %v4750_v30 = vld [vmem:[%s4494_s12 + $0x19c] ss:$12 sps:$4 sm:$0xff]  }
  0x32   : > { %3882 = vmatprep.mubr.bf16.mxu1 %v4540_v32  ;;  %3848 = vmatprep.subr.bf16.mxu0 %v4415_v4 }
  0x34   : > { %3577 = vmatpush3.bf16.msra.mxu1 %v4207_v33  ;;  %3849 = vmatpush3.bf16.msra.mxu0 %v4415_v4  ;;  %v4250_v4 = vld [vmem:[%s4494_s12 + $0x34] ss:$12 sps:$4 sm:$0xff]  }
  0x35   : > { %3578 = vmatprep.subr.bf16.mxu1 %v4213_v35  ;;  %3850 = vmatprep.subr.bf16.mxu0 %v4427_v7  ;;  %v4760_v33 = vld [vmem:[%s4494_s12 + $0x1b4] ss:$12 sps:$4 sm:$0xff]   ;;  %v4770_v35 = vld [vmem:[%s4494_s12 + $0x1cc] ss:$12 sps:$4 sm:$0xff]  }
  0x37   : > { %837 = vmatmul.mubr.bf16.gmra.mrb[4].mxu0 %v4550_v34  ;;  %3883 = vmatmul.mubr.bf16.gmra.mrb[4].mxu1 %v4557_v36 }
  0x38   : > { %3579 = vmatpush3.bf16.msra.mxu1 %v4214_v37  ;;  %844 = vmatprep.mubr.bf16.mxu0 %v4567_v39  ;;  %v4777_v37 = vld [vmem:[%s4494_s12 + $0x1c8] ss:$12 sps:$4 sm:$0xff]  }
  0x39   : > { %3580 = vmatprep.subr.bf16.mxu1 %v4215_v38  ;;  %3886 = vmatprep.mubr.bf16.mxu1 %v4219_v40  ;;  %v4780_v38 = vld [vmem:[%s4494_s12 + $0x68] ss:$12 sps:$4 sm:$0xff]   ;;  %v4292_v40 = vld [vmem:[%s5309_s1 + $0x180] sm:$0xff]  }
  0x3a   : > { %3851 = vmatpush3.bf16.msra.mxu0 %v4427_v7  ;;  %v4278_v7 = vld [vmem:[%s5309_s1 + $0xa0] sm:$0xff]  }
  0x3b   : > { %3852 = vmatprep.subr.bf16.mxu0 %v4440_v10 }
  0x3c   : > { %3581 = vmatpush3.bf16.msra.mxu1 %v4216_v41  ;;  %v4793_v41 = vld [vmem:[%s4494_s12 + $0x98] ss:$12 sps:$4 sm:$0xff]  }
  0x3d   : > { %3582 = vmatprep.subr.bf16.mxu1 %v4222_v44  ;;  %v4298_v44 = vld [vmem:[%s5309_s1 + $0x1d0] sm:$0xff]  }
  0x3e   : > { %3853 = vmatpush3.bf16.msra.mxu0 %v4440_v10  ;;  %v4257_v10 = vld [vmem:[%s4494_s12 + $0x4c] ss:$12 sps:$4 sm:$0xff]  }
  0x3f   : > { %845 = vmatmul.mubr.bf16.gmra.mrb[8].mxu0 %v4579_v42  ;;  %3887 = vmatmul.mubr.bf16.gmra.mrb[8].mxu1 %v4221_v43  ;;  %v4295_v43 = vld [vmem:[%s5309_s1 + $0x188] sm:$0xff]  }
  0x40   : > { %3583 = vmatpush3.bf16.msra.mxu1 %v4223_v45  ;;  %852 = vmatprep.mubr.bf16.mxu0 %v4594_v47  ;;  %v4809_v45 = vld [vmem:[%s4494_s12 + $0xb0] ss:$12 sps:$4 sm:$0xff]  }
  0x41   : > { %3584 = vmatprep.subr.bf16.mxu1 %v4224_v46  ;;  %3890 = vmatprep.mubr.bf16.mxu1 %v4228_v48  ;;  %v4299_v46 = vld [vmem:[%s5309_s1 + $0x190] sm:$0xff]   ;;  %v4300_v48 = vld [vmem:[%s5309_s1 + $0x1d8] sm:$0xff]  }
  0x42   : > { %3854 = vmatprep.subr.bf16.mxu0 %v4455_v13 }
  0x43   : > { %3855 = vmatpush3.bf16.msra.mxu0 %v4455_v13  ;;  %v4685_v13 = vld [vmem:[%s4494_s12 + $0x108] ss:$12 sps:$4 sm:$0xff]  }
  0x44   : > { %3585 = vmatpush3.bf16.msra.mxu1 %v4225_v49  ;;  %3856 = vmatprep.subr.bf16.mxu0 %v4472_v16  ;;  %v4301_v49 = vld [vmem:[%s5309_s1 + $0x198] sm:$0xff]  }
  0x45   : > { %3586 = vmatprep.subr.bf16.mxu1 %v4231_v50  ;;  %v4304_v50 = vld [vmem:[%s5309_s1 + $0x1e0] sm:$0xff]  }
  0x47   : > { %853 = vmatmul.mubr.bf16.gmra.mrb[12].mxu0 %v4607_v51  ;;  %3891 = vmatmul.mubr.bf16.gmra.mrb[12].mxu1 %v4230_v52  ;;  %v4305_v52 = vld [vmem:[%s5309_s1 + $0x1a0] sm:$0xff]  }
  0x48   : > { %3587 = vmatpush3.bf16.msra.mxu1 %v4232_v53  ;;  %860 = vmatprep.mubr.bf16.mxu0 %v4619_v55  ;;  %v4837_v53 = vld [vmem:[%s4494_s12 + $0xf8] ss:$12 sps:$4 sm:$0xff]  }
  0x49   : > { %3588 = vmatprep.subr.bf16.mxu1 %v4233_v54  ;;  %1358 = vmatprep.mubr.bf16.mxu1 %v4239_v56  ;;  %v4307_v54 = vld [vmem:[%s5309_s1 + $0x1e8] sm:$0xff]  }
  0x4a   : > { %3857 = vmatpush3.bf16.msra.mxu0 %v4472_v16  ;;  %v4692_v16 = vld [vmem:[%s4494_s12 + $0x124] ss:$12 sps:$4 sm:$0xff]   ;;  %v4308_v56 = vld [vmem:[%s5309_s1 + $0x1a8] sm:$0xff]  }
  0x4b   : > { %3858 = vmatprep.subr.bf16.mxu0 %v4486_v19 }
  0x4c   : > { %3589 = vmatpush3.bf16.msra.mxu1 %v4234_v57  ;;  %v4311_v57 = vld [vmem:[%s5309_s1 + $0x1f0] sm:$0xff]  }
  0x4d   : > { %3894 = vmatprep.subr.bf16.mxu1 %v4241_v58 }
  0x4e   : > { %3859 = vmatpush3.bf16.msra.mxu0 %v4486_v19  ;;  %v4306_v19 = vld [vmem:[%s5309_s1 + $0xb8] sm:$0xff]  }
  0x4f   : > { %861 = vmatmul.mubr.bf16.gmra.mrb[16].mxu0 %v4634_v60  ;;  %1359 = vmatmul.mubr.bf16.vlgmr.msra.gmra.mrb[16].mxu1 %v4237_v59  ;;  %v4312_v59 = vld [vmem:[%s5309_s1 + $0x1b0] sm:$0xff]  }
  0x50   : > { %3895 = vmatpush3.bf16.msra.mxu1 %v4241_v58  ;;  %868 = vmatprep.mubr.bf16.mxu0 %v4638_v61  ;;  %v4310_v58 = vld [vmem:[%s4494_s12 + $0x110] ss:$12 sps:$4 sm:$0xff]  }
  0x51   : > { %1366 = vmatprep.mubr.bf16.mxu1 %v4244_v62  ;;  %3896 = vmatprep.subr.bf16.mxu1 %v4254_v63  ;;  %v4315_v62 = vld [vmem:[%s4494_s12 + $0x8] ss:$12 sps:$4 sm:$0xff]  }
  0x52   : > { %3860 = vmatprep.subr.bf16.mxu0 %v4503_v22 }
  0x53   : > { %3861 = vmatpush3.bf16.msra.mxu0 %v4503_v22  ;;  %v4723_v22 = vld [vmem:[%s5309_s1 + $0x200] sm:$0xff]  }
  0x54   : > { %3897 = vmatpush3.bf16.msra.mxu1 %v4254_v63  ;;  %3710 = vmatprep.subr.bf16.mxu0 %v4291_v12  ;;  %v4313_v63 = vld [vmem:[%s5309_s1 + $0x1f8] sm:$0xff]   ;;  %v4327_v12 = vld [vmem:[%s4494_s12 + $0xc8] ss:$12 sps:$4 sm:$0xff]  }
  0x55   : > { %3898 = vmatprep.subr.bf16.mxu1 %v4264_v0 }
  0x57   : > { %869 = vmatmul.mubr.bf16.gmra.mrb[20].mxu0 %v4651_v1  ;;  %1367 = vmatmul.mubr.bf16.gmra.mrb[20].mxu1 %v4247_v2  ;;  %v4316_v2 = vld [vmem:[%s4494_s12 + $0x20] ss:$12 sps:$4 sm:$0xff]  }
  0x58   : > { %876 = vmatprep.mubr.bf16.mxu0 %v4656_v3  ;;  %1374 = vmatprep.mubr.bf16.mxu1 %v4250_v4  ;;  %v4318_v4 = vld [vmem:[%s4494_s12 + $0x38] ss:$12 sps:$4 sm:$0xff]  }
  0x59   : > { %3899 = vmatpush3.bf16.msra.mxu1 %v4264_v0  ;;  %v4314_v0 = vld [vmem:[%s5309_s1 + $0x1b8] sm:$0xff]  }
  0x5a   : > { %3900 = vmatprep.subr.bf16.mxu1 %v4271_v5 }
  0x5d   : > { %3901 = vmatpush3.bf16.msra.mxu1 %v4271_v5  ;;  %v4320_v5 = vld [vmem:[%s5309_s1 + $0x208] sm:$0xff]  }
  0x5e   : > { %3902 = vmatprep.subr.bf16.mxu1 %v4278_v7 }
  0x5f   : > { %877 = vmatmul.mubr.bf16.gmra.mrb[24].mxu0 %v4666_v6  ;;  %1375 = vmatmul.mubr.bf16.gmra.mrb[24].mxu1 %v4253_v8  ;;  %v4322_v8 = vld [vmem:[%s5309_s1 + $0x218] sm:$0xff]  }
  0x60   : > { %884 = vmatprep.mubr.bf16.mxu0 %v4673_v9  ;;  %1382 = vmatprep.mubr.bf16.mxu1 %v4257_v10 }
  0x61   : > { %3903 = vmatpush3.bf16.msra.mxu1 %v4278_v7  ;;  %v4319_v7 = vld [vmem:[%s4494_s12 + $0x50] ss:$12 sps:$4 sm:$0xff]  }
  0x62   : > { %3904 = vmatprep.subr.bf16.mxu1 %v4285_v11 }
  0x65   : > { %3905 = vmatpush3.bf16.msra.mxu1 %v4285_v11 }
  0x66   : > { %3906 = vmatprep.subr.bf16.mxu1 %v4293_v14 }
  0x67   : > { %885 = vmatmul.mubr.bf16.gmra.mrb[28].mxu0 %v4685_v13  ;;  %1383 = vmatmul.mubr.bf16.gmra.mrb[28].mxu1 %v4260_v15 }
  0x68   : > { %892 = vmatprep.mubr.bf16.mxu0 %v4692_v16  ;;  %1390 = vmatprep.mubr.bf16.mxu1 %v4507_v23  ;;  %v4726_v23 = vld [vmem:[%s4494_s12 + $0x150] ss:$12 sps:$4 sm:$0xff]  }
  0x69   : > { %3907 = vmatpush3.bf16.msra.mxu1 %v4293_v14  ;;  %v4328_v14 = vld [vmem:[%s4494_s12 + $0xe0] ss:$12 sps:$4 sm:$0xff]  }
  0x6a   : > { %3908 = vmatprep.subr.bf16.mxu1 %v4306_v19 }
  0x6d   : > { %3909 = vmatpush3.bf16.msra.mxu1 %v4306_v19 }
  0x6e   : > { %3942 = vmatprep.subr.bf16.mxu1 %v4723_v22 }
  0x6f   : > { %893 = vmatmul.mubr.bf16.gmra.mrb[32].mxu0 %v4698_v17  ;;  %1391 = vmatmul.mubr.bf16.gmra.mrb[32].mxu1 %v4522_v27  ;;  %v4740_v27 = vld [vmem:[%s4494_s12 + $0x184] ss:$12 sps:$4 sm:$0xff]  }
  0x70   : > { %900 = vmatprep.mubr.bf16.mxu0 %v4701_v18  ;;  %1398 = vmatprep.mubr.bf16.mxu1 %v4537_v31  ;;  %v4757_v31 = vld [vmem:[%s4494_s12 + $0x198] ss:$12 sps:$4 sm:$0xff]  }
  0x77   : > { %901 = vmatmul.mubr.bf16.gmra.mrb[36].mxu0 %v4711_v20  ;;  %1399 = vmatmul.mubr.bf16.gmra.mrb[36].mxu1 %v4550_v34  ;;  %v4767_v34 = vld [vmem:[%s4494_s12 + $0x1b0] ss:$12 sps:$4 sm:$0xff]  }
  0x78   : > { %908 = vmatprep.mubr.bf16.mxu0 %v4714_v21  ;;  %1406 = vmatprep.mubr.bf16.mxu1 %v4567_v39  ;;  %v4787_v39 = vld [vmem:[%s4494_s12 + $0x80] ss:$12 sps:$4 sm:$0xff]  }
  0x7f   : > { %909 = vmatmul.mubr.bf16.gmra.mrb[40].mxu0 %v4726_v23  ;;  %1407 = vmatmul.mubr.bf16.gmra.mrb[40].mxu1 %v4579_v42  ;;  %v4294_v42 = vld [vmem:[%s5309_s1 + $0x1c8] sm:$0xff]  }
  0x80   : > { %916 = vmatprep.mubr.bf16.mxu0 %v4730_v25  ;;  %1414 = vmatprep.mubr.bf16.mxu1 %v4594_v47  ;;  %v4815_v47 = vld [vmem:[%s4494_s12 + $0xc8] ss:$12 sps:$4 sm:$0xff]  }
  0x87   : > { %917 = vmatmul.mubr.bf16.gmra.mrb[44].mxu0 %v4737_v26  ;;  %1415 = vmatmul.mubr.bf16.gmra.mrb[44].mxu1 %v4607_v51  ;;  %v4831_v51 = vld [vmem:[%s4494_s12 + $0xe0] ss:$12 sps:$4 sm:$0xff]  }
  0x88   : > { %924 = vmatprep.mubr.bf16.mxu0 %v4740_v27  ;;  %1422 = vmatprep.mubr.bf16.mxu1 %v4619_v55 }
  0x8f   : > { %925 = vmatmul.mubr.bf16.gmra.mrb[48].mxu0 %v4747_v29  ;;  %1423 = vmatmul.mubr.bf16.gmra.mrb[48].mxu1 %v4634_v60 }
  0x90   : > { %932 = vmatprep.mubr.bf16.mxu0 %v4750_v30  ;;  %1430 = vmatprep.mubr.bf16.mxu1 %v4638_v61 }
  0x97   : > { %933 = vmatmul.mubr.bf16.gmra.mrb[52].mxu0 %v4757_v31  ;;  %1431 = vmatmul.mubr.bf16.gmra.mrb[52].mxu1 %v4651_v1 }
  0x98   : > { %940 = vmatprep.mubr.bf16.mxu0 %v4760_v33  ;;  %1438 = vmatprep.mubr.bf16.mxu1 %v4656_v3 }
  0x9f   : > { %941 = vmatmul.mubr.bf16.gmra.mrb[56].mxu0 %v4767_v34  ;;  %1439 = vmatmul.mubr.bf16.gmra.mrb[56].mxu1 %v4666_v6 }
  0xa0   : > { %948 = vmatprep.mubr.bf16.mxu0 %v4770_v35  ;;  %1446 = vmatprep.mubr.bf16.mxu1 %v4673_v9 }
  0xa7   : > { %949 = vmatmul.mubr.bf16.gmra.mrb[60].mxu0 %v4777_v37  ;;  %1447 = vmatmul.mubr.bf16.gmra.mrb[60].mxu1 %v4685_v13 }
  0xa8   : > { %3862 = vmatprep.mubr.bf16.mxu0 %v4780_v38  ;;  %1454 = vmatprep.mubr.bf16.mxu1 %v4692_v16 }
  0xaf   : > { %3863 = vmatmul.mubr.bf16.vlgmr.msra.gmra.mrb[64].mxu0 %v4787_v39  ;;  %1455 = vmatmul.mubr.bf16.gmra.mrb[64].mxu1 %v4698_v17 }
  0xb0   : > { %3711 = vmatpush3.bf16.msra.mxu0 %v4292_v40  ;;  %3866 = vmatprep.mubr.bf16.mxu0 %v4793_v41 }
  0xb1   : > { %3712 = vmatprep.subr.bf16.mxu0 %v4294_v42  ;;  %1462 = vmatprep.mubr.bf16.mxu1 %v4701_v18 }
  0xb4   : > { %3713 = vmatpush3.bf16.msra.mxu0 %v4295_v43 }
  0xb5   : > { %3714 = vmatprep.subr.bf16.mxu0 %v4298_v44 }
  0xb7   : > { %3867 = vmatmul.mubr.bf16.gmra.mrb[68].mxu0 %v4809_v45  ;;  %1463 = vmatmul.mubr.bf16.gmra.mrb[68].mxu1 %v4711_v20 }
  0xb8   : > { %3715 = vmatpush3.bf16.msra.mxu0 %v4299_v46  ;;  %3870 = vmatprep.mubr.bf16.mxu0 %v4815_v47  ;;  %v4334_v46 = vld [vmem:[%s4494_s12 + $0x170] ss:$12 sps:$4 sm:$0xff]  }
  0xb9   : > { %3716 = vmatprep.subr.bf16.mxu0 %v4300_v48  ;;  %1470 = vmatprep.mubr.bf16.mxu1 %v4714_v21 }
  0xbc   : > { %3717 = vmatpush3.bf16.msra.mxu0 %v4301_v49 }
  0xbd   : > { %3718 = vmatprep.subr.bf16.mxu0 %v4304_v50 }
  0xbf   : > { %3871 = vmatmul.mubr.bf16.gmra.mrb[72].mxu0 %v4831_v51  ;;  %1471 = vmatmul.mubr.bf16.gmra.mrb[72].mxu1 %v4726_v23 }
  0xc0   : > { %3719 = vmatpush3.bf16.msra.mxu0 %v4305_v52  ;;  %3874 = vmatprep.mubr.bf16.mxu0 %v4837_v53  ;;  %v4337_v52 = vld [vmem:[%s4494_s12 + $0x188] ss:$12 sps:$4 sm:$0xff]  }
  0xc1   : > { %3720 = vmatprep.subr.bf16.mxu0 %v4307_v54  ;;  %1478 = vmatprep.mubr.bf16.mxu1 %v4730_v25 }
  0xc4   : > { %3721 = vmatpush3.bf16.msra.mxu0 %v4308_v56 }
  0xc5   : > { %3722 = vmatprep.subr.bf16.mxu0 %v4311_v57 }
  0xc7   : > { %3875 = vmatmul.mubr.bf16.gmra.mrb[76].mxu0 %v4310_v58  ;;  %1479 = vmatmul.mubr.bf16.gmra.mrb[76].mxu1 %v4737_v26 }
  0xc8   : > { %3723 = vmatpush3.bf16.msra.mxu0 %v4312_v59  ;;  %3910 = vmatprep.mubr.bf16.mxu1 %v4315_v62  ;;  %v4338_v62 = vld [vmem:[%s4494_s12 + $0x1e0] ss:$12 sps:$4 sm:$0xff]  }
  0xc9   : > { %3724 = vmatprep.subr.bf16.mxu0 %v4313_v63  ;;  %2193 = vmatprep.mubr.bf16.mxu0 %v4619_v55  ;;  %v4321_v55 = vld [vmem:[%s5309_s1 + $0x210] sm:$0xff]   ;;  %v4339_v63 = vld [vmem:[%s4494_s12 + $0x1a0] ss:$12 sps:$4 sm:$0xff]  }
  0xcc   : > { %3725 = vmatpush3.bf16.msra.mxu0 %v4314_v0 }
  0xcf   : > { %3911 = vmatmul.mubr.bf16.vlgmr.msra.gmra.mrb[80].mxu1 %v4316_v2  ;;  %2194 = vmatmul.mubr.bf16.vlgmr.msra.gmra.mrb[80].mxu0 %v4634_v60  ;;  %v4323_v60 = vld [vmem:[%s5309_s1 + $0x220] sm:$0xff]  }
  0xd0   : > { %3943 = vmatpush3.bf16.msra.mxu1 %v4723_v22  ;;  %3914 = vmatprep.mubr.bf16.mxu1 %v4318_v4 }
  0xd1   : > { %2201 = vmatprep.mubr.bf16.mxu0 %v4638_v61  ;;  %3944 = vmatprep.subr.bf16.mxu1 %v4320_v5  ;;  %v4324_v61 = vld [vmem:[%s5309_s1 + $0x228] sm:$0xff]  }
  0xd4   : > { %3945 = vmatpush3.bf16.msra.mxu1 %v4320_v5 }
  0xd5   : > { %3946 = vmatprep.subr.bf16.mxu1 %v4321_v55 }
  0xd7   : > { %3915 = vmatmul.mubr.bf16.gmra.mrb[84].mxu1 %v4319_v7  ;;  %2202 = vmatmul.mubr.bf16.gmra.mrb[84].mxu0 %v4651_v1  ;;  %v4325_v1 = vld [vmem:[%s5309_s1 + $0x230] sm:$0xff]   ;;  %v4342_v7 = vld [vmem:[%s4494_s12 + $0x1b8] ss:$12 sps:$4 sm:$0xff]  }
  0xd8   : > { %3918 = vmatprep.mubr.bf16.mxu1 %v4780_v38  ;;  %2209 = vmatprep.mubr.bf16.mxu0 %v4656_v3  ;;  %v4326_v3 = vld [vmem:[%s5309_s1 + $0x238] sm:$0xff]   ;;  %v4332_v38 = vld [vmem:[%s4494_s12 + $0x140] ss:$12 sps:$4 sm:$0xff]  }
  0xd9   : > { %3947 = vmatpush3.bf16.msra.mxu1 %v4321_v55  ;;  %v4340_v55 = vld [vmem:[%s4494_s12 + $0x1fc] ss:$12 sps:$4 sm:$0xff]  }
  0xda   : > { %3948 = vmatprep.subr.bf16.mxu1 %v4322_v8 }
  0xdd   : > { %3949 = vmatpush3.bf16.msra.mxu1 %v4322_v8 }
  0xde   : > { %3950 = vmatprep.subr.bf16.mxu1 %v4323_v60 }
  0xdf   : > { %3919 = vmatmul.mubr.bf16.gmra.mrb[88].mxu1 %v4787_v39  ;;  %2210 = vmatmul.mubr.bf16.gmra.mrb[88].mxu0 %v4666_v6 }
  0xe0   : > { %3922 = vmatprep.mubr.bf16.mxu1 %v4793_v41  ;;  %2217 = vmatprep.mubr.bf16.mxu0 %v4673_v9  ;;  %v4333_v41 = vld [vmem:[%s4494_s12 + $0x158] ss:$12 sps:$4 sm:$0xff]  }
  0xe1   : > { %3951 = vmatpush3.bf16.msra.mxu1 %v4323_v60 }
  0xe2   : > { %3952 = vmatprep.subr.bf16.mxu1 %v4324_v61 }
  0xe5   : > { %3953 = vmatpush3.bf16.msra.mxu1 %v4324_v61 }
  0xe6   : > { %3954 = vmatprep.subr.bf16.mxu1 %v4325_v1 }
  0xe7   : > { %3923 = vmatmul.mubr.bf16.gmra.mrb[92].mxu1 %v4809_v45  ;;  %2218 = vmatmul.mubr.bf16.gmra.mrb[92].mxu0 %v4685_v13 }
  0xe8   : > { %3926 = vmatprep.mubr.bf16.mxu1 %v4815_v47  ;;  %2225 = vmatprep.mubr.bf16.mxu0 %v4692_v16 }
  0xe9   : > { %3955 = vmatpush3.bf16.msra.mxu1 %v4325_v1 }
  0xea   : > { %3956 = vmatprep.subr.bf16.mxu1 %v4326_v3 }
  0xed   : > { %3957 = vmatpush3.bf16.msra.mxu1 %v4326_v3 }
  0xef   : > { %3927 = vmatmul.mubr.bf16.gmra.mrb[0].mxu1 %v4831_v51  ;;  %2226 = vmatmul.mubr.bf16.gmra.mrb[96].mxu0 %v4698_v17  ;;  %v4329_v17 = vld [vmem:[%s4494_s12 + $0xf8] ss:$12 sps:$4 sm:$0xff]  }
  0xf0   : > { %3930 = vmatprep.mubr.bf16.mxu1 %v4837_v53  ;;  %2233 = vmatprep.mubr.bf16.mxu0 %v4701_v18  ;;  %v4335_v51 = vld [vmem:[%s4494_s12 + $0x1e4] ss:$12 sps:$4 sm:$0xff]  }
  0xf7   : > { %3931 = vmatmul.mubr.bf16.gmra.mrb[4].mxu1 %v4310_v58  ;;  %2234 = vmatmul.mubr.bf16.gmra.mrb[100].mxu0 %v4711_v20 }
  0xf8   : > { %3934 = vmatprep.mubr.bf16.mxu1 %v4510_v24  ;;  %2241 = vmatprep.mubr.bf16.mxu0 %v4714_v21  ;;  %v4330_v21 = vld [vmem:[%s4494_s12 + $0x110] ss:$12 sps:$4 sm:$0xff]  }
  0xff   : > { %3935 = vmatmul.mubr.bf16.gmra.mrb[8].mxu1 %v4526_v28  ;;  %2242 = vmatmul.mubr.bf16.gmra.mrb[104].mxu0 %v4726_v23 }
 0x100   : > { %3938 = vmatprep.mubr.bf16.mxu1 %v4540_v32  ;;  %2249 = vmatprep.mubr.bf16.mxu0 %v4730_v25  ;;  %v4331_v25 = vld [vmem:[%s4494_s12 + $0x128] ss:$12 sps:$4 sm:$0xff]  }
 0x102   : > { %v3454_v6 = vpop.f32.mrb[0].mxu0 }
 0x103   : > { %v3455_v9 = vpop.f32.mrb[1].mxu0 }
 0x104   : > { %v4914_v10 = vadd.f32 %v3455_v9, %v3454_v6  ;;  %v3457_v11 = vpop.f32.mrb[2].mxu0 }
 0x105   : > { %v3458_v13 = vpop.f32.mrb[3].mxu0 }
 0x106   : > { %v4917_v24 = vadd.f32 %v3458_v13, %v3457_v11  ;;  %v4343_v11 = vld [vmem:[%s4494_s12 + $0x1f8] ss:$12 sps:$4 sm:$0xff]  }
 0x107   : > { %3939 = vmatmul.mubr.bf16.gmra.mrb[12].mxu1 %v4557_v36  ;;  %2250 = vmatmul.mubr.bf16.gmra.mrb[108].mxu0 %v4737_v26 }
 0x108   : > { %2257 = vmatprep.mubr.bf16.mxu0 %v4740_v27  ;;  %3958 = vmatprep.mubr.bf16.mxu1 %v4327_v12  ;;  %v4344_v12 = vld [vmem:[%s4494_s12 + $0x1d0] ss:$12 sps:$4 sm:$0xff]  }
 0x10a   : > { %v3460_v28 = vpop.f32.mrb[4].mxu0 }
 0x10b   : > { %v3461_v32 = vpop.f32.mrb[5].mxu0 }
 0x10c   : > { %v4923_v15 = vadd.f32 %v3461_v32, %v3460_v28  ;;  %v3463_v16 = vpop.f32.mrb[6].mxu0 }
 0x10d   : > { %v3464_v18 = vpop.f32.mrb[7].mxu0 }
 0x10e   : > { %v4926_v19 = vadd.f32 %v3464_v18, %v3463_v16  ;;  %v4345_v16 = vld [vmem:[%s4494_s12 + $0x214] ss:$12 sps:$4 sm:$0xff]  }
 0x10f   : > { %2258 = vmatmul.mubr.bf16.gmra.mrb[112].mxu0 %v4747_v29  ;;  %3959 = vmatmul.mubr.bf16.vlgmr.msra.gmra.mrb[80].mxu1 %v4328_v14 }
 0x110   : > { %2265 = vmatprep.mubr.bf16.mxu0 %v4750_v30  ;;  %3962 = vmatprep.mubr.bf16.mxu1 %v4329_v17  ;;  %v4347_v17 = vld [vmem:[%s4494_s12 + $0x1e8] ss:$12 sps:$4 sm:$0xff]  }
 0x112   : > { %v3466_v36 = vpop.f32.mrb[8].mxu0 }
 0x113   : > { %v3467_v20 = vpop.f32.mrb[9].mxu0 }
 0x114   : > { %v4931_v22 = vadd.f32 %v3467_v20, %v3466_v36  ;;  %v3469_v23 = vpop.f32.mrb[10].mxu0 }
 0x115   : > { %v3470_v26 = vpop.f32.mrb[11].mxu0 }
 0x116   : > { %v4934_v27 = vadd.f32 %v3470_v26, %v3469_v23 }
 0x117   : > { %2266 = vmatmul.mubr.bf16.gmra.mrb[116].mxu0 %v4757_v31  ;;  %3963 = vmatmul.mubr.bf16.gmra.mrb[84].mxu1 %v4330_v21 }
 0x118   : > { %2273 = vmatprep.mubr.bf16.mxu0 %v4760_v33  ;;  %3966 = vmatprep.mubr.bf16.mxu1 %v4331_v25 }
 0x11a   : > { %v3472_v29 = vpop.f32.mrb[12].mxu0 }
 0x11b   : > { %v3473_v30 = vpop.f32.mrb[13].mxu0 }
 0x11c   : > { %v4939_v39 = vadd.f32 %v3473_v30, %v3472_v29  ;;  %v3475_v40 = vpop.f32.mrb[14].mxu0  ;;  %v4348_v30 = vld [vmem:[%s4494_s12 + $0x210] ss:$12 sps:$4 sm:$0xff]  }
 0x11d   : > { %v3476_v42 = vpop.f32.mrb[15].mxu0 }
 0x11e   : > { %v4942_v43 = vadd.f32 %v3476_v42, %v3475_v40 }
 0x11f   : > { %2274 = vmatmul.mubr.bf16.gmra.mrb[120].mxu0 %v4767_v34  ;;  %3967 = vmatmul.mubr.bf16.gmra.mrb[88].mxu1 %v4332_v38  ;;  %v4349_v38 = vld [vmem:[%s4494_s12 + $0x200] ss:$12 sps:$4 sm:$0xff]  }
 0x120   : > { %2281 = vmatprep.mubr.bf16.mxu0 %v4770_v35  ;;  %3970 = vmatprep.mubr.bf16.mxu1 %v4333_v41 }
 0x122   : > { %v3478_v31 = vpop.f32.mrb[16].mxu0  ;;  %v3590_v33 = vpop.f32.mrb[16].mxu1 }
 0x123   : > { %v3479_v44 = vpop.f32.mrb[17].mxu0  ;;  %v3591_v45 = vpop.f32.mrb[17].mxu1 }
 0x124   : > { %v4947_v47 = vadd.f32 %v3479_v44, %v3478_v31  ;;  %v3481_v48 = vpop.f32.mrb[18].mxu0  ;;  %v4949_v49 = vadd.f32 %v3591_v45, %v3590_v33  ;;  %v3593_v50 = vpop.f32.mrb[18].mxu1  ;;  %v4350_v33 = vld [vmem:[%s4494_s12 + $0x22c] ss:$12 sps:$4 sm:$0xff]  }
 0x125   : > { %v3482_v34 = vpop.f32.mrb[19].mxu0  ;;  %v3594_v53 = vpop.f32.mrb[19].mxu1  ;;  %v4352_v44 = vld [vmem:[%s4494_s12 + $0x218] ss:$12 sps:$4 sm:$0xff]  }
 0x126   : > { %v4953_v54 = vadd.f32 %v3482_v34, %v3481_v48  ;;  %v4955_v35 = vadd.f32 %v3594_v53, %v3593_v50 }
 0x127   : > { %2282 = vmatmul.mubr.bf16.gmra.mrb[124].mxu0 %v4777_v37  ;;  %3971 = vmatmul.mubr.bf16.gmra.mrb[92].mxu1 %v4334_v46 }
 0x128   : > { %2289 = vmatprep.mubr.bf16.mxu0 %v4335_v51  ;;  %3974 = vmatprep.mubr.bf16.mxu1 %v4337_v52 }
 0x12a   : > { %v3484_v56 = vpop.f32.mrb[20].mxu0  ;;  %v3596_v57 = vpop.f32.mrb[20].mxu1 }
 0x12b   : > { %v3485_v58 = vpop.f32.mrb[21].mxu0  ;;  %v3597_v59 = vpop.f32.mrb[21].mxu1 }
 0x12c   : > { %v4960_v0 = vadd.f32 %v3485_v58, %v3484_v56  ;;  %v3487_v2 = vpop.f32.mrb[22].mxu0  ;;  %v4962_v4 = vadd.f32 %v3597_v59, %v3596_v57  ;;  %v3599_v5 = vpop.f32.mrb[22].mxu1  ;;  %v4353_v56 = vld [vmem:[%s4494_s12 + $0x228] ss:$12 sps:$4 sm:$0xff]   ;;  %v4354_v57 = vld [vmem:[%s4494_s12 + $0x230] ss:$12 sps:$4 sm:$0xff]  }
 0x12d   : > { %v3488_v37 = vpop.f32.mrb[23].mxu0  ;;  %v3600_v8 = vpop.f32.mrb[23].mxu1  ;;  %s3230_s12 = sshll.u32 %s5318_s16, 7 }
 0x12e   : > { %v4966_v60 = vadd.f32 %v3488_v37, %v3487_v2  ;;  %v4968_v61 = vadd.f32 %v3600_v8, %v3599_v5  ;;  %s5169_s27 = scalar_lea.vmem %s5311_s3, %s3230_s12  ;;  %s5205_s6 = scalar_lea.vmem %s5312_s4, %s3230_s12 }
 0x12f   : > { %2290 = vmatmul.mubr.bf16.gmra.mrb[128].mxu0 %v4338_v62  ;;  %3975 = vmatmul.mubr.bf16.gmra.mrb[0].mxu1 %v4339_v63 }
 0x130   : > { %2297 = vmatprep.mubr.bf16.mxu0 %v4340_v55  ;;  %3978 = vmatprep.mubr.bf16.mxu1 %v4342_v7 }
 0x132   : > { %v3490_v1 = vpop.f32.mrb[24].mxu0  ;;  %v3602_v3 = vpop.f32.mrb[24].mxu1 }
 0x133   : > { %v3491_v6 = vpop.f32.mrb[25].mxu0  ;;  %v3603_v9 = vpop.f32.mrb[25].mxu1 }
 0x134   : > { %v4972_v13 = vadd.f32 %v3491_v6, %v3490_v1  ;;  %v3493_v28 = vpop.f32.mrb[26].mxu0  ;;  %v4974_v32 = vadd.f32 %v3603_v9, %v3602_v3  ;;  %v3605_v14 = vpop.f32.mrb[26].mxu1 }
 0x135   : > { %v3494_v18 = vpop.f32.mrb[27].mxu0  ;;  %v3606_v36 = vpop.f32.mrb[27].mxu1 }
 0x136   : > { %v4978_v20 = vadd.f32 %v3494_v18, %v3493_v28  ;;  %v4980_v21 = vadd.f32 %v3606_v36, %v3605_v14 }
 0x137   : > { %2298 = vmatmul.mubr.bf16.gmra.mrb[132].mxu0 %v4343_v11  ;;  %3979 = vmatmul.mubr.bf16.gmra.mrb[4].mxu1 %v4344_v12 }
 0x138   : > { %2305 = vmatprep.mubr.bf16.mxu0 %v4345_v16  ;;  %3982 = vmatprep.mubr.bf16.mxu1 %v4347_v17 }
 0x13a   : > { %v3496_v23 = vpop.f32.mrb[28].mxu0  ;;  %v3608_v25 = vpop.f32.mrb[28].mxu1 }
 0x13b   : > { %v3497_v26 = vpop.f32.mrb[29].mxu0  ;;  %v3609_v29 = vpop.f32.mrb[29].mxu1 }
 0x13c   : > { %v4984_v40 = vadd.f32 %v3497_v26, %v3496_v23  ;;  %v3499_v41 = vpop.f32.mrb[30].mxu0  ;;  %v4986_v42 = vadd.f32 %v3609_v29, %v3608_v25  ;;  %v3611_v31 = vpop.f32.mrb[30].mxu1 }
 0x13d   : > { %v3500_v45 = vpop.f32.mrb[31].mxu0  ;;  %v3612_v46 = vpop.f32.mrb[31].mxu1 }
 0x13e   : > { %v4990_v48 = vadd.f32 %v3500_v45, %v3499_v41  ;;  %v4992_v50 = vadd.f32 %v3612_v46, %v3611_v31 }
 0x13f   : > { %2306 = vmatmul.mubr.bf16.gmra.mrb[136].mxu0 %v4348_v30  ;;  %3983 = vmatmul.mubr.bf16.gmra.mrb[8].mxu1 %v4349_v38 }
 0x140   : > { %2313 = vmatprep.mubr.bf16.mxu0 %v4350_v33  ;;  %3986 = vmatprep.mubr.bf16.mxu1 %v4352_v44 }
 0x142   : > { %v3502_v51 = vpop.f32.mrb[32].mxu0  ;;  %v3614_v52 = vpop.f32.mrb[32].mxu1 }
 0x143   : > { %v3503_v34 = vpop.f32.mrb[33].mxu0  ;;  %v3615_v53 = vpop.f32.mrb[33].mxu1 }
 0x144   : > { %v3504_v58 = vadd.f32 %v3503_v34, %v3502_v51  ;;  %v3505_v59 = vpop.f32.mrb[34].mxu0  ;;  %v4996_v62 = vadd.f32 %v3615_v53, %v3614_v52  ;;  %v3617_v63 = vpop.f32.mrb[34].mxu1 }
 0x145   : > { %v3506_v2 = vpop.f32.mrb[35].mxu0  ;;  %v3618_v5 = vpop.f32.mrb[35].mxu1 }
 0x146   : > { %v3507_v55 = vadd.f32 %v3506_v2, %v3505_v59  ;;  %v4998_v7 = vadd.f32 %v3618_v5, %v3617_v63 }
 0x147   : > { %2314 = vmatmul.mubr.bf16.gmra.mrb[140].mxu0 %v4353_v56  ;;  %3987 = vmatmul.mubr.bf16.gmra.mrb[12].mxu1 %v4354_v57 }
 0x14a   : > { %v3508_v37 = vpop.f32.mrb[36].mxu0  ;;  %v3620_v8 = vpop.f32.mrb[36].mxu1 }
 0x14b   : > { %v3509_v1 = vpop.f32.mrb[37].mxu0  ;;  %v3621_v3 = vpop.f32.mrb[37].mxu1 }
 0x14c   : > { %v3510_v6 = vadd.f32 %v3509_v1, %v3508_v37  ;;  %v3511_v9 = vpop.f32.mrb[38].mxu0  ;;  %v5000_v11 = vadd.f32 %v3621_v3, %v3620_v8  ;;  %v3623_v12 = vpop.f32.mrb[38].mxu1 }
 0x14d   : > { %v3512_v28 = vpop.f32.mrb[39].mxu0  ;;  %v3624_v14 = vpop.f32.mrb[39].mxu1 }
 0x14e   : > { %v3513_v16 = vadd.f32 %v3512_v28, %v3511_v9  ;;  %v5002_v17 = vadd.f32 %v3624_v14, %v3623_v12 }
 0x152   : > { %v3514_v18 = vpop.f32.mrb[40].mxu0  ;;  %v3626_v36 = vpop.f32.mrb[40].mxu1 }
 0x153   : > { %v3515_v23 = vpop.f32.mrb[41].mxu0  ;;  %v3627_v25 = vpop.f32.mrb[41].mxu1 }
 0x154   : > { %v3516_v26 = vadd.f32 %v3515_v23, %v3514_v18  ;;  %v3517_v29 = vpop.f32.mrb[42].mxu0  ;;  %v5004_v30 = vadd.f32 %v3627_v25, %v3626_v36  ;;  %v3629_v38 = vpop.f32.mrb[42].mxu1 }
 0x155   : > { %v3518_v41 = vpop.f32.mrb[43].mxu0  ;;  %v3630_v31 = vpop.f32.mrb[43].mxu1 }
 0x156   : > { %v3519_v33 = vadd.f32 %v3518_v41, %v3517_v29  ;;  %v5006_v44 = vadd.f32 %v3630_v31, %v3629_v38 }
 0x15a   : > { %v3520_v45 = vpop.f32.mrb[44].mxu0  ;;  %v3632_v46 = vpop.f32.mrb[44].mxu1 }
 0x15b   : > { %v3521_v51 = vpop.f32.mrb[45].mxu0  ;;  %v3633_v52 = vpop.f32.mrb[45].mxu1 }
 0x15c   : > { %v3522_v34 = vadd.f32 %v3521_v51, %v3520_v45  ;;  %v3523_v53 = vpop.f32.mrb[46].mxu0  ;;  %v5008_v56 = vadd.f32 %v3633_v52, %v3632_v46  ;;  %v3635_v57 = vpop.f32.mrb[46].mxu1 }
 0x15d   : > { %v3524_v59 = vpop.f32.mrb[47].mxu0  ;;  %v3636_v63 = vpop.f32.mrb[47].mxu1 }
 0x15e   : > { %v3525_v2 = vadd.f32 %v3524_v59, %v3523_v53  ;;  %v5010_v5 = vadd.f32 %v3636_v63, %v3635_v57 }
 0x162   : > { %v3526_v37 = vpop.f32.mrb[48].mxu0  ;;  %v3638_v8 = vpop.f32.mrb[48].mxu1 }
 0x163   : > { %v3527_v1 = vpop.f32.mrb[49].mxu0  ;;  %v3639_v3 = vpop.f32.mrb[49].mxu1 }
 0x164   : > { %v5012_v9 = vadd.f32 %v3527_v1, %v3526_v37  ;;  %v3640_v12 = vadd.f32 %v3639_v3, %v3638_v8  ;;  %v3529_v28 = vpop.f32.mrb[50].mxu0  ;;  %v3641_v14 = vpop.f32.mrb[50].mxu1 }
 0x165   : > { %v3530_v18 = vpop.f32.mrb[51].mxu0  ;;  %v3642_v36 = vpop.f32.mrb[51].mxu1 }
 0x166   : > { %v5014_v23 = vadd.f32 %v3640_v12, %v3504_v58  ;;  %v5016_v25 = vadd.f32 %v3530_v18, %v3529_v28  ;;  %v3643_v29 = vadd.f32 %v3642_v36, %v3641_v14 }
 0x168   : > { %v5018_v38 = vadd.f32 %v3643_v29, %v3507_v55 }
 0x16a   : > { %v3532_v41 = vpop.f32.mrb[52].mxu0  ;;  %v3644_v31 = vpop.f32.mrb[52].mxu1 }
 0x16b   : > { %v3533_v45 = vpop.f32.mrb[53].mxu0  ;;  %v3645_v46 = vpop.f32.mrb[53].mxu1 }
 0x16c   : > { %v5020_v51 = vadd.f32 %v3533_v45, %v3532_v41  ;;  %v3646_v52 = vadd.f32 %v3645_v46, %v3644_v31  ;;  %v3535_v53 = vpop.f32.mrb[54].mxu0  ;;  %v3647_v57 = vpop.f32.mrb[54].mxu1 }
 0x16d   : > { %v3536_v59 = vpop.f32.mrb[55].mxu0  ;;  %v3648_v63 = vpop.f32.mrb[55].mxu1 }
 0x16e   : > { %v5022_v37 = vadd.f32 %v3646_v52, %v3510_v6  ;;  %v5024_v58 = vadd.f32 %v3536_v59, %v3535_v53  ;;  %v3649_v8 = vadd.f32 %v3648_v63, %v3647_v57 }
 0x170   : > { %v5026_v1 = vadd.f32 %v3649_v8, %v3513_v16 }
 0x172   : > { %5313 = vst [vmem:[#allocation2_spill] sm:$0xff] %v5026_v1  ;;  %v3538_v55 = vpop.f32.mrb[56].mxu0  ;;  %v3650_v3 = vpop.f32.mrb[56].mxu1 }
 0x173   : > { %v3539_v12 = vpop.f32.mrb[57].mxu0  ;;  %v3651_v28 = vpop.f32.mrb[57].mxu1 }
 0x174   : > { %v5028_v14 = vadd.f32 %v3539_v12, %v3538_v55  ;;  %v3652_v18 = vadd.f32 %v3651_v28, %v3650_v3  ;;  %v3541_v36 = vpop.f32.mrb[58].mxu0  ;;  %v3653_v29 = vpop.f32.mrb[58].mxu1 }
 0x175   : > { %v3542_v41 = vpop.f32.mrb[59].mxu0  ;;  %v3654_v31 = vpop.f32.mrb[59].mxu1 }
 0x176   : > { %v5030_v45 = vadd.f32 %v3652_v18, %v3516_v26  ;;  %v5032_v6 = vadd.f32 %v3542_v41, %v3541_v36  ;;  %v3655_v46 = vadd.f32 %v3654_v31, %v3653_v29 }
 0x178   : > { %v5034_v52 = vadd.f32 %v3655_v46, %v3519_v33 }
 0x17a   : > { %5314 = vst [vmem:[#allocation3_spill] sm:$0xff] %v5034_v52  ;;  %v3544_v16 = vpop.f32.mrb[60].mxu0  ;;  %v3656_v53 = vpop.f32.mrb[60].mxu1 }
 0x17b   : > { %v3545_v57 = vpop.f32.mrb[61].mxu0  ;;  %v3657_v59 = vpop.f32.mrb[61].mxu1 }
 0x17c   : > { %v5036_v63 = vadd.f32 %v3545_v57, %v3544_v16  ;;  %v3658_v8 = vadd.f32 %v3657_v59, %v3656_v53  ;;  %v3547_v55 = vpop.f32.mrb[62].mxu0  ;;  %v3659_v3 = vpop.f32.mrb[62].mxu1 }
 0x17d   : > { %v3548_v12 = vpop.f32.mrb[63].mxu0  ;;  %v3660_v28 = vpop.f32.mrb[63].mxu1 }
 0x17e   : > { %v5038_v1 = vadd.f32 %v3658_v8, %v3522_v34  ;;  %v5040_v26 = vadd.f32 %v3548_v12, %v3547_v55  ;;  %v3661_v18 = vadd.f32 %v3660_v28, %v3659_v3 }
 0x180   : > { %v5042_v36 = vadd.f32 %v3661_v18, %v3525_v2 }
 0x182   : > { %v3864_v33 = vpop.f32.mrb[64].mxu0  ;;  %v3662_v29 = vpop.f32.mrb[64].mxu1 }
 0x183   : > { %v1000_v41 = vadd.f32 %v3864_v33, %v4923_v15  ;;  %v991_v31 = vpop.f32.mrb[65].mxu0  ;;  %v3663_v46 = vpop.f32.mrb[65].mxu1 }
 0x184   : > { %v992_v16 = vadd.f32 %v4914_v10, %v991_v31  ;;  %v3664_v53 = vadd.f32 %v3663_v46, %v3662_v29  ;;  %v3865_v57 = vpop.f32.mrb[66].mxu0  ;;  %v3665_v59 = vpop.f32.mrb[66].mxu1 }
 0x185   : > { %v5047_v52 = vadd.f32 %v4962_v4, %v1000_v41  ;;  %v1003_v34 = vadd.f32 %v3865_v57, %v4926_v19  ;;  %v994_v8 = vpop.f32.mrb[67].mxu0  ;;  %v3666_v55 = vpop.f32.mrb[67].mxu1 }
 0x186   : > { %v5051_v2 = vadd.f32 %v4949_v49, %v992_v16  ;;  %v5054_v3 = vadd.f32 %v3664_v53, %v5012_v9  ;;  %v995_v15 = vadd.f32 %v4917_v24, %v994_v8  ;;  %v3667_v12 = vadd.f32 %v3666_v55, %v3665_v59 }
 0x187   : > { %v5058_v10 = vadd.f32 %v4968_v61, %v1003_v34 }
 0x188   : > { %v5061_v28 = vadd.f32 %v4955_v35, %v995_v15  ;;  %v5064_v4 = vadd.f32 %v3667_v12, %v5016_v25 }
 0x18a   : > { %v3868_v19 = vpop.f32.mrb[68].mxu0  ;;  %v3668_v18 = vpop.f32.mrb[68].mxu1 }
 0x18b   : > { %v1016_v49 = vadd.f32 %v3868_v19, %v4939_v39  ;;  %v1007_v33 = vpop.f32.mrb[69].mxu0  ;;  %v3669_v29 = vpop.f32.mrb[69].mxu1 }
 0x18c   : > { %v1008_v9 = vadd.f32 %v4931_v22, %v1007_v33  ;;  %v3670_v41 = vadd.f32 %v3669_v29, %v3668_v18  ;;  %v3869_v24 = vpop.f32.mrb[70].mxu0  ;;  %v3671_v31 = vpop.f32.mrb[70].mxu1 }
 0x18d   : > { %v5069_v61 = vadd.f32 %v4986_v42, %v1016_v49  ;;  %v1019_v35 = vadd.f32 %v3869_v24, %v4942_v43  ;;  %v1010_v46 = vpop.f32.mrb[71].mxu0  ;;  %v3672_v16 = vpop.f32.mrb[71].mxu1 }
 0x18e   : > { %v5073_v25 = vadd.f32 %v4974_v32, %v1008_v9  ;;  %v5076_v53 = vadd.f32 %v3670_v41, %v5020_v51  ;;  %v1011_v39 = vadd.f32 %v4934_v27, %v1010_v46  ;;  %v3673_v57 = vadd.f32 %v3672_v16, %v3671_v31 }
 0x18f   : > { %v5080_v22 = vadd.f32 %v4992_v50, %v1019_v35 }
 0x190   : > { %v5083_v59 = vadd.f32 %v4980_v21, %v1011_v39  ;;  %v5086_v42 = vadd.f32 %v3673_v57, %v5024_v58 }
 0x192   : > { %v3872_v43 = vpop.f32.mrb[72].mxu0  ;;  %v3674_v34 = vpop.f32.mrb[72].mxu1 }
 0x193   : > { %v1032_v32 = vadd.f32 %v3872_v43, %v4960_v0  ;;  %v1023_v8 = vpop.f32.mrb[73].mxu0  ;;  %v3675_v55 = vpop.f32.mrb[73].mxu1 }
 0x194   : > { %v1024_v51 = vadd.f32 %v4947_v47, %v1023_v8  ;;  %v3676_v15 = vadd.f32 %v3675_v55, %v3674_v34  ;;  %v3873_v27 = vpop.f32.mrb[74].mxu0  ;;  %v3677_v12 = vpop.f32.mrb[74].mxu1 }
 0x195   : > { %v5091_v50 = vadd.f32 %v5000_v11, %v1032_v32  ;;  %v1035_v21 = vadd.f32 %v3873_v27, %v4966_v60  ;;  %v1026_v19 = vpop.f32.mrb[75].mxu0  ;;  %v3678_v18 = vpop.f32.mrb[75].mxu1 }
 0x196   : > { %v5095_v58 = vadd.f32 %v4996_v62, %v1024_v51  ;;  %v5098_v49 = vadd.f32 %v3676_v15, %v5028_v14  ;;  %v1027_v0 = vadd.f32 %v4953_v54, %v1026_v19  ;;  %v3679_v33 = vadd.f32 %v3678_v18, %v3677_v12 }
 0x197   : > { %v5102_v47 = vadd.f32 %v5002_v17, %v1035_v21 }
 0x198   : > { %v1396_v29 = vadd.f32 %v4998_v7, %v1027_v0  ;;  %v5106_v11 = vadd.f32 %v3679_v33, %v5032_v6 }
 0x19a   : > { %v3876_v60 = vpop.f32.mrb[76].mxu0  ;;  %v3680_v9 = vpop.f32.mrb[76].mxu1 }
 0x19b   : > { %v1048_v41 = vadd.f32 %v3876_v60, %v4984_v40  ;;  %v1039_v62 = vpop.f32.mrb[77].mxu0  ;;  %v3681_v24 = vpop.f32.mrb[77].mxu1 }
 0x19c   : > { %v1040_v14 = vadd.f32 %v4972_v13, %v1039_v62  ;;  %v3682_v31 = vadd.f32 %v3681_v24, %v3680_v9  ;;  %v3877_v35 = vpop.f32.mrb[78].mxu0  ;;  %v3683_v54 = vpop.f32.mrb[78].mxu1 }
 0x19d   : > { %v5111_v46 = vadd.f32 %v5008_v56, %v1048_v41  ;;  %v1051_v17 = vadd.f32 %v3877_v35, %v4990_v48  ;;  %v1042_v7 = vpop.f32.mrb[79].mxu0  ;;  %v3684_v16 = vpop.f32.mrb[79].mxu1 }
 0x19e   : > { %v1409_v6 = vadd.f32 %v5004_v30, %v1040_v14  ;;  %v5116_v39 = vadd.f32 %v3682_v31, %v5036_v63  ;;  %v1043_v40 = vadd.f32 %v4978_v20, %v1042_v7  ;;  %v3685_v57 = vadd.f32 %v3684_v16, %v3683_v54 }
 0x19f   : > { %v5120_v13 = vadd.f32 %v5010_v5, %v1051_v17 }
 0x1a0   : > { %v1412_v43 = vadd.f32 %v5006_v44, %v1043_v40  ;;  %v5124_v56 = vadd.f32 %v3685_v57, %v5040_v26 }
 0x1a2   : > { %v3726_v34 = vpop.f32.mrb[80].mxu0 }
 0x1a3   : > { %v3727_v48 = vpop.f32.mrb[81].mxu0 }
 0x1a4   : > { %v3728_v32 = vadd.f32 %v3727_v48, %v3726_v34  ;;  %v3729_v8 = vpop.f32.mrb[82].mxu0 }
 0x1a5   : > { %v3730_v55 = vpop.f32.mrb[83].mxu0 }
 0x1a6   : > { %v3731_v30 = vadd.f32 %v3730_v55, %v3729_v8  ;;  %v5127_v63 = vadd.f32 %v3728_v32, %v5051_v2 }
 0x1a8   : > { %v5130_v20 = vadd.f32 %v3731_v30, %v5061_v28 }
 0x1aa   : > { %v3732_v51 = vpop.f32.mrb[84].mxu0 }
 0x1ab   : > { %v3733_v5 = vpop.f32.mrb[85].mxu0 }
 0x1ac   : > { %v3734_v15 = vadd.f32 %v3733_v5, %v3732_v51  ;;  %v3735_v27 = vpop.f32.mrb[86].mxu0 }
 0x1ad   : > { %v3736_v44 = vpop.f32.mrb[87].mxu0 }
 0x1ae   : > { %v3737_v12 = vadd.f32 %v3736_v44, %v3735_v27  ;;  %v4008_v26 = vadd.f32 %v3734_v15, %v5047_v52 }
 0x1b0   : > { %v5134_v21 = vadd.f32 %v3737_v12, %v5058_v10 }
 0x1b2   : > { %v3738_v19 = vpop.f32.mrb[88].mxu0 }
 0x1b3   : > { %v3739_v18 = vpop.f32.mrb[89].mxu0 }
 0x1b4   : > { %v3740_v0 = vadd.f32 %v3739_v18, %v3738_v19  ;;  %v3741_v33 = vpop.f32.mrb[90].mxu0 }
 0x1b5   : > { %v3742_v2 = vpop.f32.mrb[91].mxu0 }
 0x1b6   : > { %v3743_v60 = vadd.f32 %v3742_v2, %v3741_v33  ;;  %v5137_v28 = vadd.f32 %v3740_v0, %v5073_v25 }
 0x1b8   : > { %v5140_v9 = vadd.f32 %v3743_v60, %v5083_v59  ;;  %v3265_v60 = vld [vmem:[%s5169_s27] sm:$0xff]  }
 0x1ba   : > { %v3744_v41 = vpop.f32.mrb[92].mxu0 }
 0x1bb   : > { %v3745_v62 = vpop.f32.mrb[93].mxu0 }
 0x1bc   : > { %v3746_v24 = vadd.f32 %v3745_v62, %v3744_v41  ;;  %v3747_v14 = vpop.f32.mrb[94].mxu0 }
 0x1bd   : > { %v3748_v52 = vpop.f32.mrb[95].mxu0 }
 0x1be   : > { %v3749_v31 = vadd.f32 %v3748_v52, %v3747_v14  ;;  %v5143_v10 = vadd.f32 %v3746_v24, %v5069_v61  ;;  %v5182_v24 = vld [vmem:[%s5310_s2] ss:$0 sm:$0xff] }
 0x1c0   : > { %v5146_v35 = vadd.f32 %v3749_v31, %v5080_v22 }
 0x1c2   : > { %v3750_v54 = vpop.f32.mrb[96].mxu0 }
 0x1c3   : > { %v3751_v17 = vpop.f32.mrb[97].mxu0 }
 0x1c4   : > { %v3752_v7 = vadd.f32 %v3751_v17, %v3750_v54  ;;  %v3753_v25 = vpop.f32.mrb[98].mxu0 }
 0x1c5   : > { %v3754_v16 = vpop.f32.mrb[99].mxu0 }
 0x1c6   : > { %v3755_v40 = vadd.f32 %v3754_v16, %v3753_v25  ;;  %v5149_v59 = vadd.f32 %v3752_v7, %v5095_v58  ;;  %v3266_v7 = vunpack.c.l.bf16 %v3265_v60 }
 0x1c8   : > { %v5151_v57 = vadd.f32 %v3755_v40, %v1396_v29 }
 0x1ca   : > { %v3756_v34 = vpop.f32.mrb[100].mxu0 }
 0x1cb   : > { %v3757_v48 = vpop.f32.mrb[101].mxu0 }
 0x1cc   : > { %v3758_v32 = vadd.f32 %v3757_v48, %v3756_v34  ;;  %v3759_v61 = vpop.f32.mrb[102].mxu0 }
 0x1cd   : > { %v3760_v8 = vpop.f32.mrb[103].mxu0 }
 0x1ce   : > { %v3761_v55 = vadd.f32 %v3760_v8, %v3759_v61  ;;  %v5154_v22 = vadd.f32 %v3758_v32, %v5091_v50  ;;  %v3267_v61 = vunpack.c.h.bf16 %v3265_v60 }
 0x1d0   : > { %v5157_v30 = vadd.f32 %v3761_v55, %v5102_v47 }
 0x1d2   : > { %v3762_v51 = vpop.f32.mrb[104].mxu0 }
 0x1d3   : > { %v3763_v5 = vpop.f32.mrb[105].mxu0 }
 0x1d4   : > { %v3764_v58 = vadd.f32 %v3763_v5, %v3762_v51  ;;  %v3765_v15 = vpop.f32.mrb[106].mxu0 }
 0x1d5   : > { %v3766_v29 = vpop.f32.mrb[107].mxu0 }
 0x1d6   : > { %v3767_v27 = vadd.f32 %v3766_v29, %v3765_v15  ;;  %v5159_v44 = vadd.f32 %v3764_v58, %v1409_v6  ;;  %v3410_v58 = vld [vmem:[%s5169_s27 + $0x18] sm:$0xff]   ;;  %v3409_v15 = vld [vmem:[%s5169_s27 + $0x10] sm:$0xff]  }
 0x1d8   : > { %v5161_v12 = vadd.f32 %v3767_v27, %v1412_v43  ;;  %v3408_v43 = vld [vmem:[%s5169_s27 + $0x8] sm:$0xff]  }
 0x1d9   : > { %v3270_v52 = vunpack.c.l.bf16 %v3408_v43  ;;  %v3271_v34 = vunpack.c.h.bf16 %v3408_v43 }
 0x1da   : > { %v3768_v19 = vpop.f32.mrb[108].mxu0 }
 0x1db   : > { %v3769_v18 = vpop.f32.mrb[109].mxu0 }
 0x1dc   : > { %v3770_v0 = vadd.f32 %v3769_v18, %v3768_v19  ;;  %v3771_v50 = vpop.f32.mrb[110].mxu0 }
 0x1dd   : > { %v3772_v33 = vpop.f32.mrb[111].mxu0 }
 0x1de   : > { %v3773_v47 = vadd.f32 %v3772_v33, %v3771_v50  ;;  %v5172_v6 = vadd.f32 %v3770_v0, %v5111_v46  ;;  %v3274_v33 = vunpack.c.l.bf16 %v3409_v15 }
 0x1e0   : > { %v5176_v2 = vadd.f32 %v3773_v47, %v5120_v13 }
 0x1e2   : > { %v3774_v41 = vpop.f32.mrb[112].mxu0  ;;  %v3960_v62 = vpop.f32.mrb[80].mxu1 }
 0x1e3   : > { %v4009_v14 = vadd.f32 %v4008_v26, %v3960_v62  ;;  %v3775_v31 = vpop.f32.mrb[113].mxu0  ;;  %v2356_v54 = vpop.f32.mrb[81].mxu1  ;;  %v3279_v62 = vunpack.c.h.bf16 %v3410_v58 }
 0x1e4   : > { %v3776_v17 = vadd.f32 %v3775_v31, %v3774_v41  ;;  %v4013_v46 = vadd.f32 %v5127_v63, %v2356_v54  ;;  %v3777_v13 = vpop.f32.mrb[114].mxu0  ;;  %v3961_v25 = vpop.f32.mrb[82].mxu1 }
 0x1e5   : > { %v2524_v16 = vadd.f32 %v4009_v14, %v5182_v24  ;;  %v4017_v40 = vadd.f32 %v5134_v21, %v3961_v25  ;;  %v3778_v48 = vpop.f32.mrb[115].mxu0  ;;  %v2359_v32 = vpop.f32.mrb[83].mxu1 }
 0x1e6   : > { %v2522_v26 = vadd.f32 %v4013_v46, %v5182_v24  ;;  %v3779_v8 = vadd.f32 %v3778_v48, %v3777_v13  ;;  %v4021_v55 = vadd.f32 %v5130_v20, %v2359_v32  ;;  %v5190_v63 = vadd.f32 %v5014_v23, %v3776_v17 }
 0x1e7   : > { %v2620_v51 = vadd.f32 %v3270_v52, %v2524_v16  ;;  %v2525_v5 = vadd.f32 %v4017_v40, %v5182_v24  ;;  %v3278_v20 = vunpack.c.l.bf16 %v3410_v58  ;;  %v3275_v16 = vunpack.c.h.bf16 %v3409_v15 }
 0x1e8   : > { %v2618_v29 = vadd.f32 %v3266_v7, %v2522_v26  ;;  %v2523_v21 = vadd.f32 %v4021_v55, %v5182_v24  ;;  %v5197_v27 = vadd.f32 %v5018_v38, %v3779_v8  ;;  %v3412_v26 = vld [vmem:[%s5169_s27 + $0x28] sm:$0xff]   ;;  %v3411_v8 = vld [vmem:[%s5169_s27 + $0x20] sm:$0xff]  }
 0x1e9   : > { %v2621_v19 = vadd.f32 %v3271_v34, %v2525_v5  ;;  %v2652_v23 = vmax.f32 %v2620_v51, 0.0  ;;  %v5315_v5 = vld [vmem:[#allocation2_spill] sm:$0xff] }
 0x1ea   : > { %v2619_v18 = vadd.f32 %v3267_v61, %v2523_v21  ;;  %v3780_v0 = vpop.f32.mrb[116].mxu0  ;;  %v3964_v50 = vpop.f32.mrb[84].mxu1  ;;  %v2650_v14 = vmax.f32 %v2618_v29, 0.0 }
 0x1eb   : > { %v2653_v47 = vmax.f32 %v2621_v19, 0.0  ;;  %v4025_v43 = vadd.f32 %v5143_v10, %v3964_v50  ;;  %v3781_v60 = vpop.f32.mrb[117].mxu0  ;;  %v2372_v41 = vpop.f32.mrb[85].mxu1  ;;  %v3286_v19 = vunpack.c.l.bf16 %v3412_v26 }
 0x1ec   : > { %v2651_v38 = vmax.f32 %v2619_v18, 0.0  ;;  %v3782_v52 = vadd.f32 %v3781_v60, %v3780_v0  ;;  %v4029_v31 = vadd.f32 %v5137_v28, %v2372_v41  ;;  %v3783_v54 = vpop.f32.mrb[118].mxu0  ;;  %v3965_v17 = vpop.f32.mrb[86].mxu1  ;;  %v3282_v18 = vunpack.c.l.bf16 %v3411_v8 }
 0x1ed   : > { %v3336_v10 = vpack.c.bf16 %v2653_v47, %v2652_v23  ;;  %v2528_v46 = vadd.f32 %v4025_v43, %v5182_v24  ;;  %v4033_v7 = vadd.f32 %v5146_v35, %v3965_v17  ;;  %v3784_v13 = vpop.f32.mrb[119].mxu0  ;;  %v2375_v25 = vpop.f32.mrb[87].mxu1  ;;  %v3287_v47 = vunpack.c.h.bf16 %v3412_v26 }
 0x1ee   : > { %v3331_v40 = vpack.c.bf16 %v2651_v38, %v2650_v14  ;;  %v2526_v34 = vadd.f32 %v4029_v31, %v5182_v24  ;;  %v3785_v48 = vadd.f32 %v3784_v13, %v3783_v54  ;;  %v4037_v32 = vadd.f32 %v5140_v9, %v2375_v25 }
 0x1ef   : > { %3423 = vst [vmem:[%s5205_s6 + $0x8] sm:$0xff] %v3336_v10   ;;  %v2624_v28 = vadd.f32 %v3278_v20, %v2528_v46  ;;  %v2529_v61 = vadd.f32 %v4033_v7, %v5182_v24  ;;  %v5217_v55 = vadd.f32 %v5022_v37, %v3782_v52  ;;  %v3283_v17 = vunpack.c.h.bf16 %v3411_v8 }
 0x1f0   : > { %3332 = vst [vmem:[%s5205_s6] sm:$0xff] %v3331_v40   ;;  %v2622_v35 = vadd.f32 %v3274_v33, %v2526_v34  ;;  %v2527_v51 = vadd.f32 %v4037_v32, %v5182_v24  ;;  %v5222_v58 = vadd.f32 %v5315_v5, %v3785_v48  ;;  %v3413_v40 = vld [vmem:[%s5169_s27 + $0x30] sm:$0xff]   ;;  %v5316_v32 = vld [vmem:[#allocation3_spill] sm:$0xff] }
 0x1f1   : > { %v2625_v15 = vadd.f32 %v3279_v62, %v2529_v61  ;;  %v2656_v0 = vmax.f32 %v2624_v28, 0.0 }
 0x1f2   : > { %v2623_v29 = vadd.f32 %v3275_v16, %v2527_v51  ;;  %v3786_v21 = vpop.f32.mrb[120].mxu0  ;;  %v3968_v9 = vpop.f32.mrb[88].mxu1  ;;  %v2654_v43 = vmax.f32 %v2622_v35, 0.0  ;;  %v3414_v16 = vld [vmem:[%s5169_s27 + $0x38] sm:$0xff]   ;;  %v3290_v51 = vunpack.c.l.bf16 %v3413_v40 }
 0x1f3   : > { %v2657_v50 = vmax.f32 %v2625_v15, 0.0  ;;  %v4041_v20 = vadd.f32 %v5154_v22, %v3968_v9  ;;  %v3787_v23 = vpop.f32.mrb[121].mxu0  ;;  %v2388_v37 = vpop.f32.mrb[89].mxu1  ;;  %v3294_v35 = vunpack.c.l.bf16 %v3414_v16  ;;  %v3295_v9 = vunpack.c.h.bf16 %v3414_v16 }
 0x1f4   : > { %v2655_v33 = vmax.f32 %v2623_v29, 0.0  ;;  %v3788_v60 = vadd.f32 %v3787_v23, %v3786_v21  ;;  %v4045_v41 = vadd.f32 %v5149_v59, %v2388_v37  ;;  %v3789_v62 = vpop.f32.mrb[122].mxu0  ;;  %v3969_v14 = vpop.f32.mrb[90].mxu1 }
 0x1f5   : > { %v3346_v38 = vpack.c.bf16 %v2657_v50, %v2656_v0  ;;  %v2532_v52 = vadd.f32 %v4041_v20, %v5182_v24  ;;  %v4049_v31 = vadd.f32 %v5157_v30, %v3969_v14  ;;  %v3790_v22 = vpop.f32.mrb[123].mxu0  ;;  %v2391_v54 = vpop.f32.mrb[91].mxu1 }
 0x1f6   : > { %v3341_v10 = vpack.c.bf16 %v2655_v33, %v2654_v43  ;;  %v2530_v46 = vadd.f32 %v4045_v41, %v5182_v24  ;;  %v3791_v7 = vadd.f32 %v3790_v22, %v3789_v62  ;;  %v4053_v13 = vadd.f32 %v5151_v57, %v2391_v54  ;;  %v3415_v22 = vld [vmem:[%s5169_s27 + $0x40] sm:$0xff]  }
 0x1f7   : > { %3425 = vst [vmem:[%s5205_s6 + $0x18] sm:$0xff] %v3346_v38   ;;  %v2628_v59 = vadd.f32 %v3286_v19, %v2532_v52  ;;  %v2533_v25 = vadd.f32 %v4049_v31, %v5182_v24  ;;  %v5235_v34 = vadd.f32 %v5030_v45, %v3788_v60  ;;  %v3291_v60 = vunpack.c.h.bf16 %v3413_v40  ;;  %v3416_v31 = vld [vmem:[%s5169_s27 + $0x48] sm:$0xff]  }
 0x1f8   : > { %3424 = vst [vmem:[%s5205_s6 + $0x10] sm:$0xff] %v3341_v10   ;;  %v2626_v30 = vadd.f32 %v3282_v18, %v2530_v46  ;;  %v2531_v48 = vadd.f32 %v4053_v13, %v5182_v24  ;;  %v5240_v28 = vadd.f32 %v5316_v32, %v3791_v7 }
 0x1f9   : > { %v2629_v61 = vadd.f32 %v3287_v47, %v2533_v25  ;;  %v2660_v5 = vmax.f32 %v2628_v59, 0.0  ;;  %v3302_v25 = vunpack.c.l.bf16 %v3416_v31 }
 0x1fa   : > { %v2627_v26 = vadd.f32 %v3283_v17, %v2531_v48  ;;  %v3792_v8 = vpop.f32.mrb[124].mxu0  ;;  %v3972_v57 = vpop.f32.mrb[92].mxu1  ;;  %v2658_v19 = vmax.f32 %v2626_v30, 0.0 }
 0x1fb   : > { %v2661_v15 = vmax.f32 %v2629_v61, 0.0  ;;  %v4057_v29 = vadd.f32 %v5172_v6, %v3972_v57  ;;  %v3793_v21 = vpop.f32.mrb[125].mxu0  ;;  %v2404_v45 = vpop.f32.mrb[93].mxu1  ;;  %v3303_v61 = vunpack.c.h.bf16 %v3416_v31 }
 0x1fc   : > { %v2659_v18 = vmax.f32 %v2627_v26, 0.0  ;;  %v3794_v0 = vadd.f32 %v3793_v21, %v3792_v8  ;;  %v4061_v50 = vadd.f32 %v5159_v44, %v2404_v45  ;;  %v3795_v20 = vpop.f32.mrb[126].mxu0  ;;  %v3973_v23 = vpop.f32.mrb[94].mxu1  ;;  %v3299_v21 = vunpack.c.h.bf16 %v3415_v22 }
 0x1fd   : > { %v3356_v37 = vpack.c.bf16 %v2661_v15, %v2660_v5  ;;  %v2536_v47 = vadd.f32 %v4057_v29, %v5182_v24  ;;  %v4065_v43 = vadd.f32 %v5176_v2, %v3973_v23  ;;  %v3796_v6 = vpop.f32.mrb[127].mxu0  ;;  %v2407_v33 = vpop.f32.mrb[95].mxu1 }
 0x1fe   : > { %v3351_v41 = vpack.c.bf16 %v2659_v18, %v2658_v19  ;;  %v2534_v62 = vadd.f32 %v4061_v50, %v5182_v24  ;;  %v3797_v14 = vadd.f32 %v3796_v6, %v3795_v20  ;;  %v4069_v38 = vadd.f32 %v5161_v12, %v2407_v33  ;;  %v3418_v50 = vld [vmem:[%s5169_s27 + $0x58] sm:$0xff]   ;;  %v3417_v20 = vld [vmem:[%s5169_s27 + $0x50] sm:$0xff]  }
 0x1ff   : > { %3427 = vst [vmem:[%s5205_s6 + $0x28] sm:$0xff] %v3356_v37   ;;  %v2632_v44 = vadd.f32 %v3294_v35, %v2536_v47  ;;  %v2537_v52 = vadd.f32 %v4065_v43, %v5182_v24  ;;  %v4083_v54 = vadd.f32 %v5038_v1, %v3794_v0  ;;  %v3298_v12 = vunpack.c.l.bf16 %v3415_v22 }
 0x200   : > { %3426 = vst [vmem:[%s5205_s6 + $0x20] sm:$0xff] %v3351_v41   ;;  %v2630_v17 = vadd.f32 %v3290_v51, %v2534_v62  ;;  %v2535_v2 = vadd.f32 %v4069_v38, %v5182_v24  ;;  %v4089_v10 = vadd.f32 %v5042_v36, %v3797_v14  ;;  %v3306_v41 = vunpack.c.l.bf16 %v3417_v20 }
 0x201   : > { %v2633_v46 = vadd.f32 %v3295_v9, %v2537_v52  ;;  %v2664_v16 = vmax.f32 %v2632_v44, 0.0  ;;  %v3311_v31 = vunpack.c.h.bf16 %v3418_v50 }
 0x202   : > { %v2631_v7 = vadd.f32 %v3291_v60, %v2535_v2  ;;  %v3798_v13 = vpop.f32.mrb[128].mxu0  ;;  %v3976_v59 = vpop.f32.mrb[0].mxu1  ;;  %v2662_v1 = vmax.f32 %v2630_v17, 0.0 }
 0x203   : > { %v2665_v40 = vmax.f32 %v2633_v46, 0.0  ;;  %v4072_v30 = vadd.f32 %v5217_v55, %v3976_v59  ;;  %v3799_v48 = vpop.f32.mrb[129].mxu0  ;;  %v2420_v32 = vpop.f32.mrb[1].mxu1 }
 0x204   : > { %v2663_v26 = vmax.f32 %v2631_v7, 0.0  ;;  %v3800_v8 = vadd.f32 %v3799_v48, %v3798_v13  ;;  %v4075_v57 = vadd.f32 %v5190_v63, %v2420_v32  ;;  %v3801_v36 = vpop.f32.mrb[130].mxu0  ;;  %v3977_v35 = vpop.f32.mrb[2].mxu1 }
 0x205   : > { %v3366_v51 = vpack.c.bf16 %v2665_v40, %v2664_v16  ;;  %v2540_v5 = vadd.f32 %v4072_v30, %v5182_v24  ;;  %v4078_v15 = vadd.f32 %v5222_v58, %v3977_v35  ;;  %v3802_v55 = vpop.f32.mrb[131].mxu0  ;;  %v2423_v29 = vpop.f32.mrb[3].mxu1 }
 0x206   : > { %v3361_v45 = vpack.c.bf16 %v2663_v26, %v2662_v1  ;;  %v2538_v9 = vadd.f32 %v4075_v57, %v5182_v24  ;;  %v3803_v19 = vadd.f32 %v3802_v55, %v3801_v36  ;;  %v4081_v18 = vadd.f32 %v5197_v27, %v2423_v29  ;;  %v3420_v1 = vld [vmem:[%s5169_s27 + $0x68] sm:$0xff]   ;;  %v3419_v26 = vld [vmem:[%s5169_s27 + $0x60] sm:$0xff]  }
 0x207   : > { %3429 = vst [vmem:[%s5205_s6 + $0x38] sm:$0xff] %v3366_v51   ;;  %v2636_v63 = vadd.f32 %v3302_v25, %v2540_v5  ;;  %v2541_v0 = vadd.f32 %v4078_v15, %v5182_v24  ;;  %v4098_v23 = vadd.f32 %v5054_v3, %v3800_v8  ;;  %v3310_v27 = vunpack.c.l.bf16 %v3418_v50 }
 0x208   : > { %3428 = vst [vmem:[%s5205_s6 + $0x30] sm:$0xff] %v3361_v45   ;;  %v2634_v37 = vadd.f32 %v3298_v12, %v2538_v9  ;;  %v2539_v58 = vadd.f32 %v4081_v18, %v5182_v24  ;;  %v5270_v47 = vadd.f32 %v5064_v4, %v3803_v19  ;;  %v3307_v12 = vunpack.c.h.bf16 %v3417_v20 }
 0x209   : > { %v2637_v43 = vadd.f32 %v3303_v61, %v2541_v0  ;;  %v2668_v62 = vmax.f32 %v2636_v63, 0.0  ;;  %v3318_v15 = vunpack.c.l.bf16 %v3420_v1 }
 0x20a   : > { %v2635_v6 = vadd.f32 %v3299_v21, %v2539_v58  ;;  %v3804_v33 = vpop.f32.mrb[132].mxu0  ;;  %v3980_v60 = vpop.f32.mrb[4].mxu1  ;;  %v2666_v3 = vmax.f32 %v2634_v37, 0.0 }
 0x20b   : > { %v2669_v14 = vmax.f32 %v2637_v43, 0.0  ;;  %v4084_v38 = vadd.f32 %v4083_v54, %v3980_v60  ;;  %v3805_v44 = vpop.f32.mrb[133].mxu0  ;;  %v2436_v52 = vpop.f32.mrb[5].mxu1 }
 0x20c   : > { %v2667_v22 = vmax.f32 %v2635_v6, 0.0  ;;  %v3806_v17 = vadd.f32 %v3805_v44, %v3804_v33  ;;  %v4087_v2 = vadd.f32 %v5235_v34, %v2436_v52  ;;  %v3807_v4 = vpop.f32.mrb[134].mxu0  ;;  %v3981_v46 = vpop.f32.mrb[6].mxu1  ;;  %v3315_v33 = vunpack.c.h.bf16 %v3419_v26 }
 0x20d   : > { %v3376_v7 = vpack.c.bf16 %v2669_v14, %v2668_v62  ;;  %v2544_v13 = vadd.f32 %v4084_v38, %v5182_v24  ;;  %v4090_v59 = vadd.f32 %v4089_v10, %v3981_v46  ;;  %v3808_v25 = vpop.f32.mrb[135].mxu0  ;;  %v2439_v54 = vpop.f32.mrb[7].mxu1 }
 0x20e   : > { %v3371_v16 = vpack.c.bf16 %v2667_v22, %v2666_v3  ;;  %v2542_v40 = vadd.f32 %v4087_v2, %v5182_v24  ;;  %v3809_v30 = vadd.f32 %v3808_v25, %v3807_v4  ;;  %v4093_v48 = vadd.f32 %v5240_v28, %v2439_v54  ;;  %v3421_v4 = vld [vmem:[%s5169_s27 + $0x70] sm:$0xff]  }
 0x20f   : > { %3431 = vst [vmem:[%s5205_s6 + $0x48] sm:$0xff] %v3376_v7   ;;  %v2640_v34 = vadd.f32 %v3310_v27, %v2544_v13  ;;  %v2545_v32 = vadd.f32 %v4090_v59, %v5182_v24  ;;  %v4095_v61 = vadd.f32 %v5076_v53, %v3806_v17  ;;  %v3314_v28 = vunpack.c.l.bf16 %v3419_v26 }
 0x210   : > { %3430 = vst [vmem:[%s5205_s6 + $0x40] sm:$0xff] %v3371_v16   ;;  %v2638_v8 = vadd.f32 %v3306_v41, %v2542_v40  ;;  %v2543_v10 = vadd.f32 %v4093_v48, %v5182_v24  ;;  %v4101_v57 = vadd.f32 %v5086_v42, %v3809_v30  ;;  %v3319_v53 = vunpack.c.h.bf16 %v3420_v1 }
 0x211   : > { %v2641_v36 = vadd.f32 %v3311_v31, %v2545_v32  ;;  %v2672_v55 = vmax.f32 %v2640_v34, 0.0  ;;  %v3322_v30 = vunpack.c.l.bf16 %v3421_v4 }
 0x212   : > { %v2639_v35 = vadd.f32 %v3307_v12, %v2543_v10  ;;  %v3810_v51 = vpop.f32.mrb[136].mxu0  ;;  %v3984_v5 = vpop.f32.mrb[8].mxu1  ;;  %v2670_v19 = vmax.f32 %v2638_v8, 0.0  ;;  %v3323_v10 = vunpack.c.h.bf16 %v3421_v4 }
 0x213   : > { %v2673_v29 = vmax.f32 %v2641_v36, 0.0  ;;  %v4096_v21 = vadd.f32 %v4095_v61, %v3984_v5  ;;  %v3811_v45 = vpop.f32.mrb[137].mxu0  ;;  %v2452_v9 = vpop.f32.mrb[9].mxu1 }
 0x214   : > { %v2671_v18 = vmax.f32 %v2639_v35, 0.0  ;;  %v3812_v63 = vadd.f32 %v3811_v45, %v3810_v51  ;;  %v4099_v0 = vadd.f32 %v4098_v23, %v2452_v9  ;;  %v3813_v50 = vpop.f32.mrb[138].mxu0  ;;  %v3985_v42 = vpop.f32.mrb[10].mxu1 }
 0x215   : > { %v3386_v20 = vpack.c.bf16 %v2673_v29, %v2672_v55  ;;  %v2548_v37 = vadd.f32 %v4096_v21, %v5182_v24  ;;  %v4102_v58 = vadd.f32 %v4101_v57, %v3985_v42  ;;  %v3814_v43 = vpop.f32.mrb[139].mxu0  ;;  %v2455_v6 = vpop.f32.mrb[11].mxu1 }
 0x216   : > { %v3381_v60 = vpack.c.bf16 %v2671_v18, %v2670_v19  ;;  %v2546_v27 = vadd.f32 %v4099_v0, %v5182_v24  ;;  %v3815_v41 = vadd.f32 %v3814_v43, %v3813_v50  ;;  %v4105_v62 = vadd.f32 %v5270_v47, %v2455_v6 }
 0x217   : > { %3433 = vst [vmem:[%s5205_s6 + $0x58] sm:$0xff] %v3386_v20   ;;  %v2644_v14 = vadd.f32 %v3318_v15, %v2548_v37  ;;  %v2549_v23 = vadd.f32 %v4102_v58, %v5182_v24  ;;  %v4110_v38 = vadd.f32 %v5098_v49, %v3812_v63 }
 0x218   : > { %3432 = vst [vmem:[%s5205_s6 + $0x50] sm:$0xff] %v3381_v60   ;;  %v2642_v44 = vadd.f32 %v3314_v28, %v2546_v27  ;;  %v2547_v52 = vadd.f32 %v4105_v62, %v5182_v24  ;;  %v4116_v31 = vadd.f32 %v5106_v11, %v3815_v41  ;;  %v3422_v11 = vld [vmem:[%s5169_s27 + $0x78] sm:$0xff]  }
 0x219   : > { %v2645_v3 = vadd.f32 %v3319_v53, %v2549_v23  ;;  %v2676_v46 = vmax.f32 %v2644_v14, 0.0  ;;  %v3326_v36 = vunpack.c.l.bf16 %v3422_v11 }
 0x21a   : > { %v2643_v22 = vadd.f32 %v3315_v33, %v2547_v52  ;;  %v3816_v17 = vpop.f32.mrb[140].mxu0  ;;  %v3988_v2 = vpop.f32.mrb[12].mxu1  ;;  %v2674_v59 = vmax.f32 %v2642_v44, 0.0 }
 0x21b   : > { %v2677_v47 = vmax.f32 %v2645_v3, 0.0  ;;  %v3817_v7 = vpop.f32.mrb[141].mxu0  ;;  %v2468_v13 = vpop.f32.mrb[13].mxu1 }
 0x21c   : > { %v2675_v25 = vmax.f32 %v2643_v22, 0.0  ;;  %v3818_v49 = vadd.f32 %v3817_v7, %v3816_v17  ;;  %v4111_v54 = vadd.f32 %v4110_v38, %v2468_v13  ;;  %v3819_v12 = vpop.f32.mrb[142].mxu0  ;;  %v3989_v16 = vpop.f32.mrb[14].mxu1 }
 0x21d   : > { %v3396_v40 = vpack.c.bf16 %v2677_v47, %v2676_v46  ;;  %v3820_v48 = vpop.f32.mrb[143].mxu0  ;;  %v2471_v34 = vpop.f32.mrb[15].mxu1 }
 0x21e   : > { %v3391_v32 = vpack.c.bf16 %v2675_v25, %v2674_v59  ;;  %v4107_v61 = vadd.f32 %v5116_v39, %v3818_v49  ;;  %v2550_v1 = vadd.f32 %v4111_v54, %v5182_v24  ;;  %v3821_v26 = vadd.f32 %v3820_v48, %v3819_v12 }
 0x21f   : > { %3435 = vst [vmem:[%s5205_s6 + $0x68] sm:$0xff] %v3396_v40   ;;  %v4117_v8 = vadd.f32 %v4116_v31, %v2471_v34  ;;  %v3327_v39 = vunpack.c.h.bf16 %v3422_v11 }
 0x220   : > { %3434 = vst [vmem:[%s5205_s6 + $0x60] sm:$0xff] %v3391_v32   ;;  %v4108_v57 = vadd.f32 %v4107_v61, %v3988_v2  ;;  %v4113_v35 = vadd.f32 %v5124_v56, %v3821_v26  ;;  %v2646_v51 = vadd.f32 %v3322_v30, %v2550_v1 }
 0x221   : > { %v2551_v5 = vadd.f32 %v4117_v8, %v5182_v24 }
 0x222   : > { %v2552_v15 = vadd.f32 %v4108_v57, %v5182_v24  ;;  %v4114_v28 = vadd.f32 %v4113_v35, %v3989_v16  ;;  %v2678_v45 = vmax.f32 %v2646_v51, 0.0 }
 0x223   : > { %v2647_v55 = vadd.f32 %v3323_v10, %v2551_v5 }
 0x224   : > { %v2648_v29 = vadd.f32 %v3326_v36, %v2552_v15  ;;  %v2553_v21 = vadd.f32 %v4114_v28, %v5182_v24 }
 0x225   : > { %v2679_v9 = vmax.f32 %v2647_v55, 0.0 }
 0x226   : > { %v2649_v53 = vadd.f32 %v3327_v39, %v2553_v21  ;;  %v2680_v18 = vmax.f32 %v2648_v29, 0.0 }
 0x227   : > { %v3401_v19 = vpack.c.bf16 %v2679_v9, %v2678_v45 }
 0x228   : > { %v2681_v63 = vmax.f32 %v2649_v53, 0.0 }
 0x229   : > { %3436 = vst [vmem:[%s5205_s6 + $0x70] sm:$0xff] %v3401_v19  }
 0x22a   : > { %v3406_v56 = vpack.c.bf16 %v2681_v63, %v2680_v18 }
 0x22c   : > { %3437 = vst [vmem:[%s5205_s6 + $0x78] sm:$0xff] %v3406_v56  }
 0x22d PF: > { %s14_s15 = sadd.s32 1, %s4361_s15  }
 0x22e   : > { %p11_p4 = scmp.ge.s32.totalorder %s14_s15, 4  }
 0x230   :  { %13 = sbr.rel (!%p11_p4) target bundleno = 1 (0x1), region = 71 }

</bundles_post_ra>
